<compile_context>
chip_gen: v7x
topology: tpu7x:2x2x1
jax: 0.10.0
libtpu: 0.0.40
codegen_flags: <defaults>
</compile_context>

<pallas_src>
import jax
import jax.numpy as jnp
from jax.experimental import pallas as pl
from jax.experimental.pallas import tpu as pltpu

LANE = 128
VMEM_LIMIT = 32 * 1024 * 1024


def _round_up(x, m):
    return ((x + m - 1) // m) * m


def _pad128(c):
    return _round_up(c, LANE)


# -----------------------------------------------------------------------------
# Generic fused matmul kernel (stem convs + large-spatial fallback):
#   out = act( a @ w + bias  [+ residual | + res_src @ down_w + down_bias] )
# Grid is (M tiles, N tiles), both "parallel".
# -----------------------------------------------------------------------------
def fused_matmul(a, w, bias, *, relu, out_dtype,
                 residual=None, res_src=None, down_w=None, down_bias=None):
    M, K = a.shape
    N = w.shape[1]

    TM = min(256, _round_up(M, 8))
    Mp = _round_up(M, TM)
    TN = 256 if (N % 256 == 0) else N          # N is always a multiple of 128 here

    a = a.astype(jnp.bfloat16)
    w = w.astype(jnp.bfloat16)
    b2 = jnp.asarray(bias, jnp.float32).reshape(1, N)

    has_down = down_w is not None
    has_res = (residual is not None) and not has_down

    if has_res:
        residual = residual.astype(jnp.bfloat16)
    if Mp != M:
        a = jnp.pad(a, ((0, Mp - M), (0, 0)))
        if has_res:
            residual = jnp.pad(residual, ((0, Mp - M), (0, 0)))
        if has_down:
            res_src = jnp.pad(res_src, ((0, Mp - M), (0, 0)))

    args = [a, w, b2]
    in_specs = [
        pl.BlockSpec((TM, K), lambda i, j: (i, 0)),
        pl.BlockSpec((K, TN), lambda i, j: (0, j)),
        pl.BlockSpec((1, TN), lambda i, j: (0, j)),
    ]
    if has_down:
        Kd = down_w.shape[0]
        args += [res_src.astype(jnp.bfloat16),
                 down_w.astype(jnp.bfloat16),
                 jnp.asarray(down_bias, jnp.float32).reshape(1, N)]
        in_specs += [
            pl.BlockSpec((TM, Kd), lambda i, j: (i, 0)),
            pl.BlockSpec((Kd, TN), lambda i, j: (0, j)),
            pl.BlockSpec((1, TN), lambda i, j: (0, j)),
        ]
    elif has_res:
        args.append(residual)
        in_specs.append(pl.BlockSpec((TM, TN), lambda i, j: (i, j)))

    def kernel(a_ref, w_ref, b_ref, *rest):
        if has_down:
            rs_ref, dw_ref, db_ref, o_ref = rest
        elif has_res:
            r_ref, o_ref = rest
        else:
            (o_ref,) = rest
        out = jnp.dot(a_ref[...], w_ref[...],
                      preferred_element_type=jnp.float32) + b_ref[...]
        if has_down:
            out = out + jnp.dot(rs_ref[...], dw_ref[...],
                                preferred_element_type=jnp.float32) + db_ref[...]
        elif has_res:
            out = out + r_ref[...].astype(jnp.float32)
        if relu:
            out = jnp.maximum(out, 0.0)
        o_ref[...] = out.astype(o_ref.dtype)

    out = pl.pallas_call(
        kernel,
        out_shape=jax.ShapeDtypeStruct((Mp, N), out_dtype),
        grid=(Mp // TM, N // TN),
        in_specs=in_specs,
        out_specs=pl.BlockSpec((TM, TN), lambda i, j: (i, j)),
        compiler_params=pltpu.CompilerParams(
            dimension_semantics=("parallel", "parallel"),
            vmem_limit_bytes=VMEM_LIMIT),
    )(*args)
    return out[:M] if Mp != M else out


# -----------------------------------------------------------------------------
# Fused global-avg-pool + FC Pallas kernel.
# -----------------------------------------------------------------------------
def avgpool_fc(x_nhwc, fc_w, fc_b, num_classes):
    N, H, W, C = x_nhwc.shape
    x3 = x_nhwc.reshape(N, H * W, C)
    NCp = fc_w.shape[1]
    fc_b2 = jnp.asarray(fc_b, jnp.float32).reshape(1, NCp)

    def kernel(x_ref, w_ref, b_ref, o_ref):
        pooled = jnp.mean(x_ref[...].astype(jnp.float32), axis=1)          # [N, C]
        logits = jnp.dot(pooled.astype(jnp.bfloat16), w_ref[...],
                         preferred_element_type=jnp.float32) + b_ref[...]
        o_ref[...] = logits

    out = pl.pallas_call(
        kernel,
        out_shape=jax.ShapeDtypeStruct((N, NCp), jnp.float32),
        grid=(1,),
        in_specs=[pl.BlockSpec((N, H * W, C), lambda i: (0, 0, 0)),
                  pl.BlockSpec((C, NCp), lambda i: (0, 0)),
                  pl.BlockSpec((1, NCp), lambda i: (0, 0))],
        out_specs=pl.BlockSpec((N, NCp), lambda i: (0, 0)),
        compiler_params=pltpu.CompilerParams(
            dimension_semantics=("arbitrary",),
            vmem_limit_bytes=VMEM_LIMIT),
    )(x3, fc_w.astype(jnp.bfloat16), fc_b2)
    return out[:, :num_classes]


# -----------------------------------------------------------------------------
# Generic conv + folded-BN + act (im2col glue in JAX, matmul in Pallas).
# Input channels are sliced to their REAL count (no K padding); output is 128-padded.
# -----------------------------------------------------------------------------
def conv_bn_act(x, p, relu=True, residual=None, res_src=None, down=None):
    N, H, W, _ = x.shape
    KH, KW, s, pad = p["kh"], p["kw"], p["stride"], p["pad"]
    ic, OCp = p["ic"], p["ocp"]
    OH = (H + 2 * pad - KH) // s + 1
    OW = (W + 2 * pad - KW) // s + 1

    xs = x[..., :ic].astype(jnp.bfloat16)
    xp = jnp.pad(xs, ((0, 0), (pad, pad), (pad, pad), (0, 0))) if pad else xs
    cols = [xp[:, kh:kh + (OH - 1) * s + 1:s, kw:kw + (OW - 1) * s + 1:s, :]
            for kh in range(KH) for kw in range(KW)]
    patches = jnp.concatenate(cols, axis=-1).reshape(N * OH * OW, KH * KW * ic)
    w2d = p["w"].reshape(KH * KW * ic, OCp)

    res2d = None if residual is None else residual.reshape(N * OH * OW, OCp)
    rs2d = dw_ = db_ = None
    if down is not None:
        rs2d = res_src.reshape(N * OH * OW, down["ic"]).astype(jnp.bfloat16)
        dw_, db_ = down["w"], down["bias"]

    out = fused_matmul(patches, w2d, p["bias"], relu=relu, out_dtype=jnp.bfloat16,
                       residual=res2d, res_src=rs2d, down_w=dw_, down_bias=db_)
    return out.reshape(N, OH, OW, OCp)


# -----------------------------------------------------------------------------
# Whole-BasicBlock fused kernel (one pallas_call per block).
# conv2 is applied tap-by-tap on the in-VMEM conv1 output; shifted taps use tiny
# 0/1 selection matmuls; taps falling entirely on zero padding are skipped.
# -----------------------------------------------------------------------------
def fused_basic_block(x, blk):
    c1, c2 = blk["conv1"], blk["conv2"]
    s = blk["stride"]
    N, H, W, _ = x.shape
    ic1, OCp = c1["ic"], c1["ocp"]
    ic2 = c2["ic"]
    OH = (H + 2 - 3) // s + 1
    OW = (W + 2 - 3) // s + 1
    M = N * OH * OW
    Mp = _round_up(M, 8)

    # conv1 im2col (K = 9*ic1, no input-channel padding)
    xs = x[..., :ic1].astype(jnp.bfloat16)
    xp = jnp.pad(xs, ((0, 0), (1, 1), (1, 1), (0, 0)))
    cols = [xp[:, kh:kh + (OH - 1) * s + 1:s, kw:kw + (OW - 1) * s + 1:s, :]
            for kh in range(3) for kw in range(3)]
    p1 = jnp.concatenate(cols, axis=-1).reshape(M, 9 * ic1)
    if Mp != M:
        p1 = jnp.pad(p1, ((0, Mp - M), (0, 0)))
    w1 = c1["w"].reshape(9 * ic1, OCp)
    b1 = c1["bias"].reshape(1, OCp)

    # conv2 taps: keep only taps that can touch a real (non-zero-pad) input position.
    deltas = [(dh, dw) for dh in (-1, 0, 1) for dw in (-1, 0, 1)
              if abs(dh) < OH and abs(dw) < OW]
    T = len(deltas)
    w2p = jnp.pad(c2["w"], ((0, 0), (0, 0), (0, OCp - ic2), (0, 0)))   # rows -> h1 width
    taps = jnp.stack([w2p[dh + 1, dw + 1] for dh, dw in deltas])        # (T, OCp, OCp)
    b2 = c2["bias"].reshape(1, OCp)

    # 0/1 row-selection matrices for the shifted (non-center) taps.
    noncenter = [d for d in deltas if d != (0, 0)]
    nc_index = {d: i for i, d in enumerate(noncenter)}
    use_smats = len(noncenter) > 0
    smats = None
    if use_smats:
        r = jnp.arange(Mp)
        ohw = r % (OH * OW)
        oh, ow = ohw // OW, ohw % OW
        col = jnp.arange(Mp)[None, :]
        mats = []
        for dh, dw in noncenter:
            valid = ((r < M) & (oh + dh >= 0) & (oh + dh < OH)
                     & (ow + dw >= 0) & (ow + dw < OW))
            src = r + dh * OW + dw
            mats.append(((col == src[:, None]) & valid[:, None]).astype(jnp.bfloat16))
        smats = jnp.stack(mats)                                         # (Tn, Mp, Mp)

    has_down = "down" in blk
    args = [p1, w1, b1, taps, b2]
    in_specs = [
        pl.BlockSpec((Mp, 9 * ic1), lambda i: (0, 0)),
        pl.BlockSpec((9 * ic1, OCp), lambda i: (0, 0)),
        pl.BlockSpec((1, OCp), lambda i: (0, 0)),
        pl.BlockSpec((T, OCp, OCp), lambda i: (0, 0, 0)),
        pl.BlockSpec((1, OCp), lambda i: (0, 0)),
    ]
    if use_smats:
        args.append(smats)
        in_specs.append(pl.BlockSpec((len(noncenter), Mp, Mp), lambda i: (0, 0, 0)))
    if has_down:
        d = blk["down"]
        rs = x[:, ::s, ::s, :d["ic"]].reshape(M, d["ic"]).astype(jnp.bfloat16)
        if Mp != M:
            rs = jnp.pad(rs, ((0, Mp - M), (0, 0)))
        args += [rs, d["w"], d["bias"].reshape(1, OCp)]
        in_specs += [pl.BlockSpec((Mp, d["ic"]), lambda i: (0, 0)),
                     pl.BlockSpec((d["ic"], OCp), lambda i: (0, 0)),
                     pl.BlockSpec((1, OCp), lambda i: (0, 0))]
    else:
        res = x.reshape(M, OCp).astype(jnp.bfloat16)
        if Mp != M:
            res = jnp.pad(res, ((0, Mp - M), (0, 0)))
        args.append(res)
        in_specs.append(pl.BlockSpec((Mp, OCp), lambda i: (0, 0)))

    def kernel(p1_ref, w1_ref, b1_ref, t_ref, b2_ref, *rest):
        rest = list(rest)
        s_ref = rest.pop(0) if use_smats else None
        if has_down:
            rs_ref, wd_ref, bd_ref, o_ref = rest
        else:
            r_ref, o_ref = rest

        # conv1 + folded bn1 + relu (stays in VMEM)
        h1 = jnp.dot(p1_ref[...], w1_ref[...],
                     preferred_element_type=jnp.float32) + b1_ref[...]
        h1 = jnp.maximum(h1, 0.0).astype(jnp.bfloat16)

        # conv2 + folded bn2 as a sum over kernel taps
        acc = jnp.zeros((Mp, OCp), jnp.float32)
        for t, (dh, dw) in enumerate(deltas):
            if (dh, dw) == (0, 0):
                src = h1
            else:
                src = jnp.dot(s_ref[nc_index[(dh, dw)]], h1,
                              preferred_element_type=jnp.float32).astype(jnp.bfloat16)
            acc = acc + jnp.dot(src, t_ref[t], preferred_element_type=jnp.float32)
        conv2_out = acc + b2_ref[...]

        # identity / fused 1x1 downsample, residual add, final relu
        if has_down:
            ident = jnp.dot(rs_ref[...], wd_ref[...],
                            preferred_element_type=jnp.float32) + bd_ref[...]
        else:
            ident = r_ref[...].astype(jnp.float32)
        o_ref[...] = jnp.maximum(conv2_out + ident, 0.0).astype(o_ref.dtype)

    out = pl.pallas_call(
        kernel,
        out_shape=jax.ShapeDtypeStruct((Mp, OCp), jnp.bfloat16),
        grid=(1,),
        in_specs=in_specs,
        out_specs=pl.BlockSpec((Mp, OCp), lambda i: (0, 0)),
        compiler_params=pltpu.CompilerParams(
            dimension_semantics=("arbitrary",),
            vmem_limit_bytes=VMEM_LIMIT),
    )(*args)
    out = out[:M] if Mp != M else out
    return out.reshape(N, OH, OW, OCp)


def basic_block(x, blk):
    """torchvision-style BasicBlock (expansion=1). Residual added before the final ReLU."""
    s = blk["stride"]
    N, H, W, _ = x.shape
    OH = (H + 2 - 3) // s + 1
    OW = (W + 2 - 3) // s + 1
    if N * OH * OW <= 256:
        # small spatial extent: whole block in one pallas_call
        return fused_basic_block(x, blk)
    # general fallback for large spatial sizes: two fused-matmul calls
    out = conv_bn_act(x, blk["conv1"], relu=True)
    if "down" in blk:
        d = blk["down"]
        res_src = x[:, ::s, ::s, :d["ic"]]
        out = conv_bn_act(out, blk["conv2"], relu=True, res_src=res_src, down=d)
    else:
        out = conv_bn_act(out, blk["conv2"], relu=True, residual=x)
    return out


# -----------------------------------------------------------------------------
# Parameter init (mirrors module __init__: xavier conv/linear, BN gamma=1/beta=0),
# with BN folding, OC padding to 128 (K kept at the real channel count), bf16 weights.
# -----------------------------------------------------------------------------
class KeyGen:
    def __init__(self, seed=0):
        self.key = jax.random.PRNGKey(seed)

    def __call__(self):
        self.key, sub = jax.random.split(self.key)
        return sub


def xavier_normal(key, shape, fan_in, fan_out):
    std = (2.0 / (fan_in + fan_out)) ** 0.5
    return std * jax.random.normal(key, shape, dtype=jnp.float32)


def bn_scale_bias(c, eps=1e-5):
    gamma = jnp.ones((c,), jnp.float32)
    beta = jnp.zeros((c,), jnp.float32)
    mean = jnp.zeros((c,), jnp.float32)
    var = jnp.ones((c,), jnp.float32)
    scale = gamma / jnp.sqrt(var + eps)
    bias = beta - mean * scale
    return scale, bias


def make_conv_params(kg, kh, kw, ic, oc, stride, pad):
    ocp = _pad128(oc)
    w = xavier_normal(kg(), (kh, kw, ic, oc), ic * kh * kw, oc * kh * kw)
    scale, bias = bn_scale_bias(oc)
    w = w * scale.reshape(1, 1, 1, oc)                         # fold BN scale into weights
    w = jnp.pad(w, ((0, 0), (0, 0), (0, 0), (0, ocp - oc)))
    b = jnp.pad(bias, (0, ocp - oc))
    return {"w": w.astype(jnp.bfloat16), "bias": b.astype(jnp.float32),
            "kh": kh, "kw": kw, "stride": stride, "pad": pad,
            "ic": ic, "ocp": ocp}


def make_down_params(kg, ic, oc):
    ocp = _pad128(oc)
    w = xavier_normal(kg(), (1, 1, ic, oc), ic, oc)
    scale, bias = bn_scale_bias(oc)
    w = (w * scale.reshape(1, 1, 1, oc))[0, 0]
    w = jnp.pad(w, ((0, 0), (0, ocp - oc)))
    b = jnp.pad(bias, (0, ocp - oc))
    return {"w": w.astype(jnp.bfloat16), "bias": b.astype(jnp.float32), "ic": ic}


def init_params(layers=(1, 1, 1, 1), num_classes=14):
    kg = KeyGen(0)
    P = {}
    P["conv1"] = make_conv_params(kg, 11, 11, 3, 64, 2, 5)
    P["conv2"] = make_conv_params(kg, 3, 3, 64, 64, 2, 1)
    P["conv3"] = make_conv_params(kg, 3, 3, 64, 64, 2, 1)

    inplanes = 64
    stages = []
    for planes, nblocks, stride in zip((64, 128, 256, 512), layers, (1, 2, 2, 2)):
        blocks = []
        for bi in range(nblocks):
            s = stride if bi == 0 else 1
            blk = {"stride": s,
                   "conv1": make_conv_params(kg, 3, 3, inplanes, planes, s, 1),
                   "conv2": make_conv_params(kg, 3, 3, planes, planes, 1, 1)}
            if s != 1 or inplanes != planes:
                blk["down"] = make_down_params(kg, inplanes, planes)
            inplanes = planes
            blocks.append(blk)
        stages.append(blocks)
    P["stages"] = stages

    # Linear(512, num_classes): xavier weight (stored transposed, OC padded to 128);
    # bias keeps PyTorch's default uniform(+-1/sqrt(512)) (not touched by the init loop).
    ncp = _pad128(num_classes)
    fc_w = xavier_normal(kg(), (512, num_classes), 512, num_classes)
    bound = 1.0 / (512.0 ** 0.5)
    fc_b = jax.random.uniform(kg(), (num_classes,), jnp.float32, -bound, bound)
    P["fc_w"] = jnp.pad(fc_w, ((0, 0), (0, ncp - num_classes))).astype(jnp.bfloat16)
    P["fc_b"] = jnp.pad(fc_b, (0, ncp - num_classes)).astype(jnp.float32)
    P["num_classes"] = num_classes
    return P


# -----------------------------------------------------------------------------
# Forward pass (matches ResNet_variant.forward)
# -----------------------------------------------------------------------------
def resnet_variant_forward(x_nchw, P):
    x = jnp.transpose(x_nchw, (0, 2, 3, 1)).astype(jnp.bfloat16)   # NCHW -> NHWC, bf16
    x = conv_bn_act(x, P["conv1"], relu=True)
    x = conv_bn_act(x, P["conv2"], relu=True)
    x = conv_bn_act(x, P["conv3"], relu=True)
    for blocks in P["stages"]:
        for blk in blocks:
            x = basic_block(x, blk)
    # TODO(synk): nn.Dropout(p=0.5) is identity at inference; training-mode RNG mask not implemented.
    logits = avgpool_fc(x, P["fc_w"], P["fc_b"], P["num_classes"])
    return logits


if __name__ == "__main__":
    key = jax.random.PRNGKey(0)
    x = jax.random.normal(key, (4, 3, 32, 32), dtype=jnp.float32)   # small NCHW input
    params = init_params(layers=(1, 1, 1, 1), num_classes=14)

    fwd = jax.jit(lambda inp: resnet_variant_forward(inp, params))
    out = fwd(x)
    out = jax.block_until_ready(out)
    assert out.shape == (4, 14), out.shape
    assert bool(jnp.all(jnp.isfinite(out)))
    print("KERNEL_OK")
</pallas_src>

<mosaic_0001>
module attributes {stable_mosaic.version = 11 : i64} {
  func.func @kernel(%arg0: i32, %arg1: i32, %arg2: memref<256x363xbf16, #tpu.memory_space<vmem>>, %arg3: memref<363x128xbf16, #tpu.memory_space<vmem>>, %arg4: memref<1x128xf32, #tpu.memory_space<vmem>>, %arg5: memref<256x128xbf16, #tpu.memory_space<vmem>>) attributes {dimension_semantics = [#tpu.dimension_semantics<parallel>, #tpu.dimension_semantics<parallel>], iteration_bounds = array<i64: 4, 1>, scalar_prefetch = 0 : i64, scratch_operands = 0 : i64, tpu.core_type = #tpu.core_type<tc>, window_params = [{transform_indices = @transform_0, window_bounds = array<i64: 256, 363>}, {transform_indices = @transform_1, window_bounds = array<i64: 363, 128>}, {transform_indices = @transform_2, window_bounds = array<i64: 1, 128>}, {transform_indices = @transform_3, window_bounds = array<i64: 256, 128>}]} {
    %c0 = arith.constant 0 : index
    %c0_0 = arith.constant 0 : index
    %0 = vector.load %arg2[%c0, %c0_0] : memref<256x363xbf16, #tpu.memory_space<vmem>>, vector<256x363xbf16>
    %c0_1 = arith.constant 0 : index
    %c0_2 = arith.constant 0 : index
    %1 = vector.load %arg3[%c0_1, %c0_2] : memref<363x128xbf16, #tpu.memory_space<vmem>>, vector<363x128xbf16>
    %cst = arith.constant dense<0.000000e+00> : vector<256x128xf32>
    %2 = tpu.matmul %0, %1, %cst {dimension_numbers = #tpu.dot_dimension_numbers<[1], [0], [0], [1], [0, 0, 1, 1], [], []>} : vector<256x363xbf16>, vector<363x128xbf16>, vector<256x128xf32> -> vector<256x128xf32>
    %c0_3 = arith.constant 0 : index
    %c0_4 = arith.constant 0 : index
    %3 = vector.load %arg4[%c0_3, %c0_4] : memref<1x128xf32, #tpu.memory_space<vmem>>, vector<1x128xf32>
    %4 = vector.broadcast %3 : vector<1x128xf32> to vector<256x128xf32>
    %5 = arith.addf %2, %4 : vector<256x128xf32>
    %cst_5 = arith.constant 0.000000e+00 : f32
    %6 = vector.broadcast %cst_5 : f32 to vector<256x128xf32>
    %7 = arith.maximumf %5, %6 : vector<256x128xf32>
    %8 = arith.truncf %7 : vector<256x128xf32> to vector<256x128xbf16>
    %c0_6 = arith.constant 0 : index
    %c0_7 = arith.constant 0 : index
    %9 = vector.load %arg5[%c0_6, %c0_7] : memref<256x128xbf16, #tpu.memory_space<vmem>>, vector<256x128xbf16>
    tpu.vector_store %arg5[%c0_6, %c0_7], %8 {strides = array<i32>} : memref<256x128xbf16, #tpu.memory_space<vmem>>, vector<256x128xbf16>,
    return
  }
  func.func @transform_0(%arg0: i32, %arg1: i32) -> (i32, i32) {
    %c0_i32 = arith.constant 0 : i32
    %c0_i32_0 = arith.constant 0 : i32
    return %arg0, %c0_i32 : i32, i32
  }
  func.func @transform_1(%arg0: i32, %arg1: i32) -> (i32, i32) {
    %c0_i32 = arith.constant 0 : i32
    %c0_i32_0 = arith.constant 0 : i32
    return %c0_i32, %arg1 : i32, i32
  }
  func.func @transform_2(%arg0: i32, %arg1: i32) -> (i32, i32) {
    %c0_i32 = arith.constant 0 : i32
    %c0_i32_0 = arith.constant 0 : i32
    return %c0_i32, %arg1 : i32, i32
  }
  func.func @transform_3(%arg0: i32, %arg1: i32) -> (i32, i32) {
    %c0_i32 = arith.constant 0 : i32
    return %arg0, %arg1 : i32, i32
  }
}

module attributes {stable_mosaic.version = 11 : i64} {
  func.func @kernel(%arg0: i32, %arg1: i32, %arg2: memref<256x576xbf16, #tpu.memory_space<vmem>>, %arg3: memref<576x128xbf16, #tpu.memory_space<vmem>>, %arg4: memref<1x128xf32, #tpu.memory_space<vmem>>, %arg5: memref<256x128xbf16, #tpu.memory_space<vmem>>) attributes {dimension_semantics = [#tpu.dimension_semantics<parallel>, #tpu.dimension_semantics<parallel>], iteration_bounds = array<i64: 1, 1>, scalar_prefetch = 0 : i64, scratch_operands = 0 : i64, tpu.core_type = #tpu.core_type<tc>, window_params = [{transform_indices = @transform_0, window_bounds = array<i64: 256, 576>}, {transform_indices = @transform_1, window_bounds = array<i64: 576, 128>}, {transform_indices = @transform_2, window_bounds = array<i64: 1, 128>}, {transform_indices = @transform_3, window_bounds = array<i64: 256, 128>}]} {
    %c0 = arith.constant 0 : index
    %c0_0 = arith.constant 0 : index
    %0 = vector.load %arg2[%c0, %c0_0] : memref<256x576xbf16, #tpu.memory_space<vmem>>, vector<256x576xbf16>
    %c0_1 = arith.constant 0 : index
    %c0_2 = arith.constant 0 : index
    %1 = vector.load %arg3[%c0_1, %c0_2] : memref<576x128xbf16, #tpu.memory_space<vmem>>, vector<576x128xbf16>
    %cst = arith.constant dense<0.000000e+00> : vector<256x128xf32>
    %2 = tpu.matmul %0, %1, %cst {dimension_numbers = #tpu.dot_dimension_numbers<[1], [0], [0], [1], [0, 0, 1, 1], [], []>} : vector<256x576xbf16>, vector<576x128xbf16>, vector<256x128xf32> -> vector<256x128xf32>
    %c0_3 = arith.constant 0 : index
    %c0_4 = arith.constant 0 : index
    %3 = vector.load %arg4[%c0_3, %c0_4] : memref<1x128xf32, #tpu.memory_space<vmem>>, vector<1x128xf32>
    %4 = vector.broadcast %3 : vector<1x128xf32> to vector<256x128xf32>
    %5 = arith.addf %2, %4 : vector<256x128xf32>
    %cst_5 = arith.constant 0.000000e+00 : f32
    %6 = vector.broadcast %cst_5 : f32 to vector<256x128xf32>
    %7 = arith.maximumf %5, %6 : vector<256x128xf32>
    %8 = arith.truncf %7 : vector<256x128xf32> to vector<256x128xbf16>
    %c0_6 = arith.constant 0 : index
    %c0_7 = arith.constant 0 : index
    %9 = vector.load %arg5[%c0_6, %c0_7] : memref<256x128xbf16, #tpu.memory_space<vmem>>, vector<256x128xbf16>
    tpu.vector_store %arg5[%c0_6, %c0_7], %8 {strides = array<i32>} : memref<256x128xbf16, #tpu.memory_space<vmem>>, vector<256x128xbf16>,
    return
  }
  func.func @transform_0(%arg0: i32, %arg1: i32) -> (i32, i32) {
    %c0_i32 = arith.constant 0 : i32
    %c0_i32_0 = arith.constant 0 : i32
    return %arg0, %c0_i32 : i32, i32
  }
  func.func @transform_1(%arg0: i32, %arg1: i32) -> (i32, i32) {
    %c0_i32 = arith.constant 0 : i32
    %c0_i32_0 = arith.constant 0 : i32
    return %c0_i32, %arg1 : i32, i32
  }
  func.func @transform_2(%arg0: i32, %arg1: i32) -> (i32, i32) {
    %c0_i32 = arith.constant 0 : i32
    %c0_i32_0 = arith.constant 0 : i32
    return %c0_i32, %arg1 : i32, i32
  }
  func.func @transform_3(%arg0: i32, %arg1: i32) -> (i32, i32) {
    %c0_i32 = arith.constant 0 : i32
    return %arg0, %arg1 : i32, i32
  }
}

module attributes {stable_mosaic.version = 11 : i64} {
  func.func @kernel(%arg0: i32, %arg1: i32, %arg2: memref<64x576xbf16, #tpu.memory_space<vmem>>, %arg3: memref<576x128xbf16, #tpu.memory_space<vmem>>, %arg4: memref<1x128xf32, #tpu.memory_space<vmem>>, %arg5: memref<64x128xbf16, #tpu.memory_space<vmem>>) attributes {dimension_semantics = [#tpu.dimension_semantics<parallel>, #tpu.dimension_semantics<parallel>], iteration_bounds = array<i64: 1, 1>, scalar_prefetch = 0 : i64, scratch_operands = 0 : i64, tpu.core_type = #tpu.core_type<tc>, window_params = [{transform_indices = @transform_0, window_bounds = array<i64: 64, 576>}, {transform_indices = @transform_1, window_bounds = array<i64: 576, 128>}, {transform_indices = @transform_2, window_bounds = array<i64: 1, 128>}, {transform_indices = @transform_3, window_bounds = array<i64: 64, 128>}]} {
    %c0 = arith.constant 0 : index
    %c0_0 = arith.constant 0 : index
    %0 = vector.load %arg2[%c0, %c0_0] : memref<64x576xbf16, #tpu.memory_space<vmem>>, vector<64x576xbf16>
    %c0_1 = arith.constant 0 : index
    %c0_2 = arith.constant 0 : index
    %1 = vector.load %arg3[%c0_1, %c0_2] : memref<576x128xbf16, #tpu.memory_space<vmem>>, vector<576x128xbf16>
    %cst = arith.constant dense<0.000000e+00> : vector<64x128xf32>
    %2 = tpu.matmul %0, %1, %cst {dimension_numbers = #tpu.dot_dimension_numbers<[1], [0], [0], [1], [0, 0, 1, 1], [], []>} : vector<64x576xbf16>, vector<576x128xbf16>, vector<64x128xf32> -> vector<64x128xf32>
    %c0_3 = arith.constant 0 : index
    %c0_4 = arith.constant 0 : index
    %3 = vector.load %arg4[%c0_3, %c0_4] : memref<1x128xf32, #tpu.memory_space<vmem>>, vector<1x128xf32>
    %4 = vector.broadcast %3 : vector<1x128xf32> to vector<64x128xf32>
    %5 = arith.addf %2, %4 : vector<64x128xf32>
    %cst_5 = arith.constant 0.000000e+00 : f32
    %6 = vector.broadcast %cst_5 : f32 to vector<64x128xf32>
    %7 = arith.maximumf %5, %6 : vector<64x128xf32>
    %8 = arith.truncf %7 : vector<64x128xf32> to vector<64x128xbf16>
    %c0_6 = arith.constant 0 : index
    %c0_7 = arith.constant 0 : index
    %9 = vector.load %arg5[%c0_6, %c0_7] : memref<64x128xbf16, #tpu.memory_space<vmem>>, vector<64x128xbf16>
    tpu.vector_store %arg5[%c0_6, %c0_7], %8 {strides = array<i32>} : memref<64x128xbf16, #tpu.memory_space<vmem>>, vector<64x128xbf16>,
    return
  }
  func.func @transform_0(%arg0: i32, %arg1: i32) -> (i32, i32) {
    %c0_i32 = arith.constant 0 : i32
    %c0_i32_0 = arith.constant 0 : i32
    return %arg0, %c0_i32 : i32, i32
  }
  func.func @transform_1(%arg0: i32, %arg1: i32) -> (i32, i32) {
    %c0_i32 = arith.constant 0 : i32
    %c0_i32_0 = arith.constant 0 : i32
    return %c0_i32, %arg1 : i32, i32
  }
  func.func @transform_2(%arg0: i32, %arg1: i32) -> (i32, i32) {
    %c0_i32 = arith.constant 0 : i32
    %c0_i32_0 = arith.constant 0 : i32
    return %c0_i32, %arg1 : i32, i32
  }
  func.func @transform_3(%arg0: i32, %arg1: i32) -> (i32, i32) {
    %c0_i32 = arith.constant 0 : i32
    return %arg0, %arg1 : i32, i32
  }
}

module attributes {stable_mosaic.version = 11 : i64} {
  func.func @kernel(%arg0: i32, %arg1: memref<64x576xbf16, #tpu.memory_space<vmem>>, %arg2: memref<576x128xbf16, #tpu.memory_space<vmem>>, %arg3: memref<1x128xf32, #tpu.memory_space<vmem>>, %arg4: memref<9x128x128xbf16, #tpu.memory_space<vmem>>, %arg5: memref<1x128xf32, #tpu.memory_space<vmem>>, %arg6: memref<8x64x64xbf16, #tpu.memory_space<vmem>>, %arg7: memref<64x128xbf16, #tpu.memory_space<vmem>>, %arg8: memref<64x128xbf16, #tpu.memory_space<vmem>>) attributes {dimension_semantics = [#tpu.dimension_semantics<arbitrary>], iteration_bounds = array<i64: 1>, scalar_prefetch = 0 : i64, scratch_operands = 0 : i64, tpu.core_type = #tpu.core_type<tc>, window_params = [{pipeline_mode = #tpu.pipeline_mode<synchronous>, transform_indices = @transform_0, window_bounds = array<i64: 64, 576>}, {pipeline_mode = #tpu.pipeline_mode<synchronous>, transform_indices = @transform_1, window_bounds = array<i64: 576, 128>}, {pipeline_mode = #tpu.pipeline_mode<synchronous>, transform_indices = @transform_2, window_bounds = array<i64: 1, 128>}, {pipeline_mode = #tpu.pipeline_mode<synchronous>, transform_indices = @transform_3, window_bounds = array<i64: 9, 128, 128>}, {pipeline_mode = #tpu.pipeline_mode<synchronous>, transform_indices = @transform_4, window_bounds = array<i64: 1, 128>}, {pipeline_mode = #tpu.pipeline_mode<synchronous>, transform_indices = @transform_5, window_bounds = array<i64: 8, 64, 64>}, {pipeline_mode = #tpu.pipeline_mode<synchronous>, transform_indices = @transform_6, window_bounds = array<i64: 64, 128>}, {pipeline_mode = #tpu.pipeline_mode<synchronous>, transform_indices = @transform_7, window_bounds = array<i64: 64, 128>}]} {
    %c0 = arith.constant 0 : index
    %c0_0 = arith.constant 0 : index
    %0 = vector.load %arg1[%c0, %c0_0] : memref<64x576xbf16, #tpu.memory_space<vmem>>, vector<64x576xbf16>
    %c0_1 = arith.constant 0 : index
    %c0_2 = arith.constant 0 : index
    %1 = vector.load %arg2[%c0_1, %c0_2] : memref<576x128xbf16, #tpu.memory_space<vmem>>, vector<576x128xbf16>
    %cst = arith.constant dense<0.000000e+00> : vector<64x128xf32>
    %2 = tpu.matmul %0, %1, %cst {dimension_numbers = #tpu.dot_dimension_numbers<[1], [0], [0], [1], [0, 0, 1, 1], [], []>} : vector<64x576xbf16>, vector<576x128xbf16>, vector<64x128xf32> -> vector<64x128xf32>
    %c0_3 = arith.constant 0 : index
    %c0_4 = arith.constant 0 : index
    %3 = vector.load %arg3[%c0_3, %c0_4] : memref<1x128xf32, #tpu.memory_space<vmem>>, vector<1x128xf32>
    %4 = vector.broadcast %3 : vector<1x128xf32> to vector<64x128xf32>
    %5 = arith.addf %2, %4 : vector<64x128xf32>
    %cst_5 = arith.constant 0.000000e+00 : f32
    %6 = vector.broadcast %cst_5 : f32 to vector<64x128xf32>
    %7 = arith.maximumf %5, %6 : vector<64x128xf32>
    %8 = arith.truncf %7 : vector<64x128xf32> to vector<64x128xbf16>
    %cst_6 = arith.constant 0.000000e+00 : f32
    %9 = vector.broadcast %cst_6 : f32 to vector<64x128xf32>
    %c0_7 = arith.constant 0 : index
    %c0_8 = arith.constant 0 : index
    %c0_9 = arith.constant 0 : index
    %10 = vector.load %arg6[%c0_7, %c0_8, %c0_9] : memref<8x64x64xbf16, #tpu.memory_space<vmem>>, vector<1x64x64xbf16>
    %11 = vector.shape_cast %10 : vector<1x64x64xbf16> to vector<64x64xbf16>
    %cst_10 = arith.constant dense<0.000000e+00> : vector<64x128xf32>
    %12 = tpu.matmul %11, %8, %cst_10 {dimension_numbers = #tpu.dot_dimension_numbers<[1], [0], [0], [1], [0, 0, 1, 1], [], []>} : vector<64x64xbf16>, vector<64x128xbf16>, vector<64x128xf32> -> vector<64x128xf32>
    %13 = arith.truncf %12 : vector<64x128xf32> to vector<64x128xbf16>
    %c0_11 = arith.constant 0 : index
    %c0_12 = arith.constant 0 : index
    %c0_13 = arith.constant 0 : index
    %14 = vector.load %arg4[%c0_11, %c0_12, %c0_13] : memref<9x128x128xbf16, #tpu.memory_space<vmem>>, vector<1x128x128xbf16>
    %15 = vector.shape_cast %14 : vector<1x128x128xbf16> to vector<128x128xbf16>
    %cst_14 = arith.constant dense<0.000000e+00> : vector<64x128xf32>
    %16 = tpu.matmul %13, %15, %cst_14 {dimension_numbers = #tpu.dot_dimension_numbers<[1], [0], [0], [1], [0, 0, 1, 1], [], []>} : vector<64x128xbf16>, vector<128x128xbf16>, vector<64x128xf32> -> vector<64x128xf32>
    %17 = arith.addf %9, %16 : vector<64x128xf32>
    %c1 = arith.constant 1 : index
    %c0_15 = arith.constant 0 : index
    %c0_16 = arith.constant 0 : index
    %18 = vector.load %arg6[%c1, %c0_15, %c0_16] : memref<8x64x64xbf16, #tpu.memory_space<vmem>>, vector<1x64x64xbf16>
    %19 = vector.shape_cast %18 : vector<1x64x64xbf16> to vector<64x64xbf16>
    %cst_17 = arith.constant dense<0.000000e+00> : vector<64x128xf32>
    %20 = tpu.matmul %19, %8, %cst_17 {dimension_numbers = #tpu.dot_dimension_numbers<[1], [0], [0], [1], [0, 0, 1, 1], [], []>} : vector<64x64xbf16>, vector<64x128xbf16>, vector<64x128xf32> -> vector<64x128xf32>
    %21 = arith.truncf %20 : vector<64x128xf32> to vector<64x128xbf16>
    %c1_18 = arith.constant 1 : index
    %c0_19 = arith.constant 0 : index
    %c0_20 = arith.constant 0 : index
    %22 = vector.load %arg4[%c1_18, %c0_19, %c0_20] : memref<9x128x128xbf16, #tpu.memory_space<vmem>>, vector<1x128x128xbf16>
    %23 = vector.shape_cast %22 : vector<1x128x128xbf16> to vector<128x128xbf16>
    %cst_21 = arith.constant dense<0.000000e+00> : vector<64x128xf32>
    %24 = tpu.matmul %21, %23, %cst_21 {dimension_numbers = #tpu.dot_dimension_numbers<[1], [0], [0], [1], [0, 0, 1, 1], [], []>} : vector<64x128xbf16>, vector<128x128xbf16>, vector<64x128xf32> -> vector<64x128xf32>
    %25 = arith.addf %17, %24 : vector<64x128xf32>
    %c2 = arith.constant 2 : index
    %c0_22 = arith.constant 0 : index
    %c0_23 = arith.constant 0 : index
    %26 = vector.load %arg6[%c2, %c0_22, %c0_23] : memref<8x64x64xbf16, #tpu.memory_space<vmem>>, vector<1x64x64xbf16>
    %27 = vector.shape_cast %26 : vector<1x64x64xbf16> to vector<64x64xbf16>
    %cst_24 = arith.constant dense<0.000000e+00> : vector<64x128xf32>
    %28 = tpu.matmul %27, %8, %cst_24 {dimension_numbers = #tpu.dot_dimension_numbers<[1], [0], [0], [1], [0, 0, 1, 1], [], []>} : vector<64x64xbf16>, vector<64x128xbf16>, vector<64x128xf32> -> vector<64x128xf32>
    %29 = arith.truncf %28 : vector<64x128xf32> to vector<64x128xbf16>
    %c2_25 = arith.constant 2 : index
    %c0_26 = arith.constant 0 : index
    %c0_27 = arith.constant 0 : index
    %30 = vector.load %arg4[%c2_25, %c0_26, %c0_27] : memref<9x128x128xbf16, #tpu.memory_space<vmem>>, vector<1x128x128xbf16>
    %31 = vector.shape_cast %30 : vector<1x128x128xbf16> to vector<128x128xbf16>
    %cst_28 = arith.constant dense<0.000000e+00> : vector<64x128xf32>
    %32 = tpu.matmul %29, %31, %cst_28 {dimension_numbers = #tpu.dot_dimension_numbers<[1], [0], [0], [1], [0, 0, 1, 1], [], []>} : vector<64x128xbf16>, vector<128x128xbf16>, vector<64x128xf32> -> vector<64x128xf32>
    %33 = arith.addf %25, %32 : vector<64x128xf32>
    %c3 = arith.constant 3 : index
    %c0_29 = arith.constant 0 : index
    %c0_30 = arith.constant 0 : index
    %34 = vector.load %arg6[%c3, %c0_29, %c0_30] : memref<8x64x64xbf16, #tpu.memory_space<vmem>>, vector<1x64x64xbf16>
    %35 = vector.shape_cast %34 : vector<1x64x64xbf16> to vector<64x64xbf16>
    %cst_31 = arith.constant dense<0.000000e+00> : vector<64x128xf32>
    %36 = tpu.matmul %35, %8, %cst_31 {dimension_numbers = #tpu.dot_dimension_numbers<[1], [0], [0], [1], [0, 0, 1, 1], [], []>} : vector<64x64xbf16>, vector<64x128xbf16>, vector<64x128xf32> -> vector<64x128xf32>
    %37 = arith.truncf %36 : vector<64x128xf32> to vector<64x128xbf16>
    %c3_32 = arith.constant 3 : index
    %c0_33 = arith.constant 0 : index
    %c0_34 = arith.constant 0 : index
    %38 = vector.load %arg4[%c3_32, %c0_33, %c0_34] : memref<9x128x128xbf16, #tpu.memory_space<vmem>>, vector<1x128x128xbf16>
    %39 = vector.shape_cast %38 : vector<1x128x128xbf16> to vector<128x128xbf16>
    %cst_35 = arith.constant dense<0.000000e+00> : vector<64x128xf32>
    %40 = tpu.matmul %37, %39, %cst_35 {dimension_numbers = #tpu.dot_dimension_numbers<[1], [0], [0], [1], [0, 0, 1, 1], [], []>} : vector<64x128xbf16>, vector<128x128xbf16>, vector<64x128xf32> -> vector<64x128xf32>
    %41 = arith.addf %33, %40 : vector<64x128xf32>
    %c4 = arith.constant 4 : index
    %c0_36 = arith.constant 0 : index
    %c0_37 = arith.constant 0 : index
    %42 = vector.load %arg4[%c4, %c0_36, %c0_37] : memref<9x128x128xbf16, #tpu.memory_space<vmem>>, vector<1x128x128xbf16>
    %43 = vector.shape_cast %42 : vector<1x128x128xbf16> to vector<128x128xbf16>
    %cst_38 = arith.constant dense<0.000000e+00> : vector<64x128xf32>
    %44 = tpu.matmul %8, %43, %cst_38 {dimension_numbers = #tpu.dot_dimension_numbers<[1], [0], [0], [1], [0, 0, 1, 1], [], []>} : vector<64x128xbf16>, vector<128x128xbf16>, vector<64x128xf32> -> vector<64x128xf32>
    %45 = arith.addf %41, %44 : vector<64x128xf32>
    %c4_39 = arith.constant 4 : index
    %c0_40 = arith.constant 0 : index
    %c0_41 = arith.constant 0 : index
    %46 = vector.load %arg6[%c4_39, %c0_40, %c0_41] : memref<8x64x64xbf16, #tpu.memory_space<vmem>>, vector<1x64x64xbf16>
    %47 = vector.shape_cast %46 : vector<1x64x64xbf16> to vector<64x64xbf16>
    %cst_42 = arith.constant dense<0.000000e+00> : vector<64x128xf32>
    %48 = tpu.matmul %47, %8, %cst_42 {dimension_numbers = #tpu.dot_dimension_numbers<[1], [0], [0], [1], [0, 0, 1, 1], [], []>} : vector<64x64xbf16>, vector<64x128xbf16>, vector<64x128xf32> -> vector<64x128xf32>
    %49 = arith.truncf %48 : vector<64x128xf32> to vector<64x128xbf16>
    %c5 = arith.constant 5 : index
    %c0_43 = arith.constant 0 : index
    %c0_44 = arith.constant 0 : index
    %50 = vector.load %arg4[%c5, %c0_43, %c0_44] : memref<9x128x128xbf16, #tpu.memory_space<vmem>>, vector<1x128x128xbf16>
    %51 = vector.shape_cast %50 : vector<1x128x128xbf16> to vector<128x128xbf16>
    %cst_45 = arith.constant dense<0.000000e+00> : vector<64x128xf32>
    %52 = tpu.matmul %49, %51, %cst_45 {dimension_numbers = #tpu.dot_dimension_numbers<[1], [0], [0], [1], [0, 0, 1, 1], [], []>} : vector<64x128xbf16>, vector<128x128xbf16>, vector<64x128xf32> -> vector<64x128xf32>
    %53 = arith.addf %45, %52 : vector<64x128xf32>
    %c5_46 = arith.constant 5 : index
    %c0_47 = arith.constant 0 : index
    %c0_48 = arith.constant 0 : index
    %54 = vector.load %arg6[%c5_46, %c0_47, %c0_48] : memref<8x64x64xbf16, #tpu.memory_space<vmem>>, vector<1x64x64xbf16>
    %55 = vector.shape_cast %54 : vector<1x64x64xbf16> to vector<64x64xbf16>
    %cst_49 = arith.constant dense<0.000000e+00> : vector<64x128xf32>
    %56 = tpu.matmul %55, %8, %cst_49 {dimension_numbers = #tpu.dot_dimension_numbers<[1], [0], [0], [1], [0, 0, 1, 1], [], []>} : vector<64x64xbf16>, vector<64x128xbf16>, vector<64x128xf32> -> vector<64x128xf32>
    %57 = arith.truncf %56 : vector<64x128xf32> to vector<64x128xbf16>
    %c6 = arith.constant 6 : index
    %c0_50 = arith.constant 0 : index
    %c0_51 = arith.constant 0 : index
    %58 = vector.load %arg4[%c6, %c0_50, %c0_51] : memref<9x128x128xbf16, #tpu.memory_space<vmem>>, vector<1x128x128xbf16>
    %59 = vector.shape_cast %58 : vector<1x128x128xbf16> to vector<128x128xbf16>
    %cst_52 = arith.constant dense<0.000000e+00> : vector<64x128xf32>
    %60 = tpu.matmul %57, %59, %cst_52 {dimension_numbers = #tpu.dot_dimension_numbers<[1], [0], [0], [1], [0, 0, 1, 1], [], []>} : vector<64x128xbf16>, vector<128x128xbf16>, vector<64x128xf32> -> vector<64x128xf32>
    %61 = arith.addf %53, %60 : vector<64x128xf32>
    %c6_53 = arith.constant 6 : index
    %c0_54 = arith.constant 0 : index
    %c0_55 = arith.constant 0 : index
    %62 = vector.load %arg6[%c6_53, %c0_54, %c0_55] : memref<8x64x64xbf16, #tpu.memory_space<vmem>>, vector<1x64x64xbf16>
    %63 = vector.shape_cast %62 : vector<1x64x64xbf16> to vector<64x64xbf16>
    %cst_56 = arith.constant dense<0.000000e+00> : vector<64x128xf32>
    %64 = tpu.matmul %63, %8, %cst_56 {dimension_numbers = #tpu.dot_dimension_numbers<[1], [0], [0], [1], [0, 0, 1, 1], [], []>} : vector<64x64xbf16>, vector<64x128xbf16>, vector<64x128xf32> -> vector<64x128xf32>
    %65 = arith.truncf %64 : vector<64x128xf32> to vector<64x128xbf16>
    %c7 = arith.constant 7 : index
    %c0_57 = arith.constant 0 : index
    %c0_58 = arith.constant 0 : index
    %66 = vector.load %arg4[%c7, %c0_57, %c0_58] : memref<9x128x128xbf16, #tpu.memory_space<vmem>>, vector<1x128x128xbf16>
    %67 = vector.shape_cast %66 : vector<1x128x128xbf16> to vector<128x128xbf16>
    %cst_59 = arith.constant dense<0.000000e+00> : vector<64x128xf32>
    %68 = tpu.matmul %65, %67, %cst_59 {dimension_numbers = #tpu.dot_dimension_numbers<[1], [0], [0], [1], [0, 0, 1, 1], [], []>} : vector<64x128xbf16>, vector<128x128xbf16>, vector<64x128xf32> -> vector<64x128xf32>
    %69 = arith.addf %61, %68 : vector<64x128xf32>
    %c7_60 = arith.constant 7 : index
    %c0_61 = arith.constant 0 : index
    %c0_62 = arith.constant 0 : index
    %70 = vector.load %arg6[%c7_60, %c0_61, %c0_62] : memref<8x64x64xbf16, #tpu.memory_space<vmem>>, vector<1x64x64xbf16>
    %71 = vector.shape_cast %70 : vector<1x64x64xbf16> to vector<64x64xbf16>
    %cst_63 = arith.constant dense<0.000000e+00> : vector<64x128xf32>
    %72 = tpu.matmul %71, %8, %cst_63 {dimension_numbers = #tpu.dot_dimension_numbers<[1], [0], [0], [1], [0, 0, 1, 1], [], []>} : vector<64x64xbf16>, vector<64x128xbf16>, vector<64x128xf32> -> vector<64x128xf32>
    %73 = arith.truncf %72 : vector<64x128xf32> to vector<64x128xbf16>
    %c8 = arith.constant 8 : index
    %c0_64 = arith.constant 0 : index
    %c0_65 = arith.constant 0 : index
    %74 = vector.load %arg4[%c8, %c0_64, %c0_65] : memref<9x128x128xbf16, #tpu.memory_space<vmem>>, vector<1x128x128xbf16>
    %75 = vector.shape_cast %74 : vector<1x128x128xbf16> to vector<128x128xbf16>
    %cst_66 = arith.constant dense<0.000000e+00> : vector<64x128xf32>
    %76 = tpu.matmul %73, %75, %cst_66 {dimension_numbers = #tpu.dot_dimension_numbers<[1], [0], [0], [1], [0, 0, 1, 1], [], []>} : vector<64x128xbf16>, vector<128x128xbf16>, vector<64x128xf32> -> vector<64x128xf32>
    %77 = arith.addf %69, %76 : vector<64x128xf32>
    %c0_67 = arith.constant 0 : index
    %c0_68 = arith.constant 0 : index
    %78 = vector.load %arg5[%c0_67, %c0_68] : memref<1x128xf32, #tpu.memory_space<vmem>>, vector<1x128xf32>
    %79 = vector.broadcast %78 : vector<1x128xf32> to vector<64x128xf32>
    %80 = arith.addf %77, %79 : vector<64x128xf32>
    %c0_69 = arith.constant 0 : index
    %c0_70 = arith.constant 0 : index
    %81 = vector.load %arg7[%c0_69, %c0_70] : memref<64x128xbf16, #tpu.memory_space<vmem>>, vector<64x128xbf16>
    %82 = arith.extf %81 : vector<64x128xbf16> to vector<64x128xf32>
    %83 = arith.addf %80, %82 : vector<64x128xf32>
    %cst_71 = arith.constant 0.000000e+00 : f32
    %84 = vector.broadcast %cst_71 : f32 to vector<64x128xf32>
    %85 = arith.maximumf %83, %84 : vector<64x128xf32>
    %86 = arith.truncf %85 : vector<64x128xf32> to vector<64x128xbf16>
    %c0_72 = arith.constant 0 : index
    %c0_73 = arith.constant 0 : index
    %87 = vector.load %arg8[%c0_72, %c0_73] : memref<64x128xbf16, #tpu.memory_space<vmem>>, vector<64x128xbf16>
    tpu.vector_store %arg8[%c0_72, %c0_73], %86 {strides = array<i32>} : memref<64x128xbf16, #tpu.memory_space<vmem>>, vector<64x128xbf16>,
    return
  }
  func.func @transform_0(%arg0: i32) -> (i32, i32) {
    %c0_i32 = arith.constant 0 : i32
    %c0_i32_0 = arith.constant 0 : i32
    %c0_i32_1 = arith.constant 0 : i32
    return %c0_i32, %c0_i32_0 : i32, i32
  }
  func.func @transform_1(%arg0: i32) -> (i32, i32) {
    %c0_i32 = arith.constant 0 : i32
    %c0_i32_0 = arith.constant 0 : i32
    %c0_i32_1 = arith.constant 0 : i32
    return %c0_i32, %c0_i32_0 : i32, i32
  }
  func.func @transform_2(%arg0: i32) -> (i32, i32) {
    %c0_i32 = arith.constant 0 : i32
    %c0_i32_0 = arith.constant 0 : i32
    %c0_i32_1 = arith.constant 0 : i32
    return %c0_i32, %c0_i32_0 : i32, i32
  }
  func.func @transform_3(%arg0: i32) -> (i32, i32, i32) {
    %c0_i32 = arith.constant 0 : i32
    %c0_i32_0 = arith.constant 0 : i32
    %c0_i32_1 = arith.constant 0 : i32
    %c0_i32_2 = arith.constant 0 : i32
    return %c0_i32, %c0_i32_0, %c0_i32_1 : i32, i32, i32
  }
  func.func @transform_4(%arg0: i32) -> (i32, i32) {
    %c0_i32 = arith.constant 0 : i32
    %c0_i32_0 = arith.constant 0 : i32
    %c0_i32_1 = arith.constant 0 : i32
    return %c0_i32, %c0_i32_0 : i32, i32
  }
  func.func @transform_5(%arg0: i32) -> (i32, i32, i32) {
    %c0_i32 = arith.constant 0 : i32
    %c0_i32_0 = arith.constant 0 : i32
    %c0_i32_1 = arith.constant 0 : i32
    %c0_i32_2 = arith.constant 0 : i32
    return %c0_i32, %c0_i32_0, %c0_i32_1 : i32, i32, i32
  }
  func.func @transform_6(%arg0: i32) -> (i32, i32) {
    %c0_i32 = arith.constant 0 : i32
    %c0_i32_0 = arith.constant 0 : i32
    %c0_i32_1 = arith.constant 0 : i32
    return %c0_i32, %c0_i32_0 : i32, i32
  }
  func.func @transform_7(%arg0: i32) -> (i32, i32) {
    %c0_i32 = arith.constant 0 : i32
    %c0_i32_0 = arith.constant 0 : i32
    %c0_i32_1 = arith.constant 0 : i32
    return %c0_i32, %c0_i32_0 : i32, i32
  }
}

module attributes {stable_mosaic.version = 11 : i64} {
  func.func @kernel(%arg0: i32, %arg1: memref<16x576xbf16, #tpu.memory_space<vmem>>, %arg2: memref<576x128xbf16, #tpu.memory_space<vmem>>, %arg3: memref<1x128xf32, #tpu.memory_space<vmem>>, %arg4: memref<9x128x128xbf16, #tpu.memory_space<vmem>>, %arg5: memref<1x128xf32, #tpu.memory_space<vmem>>, %arg6: memref<8x16x16xbf16, #tpu.memory_space<vmem>>, %arg7: memref<16x64xbf16, #tpu.memory_space<vmem>>, %arg8: memref<64x128xbf16, #tpu.memory_space<vmem>>, %arg9: memref<1x128xf32, #tpu.memory_space<vmem>>, %arg10: memref<16x128xbf16, #tpu.memory_space<vmem>>) attributes {dimension_semantics = [#tpu.dimension_semantics<arbitrary>], iteration_bounds = array<i64: 1>, scalar_prefetch = 0 : i64, scratch_operands = 0 : i64, tpu.core_type = #tpu.core_type<tc>, window_params = [{pipeline_mode = #tpu.pipeline_mode<synchronous>, transform_indices = @transform_0, window_bounds = array<i64: 16, 576>}, {pipeline_mode = #tpu.pipeline_mode<synchronous>, transform_indices = @transform_1, window_bounds = array<i64: 576, 128>}, {pipeline_mode = #tpu.pipeline_mode<synchronous>, transform_indices = @transform_2, window_bounds = array<i64: 1, 128>}, {pipeline_mode = #tpu.pipeline_mode<synchronous>, transform_indices = @transform_3, window_bounds = array<i64: 9, 128, 128>}, {pipeline_mode = #tpu.pipeline_mode<synchronous>, transform_indices = @transform_4, window_bounds = array<i64: 1, 128>}, {pipeline_mode = #tpu.pipeline_mode<synchronous>, transform_indices = @transform_5, window_bounds = array<i64: 8, 16, 16>}, {pipeline_mode = #tpu.pipeline_mode<synchronous>, transform_indices = @transform_6, window_bounds = array<i64: 16, 64>}, {pipeline_mode = #tpu.pipeline_mode<synchronous>, transform_indices = @transform_7, window_bounds = array<i64: 64, 128>}, {pipeline_mode = #tpu.pipeline_mode<synchronous>, transform_indices = @transform_8, window_bounds = array<i64: 1, 128>}, {pipeline_mode = #tpu.pipeline_mode<synchronous>, transform_indices = @transform_9, window_bounds = array<i64: 16, 128>}]} {
    %c0 = arith.constant 0 : index
    %c0_0 = arith.constant 0 : index
    %0 = vector.load %arg1[%c0, %c0_0] : memref<16x576xbf16, #tpu.memory_space<vmem>>, vector<16x576xbf16>
    %c0_1 = arith.constant 0 : index
    %c0_2 = arith.constant 0 : index
    %1 = vector.load %arg2[%c0_1, %c0_2] : memref<576x128xbf16, #tpu.memory_space<vmem>>, vector<576x128xbf16>
    %cst = arith.constant dense<0.000000e+00> : vector<16x128xf32>
    %2 = tpu.matmul %0, %1, %cst {dimension_numbers = #tpu.dot_dimension_numbers<[1], [0], [0], [1], [0, 0, 1, 1], [], []>} : vector<16x576xbf16>, vector<576x128xbf16>, vector<16x128xf32> -> vector<16x128xf32>
    %c0_3 = arith.constant 0 : index
    %c0_4 = arith.constant 0 : index
    %3 = vector.load %arg3[%c0_3, %c0_4] : memref<1x128xf32, #tpu.memory_space<vmem>>, vector<1x128xf32>
    %4 = vector.broadcast %3 : vector<1x128xf32> to vector<16x128xf32>
    %5 = arith.addf %2, %4 : vector<16x128xf32>
    %cst_5 = arith.constant 0.000000e+00 : f32
    %6 = vector.broadcast %cst_5 : f32 to vector<16x128xf32>
    %7 = arith.maximumf %5, %6 : vector<16x128xf32>
    %8 = arith.truncf %7 : vector<16x128xf32> to vector<16x128xbf16>
    %cst_6 = arith.constant 0.000000e+00 : f32
    %9 = vector.broadcast %cst_6 : f32 to vector<16x128xf32>
    %c0_7 = arith.constant 0 : index
    %c0_8 = arith.constant 0 : index
    %c0_9 = arith.constant 0 : index
    %10 = vector.load %arg6[%c0_7, %c0_8, %c0_9] : memref<8x16x16xbf16, #tpu.memory_space<vmem>>, vector<1x16x16xbf16>
    %11 = vector.shape_cast %10 : vector<1x16x16xbf16> to vector<16x16xbf16>
    %cst_10 = arith.constant dense<0.000000e+00> : vector<16x128xf32>
    %12 = tpu.matmul %11, %8, %cst_10 {dimension_numbers = #tpu.dot_dimension_numbers<[1], [0], [0], [1], [0, 0, 1, 1], [], []>} : vector<16x16xbf16>, vector<16x128xbf16>, vector<16x128xf32> -> vector<16x128xf32>
    %13 = arith.truncf %12 : vector<16x128xf32> to vector<16x128xbf16>
    %c0_11 = arith.constant 0 : index
    %c0_12 = arith.constant 0 : index
    %c0_13 = arith.constant 0 : index
    %14 = vector.load %arg4[%c0_11, %c0_12, %c0_13] : memref<9x128x128xbf16, #tpu.memory_space<vmem>>, vector<1x128x128xbf16>
    %15 = vector.shape_cast %14 : vector<1x128x128xbf16> to vector<128x128xbf16>
    %cst_14 = arith.constant dense<0.000000e+00> : vector<16x128xf32>
    %16 = tpu.matmul %13, %15, %cst_14 {dimension_numbers = #tpu.dot_dimension_numbers<[1], [0], [0], [1], [0, 0, 1, 1], [], []>} : vector<16x128xbf16>, vector<128x128xbf16>, vector<16x128xf32> -> vector<16x128xf32>
    %17 = arith.addf %9, %16 : vector<16x128xf32>
    %c1 = arith.constant 1 : index
    %c0_15 = arith.constant 0 : index
    %c0_16 = arith.constant 0 : index
    %18 = vector.load %arg6[%c1, %c0_15, %c0_16] : memref<8x16x16xbf16, #tpu.memory_space<vmem>>, vector<1x16x16xbf16>
    %19 = vector.shape_cast %18 : vector<1x16x16xbf16> to vector<16x16xbf16>
    %cst_17 = arith.constant dense<0.000000e+00> : vector<16x128xf32>
    %20 = tpu.matmul %19, %8, %cst_17 {dimension_numbers = #tpu.dot_dimension_numbers<[1], [0], [0], [1], [0, 0, 1, 1], [], []>} : vector<16x16xbf16>, vector<16x128xbf16>, vector<16x128xf32> -> vector<16x128xf32>
    %21 = arith.truncf %20 : vector<16x128xf32> to vector<16x128xbf16>
    %c1_18 = arith.constant 1 : index
    %c0_19 = arith.constant 0 : index
    %c0_20 = arith.constant 0 : index
    %22 = vector.load %arg4[%c1_18, %c0_19, %c0_20] : memref<9x128x128xbf16, #tpu.memory_space<vmem>>, vector<1x128x128xbf16>
    %23 = vector.shape_cast %22 : vector<1x128x128xbf16> to vector<128x128xbf16>
    %cst_21 = arith.constant dense<0.000000e+00> : vector<16x128xf32>
    %24 = tpu.matmul %21, %23, %cst_21 {dimension_numbers = #tpu.dot_dimension_numbers<[1], [0], [0], [1], [0, 0, 1, 1], [], []>} : vector<16x128xbf16>, vector<128x128xbf16>, vector<16x128xf32> -> vector<16x128xf32>
    %25 = arith.addf %17, %24 : vector<16x128xf32>
    %c2 = arith.constant 2 : index
    %c0_22 = arith.constant 0 : index
    %c0_23 = arith.constant 0 : index
    %26 = vector.load %arg6[%c2, %c0_22, %c0_23] : memref<8x16x16xbf16, #tpu.memory_space<vmem>>, vector<1x16x16xbf16>
    %27 = vector.shape_cast %26 : vector<1x16x16xbf16> to vector<16x16xbf16>
    %cst_24 = arith.constant dense<0.000000e+00> : vector<16x128xf32>
    %28 = tpu.matmul %27, %8, %cst_24 {dimension_numbers = #tpu.dot_dimension_numbers<[1], [0], [0], [1], [0, 0, 1, 1], [], []>} : vector<16x16xbf16>, vector<16x128xbf16>, vector<16x128xf32> -> vector<16x128xf32>
    %29 = arith.truncf %28 : vector<16x128xf32> to vector<16x128xbf16>
    %c2_25 = arith.constant 2 : index
    %c0_26 = arith.constant 0 : index
    %c0_27 = arith.constant 0 : index
    %30 = vector.load %arg4[%c2_25, %c0_26, %c0_27] : memref<9x128x128xbf16, #tpu.memory_space<vmem>>, vector<1x128x128xbf16>
    %31 = vector.shape_cast %30 : vector<1x128x128xbf16> to vector<128x128xbf16>
    %cst_28 = arith.constant dense<0.000000e+00> : vector<16x128xf32>
    %32 = tpu.matmul %29, %31, %cst_28 {dimension_numbers = #tpu.dot_dimension_numbers<[1], [0], [0], [1], [0, 0, 1, 1], [], []>} : vector<16x128xbf16>, vector<128x128xbf16>, vector<16x128xf32> -> vector<16x128xf32>
    %33 = arith.addf %25, %32 : vector<16x128xf32>
    %c3 = arith.constant 3 : index
    %c0_29 = arith.constant 0 : index
    %c0_30 = arith.constant 0 : index
    %34 = vector.load %arg6[%c3, %c0_29, %c0_30] : memref<8x16x16xbf16, #tpu.memory_space<vmem>>, vector<1x16x16xbf16>
    %35 = vector.shape_cast %34 : vector<1x16x16xbf16> to vector<16x16xbf16>
    %cst_31 = arith.constant dense<0.000000e+00> : vector<16x128xf32>
    %36 = tpu.matmul %35, %8, %cst_31 {dimension_numbers = #tpu.dot_dimension_numbers<[1], [0], [0], [1], [0, 0, 1, 1], [], []>} : vector<16x16xbf16>, vector<16x128xbf16>, vector<16x128xf32> -> vector<16x128xf32>
    %37 = arith.truncf %36 : vector<16x128xf32> to vector<16x128xbf16>
    %c3_32 = arith.constant 3 : index
    %c0_33 = arith.constant 0 : index
    %c0_34 = arith.constant 0 : index
    %38 = vector.load %arg4[%c3_32, %c0_33, %c0_34] : memref<9x128x128xbf16, #tpu.memory_space<vmem>>, vector<1x128x128xbf16>
    %39 = vector.shape_cast %38 : vector<1x128x128xbf16> to vector<128x128xbf16>
    %cst_35 = arith.constant dense<0.000000e+00> : vector<16x128xf32>
    %40 = tpu.matmul %37, %39, %cst_35 {dimension_numbers = #tpu.dot_dimension_numbers<[1], [0], [0], [1], [0, 0, 1, 1], [], []>} : vector<16x128xbf16>, vector<128x128xbf16>, vector<16x128xf32> -> vector<16x128xf32>
    %41 = arith.addf %33, %40 : vector<16x128xf32>
    %c4 = arith.constant 4 : index
    %c0_36 = arith.constant 0 : index
    %c0_37 = arith.constant 0 : index
    %42 = vector.load %arg4[%c4, %c0_36, %c0_37] : memref<9x128x128xbf16, #tpu.memory_space<vmem>>, vector<1x128x128xbf16>
    %43 = vector.shape_cast %42 : vector<1x128x128xbf16> to vector<128x128xbf16>
    %cst_38 = arith.constant dense<0.000000e+00> : vector<16x128xf32>
    %44 = tpu.matmul %8, %43, %cst_38 {dimension_numbers = #tpu.dot_dimension_numbers<[1], [0], [0], [1], [0, 0, 1, 1], [], []>} : vector<16x128xbf16>, vector<128x128xbf16>, vector<16x128xf32> -> vector<16x128xf32>
    %45 = arith.addf %41, %44 : vector<16x128xf32>
    %c4_39 = arith.constant 4 : index
    %c0_40 = arith.constant 0 : index
    %c0_41 = arith.constant 0 : index
    %46 = vector.load %arg6[%c4_39, %c0_40, %c0_41] : memref<8x16x16xbf16, #tpu.memory_space<vmem>>, vector<1x16x16xbf16>
    %47 = vector.shape_cast %46 : vector<1x16x16xbf16> to vector<16x16xbf16>
    %cst_42 = arith.constant dense<0.000000e+00> : vector<16x128xf32>
    %48 = tpu.matmul %47, %8, %cst_42 {dimension_numbers = #tpu.dot_dimension_numbers<[1], [0], [0], [1], [0, 0, 1, 1], [], []>} : vector<16x16xbf16>, vector<16x128xbf16>, vector<16x128xf32> -> vector<16x128xf32>
    %49 = arith.truncf %48 : vector<16x128xf32> to vector<16x128xbf16>
    %c5 = arith.constant 5 : index
    %c0_43 = arith.constant 0 : index
    %c0_44 = arith.constant 0 : index
    %50 = vector.load %arg4[%c5, %c0_43, %c0_44] : memref<9x128x128xbf16, #tpu.memory_space<vmem>>, vector<1x128x128xbf16>
    %51 = vector.shape_cast %50 : vector<1x128x128xbf16> to vector<128x128xbf16>
    %cst_45 = arith.constant dense<0.000000e+00> : vector<16x128xf32>
    %52 = tpu.matmul %49, %51, %cst_45 {dimension_numbers = #tpu.dot_dimension_numbers<[1], [0], [0], [1], [0, 0, 1, 1], [], []>} : vector<16x128xbf16>, vector<128x128xbf16>, vector<16x128xf32> -> vector<16x128xf32>
    %53 = arith.addf %45, %52 : vector<16x128xf32>
    %c5_46 = arith.constant 5 : index
    %c0_47 = arith.constant 0 : index
    %c0_48 = arith.constant 0 : index
    %54 = vector.load %arg6[%c5_46, %c0_47, %c0_48] : memref<8x16x16xbf16, #tpu.memory_space<vmem>>, vector<1x16x16xbf16>
    %55 = vector.shape_cast %54 : vector<1x16x16xbf16> to vector<16x16xbf16>
    %cst_49 = arith.constant dense<0.000000e+00> : vector<16x128xf32>
    %56 = tpu.matmul %55, %8, %cst_49 {dimension_numbers = #tpu.dot_dimension_numbers<[1], [0], [0], [1], [0, 0, 1, 1], [], []>} : vector<16x16xbf16>, vector<16x128xbf16>, vector<16x128xf32> -> vector<16x128xf32>
    %57 = arith.truncf %56 : vector<16x128xf32> to vector<16x128xbf16>
    %c6 = arith.constant 6 : index
    %c0_50 = arith.constant 0 : index
    %c0_51 = arith.constant 0 : index
    %58 = vector.load %arg4[%c6, %c0_50, %c0_51] : memref<9x128x128xbf16, #tpu.memory_space<vmem>>, vector<1x128x128xbf16>
    %59 = vector.shape_cast %58 : vector<1x128x128xbf16> to vector<128x128xbf16>
    %cst_52 = arith.constant dense<0.000000e+00> : vector<16x128xf32>
    %60 = tpu.matmul %57, %59, %cst_52 {dimension_numbers = #tpu.dot_dimension_numbers<[1], [0], [0], [1], [0, 0, 1, 1], [], []>} : vector<16x128xbf16>, vector<128x128xbf16>, vector<16x128xf32> -> vector<16x128xf32>
    %61 = arith.addf %53, %60 : vector<16x128xf32>
    %c6_53 = arith.constant 6 : index
    %c0_54 = arith.constant 0 : index
    %c0_55 = arith.constant 0 : index
    %62 = vector.load %arg6[%c6_53, %c0_54, %c0_55] : memref<8x16x16xbf16, #tpu.memory_space<vmem>>, vector<1x16x16xbf16>
    %63 = vector.shape_cast %62 : vector<1x16x16xbf16> to vector<16x16xbf16>
    %cst_56 = arith.constant dense<0.000000e+00> : vector<16x128xf32>
    %64 = tpu.matmul %63, %8, %cst_56 {dimension_numbers = #tpu.dot_dimension_numbers<[1], [0], [0], [1], [0, 0, 1, 1], [], []>} : vector<16x16xbf16>, vector<16x128xbf16>, vector<16x128xf32> -> vector<16x128xf32>
    %65 = arith.truncf %64 : vector<16x128xf32> to vector<16x128xbf16>
    %c7 = arith.constant 7 : index
    %c0_57 = arith.constant 0 : index
    %c0_58 = arith.constant 0 : index
    %66 = vector.load %arg4[%c7, %c0_57, %c0_58] : memref<9x128x128xbf16, #tpu.memory_space<vmem>>, vector<1x128x128xbf16>
    %67 = vector.shape_cast %66 : vector<1x128x128xbf16> to vector<128x128xbf16>
    %cst_59 = arith.constant dense<0.000000e+00> : vector<16x128xf32>
    %68 = tpu.matmul %65, %67, %cst_59 {dimension_numbers = #tpu.dot_dimension_numbers<[1], [0], [0], [1], [0, 0, 1, 1], [], []>} : vector<16x128xbf16>, vector<128x128xbf16>, vector<16x128xf32> -> vector<16x128xf32>
    %69 = arith.addf %61, %68 : vector<16x128xf32>
    %c7_60 = arith.constant 7 : index
    %c0_61 = arith.constant 0 : index
    %c0_62 = arith.constant 0 : index
    %70 = vector.load %arg6[%c7_60, %c0_61, %c0_62] : memref<8x16x16xbf16, #tpu.memory_space<vmem>>, vector<1x16x16xbf16>
    %71 = vector.shape_cast %70 : vector<1x16x16xbf16> to vector<16x16xbf16>
    %cst_63 = arith.constant dense<0.000000e+00> : vector<16x128xf32>
    %72 = tpu.matmul %71, %8, %cst_63 {dimension_numbers = #tpu.dot_dimension_numbers<[1], [0], [0], [1], [0, 0, 1, 1], [], []>} : vector<16x16xbf16>, vector<16x128xbf16>, vector<16x128xf32> -> vector<16x128xf32>
    %73 = arith.truncf %72 : vector<16x128xf32> to vector<16x128xbf16>
    %c8 = arith.constant 8 : index
    %c0_64 = arith.constant 0 : index
    %c0_65 = arith.constant 0 : index
    %74 = vector.load %arg4[%c8, %c0_64, %c0_65] : memref<9x128x128xbf16, #tpu.memory_space<vmem>>, vector<1x128x128xbf16>
    %75 = vector.shape_cast %74 : vector<1x128x128xbf16> to vector<128x128xbf16>
    %cst_66 = arith.constant dense<0.000000e+00> : vector<16x128xf32>
    %76 = tpu.matmul %73, %75, %cst_66 {dimension_numbers = #tpu.dot_dimension_numbers<[1], [0], [0], [1], [0, 0, 1, 1], [], []>} : vector<16x128xbf16>, vector<128x128xbf16>, vector<16x128xf32> -> vector<16x128xf32>
    %77 = arith.addf %69, %76 : vector<16x128xf32>
    %c0_67 = arith.constant 0 : index
    %c0_68 = arith.constant 0 : index
    %78 = vector.load %arg5[%c0_67, %c0_68] : memref<1x128xf32, #tpu.memory_space<vmem>>, vector<1x128xf32>
    %79 = vector.broadcast %78 : vector<1x128xf32> to vector<16x128xf32>
    %80 = arith.addf %77, %79 : vector<16x128xf32>
    %c0_69 = arith.constant 0 : index
    %c0_70 = arith.constant 0 : index
    %81 = vector.load %arg7[%c0_69, %c0_70] : memref<16x64xbf16, #tpu.memory_space<vmem>>, vector<16x64xbf16>
    %c0_71 = arith.constant 0 : index
    %c0_72 = arith.constant 0 : index
    %82 = vector.load %arg8[%c0_71, %c0_72] : memref<64x128xbf16, #tpu.memory_space<vmem>>, vector<64x128xbf16>
    %cst_73 = arith.constant dense<0.000000e+00> : vector<16x128xf32>
    %83 = tpu.matmul %81, %82, %cst_73 {dimension_numbers = #tpu.dot_dimension_numbers<[1], [0], [0], [1], [0, 0, 1, 1], [], []>} : vector<16x64xbf16>, vector<64x128xbf16>, vector<16x128xf32> -> vector<16x128xf32>
    %c0_74 = arith.constant 0 : index
    %c0_75 = arith.constant 0 : index
    %84 = vector.load %arg9[%c0_74, %c0_75] : memref<1x128xf32, #tpu.memory_space<vmem>>, vector<1x128xf32>
    %85 = vector.broadcast %84 : vector<1x128xf32> to vector<16x128xf32>
    %86 = arith.addf %83, %85 : vector<16x128xf32>
    %87 = arith.addf %80, %86 : vector<16x128xf32>
    %cst_76 = arith.constant 0.000000e+00 : f32
    %88 = vector.broadcast %cst_76 : f32 to vector<16x128xf32>
    %89 = arith.maximumf %87, %88 : vector<16x128xf32>
    %90 = arith.truncf %89 : vector<16x128xf32> to vector<16x128xbf16>
    %c0_77 = arith.constant 0 : index
    %c0_78 = arith.constant 0 : index
    %91 = vector.load %arg10[%c0_77, %c0_78] : memref<16x128xbf16, #tpu.memory_space<vmem>>, vector<16x128xbf16>
    tpu.vector_store %arg10[%c0_77, %c0_78], %90 {strides = array<i32>} : memref<16x128xbf16, #tpu.memory_space<vmem>>, vector<16x128xbf16>,
    return
  }
  func.func @transform_0(%arg0: i32) -> (i32, i32) {
    %c0_i32 = arith.constant 0 : i32
    %c0_i32_0 = arith.constant 0 : i32
    %c0_i32_1 = arith.constant 0 : i32
    return %c0_i32, %c0_i32_0 : i32, i32
  }
  func.func @transform_1(%arg0: i32) -> (i32, i32) {
    %c0_i32 = arith.constant 0 : i32
    %c0_i32_0 = arith.constant 0 : i32
    %c0_i32_1 = arith.constant 0 : i32
    return %c0_i32, %c0_i32_0 : i32, i32
  }
  func.func @transform_2(%arg0: i32) -> (i32, i32) {
    %c0_i32 = arith.constant 0 : i32
    %c0_i32_0 = arith.constant 0 : i32
    %c0_i32_1 = arith.constant 0 : i32
    return %c0_i32, %c0_i32_0 : i32, i32
  }
  func.func @transform_3(%arg0: i32) -> (i32, i32, i32) {
    %c0_i32 = arith.constant 0 : i32
    %c0_i32_0 = arith.constant 0 : i32
    %c0_i32_1 = arith.constant 0 : i32
    %c0_i32_2 = arith.constant 0 : i32
    return %c0_i32, %c0_i32_0, %c0_i32_1 : i32, i32, i32
  }
  func.func @transform_4(%arg0: i32) -> (i32, i32) {
    %c0_i32 = arith.constant 0 : i32
    %c0_i32_0 = arith.constant 0 : i32
    %c0_i32_1 = arith.constant 0 : i32
    return %c0_i32, %c0_i32_0 : i32, i32
  }
  func.func @transform_5(%arg0: i32) -> (i32, i32, i32) {
    %c0_i32 = arith.constant 0 : i32
    %c0_i32_0 = arith.constant 0 : i32
    %c0_i32_1 = arith.constant 0 : i32
    %c0_i32_2 = arith.constant 0 : i32
    return %c0_i32, %c0_i32_0, %c0_i32_1 : i32, i32, i32
  }
  func.func @transform_6(%arg0: i32) -> (i32, i32) {
    %c0_i32 = arith.constant 0 : i32
    %c0_i32_0 = arith.constant 0 : i32
    %c0_i32_1 = arith.constant 0 : i32
    return %c0_i32, %c0_i32_0 : i32, i32
  }
  func.func @transform_7(%arg0: i32) -> (i32, i32) {
    %c0_i32 = arith.constant 0 : i32
    %c0_i32_0 = arith.constant 0 : i32
    %c0_i32_1 = arith.constant 0 : i32
    return %c0_i32, %c0_i32_0 : i32, i32
  }
  func.func @transform_8(%arg0: i32) -> (i32, i32) {
    %c0_i32 = arith.constant 0 : i32
    %c0_i32_0 = arith.constant 0 : i32
    %c0_i32_1 = arith.constant 0 : i32
    return %c0_i32, %c0_i32_0 : i32, i32
  }
  func.func @transform_9(%arg0: i32) -> (i32, i32) {
    %c0_i32 = arith.constant 0 : i32
    %c0_i32_0 = arith.constant 0 : i32
    %c0_i32_1 = arith.constant 0 : i32
    return %c0_i32, %c0_i32_0 : i32, i32
  }
}

module attributes {stable_mosaic.version = 11 : i64} {
  func.func @kernel(%arg0: i32, %arg1: memref<8x1152xbf16, #tpu.memory_space<vmem>>, %arg2: memref<1152x256xbf16, #tpu.memory_space<vmem>>, %arg3: memref<1x256xf32, #tpu.memory_space<vmem>>, %arg4: memref<1x256x256xbf16, #tpu.memory_space<vmem>>, %arg5: memref<1x256xf32, #tpu.memory_space<vmem>>, %arg6: memref<8x128xbf16, #tpu.memory_space<vmem>>, %arg7: memref<128x256xbf16, #tpu.memory_space<vmem>>, %arg8: memref<1x256xf32, #tpu.memory_space<vmem>>, %arg9: memref<8x256xbf16, #tpu.memory_space<vmem>>) attributes {dimension_semantics = [#tpu.dimension_semantics<arbitrary>], iteration_bounds = array<i64: 1>, scalar_prefetch = 0 : i64, scratch_operands = 0 : i64, tpu.core_type = #tpu.core_type<tc>, window_params = [{pipeline_mode = #tpu.pipeline_mode<synchronous>, transform_indices = @transform_0, window_bounds = array<i64: 8, 1152>}, {pipeline_mode = #tpu.pipeline_mode<synchronous>, transform_indices = @transform_1, window_bounds = array<i64: 1152, 256>}, {pipeline_mode = #tpu.pipeline_mode<synchronous>, transform_indices = @transform_2, window_bounds = array<i64: 1, 256>}, {pipeline_mode = #tpu.pipeline_mode<synchronous>, transform_indices = @transform_3, window_bounds = array<i64: 1, 256, 256>}, {pipeline_mode = #tpu.pipeline_mode<synchronous>, transform_indices = @transform_4, window_bounds = array<i64: 1, 256>}, {pipeline_mode = #tpu.pipeline_mode<synchronous>, transform_indices = @transform_5, window_bounds = array<i64: 8, 128>}, {pipeline_mode = #tpu.pipeline_mode<synchronous>, transform_indices = @transform_6, window_bounds = array<i64: 128, 256>}, {pipeline_mode = #tpu.pipeline_mode<synchronous>, transform_indices = @transform_7, window_bounds = array<i64: 1, 256>}, {pipeline_mode = #tpu.pipeline_mode<synchronous>, transform_indices = @transform_8, window_bounds = array<i64: 8, 256>}]} {
    %c0 = arith.constant 0 : index
    %c0_0 = arith.constant 0 : index
    %0 = vector.load %arg1[%c0, %c0_0] : memref<8x1152xbf16, #tpu.memory_space<vmem>>, vector<8x1152xbf16>
    %c0_1 = arith.constant 0 : index
    %c0_2 = arith.constant 0 : index
    %1 = vector.load %arg2[%c0_1, %c0_2] : memref<1152x256xbf16, #tpu.memory_space<vmem>>, vector<1152x256xbf16>
    %cst = arith.constant dense<0.000000e+00> : vector<8x256xf32>
    %2 = tpu.matmul %0, %1, %cst {dimension_numbers = #tpu.dot_dimension_numbers<[1], [0], [0], [1], [0, 0, 1, 1], [], []>} : vector<8x1152xbf16>, vector<1152x256xbf16>, vector<8x256xf32> -> vector<8x256xf32>
    %c0_3 = arith.constant 0 : index
    %c0_4 = arith.constant 0 : index
    %3 = vector.load %arg3[%c0_3, %c0_4] : memref<1x256xf32, #tpu.memory_space<vmem>>, vector<1x256xf32>
    %4 = vector.broadcast %3 : vector<1x256xf32> to vector<8x256xf32>
    %5 = arith.addf %2, %4 : vector<8x256xf32>
    %cst_5 = arith.constant 0.000000e+00 : f32
    %6 = vector.broadcast %cst_5 : f32 to vector<8x256xf32>
    %7 = arith.maximumf %5, %6 : vector<8x256xf32>
    %8 = arith.truncf %7 : vector<8x256xf32> to vector<8x256xbf16>
    %cst_6 = arith.constant 0.000000e+00 : f32
    %9 = vector.broadcast %cst_6 : f32 to vector<8x256xf32>
    %c0_7 = arith.constant 0 : index
    %c0_8 = arith.constant 0 : index
    %c0_9 = arith.constant 0 : index
    %10 = vector.load %arg4[%c0_7, %c0_8, %c0_9] : memref<1x256x256xbf16, #tpu.memory_space<vmem>>, vector<1x256x256xbf16>
    %11 = vector.shape_cast %10 : vector<1x256x256xbf16> to vector<256x256xbf16>
    %cst_10 = arith.constant dense<0.000000e+00> : vector<8x256xf32>
    %12 = tpu.matmul %8, %11, %cst_10 {dimension_numbers = #tpu.dot_dimension_numbers<[1], [0], [0], [1], [0, 0, 1, 1], [], []>} : vector<8x256xbf16>, vector<256x256xbf16>, vector<8x256xf32> -> vector<8x256xf32>
    %13 = arith.addf %9, %12 : vector<8x256xf32>
    %c0_11 = arith.constant 0 : index
    %c0_12 = arith.constant 0 : index
    %14 = vector.load %arg5[%c0_11, %c0_12] : memref<1x256xf32, #tpu.memory_space<vmem>>, vector<1x256xf32>
    %15 = vector.broadcast %14 : vector<1x256xf32> to vector<8x256xf32>
    %16 = arith.addf %13, %15 : vector<8x256xf32>
    %c0_13 = arith.constant 0 : index
    %c0_14 = arith.constant 0 : index
    %17 = vector.load %arg6[%c0_13, %c0_14] : memref<8x128xbf16, #tpu.memory_space<vmem>>, vector<8x128xbf16>
    %c0_15 = arith.constant 0 : index
    %c0_16 = arith.constant 0 : index
    %18 = vector.load %arg7[%c0_15, %c0_16] : memref<128x256xbf16, #tpu.memory_space<vmem>>, vector<128x256xbf16>
    %cst_17 = arith.constant dense<0.000000e+00> : vector<8x256xf32>
    %19 = tpu.matmul %17, %18, %cst_17 {dimension_numbers = #tpu.dot_dimension_numbers<[1], [0], [0], [1], [0, 0, 1, 1], [], []>} : vector<8x128xbf16>, vector<128x256xbf16>, vector<8x256xf32> -> vector<8x256xf32>
    %c0_18 = arith.constant 0 : index
    %c0_19 = arith.constant 0 : index
    %20 = vector.load %arg8[%c0_18, %c0_19] : memref<1x256xf32, #tpu.memory_space<vmem>>, vector<1x256xf32>
    %21 = vector.broadcast %20 : vector<1x256xf32> to vector<8x256xf32>
    %22 = arith.addf %19, %21 : vector<8x256xf32>
    %23 = arith.addf %16, %22 : vector<8x256xf32>
    %cst_20 = arith.constant 0.000000e+00 : f32
    %24 = vector.broadcast %cst_20 : f32 to vector<8x256xf32>
    %25 = arith.maximumf %23, %24 : vector<8x256xf32>
    %26 = arith.truncf %25 : vector<8x256xf32> to vector<8x256xbf16>
    %c0_21 = arith.constant 0 : index
    %c0_22 = arith.constant 0 : index
    %27 = vector.load %arg9[%c0_21, %c0_22] : memref<8x256xbf16, #tpu.memory_space<vmem>>, vector<8x256xbf16>
    tpu.vector_store %arg9[%c0_21, %c0_22], %26 {strides = array<i32>} : memref<8x256xbf16, #tpu.memory_space<vmem>>, vector<8x256xbf16>,
    return
  }
  func.func @transform_0(%arg0: i32) -> (i32, i32) {
    %c0_i32 = arith.constant 0 : i32
    %c0_i32_0 = arith.constant 0 : i32
    %c0_i32_1 = arith.constant 0 : i32
    return %c0_i32, %c0_i32_0 : i32, i32
  }
  func.func @transform_1(%arg0: i32) -> (i32, i32) {
    %c0_i32 = arith.constant 0 : i32
    %c0_i32_0 = arith.constant 0 : i32
    %c0_i32_1 = arith.constant 0 : i32
    return %c0_i32, %c0_i32_0 : i32, i32
  }
  func.func @transform_2(%arg0: i32) -> (i32, i32) {
    %c0_i32 = arith.constant 0 : i32
    %c0_i32_0 = arith.constant 0 : i32
    %c0_i32_1 = arith.constant 0 : i32
    return %c0_i32, %c0_i32_0 : i32, i32
  }
  func.func @transform_3(%arg0: i32) -> (i32, i32, i32) {
    %c0_i32 = arith.constant 0 : i32
    %c0_i32_0 = arith.constant 0 : i32
    %c0_i32_1 = arith.constant 0 : i32
    %c0_i32_2 = arith.constant 0 : i32
    return %c0_i32, %c0_i32_0, %c0_i32_1 : i32, i32, i32
  }
  func.func @transform_4(%arg0: i32) -> (i32, i32) {
    %c0_i32 = arith.constant 0 : i32
    %c0_i32_0 = arith.constant 0 : i32
    %c0_i32_1 = arith.constant 0 : i32
    return %c0_i32, %c0_i32_0 : i32, i32
  }
  func.func @transform_5(%arg0: i32) -> (i32, i32) {
    %c0_i32 = arith.constant 0 : i32
    %c0_i32_0 = arith.constant 0 : i32
    %c0_i32_1 = arith.constant 0 : i32
    return %c0_i32, %c0_i32_0 : i32, i32
  }
  func.func @transform_6(%arg0: i32) -> (i32, i32) {
    %c0_i32 = arith.constant 0 : i32
    %c0_i32_0 = arith.constant 0 : i32
    %c0_i32_1 = arith.constant 0 : i32
    return %c0_i32, %c0_i32_0 : i32, i32
  }
  func.func @transform_7(%arg0: i32) -> (i32, i32) {
    %c0_i32 = arith.constant 0 : i32
    %c0_i32_0 = arith.constant 0 : i32
    %c0_i32_1 = arith.constant 0 : i32
    return %c0_i32, %c0_i32_0 : i32, i32
  }
  func.func @transform_8(%arg0: i32) -> (i32, i32) {
    %c0_i32 = arith.constant 0 : i32
    %c0_i32_0 = arith.constant 0 : i32
    %c0_i32_1 = arith.constant 0 : i32
    return %c0_i32, %c0_i32_0 : i32, i32
  }
}

module attributes {stable_mosaic.version = 11 : i64} {
  func.func @kernel(%arg0: i32, %arg1: memref<8x2304xbf16, #tpu.memory_space<vmem>>, %arg2: memref<2304x512xbf16, #tpu.memory_space<vmem>>, %arg3: memref<1x512xf32, #tpu.memory_space<vmem>>, %arg4: memref<1x512x512xbf16, #tpu.memory_space<vmem>>, %arg5: memref<1x512xf32, #tpu.memory_space<vmem>>, %arg6: memref<8x256xbf16, #tpu.memory_space<vmem>>, %arg7: memref<256x512xbf16, #tpu.memory_space<vmem>>, %arg8: memref<1x512xf32, #tpu.memory_space<vmem>>, %arg9: memref<8x512xbf16, #tpu.memory_space<vmem>>) attributes {dimension_semantics = [#tpu.dimension_semantics<arbitrary>], iteration_bounds = array<i64: 1>, scalar_prefetch = 0 : i64, scratch_operands = 0 : i64, tpu.core_type = #tpu.core_type<tc>, window_params = [{pipeline_mode = #tpu.pipeline_mode<synchronous>, transform_indices = @transform_0, window_bounds = array<i64: 8, 2304>}, {pipeline_mode = #tpu.pipeline_mode<synchronous>, transform_indices = @transform_1, window_bounds = array<i64: 2304, 512>}, {pipeline_mode = #tpu.pipeline_mode<synchronous>, transform_indices = @transform_2, window_bounds = array<i64: 1, 512>}, {pipeline_mode = #tpu.pipeline_mode<synchronous>, transform_indices = @transform_3, window_bounds = array<i64: 1, 512, 512>}, {pipeline_mode = #tpu.pipeline_mode<synchronous>, transform_indices = @transform_4, window_bounds = array<i64: 1, 512>}, {pipeline_mode = #tpu.pipeline_mode<synchronous>, transform_indices = @transform_5, window_bounds = array<i64: 8, 256>}, {pipeline_mode = #tpu.pipeline_mode<synchronous>, transform_indices = @transform_6, window_bounds = array<i64: 256, 512>}, {pipeline_mode = #tpu.pipeline_mode<synchronous>, transform_indices = @transform_7, window_bounds = array<i64: 1, 512>}, {pipeline_mode = #tpu.pipeline_mode<synchronous>, transform_indices = @transform_8, window_bounds = array<i64: 8, 512>}]} {
    %c0 = arith.constant 0 : index
    %c0_0 = arith.constant 0 : index
    %0 = vector.load %arg1[%c0, %c0_0] : memref<8x2304xbf16, #tpu.memory_space<vmem>>, vector<8x2304xbf16>
    %c0_1 = arith.constant 0 : index
    %c0_2 = arith.constant 0 : index
    %1 = vector.load %arg2[%c0_1, %c0_2] : memref<2304x512xbf16, #tpu.memory_space<vmem>>, vector<2304x512xbf16>
    %cst = arith.constant dense<0.000000e+00> : vector<8x512xf32>
    %2 = tpu.matmul %0, %1, %cst {dimension_numbers = #tpu.dot_dimension_numbers<[1], [0], [0], [1], [0, 0, 1, 1], [], []>} : vector<8x2304xbf16>, vector<2304x512xbf16>, vector<8x512xf32> -> vector<8x512xf32>
    %c0_3 = arith.constant 0 : index
    %c0_4 = arith.constant 0 : index
    %3 = vector.load %arg3[%c0_3, %c0_4] : memref<1x512xf32, #tpu.memory_space<vmem>>, vector<1x512xf32>
    %4 = vector.broadcast %3 : vector<1x512xf32> to vector<8x512xf32>
    %5 = arith.addf %2, %4 : vector<8x512xf32>
    %cst_5 = arith.constant 0.000000e+00 : f32
    %6 = vector.broadcast %cst_5 : f32 to vector<8x512xf32>
    %7 = arith.maximumf %5, %6 : vector<8x512xf32>
    %8 = arith.truncf %7 : vector<8x512xf32> to vector<8x512xbf16>
    %cst_6 = arith.constant 0.000000e+00 : f32
    %9 = vector.broadcast %cst_6 : f32 to vector<8x512xf32>
    %c0_7 = arith.constant 0 : index
    %c0_8 = arith.constant 0 : index
    %c0_9 = arith.constant 0 : index
    %10 = vector.load %arg4[%c0_7, %c0_8, %c0_9] : memref<1x512x512xbf16, #tpu.memory_space<vmem>>, vector<1x512x512xbf16>
    %11 = vector.shape_cast %10 : vector<1x512x512xbf16> to vector<512x512xbf16>
    %cst_10 = arith.constant dense<0.000000e+00> : vector<8x512xf32>
    %12 = tpu.matmul %8, %11, %cst_10 {dimension_numbers = #tpu.dot_dimension_numbers<[1], [0], [0], [1], [0, 0, 1, 1], [], []>} : vector<8x512xbf16>, vector<512x512xbf16>, vector<8x512xf32> -> vector<8x512xf32>
    %13 = arith.addf %9, %12 : vector<8x512xf32>
    %c0_11 = arith.constant 0 : index
    %c0_12 = arith.constant 0 : index
    %14 = vector.load %arg5[%c0_11, %c0_12] : memref<1x512xf32, #tpu.memory_space<vmem>>, vector<1x512xf32>
    %15 = vector.broadcast %14 : vector<1x512xf32> to vector<8x512xf32>
    %16 = arith.addf %13, %15 : vector<8x512xf32>
    %c0_13 = arith.constant 0 : index
    %c0_14 = arith.constant 0 : index
    %17 = vector.load %arg6[%c0_13, %c0_14] : memref<8x256xbf16, #tpu.memory_space<vmem>>, vector<8x256xbf16>
    %c0_15 = arith.constant 0 : index
    %c0_16 = arith.constant 0 : index
    %18 = vector.load %arg7[%c0_15, %c0_16] : memref<256x512xbf16, #tpu.memory_space<vmem>>, vector<256x512xbf16>
    %cst_17 = arith.constant dense<0.000000e+00> : vector<8x512xf32>
    %19 = tpu.matmul %17, %18, %cst_17 {dimension_numbers = #tpu.dot_dimension_numbers<[1], [0], [0], [1], [0, 0, 1, 1], [], []>} : vector<8x256xbf16>, vector<256x512xbf16>, vector<8x512xf32> -> vector<8x512xf32>
    %c0_18 = arith.constant 0 : index
    %c0_19 = arith.constant 0 : index
    %20 = vector.load %arg8[%c0_18, %c0_19] : memref<1x512xf32, #tpu.memory_space<vmem>>, vector<1x512xf32>
    %21 = vector.broadcast %20 : vector<1x512xf32> to vector<8x512xf32>
    %22 = arith.addf %19, %21 : vector<8x512xf32>
    %23 = arith.addf %16, %22 : vector<8x512xf32>
    %cst_20 = arith.constant 0.000000e+00 : f32
    %24 = vector.broadcast %cst_20 : f32 to vector<8x512xf32>
    %25 = arith.maximumf %23, %24 : vector<8x512xf32>
    %26 = arith.truncf %25 : vector<8x512xf32> to vector<8x512xbf16>
    %c0_21 = arith.constant 0 : index
    %c0_22 = arith.constant 0 : index
    %27 = vector.load %arg9[%c0_21, %c0_22] : memref<8x512xbf16, #tpu.memory_space<vmem>>, vector<8x512xbf16>
    tpu.vector_store %arg9[%c0_21, %c0_22], %26 {strides = array<i32>} : memref<8x512xbf16, #tpu.memory_space<vmem>>, vector<8x512xbf16>,
    return
  }
  func.func @transform_0(%arg0: i32) -> (i32, i32) {
    %c0_i32 = arith.constant 0 : i32
    %c0_i32_0 = arith.constant 0 : i32
    %c0_i32_1 = arith.constant 0 : i32
    return %c0_i32, %c0_i32_0 : i32, i32
  }
  func.func @transform_1(%arg0: i32) -> (i32, i32) {
    %c0_i32 = arith.constant 0 : i32
    %c0_i32_0 = arith.constant 0 : i32
    %c0_i32_1 = arith.constant 0 : i32
    return %c0_i32, %c0_i32_0 : i32, i32
  }
  func.func @transform_2(%arg0: i32) -> (i32, i32) {
    %c0_i32 = arith.constant 0 : i32
    %c0_i32_0 = arith.constant 0 : i32
    %c0_i32_1 = arith.constant 0 : i32
    return %c0_i32, %c0_i32_0 : i32, i32
  }
  func.func @transform_3(%arg0: i32) -> (i32, i32, i32) {
    %c0_i32 = arith.constant 0 : i32
    %c0_i32_0 = arith.constant 0 : i32
    %c0_i32_1 = arith.constant 0 : i32
    %c0_i32_2 = arith.constant 0 : i32
    return %c0_i32, %c0_i32_0, %c0_i32_1 : i32, i32, i32
  }
  func.func @transform_4(%arg0: i32) -> (i32, i32) {
    %c0_i32 = arith.constant 0 : i32
    %c0_i32_0 = arith.constant 0 : i32
    %c0_i32_1 = arith.constant 0 : i32
    return %c0_i32, %c0_i32_0 : i32, i32
  }
  func.func @transform_5(%arg0: i32) -> (i32, i32) {
    %c0_i32 = arith.constant 0 : i32
    %c0_i32_0 = arith.constant 0 : i32
    %c0_i32_1 = arith.constant 0 : i32
    return %c0_i32, %c0_i32_0 : i32, i32
  }
  func.func @transform_6(%arg0: i32) -> (i32, i32) {
    %c0_i32 = arith.constant 0 : i32
    %c0_i32_0 = arith.constant 0 : i32
    %c0_i32_1 = arith.constant 0 : i32
    return %c0_i32, %c0_i32_0 : i32, i32
  }
  func.func @transform_7(%arg0: i32) -> (i32, i32) {
    %c0_i32 = arith.constant 0 : i32
    %c0_i32_0 = arith.constant 0 : i32
    %c0_i32_1 = arith.constant 0 : i32
    return %c0_i32, %c0_i32_0 : i32, i32
  }
  func.func @transform_8(%arg0: i32) -> (i32, i32) {
    %c0_i32 = arith.constant 0 : i32
    %c0_i32_0 = arith.constant 0 : i32
    %c0_i32_1 = arith.constant 0 : i32
    return %c0_i32, %c0_i32_0 : i32, i32
  }
}

module attributes {stable_mosaic.version = 11 : i64} {
  func.func @kernel(%arg0: i32, %arg1: memref<4x1x512xbf16, #tpu.memory_space<vmem>>, %arg2: memref<512x128xbf16, #tpu.memory_space<vmem>>, %arg3: memref<1x128xf32, #tpu.memory_space<vmem>>, %arg4: memref<4x128xf32, #tpu.memory_space<vmem>>) attributes {dimension_semantics = [#tpu.dimension_semantics<arbitrary>], iteration_bounds = array<i64: 1>, scalar_prefetch = 0 : i64, scratch_operands = 0 : i64, tpu.core_type = #tpu.core_type<tc>, window_params = [{pipeline_mode = #tpu.pipeline_mode<synchronous>, transform_indices = @transform_0, window_bounds = array<i64: 4, 1, 512>}, {pipeline_mode = #tpu.pipeline_mode<synchronous>, transform_indices = @transform_1, window_bounds = array<i64: 512, 128>}, {pipeline_mode = #tpu.pipeline_mode<synchronous>, transform_indices = @transform_2, window_bounds = array<i64: 1, 128>}, {pipeline_mode = #tpu.pipeline_mode<synchronous>, transform_indices = @transform_3, window_bounds = array<i64: 4, 128>}]} {
    %c0 = arith.constant 0 : index
    %c0_0 = arith.constant 0 : index
    %c0_1 = arith.constant 0 : index
    %0 = vector.load %arg1[%c0, %c0_0, %c0_1] : memref<4x1x512xbf16, #tpu.memory_space<vmem>>, vector<4x1x512xbf16>
    %1 = arith.extf %0 : vector<4x1x512xbf16> to vector<4x1x512xf32>
    %cst = arith.constant dense<0.000000e+00> : vector<4x512xf32>
    %2 = vector.multi_reduction <add>, %1, %cst [1] : vector<4x1x512xf32> to vector<4x512xf32>
    %cst_2 = arith.constant 1.000000e+00 : f32
    %3 = vector.broadcast %cst_2 : f32 to vector<4x512xf32>
    %4 = arith.divf %2, %3 : vector<4x512xf32>
    %5 = arith.truncf %4 : vector<4x512xf32> to vector<4x512xbf16>
    %c0_3 = arith.constant 0 : index
    %c0_4 = arith.constant 0 : index
    %6 = vector.load %arg2[%c0_3, %c0_4] : memref<512x128xbf16, #tpu.memory_space<vmem>>, vector<512x128xbf16>
    %cst_5 = arith.constant dense<0.000000e+00> : vector<4x128xf32>
    %7 = tpu.matmul %5, %6, %cst_5 {dimension_numbers = #tpu.dot_dimension_numbers<[1], [0], [0], [1], [0, 0, 1, 1], [], []>} : vector<4x512xbf16>, vector<512x128xbf16>, vector<4x128xf32> -> vector<4x128xf32>
    %c0_6 = arith.constant 0 : index
    %c0_7 = arith.constant 0 : index
    %8 = vector.load %arg3[%c0_6, %c0_7] : memref<1x128xf32, #tpu.memory_space<vmem>>, vector<1x128xf32>
    %9 = vector.broadcast %8 : vector<1x128xf32> to vector<4x128xf32>
    %10 = arith.addf %7, %9 : vector<4x128xf32>
    %c0_8 = arith.constant 0 : index
    %c0_9 = arith.constant 0 : index
    %11 = vector.load %arg4[%c0_8, %c0_9] : memref<4x128xf32, #tpu.memory_space<vmem>>, vector<4x128xf32>
    tpu.vector_store %arg4[%c0_8, %c0_9], %10 {strides = array<i32>} : memref<4x128xf32, #tpu.memory_space<vmem>>, vector<4x128xf32>,
    return
  }
  func.func @transform_0(%arg0: i32) -> (i32, i32, i32) {
    %c0_i32 = arith.constant 0 : i32
    %c0_i32_0 = arith.constant 0 : i32
    %c0_i32_1 = arith.constant 0 : i32
    %c0_i32_2 = arith.constant 0 : i32
    return %c0_i32, %c0_i32_0, %c0_i32_1 : i32, i32, i32
  }
  func.func @transform_1(%arg0: i32) -> (i32, i32) {
    %c0_i32 = arith.constant 0 : i32
    %c0_i32_0 = arith.constant 0 : i32
    %c0_i32_1 = arith.constant 0 : i32
    return %c0_i32, %c0_i32_0 : i32, i32
  }
  func.func @transform_2(%arg0: i32) -> (i32, i32) {
    %c0_i32 = arith.constant 0 : i32
    %c0_i32_0 = arith.constant 0 : i32
    %c0_i32_1 = arith.constant 0 : i32
    return %c0_i32, %c0_i32_0 : i32, i32
  }
  func.func @transform_3(%arg0: i32) -> (i32, i32) {
    %c0_i32 = arith.constant 0 : i32
    %c0_i32_0 = arith.constant 0 : i32
    %c0_i32_1 = arith.constant 0 : i32
    return %c0_i32, %c0_i32_0 : i32, i32
  }
}

</mosaic_0001>

<bundles_post_ra>
// kernel: _lambda_.8
= control target key start
LH: loop header
LB: loop body
LE: loop exit
PB: predicated region body
PF: predicated region fallthrough
CT: control target
= control target key end

     0   :  { %s2010_s12 = smov 0   ;;  %s2012_s13 = smov 0   ;;  %s2267_s0 = inlined_call_operand.vmem [shape: bf16[1024,363], index: 0, kind: input, shape index: {}]   ;;  %s2268_s1 = inlined_call_operand.vmem [shape: bf16[363,128], index: 1, kind: input, shape index: {}]   ;;  %s2269_s2 = inlined_call_operand.vmem [shape: f32[1,128], index: 2, kind: input, shape index: {}]   ;;  %s2270_s3 = inlined_call_operand.vmem [shape: bf16[1024,128], index: 3, kind: output, shape index: {}]  }
   0x1   :  { %s2014_s14 = smov 0  }
   0x2 LB: > { %s25_s15 = sadd.s32 1, %s1983_s13  ;;  %p1401_p0 = scmp.ge.s32.totalorder %s1987_s14, 1  ;;  %s1987_s14 = sphi %s2014_s14, %s13_s14   ;;  %s1983_s13 = sphi %s2012_s13, %s2272_s13   ;;  %s1979_s12 = sphi %s2010_s12, %s2271_s12  }
   0x3   : > { %p27_p1 = scmp.ge.s32.totalorder %s25_s15, 4  ;;  %p170_p2 = scmp.lt.s32.totalorder %s1987_s14, 5 }
   0x5   : > { %s2274_s15 = smov (%p27_p1, %s25_s15), 0  ;;  %p171_p3 = pnand %p1401_p0, %p170_p2 }
   0x6   : > { %v1878_v0 = vld [vmem:[%s2268_s1 + $0x40] sm:$0xff] (!%p171_p3)   ;;  %s1402_s18 = sshll.u32 (!%p171_p3), %s1979_s12, 5  ;;  %v1880_v2 = vld [vmem:[%s2268_s1 + $0x48] sm:$0xff] (!%p171_p3)   ;;  %v1882_v4 = vld [vmem:[%s2268_s1 + $0x50] sm:$0xff] (!%p171_p3)   ;;  %vm772_vm0 = vcmask (!%p171_p3), 1044480   ;;  %vm773_vm1 = vcmask (!%p171_p3), 1045504  }
   0x7   : > { %174 = sbr.rel (%p171_p3) target bundleno = 353 (0x161), region = 32  ;;  %v1879_v1 = vld [vmem:[%s2268_s1] sm:$0xff] (!%p171_p3)   ;;  %1655 = vmatprep.subr.bf16.mxu0 (!%p171_p3), %v1878_v0  ;;  %1836 = vmatprep.subr.bf16.mxu1 (!%p171_p3), %v1878_v0  ;;  %p206_p4 = scmp.lt.s32.totalorder (!%p171_p3), %s1402_s18, 127  ;;  %v1881_v3 = vld [vmem:[%s2268_s1 + $0x8] sm:$0xff] (!%p171_p3)   ;;  %v1883_v5 = vld [vmem:[%s2268_s1 + $0x10] sm:$0xff] (!%p171_p3)   ;;  %v1989_v32 = vmov (!%p171_p3), 65535  }
   0x8   : > { %1656 = vmatpush3.bf16.msra.mxu0 (!%p171_p3), %v1879_v1  ;;  %1844 = vmatpush3.bf16.msra.mxu1 (!%p171_p3), %v1879_v1  ;;  %v1884_v6 = vld [vmem:[%s2268_s1 + $0x58] sm:$0xff] (!%p171_p3)   ;;  %v1886_v8 = vld [vmem:[%s2268_s1 + $0x60] sm:$0xff] (!%p171_p3)   ;;  %v1888_v10 = vld [vmem:[%s2268_s1 + $0x68] sm:$0xff] (!%p171_p3)   ;;  %v774_v33 = vsel (!%p171_p3), %vm772_vm0, 4294967295, %v1989_v32  ;;  %vm723_vm2 = vcmask (!%p171_p3), 875520  }
   0x9   : > { %1657 = vmatprep.subr.bf16.mxu0 (!%p171_p3), %v1880_v2  ;;  %1837 = vmatprep.subr.bf16.mxu1 (!%p171_p3), %v1880_v2  ;;  %v1885_v7 = vld [vmem:[%s2268_s1 + $0x18] sm:$0xff] (!%p171_p3)   ;;  %v1887_v9 = vld [vmem:[%s2268_s1 + $0x20] sm:$0xff] (!%p171_p3)   ;;  %v1889_v13 = vld [vmem:[%s2268_s1 + $0x28] sm:$0xff] (!%p171_p3)   ;;  %v775_v39 = vsel (!%p171_p3), %vm773_vm1, %v774_v33, 0 }
   0xa   : > { %v1890_v14 = vld [vmem:[%s2268_s1 + $0x70] sm:$0xff] (!%p171_p3)   ;;  %v1892_v16 = vld [vmem:[%s2268_s1 + $0x78] sm:$0xff] (!%p171_p3)   ;;  %v1900_v18 = vld [vmem:[%s2268_s1 + $0x80] sm:$0xff] (!%p171_p3)  }
   0xb   : > { %v1891_v15 = vld [vmem:[%s2268_s1 + $0x30] sm:$0xff] (!%p171_p3)   ;;  %v1893_v17 = vld [vmem:[%s2268_s1 + $0x38] sm:$0xff] (!%p171_p3)   ;;  %v1907_v23 = vld [vmem:[%s2268_s1 + $0x88] sm:$0xff] (!%p171_p3)  }
   0xc   : > { %1658 = vmatpush3.bf16.msra.mxu0 (!%p171_p3), %v1881_v3  ;;  %1845 = vmatpush3.bf16.msra.mxu1 (!%p171_p3), %v1881_v3  ;;  %v1908_v25 = vld [vmem:[%s2268_s1 + $0x90] sm:$0xff] (!%p171_p3)   ;;  %v1915_v29 = vld [vmem:[%s2268_s1 + $0x98] sm:$0xff] (!%p171_p3)   ;;  %v1916_v31 = vld [vmem:[%s2268_s1 + $0xa0] sm:$0xff] (!%p171_p3)  }
   0xd   : > { %1659 = vmatprep.subr.bf16.mxu0 (!%p171_p3), %v1882_v4  ;;  %1838 = vmatprep.subr.bf16.mxu1 (!%p171_p3), %v1882_v4  ;;  %v1923_v37 = vld [vmem:[%s2268_s1 + $0xa8] sm:$0xff] (!%p171_p3)   ;;  %v1924_v38 = vld [vmem:[%s2268_s1 + $0xb0] sm:$0x3f] (!%p171_p3)  }
   0xe   : > { %s2276_s18 = smov (!%p206_p4, %s1402_s18), 127  ;;  %v777_v40 = vand.u32 %v1924_v38, %v775_v39 }
   0xf   : > { %s1852_s4 = smul.u32 12, %s2276_s18  ;;  %s1405_s23 = sshll.u32 %s2276_s18, 2 }
  0x10   : > { %1660 = vmatpush3.bf16.msra.mxu0 %v1883_v5  ;;  %1846 = vmatpush3.bf16.msra.mxu1 %v1883_v5  ;;  %s2198_s26 = scalar_lea.vmem %s2270_s3, %s1405_s23 }
  0x11   : > { %1661 = vmatprep.subr.bf16.mxu0 %v1884_v6  ;;  %1839 = vmatprep.subr.bf16.mxu1 %v1884_v6  ;;  %s2061_s11 = scalar_lea.vmem %s2267_s0, %s1852_s4 }
  0x12   : > { %v1896_v11 = vld [vmem:[%s2061_s11 + $0x4] ss:$12 sps:$4 sm:$0xff]   ;;  %v1894_v19 = vld [vmem:[%s2061_s11] ss:$12 sps:$4 sm:$0xff]   ;;  %v1901_v21 = vld [vmem:[%s2061_s11 + $0x1c] ss:$12 sps:$4 sm:$0xff]  }
  0x13   : > { %v1899_v12 = vld [vmem:[%s2061_s11 + $0x124] ss:$12 sps:$4 sm:$0xff]   ;;  %811 = vmatprep.mubr.bf16.mxu0 %v1896_v11  ;;  %v1897_v20 = vld [vmem:[%s2061_s11 + $0x120] ss:$12 sps:$4 sm:$0xff]   ;;  %v1903_v22 = vld [vmem:[%s2061_s11 + $0x13c] ss:$12 sps:$4 sm:$0xff]  }
  0x14   : > { %1662 = vmatpush3.bf16.msra.mxu0 %v1885_v7  ;;  %1847 = vmatpush3.bf16.msra.mxu1 %v1885_v7  ;;  %v1905_v24 = vld [vmem:[%s2061_s11 + $0x18] ss:$12 sps:$4 sm:$0xff]   ;;  %v1909_v27 = vld [vmem:[%s2061_s11 + $0x34] ss:$12 sps:$4 sm:$0xff]   ;;  %v1913_v30 = vld [vmem:[%s2061_s11 + $0x30] ss:$12 sps:$4 sm:$0xff]  }
  0x15   : > { %1663 = vmatprep.subr.bf16.mxu0 %v1886_v8  ;;  %1840 = vmatprep.subr.bf16.mxu1 %v1886_v8  ;;  %v1906_v26 = vld [vmem:[%s2061_s11 + $0x138] ss:$12 sps:$4 sm:$0xff]   ;;  %v1911_v28 = vld [vmem:[%s2061_s11 + $0x154] ss:$12 sps:$4 sm:$0xff]   ;;  %v1914_v34 = vld [vmem:[%s2061_s11 + $0x150] ss:$12 sps:$4 sm:$0xff]  }
  0x16   : > { %907 = vmatprep.mubr.bf16.mxu1 %v1899_v12  ;;  %v1917_v35 = vld [vmem:[%s2061_s11 + $0x4c] ss:$12 sps:$4 sm:$0xff]   ;;  %v1921_v41 = vld [vmem:[%s2061_s11 + $0x48] ss:$12 sps:$4 sm:$0xff]   ;;  %v1925_v43 = vld [vmem:[%s2061_s11 + $0x64] ss:$12 sps:$4 sm:$0xff]  }
  0x17   : > { %v1919_v36 = vld [vmem:[%s2061_s11 + $0x16c] ss:$12 sps:$4 sm:$0xff]   ;;  %v1922_v42 = vld [vmem:[%s2061_s11 + $0x168] ss:$12 sps:$4 sm:$0xff]   ;;  %v1934_v50 = vld [vmem:[%s2061_s11 + $0x50] ss:$12 sps:$4 sm:$0xff]  }
  0x18   : > { %1664 = vmatpush3.bf16.msra.mxu0 %v1887_v9  ;;  %1848 = vmatpush3.bf16.msra.mxu1 %v1887_v9  ;;  %v1927_v44 = vld [vmem:[%s2061_s11 + $0x8] ss:$12 sps:$4 sm:$0xff]   ;;  %v1928_v45 = vld [vmem:[%s2061_s11 + $0x60] ss:$12 sps:$4 sm:$0xff]   ;;  %v1932_v48 = vld [vmem:[%s2061_s11 + $0x38] ss:$12 sps:$4 sm:$0xff]  }
  0x19   : > { %1665 = vmatprep.subr.bf16.mxu0 %v1888_v10  ;;  %1841 = vmatprep.subr.bf16.mxu1 %v1888_v10  ;;  %v1929_v46 = vld [vmem:[%s2061_s11 + $0x20] ss:$12 sps:$4 sm:$0xff]   ;;  %v1930_v47 = vld [vmem:[%s2061_s11 + $0x7c] ss:$12 sps:$4 sm:$0xff]   ;;  %v1933_v49 = vld [vmem:[%s2061_s11 + $0x78] ss:$12 sps:$4 sm:$0xff]  }
  0x1a   : > { %v1935_v51 = vld [vmem:[%s2061_s11 + $0x94] ss:$12 sps:$4 sm:$0xff]   ;;  %v1938_v53 = vld [vmem:[%s2061_s11 + $0x90] ss:$12 sps:$4 sm:$0xff]   ;;  %v1940_v55 = vld [vmem:[%s2061_s11 + $0xac] ss:$12 sps:$4 sm:$0xff]  }
  0x1b   : > { %v1937_v52 = vld [vmem:[%s2061_s11 + $0x68] ss:$12 sps:$4 sm:$0xff]   ;;  %v1939_v54 = vld [vmem:[%s2061_s11 + $0x80] ss:$12 sps:$4 sm:$0xff]   ;;  %v1942_v56 = vld [vmem:[%s2061_s11 + $0x98] ss:$12 sps:$4 sm:$0xff]  }
  0x1c   : > { %1666 = vmatpush3.bf16.msra.mxu0 %v1889_v13  ;;  %1849 = vmatpush3.bf16.msra.mxu1 %v1889_v13  ;;  %v1943_v57 = vld [vmem:[%s2061_s11 + $0xa8] ss:$12 sps:$4 sm:$0xff]   ;;  %v1944_v58 = vld [vmem:[%s2061_s11 + $0xb0] ss:$12 sps:$4 sm:$0xff]   ;;  %v1948_v61 = vld [vmem:[%s2061_s11 + $0xc0] ss:$12 sps:$4 sm:$0xff]  }
  0x1d   : > { %1667 = vmatprep.subr.bf16.mxu0 %v1890_v14  ;;  %1842 = vmatprep.subr.bf16.mxu1 %v1890_v14  ;;  %v1945_v59 = vld [vmem:[%s2061_s11 + $0xc4] ss:$12 sps:$4 sm:$0xff]   ;;  %v1947_v60 = vld [vmem:[%s2061_s11 + $0xc8] ss:$12 sps:$4 sm:$0xff]   ;;  %v1949_v62 = vld [vmem:[%s2061_s11 + $0xe0] ss:$12 sps:$4 sm:$0xff]  }
  0x1e   : > { %v1950_v63 = vld [vmem:[%s2061_s11 + $0xdc] ss:$12 sps:$4 sm:$0xff]   ;;  %v1952_v0 = vld [vmem:[%s2061_s11 + $0xf8] ss:$12 sps:$4 sm:$0xff]   ;;  %v1955_v3 = vld [vmem:[%s2061_s11 + $0xf4] ss:$12 sps:$4 sm:$0xff]  }
  0x1f   : > { %v1953_v1 = vld [vmem:[%s2061_s11 + $0xd8] ss:$12 sps:$4 sm:$0xff]   ;;  %v1954_v2 = vld [vmem:[%s2061_s11 + $0x110] ss:$12 sps:$4 sm:$0xff]   ;;  %v1957_v4 = vld [vmem:[%s2061_s11 + $0x128] ss:$12 sps:$4 sm:$0xff]  }
  0x20   : > { %1668 = vmatpush3.bf16.msra.mxu0 %v1891_v15  ;;  %1850 = vmatpush3.bf16.msra.mxu1 %v1891_v15  ;;  %v1958_v5 = vld [vmem:[%s2061_s11 + $0xf0] ss:$12 sps:$4 sm:$0xff]   ;;  %v1959_v6 = vld [vmem:[%s2061_s11 + $0x140] ss:$12 sps:$4 sm:$0xff]   ;;  %v1962_v8 = vld [vmem:[%s2061_s11 + $0x158] ss:$12 sps:$4 sm:$0xff]  }
  0x21   : > { %1669 = vmatprep.subr.bf16.mxu0 %v1892_v16  ;;  %1843 = vmatprep.subr.bf16.mxu1 %v1892_v16  ;;  %v1960_v7 = vld [vmem:[%s2061_s11 + $0x10c] ss:$12 sps:$4 sm:$0xff]   ;;  %v1963_v9 = vld [vmem:[%s2061_s11 + $0x108] ss:$12 sps:$4 sm:$0xff]   ;;  %v1964_v10 = vld [vmem:[%s2061_s11 + $0x170] ss:$12 sps:$4 sm:$0xff]  }
  0x24   : > { %1670 = vmatpush3.bf16.msra.mxu0 %v1893_v17  ;;  %1851 = vmatpush3.bf16.msra.mxu1 %v1893_v17 }
  0x25   : > { %1790 = vmatprep.subr.bf16.mxu1 %v1900_v18 }
  0x27   : > { %812 = vmatmul.mubr.bf16.vlgmr.msra.gmra.mrb[0].mxu0 %v1894_v19  ;;  %908 = vmatmul.mubr.bf16.vlgmr.msra.gmra.mrb[0].mxu1 %v1897_v20 }
  0x28   : > { %1791 = vmatpush3.bf16.msra.mxu1 %v1900_v18  ;;  %819 = vmatprep.mubr.bf16.mxu0 %v1901_v21 }
  0x29   : > { %915 = vmatprep.mubr.bf16.mxu1 %v1903_v22  ;;  %1792 = vmatprep.subr.bf16.mxu1 %v1907_v23 }
  0x2c   : > { %1793 = vmatpush3.bf16.msra.mxu1 %v1907_v23 }
  0x2d   : > { %1794 = vmatprep.subr.bf16.mxu1 %v1908_v25 }
  0x2f   : > { %820 = vmatmul.mubr.bf16.gmra.mrb[4].mxu0 %v1905_v24  ;;  %916 = vmatmul.mubr.bf16.gmra.mrb[4].mxu1 %v1906_v26 }
  0x30   : > { %1795 = vmatpush3.bf16.msra.mxu1 %v1908_v25  ;;  %827 = vmatprep.mubr.bf16.mxu0 %v1909_v27 }
  0x31   : > { %923 = vmatprep.mubr.bf16.mxu1 %v1911_v28  ;;  %1796 = vmatprep.subr.bf16.mxu1 %v1915_v29 }
  0x34   : > { %1797 = vmatpush3.bf16.msra.mxu1 %v1915_v29 }
  0x35   : > { %1798 = vmatprep.subr.bf16.mxu1 %v1916_v31 }
  0x37   : > { %828 = vmatmul.mubr.bf16.gmra.mrb[8].mxu0 %v1913_v30  ;;  %924 = vmatmul.mubr.bf16.gmra.mrb[8].mxu1 %v1914_v34 }
  0x38   : > { %1799 = vmatpush3.bf16.msra.mxu1 %v1916_v31  ;;  %835 = vmatprep.mubr.bf16.mxu0 %v1917_v35 }
  0x39   : > { %931 = vmatprep.mubr.bf16.mxu1 %v1919_v36  ;;  %1800 = vmatprep.subr.bf16.mxu1 %v1923_v37 }
  0x3c   : > { %1801 = vmatpush3.bf16.msra.mxu1 %v1923_v37 }
  0x3d   : > { %1802 = vmatprep.subr.bf16.mxu1 %v777_v40 }
  0x3f   : > { %836 = vmatmul.mubr.bf16.gmra.mrb[12].mxu0 %v1921_v41  ;;  %932 = vmatmul.mubr.bf16.gmra.mrb[12].mxu1 %v1922_v42 }
  0x40   : > { %1803 = vmatpush3.bf16.msra.mxu1 %v777_v40  ;;  %843 = vmatprep.mubr.bf16.mxu0 %v1925_v43 }
  0x41   : > { %1804 = vmatprep.mubr.msk.bf16.mxu1 %vm723_vm2, %v1927_v44 }
  0x47   : > { %844 = vmatmul.mubr.bf16.gmra.mrb[16].mxu0 %v1928_v45  ;;  %1805 = vmatmul.mubr.msk.bf16.vlgmr.msra.gmra.mrb[16].mxu1 %vm723_vm2, %v1929_v46 }
  0x48   : > { %851 = vmatprep.mubr.bf16.mxu0 %v1930_v47  ;;  %1808 = vmatprep.mubr.msk.bf16.mxu1 %vm723_vm2, %v1932_v48 }
  0x4f   : > { %852 = vmatmul.mubr.bf16.gmra.mrb[20].mxu0 %v1933_v49  ;;  %1809 = vmatmul.mubr.msk.bf16.gmra.mrb[20].mxu1 %vm723_vm2, %v1934_v50 }
  0x50   : > { %859 = vmatprep.mubr.bf16.mxu0 %v1935_v51  ;;  %1812 = vmatprep.mubr.msk.bf16.mxu1 %vm723_vm2, %v1937_v52 }
  0x57   : > { %860 = vmatmul.mubr.bf16.gmra.mrb[24].mxu0 %v1938_v53  ;;  %1813 = vmatmul.mubr.msk.bf16.gmra.mrb[24].mxu1 %vm723_vm2, %v1939_v54 }
  0x58   : > { %867 = vmatprep.mubr.bf16.mxu0 %v1940_v55  ;;  %1816 = vmatprep.mubr.msk.bf16.mxu1 %vm723_vm2, %v1942_v56 }
  0x5f   : > { %868 = vmatmul.mubr.bf16.gmra.mrb[28].mxu0 %v1943_v57  ;;  %1817 = vmatmul.mubr.msk.bf16.gmra.mrb[28].mxu1 %vm723_vm2, %v1944_v58 }
  0x60   : > { %875 = vmatprep.mubr.bf16.mxu0 %v1945_v59  ;;  %1820 = vmatprep.mubr.msk.bf16.mxu1 %vm723_vm2, %v1947_v60  ;;  %v2188_v59 = vld [vmem:[%s2269_s2] ss:$0 sm:$0xff] }
  0x67   : > { %876 = vmatmul.mubr.bf16.gmra.mrb[32].mxu0 %v1948_v61  ;;  %1821 = vmatmul.mubr.msk.bf16.gmra.mrb[32].mxu1 %vm723_vm2, %v1949_v62 }
  0x68   : > { %883 = vmatprep.mubr.bf16.mxu0 %v1950_v63  ;;  %1824 = vmatprep.mubr.msk.bf16.mxu1 %vm723_vm2, %v1952_v0 }
  0x6f   : > { %884 = vmatmul.mubr.bf16.gmra.mrb[36].mxu0 %v1953_v1  ;;  %1825 = vmatmul.mubr.msk.bf16.gmra.mrb[36].mxu1 %vm723_vm2, %v1954_v2 }
  0x70   : > { %891 = vmatprep.mubr.bf16.mxu0 %v1955_v3  ;;  %1828 = vmatprep.mubr.msk.bf16.mxu1 %vm723_vm2, %v1957_v4 }
  0x77   : > { %892 = vmatmul.mubr.bf16.gmra.mrb[40].mxu0 %v1958_v5  ;;  %1829 = vmatmul.mubr.msk.bf16.gmra.mrb[40].mxu1 %vm723_vm2, %v1959_v6 }
  0x78   : > { %899 = vmatprep.mubr.bf16.mxu0 %v1960_v7  ;;  %1832 = vmatprep.mubr.msk.bf16.mxu1 %vm723_vm2, %v1962_v8 }
  0x7f   : > { %900 = vmatmul.mubr.bf16.gmra.mrb[44].mxu0 %v1963_v9  ;;  %1833 = vmatmul.mubr.msk.bf16.gmra.mrb[44].mxu1 %vm723_vm2, %v1964_v10 }
  0xfa   : > { %v1671_v11 = vpop.f32.mrb[0].mxu0  ;;  %v1743_v12 = vpop.f32.mrb[0].mxu1 }
  0xfb   : > { %v1672_v13 = vpop.f32.mrb[1].mxu0  ;;  %v1744_v14 = vpop.f32.mrb[1].mxu1 }
  0xfc   : > { %v1673_v15 = vadd.f32 %v1672_v13, %v1671_v11  ;;  %v1674_v16 = vpop.f32.mrb[2].mxu0  ;;  %v2169_v17 = vadd.f32 %v1744_v14, %v1743_v12  ;;  %v1746_v18 = vpop.f32.mrb[2].mxu1 }
  0xfd   : > { %v1675_v19 = vpop.f32.mrb[3].mxu0  ;;  %v1747_v20 = vpop.f32.mrb[3].mxu1 }
  0xfe   : > { %v1676_v21 = vadd.f32 %v1675_v19, %v1674_v16  ;;  %v2171_v22 = vadd.f32 %v1747_v20, %v1746_v18  ;;  %v814_v63 = vadd.f32 %v1673_v15, %v2188_v59 }
 0x100   : > { %v817_v8 = vadd.f32 %v1676_v21, %v2188_v59 }
 0x102   : > { %v1677_v23 = vpop.f32.mrb[4].mxu0  ;;  %v1749_v24 = vpop.f32.mrb[4].mxu1 }
 0x103   : > { %v1678_v25 = vpop.f32.mrb[5].mxu0  ;;  %v1750_v26 = vpop.f32.mrb[5].mxu1 }
 0x104   : > { %v1679_v27 = vadd.f32 %v1678_v25, %v1677_v23  ;;  %v1680_v28 = vpop.f32.mrb[6].mxu0  ;;  %v2173_v29 = vadd.f32 %v1750_v26, %v1749_v24  ;;  %v1752_v30 = vpop.f32.mrb[6].mxu1 }
 0x105   : > { %v1681_v31 = vpop.f32.mrb[7].mxu0  ;;  %v1753_v32 = vpop.f32.mrb[7].mxu1 }
 0x106   : > { %v1682_v33 = vadd.f32 %v1681_v31, %v1680_v28  ;;  %v2175_v34 = vadd.f32 %v1753_v32, %v1752_v30  ;;  %v822_v60 = vadd.f32 %v1679_v27, %v2188_v59 }
 0x108   : > { %v825_v3 = vadd.f32 %v1682_v33, %v2188_v59 }
 0x10a   : > { %v1683_v35 = vpop.f32.mrb[8].mxu0  ;;  %v1755_v36 = vpop.f32.mrb[8].mxu1 }
 0x10b   : > { %v1684_v37 = vpop.f32.mrb[9].mxu0  ;;  %v1756_v38 = vpop.f32.mrb[9].mxu1 }
 0x10c   : > { %v1685_v39 = vadd.f32 %v1684_v37, %v1683_v35  ;;  %v1686_v40 = vpop.f32.mrb[10].mxu0  ;;  %v2177_v41 = vadd.f32 %v1756_v38, %v1755_v36  ;;  %v1758_v42 = vpop.f32.mrb[10].mxu1 }
 0x10d   : > { %v1687_v43 = vpop.f32.mrb[11].mxu0  ;;  %v1759_v44 = vpop.f32.mrb[11].mxu1 }
 0x10e   : > { %v1688_v45 = vadd.f32 %v1687_v43, %v1686_v40  ;;  %v2179_v46 = vadd.f32 %v1759_v44, %v1758_v42  ;;  %v830_v25 = vadd.f32 %v1685_v39, %v2188_v59 }
 0x110   : > { %v833_v36 = vadd.f32 %v1688_v45, %v2188_v59 }
 0x112   : > { %v1689_v47 = vpop.f32.mrb[12].mxu0  ;;  %v1761_v48 = vpop.f32.mrb[12].mxu1 }
 0x113   : > { %v1690_v49 = vpop.f32.mrb[13].mxu0  ;;  %v1762_v50 = vpop.f32.mrb[13].mxu1 }
 0x114   : > { %v1691_v51 = vadd.f32 %v1690_v49, %v1689_v47  ;;  %v1692_v52 = vpop.f32.mrb[14].mxu0  ;;  %v2181_v53 = vadd.f32 %v1762_v50, %v1761_v48  ;;  %v1764_v54 = vpop.f32.mrb[14].mxu1 }
 0x115   : > { %v1693_v55 = vpop.f32.mrb[15].mxu0  ;;  %v1765_v56 = vpop.f32.mrb[15].mxu1 }
 0x116   : > { %v1694_v57 = vadd.f32 %v1693_v55, %v1692_v52  ;;  %v2183_v58 = vadd.f32 %v1765_v56, %v1764_v54  ;;  %v838_v20 = vadd.f32 %v1691_v51, %v2188_v59 }
 0x118   : > { %v841_v30 = vadd.f32 %v1694_v57, %v2188_v59 }
 0x11a   : > { %v1695_v61 = vpop.f32.mrb[16].mxu0  ;;  %v1806_v62 = vpop.f32.mrb[16].mxu1 }
 0x11b   : > { %v983_v0 = vadd.f32 %v1806_v62, %v822_v60  ;;  %v1696_v1 = vpop.f32.mrb[17].mxu0  ;;  %v974_v2 = vpop.f32.mrb[17].mxu1 }
 0x11c   : > { %v1697_v4 = vadd.f32 %v1696_v1, %v1695_v61  ;;  %v975_v5 = vadd.f32 %v974_v2, %v814_v63  ;;  %v1698_v6 = vpop.f32.mrb[18].mxu0  ;;  %v1807_v7 = vpop.f32.mrb[18].mxu1 }
 0x11d   : > { %v986_v9 = vadd.f32 %v1807_v7, %v825_v3  ;;  %v1699_v10 = vpop.f32.mrb[19].mxu0  ;;  %v977_v11 = vpop.f32.mrb[19].mxu1  ;;  %v1103_v14 = vmax.f32 %v983_v0, 0.0 }
 0x11e   : > { %v1700_v12 = vadd.f32 %v1699_v10, %v1698_v6  ;;  %v978_v13 = vadd.f32 %v977_v11, %v817_v8  ;;  %v1101_v15 = vmax.f32 %v975_v5, 0.0  ;;  %v846_v55 = vadd.f32 %v1697_v4, %v2188_v59 }
 0x11f   : > { %v1104_v16 = vmax.f32 %v986_v9, 0.0 }
 0x120   : > { %v1102_v18 = vmax.f32 %v978_v13, 0.0  ;;  %v849_v1 = vadd.f32 %v1700_v12, %v2188_v59 }
 0x121   : > { %v1568_v19 = vpack.c.bf16 %v1104_v16, %v1103_v14 }
 0x122   : > { %v1563_v21 = vpack.c.bf16 %v1102_v18, %v1101_v15  ;;  %v1701_v23 = vpop.f32.mrb[20].mxu0  ;;  %v1810_v24 = vpop.f32.mrb[20].mxu1 }
 0x123   : > { %1640 = vst [vmem:[%s2198_s26 + $0x8] sm:$0xff] %v1568_v19   ;;  %v999_v26 = vadd.f32 %v1810_v24, %v838_v20  ;;  %v1702_v27 = vpop.f32.mrb[21].mxu0  ;;  %v990_v28 = vpop.f32.mrb[21].mxu1 }
 0x124   : > { %1564 = vst [vmem:[%s2198_s26] sm:$0xff] %v1563_v21   ;;  %v1703_v31 = vadd.f32 %v1702_v27, %v1701_v23  ;;  %v991_v32 = vadd.f32 %v990_v28, %v830_v25  ;;  %v1704_v33 = vpop.f32.mrb[22].mxu0  ;;  %v1811_v35 = vpop.f32.mrb[22].mxu1 }
 0x125   : > { %v1002_v37 = vadd.f32 %v1811_v35, %v841_v30  ;;  %v1705_v38 = vpop.f32.mrb[23].mxu0  ;;  %v993_v40 = vpop.f32.mrb[23].mxu1  ;;  %v1107_v39 = vmax.f32 %v999_v26, 0.0 }
 0x126   : > { %v1706_v42 = vadd.f32 %v1705_v38, %v1704_v33  ;;  %v994_v43 = vadd.f32 %v993_v40, %v833_v36  ;;  %v1105_v47 = vmax.f32 %v991_v32, 0.0  ;;  %v854_v50 = vadd.f32 %v1703_v31, %v2188_v59 }
 0x127   : > { %v1108_v44 = vmax.f32 %v1002_v37, 0.0 }
 0x128   : > { %v1106_v48 = vmax.f32 %v994_v43, 0.0  ;;  %v857_v60 = vadd.f32 %v1706_v42, %v2188_v59 }
 0x129   : > { %v1578_v49 = vpack.c.bf16 %v1108_v44, %v1107_v39 }
 0x12a   : > { %v1573_v51 = vpack.c.bf16 %v1106_v48, %v1105_v47  ;;  %v1707_v52 = vpop.f32.mrb[24].mxu0  ;;  %v1814_v54 = vpop.f32.mrb[24].mxu1 }
 0x12b   : > { %1642 = vst [vmem:[%s2198_s26 + $0x18] sm:$0xff] %v1578_v49   ;;  %v1015_v45 = vadd.f32 %v1814_v54, %v854_v50  ;;  %v1708_v56 = vpop.f32.mrb[25].mxu0  ;;  %v1006_v57 = vpop.f32.mrb[25].mxu1 }
 0x12c   : > { %1641 = vst [vmem:[%s2198_s26 + $0x10] sm:$0xff] %v1573_v51   ;;  %v1709_v61 = vadd.f32 %v1708_v56, %v1707_v52  ;;  %v1007_v62 = vadd.f32 %v1006_v57, %v846_v55  ;;  %v1710_v63 = vpop.f32.mrb[26].mxu0  ;;  %v1815_v0 = vpop.f32.mrb[26].mxu1 }
 0x12d   : > { %v1018_v2 = vadd.f32 %v1815_v0, %v857_v60  ;;  %v1711_v3 = vpop.f32.mrb[27].mxu0  ;;  %v1009_v5 = vpop.f32.mrb[27].mxu1  ;;  %v1111_v7 = vmax.f32 %v1015_v45, 0.0 }
 0x12e   : > { %v1712_v6 = vadd.f32 %v1711_v3, %v1710_v63  ;;  %v1010_v4 = vadd.f32 %v1009_v5, %v849_v1  ;;  %v1109_v9 = vmax.f32 %v1007_v62, 0.0  ;;  %v862_v15 = vadd.f32 %v1709_v61, %v2188_v59 }
 0x12f   : > { %v1112_v8 = vmax.f32 %v1018_v2, 0.0 }
 0x130   : > { %v1110_v10 = vmax.f32 %v1010_v4, 0.0  ;;  %v865_v24 = vadd.f32 %v1712_v6, %v2188_v59 }
 0x131   : > { %v1588_v11 = vpack.c.bf16 %v1112_v8, %v1111_v7 }
 0x132   : > { %v1583_v13 = vpack.c.bf16 %v1110_v10, %v1109_v9  ;;  %v1713_v14 = vpop.f32.mrb[28].mxu0  ;;  %v1818_v16 = vpop.f32.mrb[28].mxu1 }
 0x133   : > { %1644 = vst [vmem:[%s2198_s26 + $0x28] sm:$0xff] %v1588_v11   ;;  %v1714_v18 = vpop.f32.mrb[29].mxu0  ;;  %v1022_v19 = vpop.f32.mrb[29].mxu1 }
 0x134   : > { %1643 = vst [vmem:[%s2198_s26 + $0x20] sm:$0xff] %v1583_v13   ;;  %v1715_v12 = vadd.f32 %v1714_v18, %v1713_v14  ;;  %v1023_v20 = vadd.f32 %v1022_v19, %v862_v15  ;;  %v1716_v21 = vpop.f32.mrb[30].mxu0  ;;  %v1819_v23 = vpop.f32.mrb[30].mxu1  ;;  %v918_v13 = vadd.f32 %v2173_v29, %v2188_v59  ;;  %v910_v18 = vadd.f32 %v2169_v17, %v2188_v59 }
 0x135   : > { %v1717_v25 = vpop.f32.mrb[31].mxu0  ;;  %v1025_v26 = vpop.f32.mrb[31].mxu1 }
 0x136   : > { %v870_v27 = vadd.f32 %v1715_v12, %v2188_v59  ;;  %v1718_v28 = vadd.f32 %v1717_v25, %v1716_v21  ;;  %v1026_v30 = vadd.f32 %v1025_v26, %v865_v24  ;;  %v1113_v32 = vmax.f32 %v1023_v20, 0.0 }
 0x137   : > { %v921_v21 = vadd.f32 %v2175_v34, %v2188_v59 }
 0x138   : > { %v1031_v31 = vadd.f32 %v1818_v16, %v870_v27  ;;  %v873_v33 = vadd.f32 %v1718_v28, %v2188_v59  ;;  %v1114_v35 = vmax.f32 %v1026_v30, 0.0 }
 0x13a   : > { %v1034_v36 = vadd.f32 %v1819_v23, %v873_v33  ;;  %v1593_v37 = vpack.c.bf16 %v1114_v35, %v1113_v32  ;;  %v1719_v38 = vpop.f32.mrb[32].mxu0  ;;  %v1822_v40 = vpop.f32.mrb[32].mxu1  ;;  %v1115_v39 = vmax.f32 %v1031_v31, 0.0  ;;  %v913_v31 = vadd.f32 %v2171_v22, %v2188_v59 }
 0x13b   : > { %v1720_v42 = vpop.f32.mrb[33].mxu0  ;;  %v1038_v43 = vpop.f32.mrb[33].mxu1 }
 0x13c   : > { %v1116_v44 = vmax.f32 %v1034_v36, 0.0  ;;  %1645 = vst [vmem:[%s2198_s26 + $0x30] sm:$0xff] %v1593_v37   ;;  %v1721_v47 = vadd.f32 %v1720_v42, %v1719_v38  ;;  %v1722_v48 = vpop.f32.mrb[34].mxu0  ;;  %v1823_v49 = vpop.f32.mrb[34].mxu1 }
 0x13d   : > { %v1723_v50 = vpop.f32.mrb[35].mxu0  ;;  %v1041_v51 = vpop.f32.mrb[35].mxu1 }
 0x13e   : > { %v1598_v52 = vpack.c.bf16 %v1116_v44, %v1115_v39  ;;  %v878_v54 = vadd.f32 %v1721_v47, %v2188_v59  ;;  %v1724_v55 = vadd.f32 %v1723_v50, %v1722_v48  ;;  %v934_v44 = vadd.f32 %v2181_v53, %v2188_v59 }
 0x140   : > { %1646 = vst [vmem:[%s2198_s26 + $0x38] sm:$0xff] %v1598_v52   ;;  %v1039_v45 = vadd.f32 %v1038_v43, %v878_v54  ;;  %v881_v56 = vadd.f32 %v1724_v55, %v2188_v59  ;;  %v937_v55 = vadd.f32 %v2183_v58, %v2188_v59 }
 0x142   : > { %v1042_v57 = vadd.f32 %v1041_v51, %v881_v56  ;;  %v1725_v60 = vpop.f32.mrb[36].mxu0  ;;  %v2222_v61 = vpop.f32.mrb[36].mxu1  ;;  %v1117_v0 = vmax.f32 %v1039_v45, 0.0 }
 0x143   : > { %v1726_v62 = vpop.f32.mrb[37].mxu0  ;;  %v1054_v63 = vpop.f32.mrb[37].mxu1 }
 0x144   : > { %v1118_v1 = vmax.f32 %v1042_v57, 0.0  ;;  %v1727_v2 = vadd.f32 %v1726_v62, %v1725_v60  ;;  %v1728_v3 = vpop.f32.mrb[38].mxu0  ;;  %v2224_v5 = vpop.f32.mrb[38].mxu1 }
 0x145   : > { %v1729_v6 = vpop.f32.mrb[39].mxu0  ;;  %v1057_v4 = vpop.f32.mrb[39].mxu1 }
 0x146   : > { %v1603_v7 = vpack.c.bf16 %v1118_v1, %v1117_v0  ;;  %v886_v8 = vadd.f32 %v1727_v2, %v2188_v59  ;;  %v1730_v9 = vadd.f32 %v1729_v6, %v1728_v3 }
 0x148   : > { %1647 = vst [vmem:[%s2198_s26 + $0x40] sm:$0xff] %v1603_v7   ;;  %v1047_v10 = vadd.f32 %v1822_v40, %v886_v8  ;;  %v889_v11 = vadd.f32 %v1730_v9, %v2188_v59 }
 0x14a   : > { %v1050_v14 = vadd.f32 %v1823_v49, %v889_v11  ;;  %v1731_v16 = vpop.f32.mrb[40].mxu0  ;;  %v1830_v15 = vpop.f32.mrb[40].mxu1  ;;  %v1119_v23 = vmax.f32 %v1047_v10, 0.0  ;;  %v926_v49 = vadd.f32 %v2177_v41, %v2188_v59  ;;  %v929_v41 = vadd.f32 %v2179_v46, %v2188_v59 }
 0x14b   : > { %v1079_v19 = vadd.f32 %v1830_v15, %v918_v13  ;;  %v1732_v12 = vpop.f32.mrb[41].mxu0  ;;  %v1070_v20 = vpop.f32.mrb[41].mxu1 }
 0x14c   : > { %v1120_v24 = vmax.f32 %v1050_v14, 0.0  ;;  %v1733_v25 = vadd.f32 %v1732_v12, %v1731_v16  ;;  %v1071_v26 = vadd.f32 %v1070_v20, %v910_v18  ;;  %v1734_v27 = vpop.f32.mrb[42].mxu0  ;;  %v1831_v28 = vpop.f32.mrb[42].mxu1 }
 0x14d   : > { %v1082_v29 = vadd.f32 %v1831_v28, %v921_v21  ;;  %v1735_v30 = vpop.f32.mrb[43].mxu0  ;;  %v1073_v32 = vpop.f32.mrb[43].mxu1  ;;  %v1127_v36 = vmax.f32 %v1079_v19, 0.0 }
 0x14e   : > { %v1608_v17 = vpack.c.bf16 %v1120_v24, %v1119_v23  ;;  %v894_v33 = vadd.f32 %v1733_v25, %v2188_v59  ;;  %v1736_v35 = vadd.f32 %v1735_v30, %v1734_v27  ;;  %v1074_v37 = vadd.f32 %v1073_v32, %v913_v31 }
 0x14f   : > { %v1128_v34 = vmax.f32 %v1082_v29, 0.0  ;;  %v1125_v42 = vmax.f32 %v1071_v26, 0.0 }
 0x150   : > { %1648 = vst [vmem:[%s2198_s26 + $0x48] sm:$0xff] %v1608_v17   ;;  %v1055_v38 = vadd.f32 %v1054_v63, %v894_v33  ;;  %v897_v40 = vadd.f32 %v1736_v35, %v2188_v59  ;;  %v1126_v39 = vmax.f32 %v1074_v37, 0.0 }
 0x151   : > { %v1628_v43 = vpack.c.bf16 %v1128_v34, %v1127_v36 }
 0x152   : > { %v1058_v22 = vadd.f32 %v1057_v4, %v897_v40  ;;  %v1737_v47 = vpop.f32.mrb[44].mxu0  ;;  %v1834_v48 = vpop.f32.mrb[44].mxu1  ;;  %v1623_v50 = vpack.c.bf16 %v1126_v39, %v1125_v42  ;;  %v1121_v45 = vmax.f32 %v1055_v38, 0.0 }
 0x153   : > { %1652 = vst [vmem:[%s2198_s26 + $0x68] sm:$0xff] %v1628_v43   ;;  %v1095_v51 = vadd.f32 %v1834_v48, %v934_v44  ;;  %v1738_v52 = vpop.f32.mrb[45].mxu0  ;;  %v1086_v54 = vpop.f32.mrb[45].mxu1 }
 0x154   : > { %v1122_v56 = vmax.f32 %v1058_v22, 0.0  ;;  %v1739_v57 = vadd.f32 %v1738_v52, %v1737_v47  ;;  %v1087_v53 = vadd.f32 %v1086_v54, %v926_v49  ;;  %v1740_v60 = vpop.f32.mrb[46].mxu0  ;;  %v1835_v62 = vpop.f32.mrb[46].mxu1  ;;  %1651 = vst [vmem:[%s2198_s26 + $0x60] sm:$0xff] %v1623_v50  }
 0x155   : > { %v1098_v63 = vadd.f32 %v1835_v62, %v937_v55  ;;  %v1741_v0 = vpop.f32.mrb[47].mxu0  ;;  %v1089_v1 = vpop.f32.mrb[47].mxu1  ;;  %v1131_v6 = vmax.f32 %v1095_v51, 0.0 }
 0x156   : > { %v1613_v2 = vpack.c.bf16 %v1122_v56, %v1121_v45  ;;  %v902_v3 = vadd.f32 %v1739_v57, %v2188_v59  ;;  %v1742_v58 = vadd.f32 %v1741_v0, %v1740_v60  ;;  %v1090_v7 = vadd.f32 %v1089_v1, %v929_v41 }
 0x157   : > { %v1132_v4 = vmax.f32 %v1098_v63, 0.0  ;;  %v1129_v10 = vmax.f32 %v1087_v53, 0.0 }
 0x158   : > { %1649 = vst [vmem:[%s2198_s26 + $0x50] sm:$0xff] %v1613_v2   ;;  %v1063_v8 = vadd.f32 %v2222_v61, %v902_v3  ;;  %v905_v9 = vadd.f32 %v1742_v58, %v2188_v59  ;;  %v1130_v13 = vmax.f32 %v1090_v7, 0.0 }
 0x159   : > { %v1638_v11 = vpack.c.bf16 %v1132_v4, %v1131_v6 }
 0x15a   : > { %v1066_v46 = vadd.f32 %v2224_v5, %v905_v9  ;;  %v1633_v14 = vpack.c.bf16 %v1130_v13, %v1129_v10  ;;  %v1123_v16 = vmax.f32 %v1063_v8, 0.0 }
 0x15b   : > { %1654 = vst [vmem:[%s2198_s26 + $0x78] sm:$0xff] %v1638_v11  }
 0x15c   : > { %v1124_v15 = vmax.f32 %v1066_v46, 0.0  ;;  %1653 = vst [vmem:[%s2198_s26 + $0x70] sm:$0xff] %v1633_v14  }
 0x15e   : > { %v1618_v18 = vpack.c.bf16 %v1124_v15, %v1123_v16 }
 0x160   : > { %1650 = vst [vmem:[%s2198_s26 + $0x58] sm:$0xff] %v1618_v18  }
 0x161 PF: > { %s13_s14 = sadd.s32 1, %s1987_s14   ;;  %s2271_s12 = smov %s1983_s13 }
 0x162   : > { %p10_p5 = scmp.ge.s32.totalorder %s13_s14, 6   ;;  %s2272_s13 = smov %s2274_s15 }
 0x164   :  { %12 = sbr.rel (!%p10_p5) target bundleno = 2 (0x2), region = 68 }

// kernel: _lambda_.9
= control target key start
LH: loop header
LB: loop body
LE: loop exit
PB: predicated region body
PF: predicated region fallthrough
CT: control target
= control target key end

     0   :  { %vm806_vm0 = vcmask 523264   ;;  %s2854_s1 = inlined_call_operand.vmem [shape: bf16[576,128], index: 1, kind: input, shape index: {}]   ;;  %s2855_s0 = inlined_call_operand.vmem [shape: bf16[256,576], index: 0, kind: input, shape index: {}]   ;;  %s2856_s2 = inlined_call_operand.vmem [shape: f32[1,128], index: 2, kind: input, shape index: {}]   ;;  %s2857_s3 = inlined_call_operand.vmem [shape: bf16[256,128], index: 3, kind: output, shape index: {}]  }
   0x1   :  { %v2126_v0 = vld [vmem:[%s2854_s1 + $0x40] sm:$0xff]   ;;  %v2128_v2 = vld [vmem:[%s2854_s1 + $0x48] sm:$0xff]   ;;  %v2130_v4 = vld [vmem:[%s2854_s1 + $0x50] sm:$0xff]  }
   0x2   :  { %v2127_v1 = vld [vmem:[%s2854_s1] sm:$0xff]   ;;  %1826 = vmatprep.subr.bf16.mxu0 %v2126_v0  ;;  %2110 = vmatprep.subr.bf16.mxu1 %v2126_v0  ;;  %v2129_v3 = vld [vmem:[%s2854_s1 + $0x8] sm:$0xff]   ;;  %v2131_v5 = vld [vmem:[%s2854_s1 + $0x10] sm:$0xff]  }
   0x3   :  { %1827 = vmatpush3.bf16.msra.mxu0 %v2127_v1  ;;  %2118 = vmatpush3.bf16.msra.mxu1 %v2127_v1  ;;  %v2132_v6 = vld [vmem:[%s2854_s1 + $0x58] sm:$0xff]   ;;  %v2134_v8 = vld [vmem:[%s2854_s1 + $0x60] sm:$0xff]   ;;  %v2136_v10 = vld [vmem:[%s2854_s1 + $0x68] sm:$0xff]  }
   0x4   :  { %1828 = vmatprep.subr.bf16.mxu0 %v2128_v2  ;;  %2111 = vmatprep.subr.bf16.mxu1 %v2128_v2  ;;  %v2133_v7 = vld [vmem:[%s2854_s1 + $0x18] sm:$0xff]   ;;  %v2135_v9 = vld [vmem:[%s2854_s1 + $0x20] sm:$0xff]   ;;  %v2137_v13 = vld [vmem:[%s2854_s1 + $0x28] sm:$0xff]  }
   0x5   :  { %v2144_v11 = vld [vmem:[%s2855_s0 + $0x4] ss:$20 sps:$4 sm:$0xff]   ;;  %v2138_v14 = vld [vmem:[%s2854_s1 + $0x70] sm:$0xff]   ;;  %v2150_v23 = vld [vmem:[%s2854_s1 + $0xc8] sm:$0xff]  }
   0x6   :  { %v2147_v12 = vld [vmem:[%s2855_s0 + $0x1e4] ss:$20 sps:$4 sm:$0xff]   ;;  %887 = vmatprep.mubr.bf16.mxu0 %v2144_v11  ;;  %v2139_v15 = vld [vmem:[%s2854_s1 + $0x30] sm:$0xff]   ;;  %v2153_v24 = vld [vmem:[%s2855_s0 + $0x2c] ss:$20 sps:$4 sm:$0xff]  }
   0x7   :  { %1829 = vmatpush3.bf16.msra.mxu0 %v2129_v3  ;;  %2119 = vmatpush3.bf16.msra.mxu1 %v2129_v3  ;;  %v2140_v16 = vld [vmem:[%s2854_s1 + $0x78] sm:$0xff]   ;;  %v2148_v18 = vld [vmem:[%s2854_s1 + $0xc0] sm:$0xff]   ;;  %v2152_v26 = vld [vmem:[%s2854_s1 + $0x88] sm:$0xff]  }
   0x8   :  { %1830 = vmatprep.subr.bf16.mxu0 %v2130_v4  ;;  %2112 = vmatprep.subr.bf16.mxu1 %v2130_v4  ;;  %v2141_v17 = vld [vmem:[%s2854_s1 + $0x38] sm:$0xff]   ;;  %v2151_v19 = vld [vmem:[%s2854_s1 + $0x100] sm:$0xff]   ;;  %v2159_v28 = vld [vmem:[%s2854_s1 + $0xd0] sm:$0xff]  }
   0x9   :  { %983 = vmatprep.mubr.bf16.mxu1 %v2147_v12  ;;  %v2142_v20 = vld [vmem:[%s2855_s0] ss:$20 sps:$4 sm:$0xff]   ;;  %v2157_v27 = vld [vmem:[%s2855_s0 + $0x28] ss:$20 sps:$4 sm:$0xff]   ;;  %v2167_v36 = vld [vmem:[%s2855_s0 + $0x50] ss:$20 sps:$4 sm:$0xff]  }
   0xa   :  { %v2145_v21 = vld [vmem:[%s2855_s0 + $0x1e0] ss:$20 sps:$4 sm:$0xff]   ;;  %v2158_v29 = vld [vmem:[%s2855_s0 + $0x208] ss:$20 sps:$4 sm:$0xff]   ;;  %v2168_v38 = vld [vmem:[%s2855_s0 + $0x230] ss:$20 sps:$4 sm:$0xff]  }
   0xb   :  { %1831 = vmatpush3.bf16.msra.mxu0 %v2131_v5  ;;  %2120 = vmatpush3.bf16.msra.mxu1 %v2131_v5  ;;  %v2149_v22 = vld [vmem:[%s2854_s1 + $0x80] sm:$0xff]   ;;  %v2160_v30 = vld [vmem:[%s2854_s1 + $0x90] sm:$0xff]   ;;  %v2161_v31 = vld [vmem:[%s2854_s1 + $0xd8] sm:$0xff]  }
   0xc   :  { %1832 = vmatprep.subr.bf16.mxu0 %v2132_v6  ;;  %2113 = vmatprep.subr.bf16.mxu1 %v2132_v6  ;;  %v2155_v25 = vld [vmem:[%s2855_s0 + $0x20c] ss:$20 sps:$4 sm:$0xff]   ;;  %v2163_v32 = vld [vmem:[%s2855_s0 + $0x54] ss:$20 sps:$4 sm:$0xff]   ;;  %v2162_v34 = vld [vmem:[%s2854_s1 + $0x98] sm:$0xff]  }
   0xd   :  { %v2165_v33 = vld [vmem:[%s2855_s0 + $0x234] ss:$20 sps:$4 sm:$0xff]   ;;  %v2169_v37 = vld [vmem:[%s2854_s1 + $0xe0] sm:$0xff]   ;;  %v2173_v41 = vld [vmem:[%s2855_s0 + $0x7c] ss:$20 sps:$4 sm:$0xff]  }
   0xe   :  { %v2182_v35 = vld [vmem:[%s2854_s1 + $0x108] sm:$0xff]   ;;  %v2170_v39 = vld [vmem:[%s2854_s1 + $0xa0] sm:$0xff]   ;;  %v2175_v42 = vld [vmem:[%s2855_s0 + $0x25c] ss:$20 sps:$4 sm:$0xff]  }
   0xf   :  { %1833 = vmatpush3.bf16.msra.mxu0 %v2133_v7  ;;  %2121 = vmatpush3.bf16.msra.mxu1 %v2133_v7  ;;  %v2171_v40 = vld [vmem:[%s2854_s1 + $0xe8] sm:$0xff]   ;;  %v2179_v46 = vld [vmem:[%s2854_s1 + $0xf0] sm:$0xff]   ;;  %v2181_v49 = vld [vmem:[%s2854_s1 + $0xf8] sm:$0xff]  }
  0x10   :  { %1834 = vmatprep.subr.bf16.mxu0 %v2134_v8  ;;  %2114 = vmatprep.subr.bf16.mxu1 %v2134_v8  ;;  %v2172_v43 = vld [vmem:[%s2854_s1 + $0xa8] sm:$0xff]   ;;  %v2202_v47 = vld [vmem:[%s2854_s1 + $0x110] sm:$0xff]   ;;  %v2184_v50 = vld [vmem:[%s2855_s0 + $0xa4] ss:$20 sps:$4 sm:$0xff]  }
  0x11   :  { %v2177_v44 = vld [vmem:[%s2855_s0 + $0x78] ss:$20 sps:$4 sm:$0xff]   ;;  %v2180_v48 = vld [vmem:[%s2854_s1 + $0xb0] sm:$0xff]   ;;  %v2186_v53 = vld [vmem:[%s2855_s0 + $0x8] ss:$20 sps:$4 sm:$0xff]  }
  0x12   :  { %v2178_v45 = vld [vmem:[%s2855_s0 + $0x258] ss:$20 sps:$4 sm:$0xff]   ;;  %v2189_v54 = vld [vmem:[%s2855_s0 + $0xa0] ss:$20 sps:$4 sm:$0xff]   ;;  %v2194_v58 = vld [vmem:[%s2855_s0 + $0xc8] ss:$20 sps:$4 sm:$0xff]  }
  0x13   :  { %1835 = vmatpush3.bf16.msra.mxu0 %v2135_v9  ;;  %2122 = vmatpush3.bf16.msra.mxu1 %v2135_v9  ;;  %v2188_v51 = vld [vmem:[%s2855_s0 + $0xc] ss:$20 sps:$4 sm:$0xff]   ;;  %v2183_v52 = vld [vmem:[%s2854_s1 + $0xb8] sm:$0xff]   ;;  %v2192_v57 = vld [vmem:[%s2855_s0 + $0x34] ss:$20 sps:$4 sm:$0xff]  }
  0x14   :  { %1836 = vmatprep.subr.bf16.mxu0 %v2136_v10  ;;  %2115 = vmatprep.subr.bf16.mxu1 %v2136_v10  ;;  %v2190_v55 = vld [vmem:[%s2855_s0 + $0xcc] ss:$20 sps:$4 sm:$0xff]   ;;  %v2221_v56 = vld [vmem:[%s2854_s1 + $0x118] sm:$0xff]   ;;  %v2195_v59 = vld [vmem:[%s2855_s0 + $0x30] ss:$20 sps:$4 sm:$0xff]  }
  0x15   :  { %v2196_v60 = vld [vmem:[%s2855_s0 + $0xf4] ss:$20 sps:$4 sm:$0xff]   ;;  %v2198_v61 = vld [vmem:[%s2855_s0 + $0x5c] ss:$20 sps:$4 sm:$0xff]   ;;  %v2201_v63 = vld [vmem:[%s2855_s0 + $0x58] ss:$20 sps:$4 sm:$0xff]  }
  0x16   :  { %v2200_v62 = vld [vmem:[%s2855_s0 + $0xf0] ss:$20 sps:$4 sm:$0xff]   ;;  %v2207_v2 = vld [vmem:[%s2855_s0 + $0x118] ss:$20 sps:$4 sm:$0xff]   ;;  %v2208_v3 = vld [vmem:[%s2855_s0 + $0x80] ss:$20 sps:$4 sm:$0xff]  }
  0x17   :  { %1837 = vmatpush3.bf16.msra.mxu0 %v2137_v13  ;;  %2123 = vmatpush3.bf16.msra.mxu1 %v2137_v13  ;;  %v2203_v0 = vld [vmem:[%s2855_s0 + $0x11c] ss:$20 sps:$4 sm:$0xff]   ;;  %v2205_v1 = vld [vmem:[%s2855_s0 + $0x84] ss:$20 sps:$4 sm:$0xff]   ;;  %v2211_v5 = vld [vmem:[%s2855_s0 + $0xac] ss:$20 sps:$4 sm:$0xff]  }
  0x18   :  { %1838 = vmatprep.subr.bf16.mxu0 %v2138_v14  ;;  %2116 = vmatprep.subr.bf16.mxu1 %v2138_v14  ;;  %v2209_v4 = vld [vmem:[%s2855_s0 + $0x144] ss:$20 sps:$4 sm:$0xff]   ;;  %v2213_v6 = vld [vmem:[%s2855_s0 + $0x140] ss:$20 sps:$4 sm:$0xff]   ;;  %v2214_v7 = vld [vmem:[%s2855_s0 + $0xa8] ss:$20 sps:$4 sm:$0xff]  }
  0x19   :  { %v2215_v8 = vld [vmem:[%s2855_s0 + $0x16c] ss:$20 sps:$4 sm:$0xff]   ;;  %v2217_v9 = vld [vmem:[%s2855_s0 + $0xd4] ss:$20 sps:$4 sm:$0xff]   ;;  %v2220_v11 = vld [vmem:[%s2855_s0 + $0xd0] ss:$20 sps:$4 sm:$0xff]  }
  0x1a   :  { %v2219_v10 = vld [vmem:[%s2855_s0 + $0x168] ss:$20 sps:$4 sm:$0xff]   ;;  %v2226_v14 = vld [vmem:[%s2855_s0 + $0x190] ss:$20 sps:$4 sm:$0xff]  }
  0x1b   :  { %1839 = vmatpush3.bf16.msra.mxu0 %v2139_v15  ;;  %2124 = vmatpush3.bf16.msra.mxu1 %v2139_v15  ;;  %v2222_v12 = vld [vmem:[%s2855_s0 + $0x194] ss:$20 sps:$4 sm:$0xff]   ;;  %v2224_v13 = vld [vmem:[%s2855_s0 + $0xfc] ss:$20 sps:$4 sm:$0xff]   ;;  %v2227_v15 = vld [vmem:[%s2855_s0 + $0xf8] ss:$20 sps:$4 sm:$0xff]  }
  0x1c   :  { %1840 = vmatprep.subr.bf16.mxu0 %v2140_v16  ;;  %2117 = vmatprep.subr.bf16.mxu1 %v2140_v16  ;;  %v2228_v16 = vld [vmem:[%s2855_s0 + $0x1bc] ss:$20 sps:$4 sm:$0xff]  }
  0x1f   :  { %1841 = vmatpush3.bf16.msra.mxu0 %v2141_v17  ;;  %2125 = vmatpush3.bf16.msra.mxu1 %v2141_v17  ;;  %v2230_v17 = vld [vmem:[%s2855_s0 + $0x124] ss:$20 sps:$4 sm:$0xff]  }
  0x20   :  { %1938 = vmatprep.subr.bf16.mxu1 %v2148_v18  ;;  %2070 = vmatprep.subr.bf16.mxu0 %v2151_v19  ;;  %v2232_v18 = vld [vmem:[%s2855_s0 + $0x1b8] ss:$20 sps:$4 sm:$0xff]  }
  0x22   :  { %888 = vmatmul.mubr.bf16.vlgmr.msra.gmra.mrb[0].mxu0 %v2142_v20  ;;  %984 = vmatmul.mubr.bf16.vlgmr.msra.gmra.mrb[0].mxu1 %v2145_v21  ;;  %v2234_v20 = vld [vmem:[%s2855_s0 + $0x14c] ss:$20 sps:$4 sm:$0xff]   ;;  %v2236_v21 = vld [vmem:[%s2855_s0 + $0x10] ss:$20 sps:$4 sm:$0xff]  }
  0x23   :  { %1939 = vmatpush3.bf16.msra.mxu1 %v2149_v22  ;;  %2071 = vmatpush3.bf16.msra.mxu0 %v2151_v19  ;;  %v2233_v19 = vld [vmem:[%s2855_s0 + $0x120] ss:$20 sps:$4 sm:$0xff]   ;;  %v2237_v22 = vld [vmem:[%s2855_s0 + $0x148] ss:$20 sps:$4 sm:$0xff]  }
  0x24   :  { %1940 = vmatprep.subr.bf16.mxu1 %v2150_v23  ;;  %895 = vmatprep.mubr.bf16.mxu0 %v2153_v24  ;;  %v2238_v23 = vld [vmem:[%s2855_s0 + $0x38] ss:$20 sps:$4 sm:$0xff]   ;;  %v2239_v24 = vld [vmem:[%s2855_s0 + $0x174] ss:$20 sps:$4 sm:$0xff]  }
  0x25   :  { %991 = vmatprep.mubr.bf16.mxu1 %v2155_v25  ;;  %2072 = vmatprep.subr.bf16.mxu0 %v2182_v35  ;;  %v2241_v25 = vld [vmem:[%s2855_s0 + $0x60] ss:$20 sps:$4 sm:$0xff]  }
  0x27   :  { %1941 = vmatpush3.bf16.msra.mxu1 %v2152_v26  ;;  %2073 = vmatpush3.bf16.msra.mxu0 %v2182_v35  ;;  %v2242_v26 = vld [vmem:[%s2855_s0 + $0x170] ss:$20 sps:$4 sm:$0xff]   ;;  %v2253_v35 = vld [vmem:[%s2855_s0 + $0x128] ss:$20 sps:$4 sm:$0xff]  }
  0x28   :  { %1942 = vmatprep.subr.bf16.mxu1 %v2159_v28  ;;  %2074 = vmatprep.subr.bf16.mxu0 %v2202_v47  ;;  %v2244_v28 = vld [vmem:[%s2855_s0 + $0x19c] ss:$20 sps:$4 sm:$0xff]  }
  0x2a   :  { %896 = vmatmul.mubr.bf16.gmra.mrb[4].mxu0 %v2157_v27  ;;  %992 = vmatmul.mubr.bf16.gmra.mrb[4].mxu1 %v2158_v29  ;;  %v2243_v27 = vld [vmem:[%s2855_s0 + $0x88] ss:$20 sps:$4 sm:$0xff]   ;;  %v2246_v29 = vld [vmem:[%s2855_s0 + $0xb0] ss:$20 sps:$4 sm:$0xff]  }
  0x2b   :  { %1943 = vmatpush3.bf16.msra.mxu1 %v2160_v30  ;;  %903 = vmatprep.mubr.bf16.mxu0 %v2163_v32  ;;  %v2247_v30 = vld [vmem:[%s2855_s0 + $0x198] ss:$20 sps:$4 sm:$0xff]  }
  0x2c   :  { %1944 = vmatprep.subr.bf16.mxu1 %v2161_v31  ;;  %999 = vmatprep.mubr.bf16.mxu1 %v2165_v33  ;;  %v2248_v31 = vld [vmem:[%s2855_s0 + $0xd8] ss:$20 sps:$4 sm:$0xff]   ;;  %v2251_v33 = vld [vmem:[%s2855_s0 + $0x100] ss:$20 sps:$4 sm:$0xff]  }
  0x2d   :  { %2075 = vmatpush3.bf16.msra.mxu0 %v2202_v47  ;;  %v2249_v32 = vld [vmem:[%s2855_s0 + $0x1c4] ss:$20 sps:$4 sm:$0xff]  }
  0x2e   :  { %2076 = vmatprep.subr.bf16.mxu0 %v2221_v56  ;;  %v2268_v47 = vld [vmem:[%s2855_s0 + $0x218] ss:$20 sps:$4 sm:$0xff]  }
  0x2f   :  { %1945 = vmatpush3.bf16.msra.mxu1 %v2162_v34  ;;  %v2252_v34 = vld [vmem:[%s2855_s0 + $0x1c0] ss:$20 sps:$4 sm:$0xff]  }
  0x30   :  { %1946 = vmatprep.subr.bf16.mxu1 %v2169_v37  ;;  %v2256_v37 = vld [vmem:[%s2855_s0 + $0x150] ss:$20 sps:$4 sm:$0xff]  }
  0x31   :  { %2077 = vmatpush3.bf16.msra.mxu0 %v2221_v56 }
  0x32   :  { %904 = vmatmul.mubr.bf16.gmra.mrb[8].mxu0 %v2167_v36  ;;  %1000 = vmatmul.mubr.bf16.gmra.mrb[8].mxu1 %v2168_v38  ;;  %v2254_v36 = vld [vmem:[%s2855_s0 + $0x1ec] ss:$20 sps:$4 sm:$0xff]   ;;  %v2257_v38 = vld [vmem:[%s2855_s0 + $0x1e8] ss:$20 sps:$4 sm:$0xff]  }
  0x33   :  { %1947 = vmatpush3.bf16.msra.mxu1 %v2170_v39  ;;  %911 = vmatprep.mubr.bf16.mxu0 %v2173_v41  ;;  %v2258_v39 = vld [vmem:[%s2855_s0 + $0x178] ss:$20 sps:$4 sm:$0xff]   ;;  %v2261_v41 = vld [vmem:[%s2855_s0 + $0x1a0] ss:$20 sps:$4 sm:$0xff]  }
  0x34   :  { %1948 = vmatprep.subr.bf16.mxu1 %v2171_v40  ;;  %1007 = vmatprep.mubr.bf16.mxu1 %v2175_v42  ;;  %v2259_v40 = vld [vmem:[%s2855_s0 + $0x214] ss:$20 sps:$4 sm:$0xff]   ;;  %v2262_v42 = vld [vmem:[%s2855_s0 + $0x210] ss:$20 sps:$4 sm:$0xff]  }
  0x37   :  { %1949 = vmatpush3.bf16.msra.mxu1 %v2172_v43  ;;  %v2263_v43 = vld [vmem:[%s2855_s0 + $0x1c8] ss:$20 sps:$4 sm:$0xff]  }
  0x38   :  { %1950 = vmatprep.subr.bf16.mxu1 %v2179_v46  ;;  %v2267_v46 = vld [vmem:[%s2855_s0 + $0x238] ss:$20 sps:$4 sm:$0xff]  }
  0x3a   :  { %912 = vmatmul.mubr.bf16.gmra.mrb[12].mxu0 %v2177_v44  ;;  %1008 = vmatmul.mubr.bf16.gmra.mrb[12].mxu1 %v2178_v45  ;;  %v2264_v44 = vld [vmem:[%s2855_s0 + $0x23c] ss:$20 sps:$4 sm:$0xff]  }
  0x3b   :  { %1951 = vmatpush3.bf16.msra.mxu1 %v2180_v48  ;;  %919 = vmatprep.mubr.bf16.mxu0 %v2184_v50  ;;  %v2266_v45 = vld [vmem:[%s2855_s0 + $0x1f0] ss:$20 sps:$4 sm:$0xff]   ;;  %v2272_v50 = vld [vmem:[%s2855_s0 + $0x260] ss:$20 sps:$4 sm:$0xff]  }
  0x3c   :  { %1952 = vmatprep.subr.bf16.mxu1 %v2181_v49  ;;  %1048 = vmatprep.mubr.bf16.mxu1 %v2188_v51  ;;  %v2269_v48 = vld [vmem:[%s2855_s0 + $0x264] ss:$20 sps:$4 sm:$0xff]   ;;  %v2271_v49 = vld [vmem:[%s2855_s0 + $0x240] ss:$20 sps:$4 sm:$0xff]   ;;  %v2273_v51 = vld [vmem:[%s2855_s0 + $0x268] ss:$20 sps:$4 sm:$0xff]  }
  0x3f   :  { %1953 = vmatpush3.bf16.msra.mxu1 %v2183_v52 }
  0x42   :  { %920 = vmatmul.mubr.bf16.gmra.mrb[16].mxu0 %v2189_v54  ;;  %1049 = vmatmul.mubr.bf16.vlgmr.msra.gmra.mrb[16].mxu1 %v2186_v53 }
  0x43   :  { %927 = vmatprep.mubr.bf16.mxu0 %v2190_v55  ;;  %1056 = vmatprep.mubr.bf16.mxu1 %v2192_v57 }
  0x4a   :  { %928 = vmatmul.mubr.bf16.gmra.mrb[20].mxu0 %v2194_v58  ;;  %1057 = vmatmul.mubr.bf16.gmra.mrb[20].mxu1 %v2195_v59 }
  0x4b   :  { %935 = vmatprep.mubr.bf16.mxu0 %v2196_v60  ;;  %1064 = vmatprep.mubr.bf16.mxu1 %v2198_v61 }
  0x52   :  { %936 = vmatmul.mubr.bf16.gmra.mrb[24].mxu0 %v2200_v62  ;;  %1065 = vmatmul.mubr.bf16.gmra.mrb[24].mxu1 %v2201_v63 }
  0x53   :  { %943 = vmatprep.mubr.bf16.mxu0 %v2203_v0  ;;  %1072 = vmatprep.mubr.bf16.mxu1 %v2205_v1 }
  0x5a   :  { %944 = vmatmul.mubr.bf16.gmra.mrb[28].mxu0 %v2207_v2  ;;  %1073 = vmatmul.mubr.bf16.gmra.mrb[28].mxu1 %v2208_v3 }
  0x5b   :  { %951 = vmatprep.mubr.bf16.mxu0 %v2209_v4  ;;  %1080 = vmatprep.mubr.bf16.mxu1 %v2211_v5 }
  0x62   :  { %952 = vmatmul.mubr.bf16.gmra.mrb[32].mxu0 %v2213_v6  ;;  %1081 = vmatmul.mubr.bf16.gmra.mrb[32].mxu1 %v2214_v7 }
  0x63   :  { %959 = vmatprep.mubr.bf16.mxu0 %v2215_v8  ;;  %1088 = vmatprep.mubr.bf16.mxu1 %v2217_v9 }
  0x6a   :  { %960 = vmatmul.mubr.bf16.gmra.mrb[36].mxu0 %v2219_v10  ;;  %1089 = vmatmul.mubr.bf16.gmra.mrb[36].mxu1 %v2220_v11 }
  0x6b   :  { %967 = vmatprep.mubr.bf16.mxu0 %v2222_v12  ;;  %1096 = vmatprep.mubr.bf16.mxu1 %v2224_v13 }
  0x72   :  { %968 = vmatmul.mubr.bf16.gmra.mrb[40].mxu0 %v2226_v14  ;;  %1097 = vmatmul.mubr.bf16.gmra.mrb[40].mxu1 %v2227_v15 }
  0x73   :  { %975 = vmatprep.mubr.bf16.mxu0 %v2228_v16  ;;  %1104 = vmatprep.mubr.bf16.mxu1 %v2230_v17 }
  0x7a   :  { %976 = vmatmul.mubr.bf16.gmra.mrb[44].mxu0 %v2232_v18  ;;  %1105 = vmatmul.mubr.bf16.gmra.mrb[44].mxu1 %v2233_v19 }
  0x7b   :  { %1112 = vmatprep.mubr.bf16.mxu1 %v2234_v20  ;;  %2078 = vmatprep.mubr.msk.bf16.mxu0 %vm806_vm0, %v2236_v21 }
  0x82   :  { %1113 = vmatmul.mubr.bf16.gmra.mrb[48].mxu1 %v2237_v22  ;;  %2079 = vmatmul.mubr.msk.bf16.vlgmr.msra.gmra.mrb[48].mxu0 %vm806_vm0, %v2238_v23 }
  0x83   :  { %1120 = vmatprep.mubr.bf16.mxu1 %v2239_v24  ;;  %2082 = vmatprep.mubr.msk.bf16.mxu0 %vm806_vm0, %v2241_v25 }
  0x8a   :  { %1121 = vmatmul.mubr.bf16.gmra.mrb[52].mxu1 %v2242_v26  ;;  %2083 = vmatmul.mubr.msk.bf16.gmra.mrb[52].mxu0 %vm806_vm0, %v2243_v27 }
  0x8b   :  { %1128 = vmatprep.mubr.bf16.mxu1 %v2244_v28  ;;  %2086 = vmatprep.mubr.msk.bf16.mxu0 %vm806_vm0, %v2246_v29 }
  0x92   :  { %1129 = vmatmul.mubr.bf16.gmra.mrb[56].mxu1 %v2247_v30  ;;  %2087 = vmatmul.mubr.msk.bf16.gmra.mrb[56].mxu0 %vm806_vm0, %v2248_v31 }
  0x93   :  { %1136 = vmatprep.mubr.bf16.mxu1 %v2249_v32  ;;  %2090 = vmatprep.mubr.msk.bf16.mxu0 %vm806_vm0, %v2251_v33 }
  0x9a   :  { %1137 = vmatmul.mubr.bf16.gmra.mrb[60].mxu1 %v2252_v34  ;;  %2091 = vmatmul.mubr.msk.bf16.gmra.mrb[60].mxu0 %vm806_vm0, %v2253_v35 }
  0x9b   :  { %1144 = vmatprep.mubr.bf16.mxu1 %v2254_v36  ;;  %2094 = vmatprep.mubr.msk.bf16.mxu0 %vm806_vm0, %v2256_v37 }
  0xa2   :  { %1145 = vmatmul.mubr.bf16.gmra.mrb[64].mxu1 %v2257_v38  ;;  %2095 = vmatmul.mubr.msk.bf16.gmra.mrb[64].mxu0 %vm806_vm0, %v2258_v39  ;;  %v2677_v38 = vld [vmem:[%s2856_s2] ss:$0 sm:$0xff] }
  0xa3   :  { %1152 = vmatprep.mubr.bf16.mxu1 %v2259_v40  ;;  %2098 = vmatprep.mubr.msk.bf16.mxu0 %vm806_vm0, %v2261_v41 }
  0xaa   :  { %1153 = vmatmul.mubr.bf16.gmra.mrb[68].mxu1 %v2262_v42  ;;  %2099 = vmatmul.mubr.msk.bf16.gmra.mrb[68].mxu0 %vm806_vm0, %v2263_v43 }
  0xab   :  { %1160 = vmatprep.mubr.bf16.mxu1 %v2264_v44  ;;  %2102 = vmatprep.mubr.msk.bf16.mxu0 %vm806_vm0, %v2266_v45 }
  0xb2   :  { %1161 = vmatmul.mubr.bf16.gmra.mrb[72].mxu1 %v2267_v46  ;;  %2103 = vmatmul.mubr.msk.bf16.gmra.mrb[72].mxu0 %vm806_vm0, %v2268_v47 }
  0xb3   :  { %1168 = vmatprep.mubr.bf16.mxu1 %v2269_v48  ;;  %2106 = vmatprep.mubr.msk.bf16.mxu0 %vm806_vm0, %v2271_v49 }
  0xba   :  { %1169 = vmatmul.mubr.bf16.gmra.mrb[76].mxu1 %v2272_v50  ;;  %2107 = vmatmul.mubr.msk.bf16.gmra.mrb[76].mxu0 %vm806_vm0, %v2273_v51 }
  0xf5   :  { %v1914_v52 = vpop.f32.mrb[0].mxu1  ;;  %v1842_v53 = vpop.f32.mrb[0].mxu0 }
  0xf6   :  { %v1915_v54 = vpop.f32.mrb[1].mxu1  ;;  %v1843_v55 = vpop.f32.mrb[1].mxu0 }
  0xf7   :  { %v2658_v56 = vadd.f32 %v1915_v54, %v1914_v52  ;;  %v1917_v57 = vpop.f32.mrb[2].mxu1  ;;  %v1844_v58 = vadd.f32 %v1843_v55, %v1842_v53  ;;  %v1845_v59 = vpop.f32.mrb[2].mxu0 }
  0xf8   :  { %v1918_v60 = vpop.f32.mrb[3].mxu1  ;;  %v1846_v61 = vpop.f32.mrb[3].mxu0 }
  0xf9   :  { %v2660_v62 = vadd.f32 %v1918_v60, %v1917_v57  ;;  %v1847_v63 = vadd.f32 %v1846_v61, %v1845_v59  ;;  %v890_v41 = vadd.f32 %v1844_v58, %v2677_v38 }
  0xfb   :  { %v893_v48 = vadd.f32 %v1847_v63, %v2677_v38 }
  0xfd   :  { %v1920_v0 = vpop.f32.mrb[4].mxu1  ;;  %v1848_v1 = vpop.f32.mrb[4].mxu0 }
  0xfe   :  { %v1921_v2 = vpop.f32.mrb[5].mxu1  ;;  %v1849_v3 = vpop.f32.mrb[5].mxu0 }
  0xff   :  { %v2662_v4 = vadd.f32 %v1921_v2, %v1920_v0  ;;  %v1923_v5 = vpop.f32.mrb[6].mxu1  ;;  %v1850_v6 = vadd.f32 %v1849_v3, %v1848_v1  ;;  %v1851_v7 = vpop.f32.mrb[6].mxu0 }
 0x100   :  { %v1924_v8 = vpop.f32.mrb[7].mxu1  ;;  %v1852_v9 = vpop.f32.mrb[7].mxu0 }
 0x101   :  { %v2664_v10 = vadd.f32 %v1924_v8, %v1923_v5  ;;  %v1853_v11 = vadd.f32 %v1852_v9, %v1851_v7  ;;  %v898_v58 = vadd.f32 %v1850_v6, %v2677_v38 }
 0x103   :  { %v901_v63 = vadd.f32 %v1853_v11, %v2677_v38 }
 0x105   :  { %v1926_v12 = vpop.f32.mrb[8].mxu1  ;;  %v1854_v13 = vpop.f32.mrb[8].mxu0 }
 0x106   :  { %v1927_v14 = vpop.f32.mrb[9].mxu1  ;;  %v1855_v15 = vpop.f32.mrb[9].mxu0 }
 0x107   :  { %v2666_v16 = vadd.f32 %v1927_v14, %v1926_v12  ;;  %v1929_v17 = vpop.f32.mrb[10].mxu1  ;;  %v1856_v18 = vadd.f32 %v1855_v15, %v1854_v13  ;;  %v1857_v19 = vpop.f32.mrb[10].mxu0 }
 0x108   :  { %v1930_v20 = vpop.f32.mrb[11].mxu1  ;;  %v1858_v21 = vpop.f32.mrb[11].mxu0 }
 0x109   :  { %v2668_v22 = vadd.f32 %v1930_v20, %v1929_v17  ;;  %v1859_v23 = vadd.f32 %v1858_v21, %v1857_v19  ;;  %v906_v6 = vadd.f32 %v1856_v18, %v2677_v38 }
 0x10b   :  { %v909_v11 = vadd.f32 %v1859_v23, %v2677_v38 }
 0x10d   :  { %v1932_v24 = vpop.f32.mrb[12].mxu1  ;;  %v1860_v25 = vpop.f32.mrb[12].mxu0 }
 0x10e   :  { %v1933_v26 = vpop.f32.mrb[13].mxu1  ;;  %v1861_v27 = vpop.f32.mrb[13].mxu0 }
 0x10f   :  { %v2670_v28 = vadd.f32 %v1933_v26, %v1932_v24  ;;  %v1935_v29 = vpop.f32.mrb[14].mxu1  ;;  %v1862_v30 = vadd.f32 %v1861_v27, %v1860_v25  ;;  %v1863_v31 = vpop.f32.mrb[14].mxu0 }
 0x110   :  { %v1936_v32 = vpop.f32.mrb[15].mxu1  ;;  %v1864_v33 = vpop.f32.mrb[15].mxu0 }
 0x111   :  { %v2672_v34 = vadd.f32 %v1936_v32, %v1935_v29  ;;  %v1865_v35 = vadd.f32 %v1864_v33, %v1863_v31  ;;  %v914_v18 = vadd.f32 %v1862_v30, %v2677_v38 }
 0x113   :  { %v917_v23 = vadd.f32 %v1865_v35, %v2677_v38 }
 0x115   :  { %v1954_v36 = vpop.f32.mrb[16].mxu1  ;;  %v1866_v37 = vpop.f32.mrb[16].mxu0 }
 0x116   :  { %v1955_v39 = vpop.f32.mrb[17].mxu1  ;;  %v1867_v40 = vpop.f32.mrb[17].mxu0 }
 0x117   :  { %v1956_v42 = vadd.f32 %v1955_v39, %v1954_v36  ;;  %v1957_v43 = vpop.f32.mrb[18].mxu1  ;;  %v1868_v44 = vadd.f32 %v1867_v40, %v1866_v37  ;;  %v1869_v45 = vpop.f32.mrb[18].mxu0 }
 0x118   :  { %v1958_v46 = vpop.f32.mrb[19].mxu1  ;;  %v1870_v47 = vpop.f32.mrb[19].mxu0 }
 0x119   :  { %v1959_v49 = vadd.f32 %v1958_v46, %v1957_v43  ;;  %v1871_v50 = vadd.f32 %v1870_v47, %v1869_v45  ;;  %v2681_v51 = vadd.f32 %v1956_v42, %v890_v41  ;;  %v922_v30 = vadd.f32 %v1868_v44, %v2677_v38 }
 0x11b   :  { %v2683_v52 = vadd.f32 %v1959_v49, %v893_v48  ;;  %v925_v35 = vadd.f32 %v1871_v50, %v2677_v38 }
 0x11d   :  { %v1960_v53 = vpop.f32.mrb[20].mxu1  ;;  %v1872_v54 = vpop.f32.mrb[20].mxu0 }
 0x11e   :  { %v1961_v55 = vpop.f32.mrb[21].mxu1  ;;  %v1873_v57 = vpop.f32.mrb[21].mxu0 }
 0x11f   :  { %v1962_v59 = vadd.f32 %v1961_v55, %v1960_v53  ;;  %v1963_v60 = vpop.f32.mrb[22].mxu1  ;;  %v1874_v61 = vadd.f32 %v1873_v57, %v1872_v54  ;;  %v1875_v0 = vpop.f32.mrb[22].mxu0 }
 0x120   :  { %v1964_v1 = vpop.f32.mrb[23].mxu1  ;;  %v1876_v2 = vpop.f32.mrb[23].mxu0 }
 0x121   :  { %v1965_v3 = vadd.f32 %v1964_v1, %v1963_v60  ;;  %v1877_v5 = vadd.f32 %v1876_v2, %v1875_v0  ;;  %v2687_v7 = vadd.f32 %v1962_v59, %v898_v58  ;;  %v930_v44 = vadd.f32 %v1874_v61, %v2677_v38 }
 0x123   :  { %v2689_v8 = vadd.f32 %v1965_v3, %v901_v63 }
 0x125   :  { %v1966_v9 = vpop.f32.mrb[24].mxu1  ;;  %v1878_v12 = vpop.f32.mrb[24].mxu0 }
 0x126   :  { %v1967_v13 = vpop.f32.mrb[25].mxu1  ;;  %v1879_v14 = vpop.f32.mrb[25].mxu0 }
 0x127   :  { %v1968_v15 = vadd.f32 %v1967_v13, %v1966_v9  ;;  %v1969_v17 = vpop.f32.mrb[26].mxu1  ;;  %v1880_v19 = vadd.f32 %v1879_v14, %v1878_v12  ;;  %v1881_v20 = vpop.f32.mrb[26].mxu0 }
 0x128   :  { %v1970_v21 = vpop.f32.mrb[27].mxu1  ;;  %v1882_v24 = vpop.f32.mrb[27].mxu0 }
 0x129   :  { %v1971_v25 = vadd.f32 %v1970_v21, %v1969_v17  ;;  %v1883_v26 = vadd.f32 %v1882_v24, %v1881_v20  ;;  %v2693_v27 = vadd.f32 %v1968_v15, %v906_v6 }
 0x12b   :  { %v2695_v29 = vadd.f32 %v1971_v25, %v909_v11  ;;  %v933_v11 = vadd.f32 %v1877_v5, %v2677_v38 }
 0x12d   :  { %v1972_v31 = vpop.f32.mrb[28].mxu1  ;;  %v1884_v32 = vpop.f32.mrb[28].mxu0 }
 0x12e   :  { %v1973_v33 = vpop.f32.mrb[29].mxu1  ;;  %v1885_v36 = vpop.f32.mrb[29].mxu0 }
 0x12f   :  { %v1974_v37 = vadd.f32 %v1973_v33, %v1972_v31  ;;  %v1975_v39 = vpop.f32.mrb[30].mxu1  ;;  %v1886_v40 = vadd.f32 %v1885_v36, %v1884_v32  ;;  %v1887_v41 = vpop.f32.mrb[30].mxu0 }
 0x130   :  { %v1976_v42 = vpop.f32.mrb[31].mxu1  ;;  %v1888_v43 = vpop.f32.mrb[31].mxu0 }
 0x131   :  { %v1977_v45 = vadd.f32 %v1976_v42, %v1975_v39  ;;  %v1889_v46 = vadd.f32 %v1888_v43, %v1887_v41  ;;  %v2699_v47 = vadd.f32 %v1974_v37, %v914_v18  ;;  %v938_v39 = vadd.f32 %v1880_v19, %v2677_v38 }
 0x133   :  { %v2701_v48 = vadd.f32 %v1977_v45, %v917_v23 }
 0x135   :  { %v1978_v49 = vpop.f32.mrb[32].mxu1  ;;  %v1890_v53 = vpop.f32.mrb[32].mxu0 }
 0x136   :  { %v1979_v54 = vpop.f32.mrb[33].mxu1  ;;  %v1891_v55 = vpop.f32.mrb[33].mxu0 }
 0x137   :  { %v1980_v57 = vadd.f32 %v1979_v54, %v1978_v49  ;;  %v1981_v58 = vpop.f32.mrb[34].mxu1  ;;  %v1892_v59 = vadd.f32 %v1891_v55, %v1890_v53  ;;  %v1893_v60 = vpop.f32.mrb[34].mxu0  ;;  %v941_v49 = vadd.f32 %v1883_v26, %v2677_v38 }
 0x138   :  { %v1982_v0 = vpop.f32.mrb[35].mxu1  ;;  %v1894_v1 = vpop.f32.mrb[35].mxu0 }
 0x139   :  { %v1983_v2 = vadd.f32 %v1982_v0, %v1981_v58  ;;  %v2705_v63 = vadd.f32 %v1894_v1, %v1893_v60  ;;  %v2707_v3 = vadd.f32 %v1980_v57, %v922_v30  ;;  %v946_v0 = vadd.f32 %v1886_v40, %v2677_v38 }
 0x13b   :  { %v2709_v9 = vadd.f32 %v1983_v2, %v925_v35 }
 0x13d   :  { %v1984_v12 = vpop.f32.mrb[36].mxu1  ;;  %v1896_v13 = vpop.f32.mrb[36].mxu0 }
 0x13e   :  { %v1985_v14 = vpop.f32.mrb[37].mxu1  ;;  %v1897_v6 = vpop.f32.mrb[37].mxu0 }
 0x13f   :  { %v1986_v15 = vadd.f32 %v1985_v14, %v1984_v12  ;;  %v1987_v17 = vpop.f32.mrb[38].mxu1  ;;  %v2712_v20 = vadd.f32 %v1897_v6, %v1896_v13  ;;  %v1899_v21 = vpop.f32.mrb[38].mxu0  ;;  %v949_v14 = vadd.f32 %v1889_v46, %v2677_v38 }
 0x140   :  { %v1988_v24 = vpop.f32.mrb[39].mxu1  ;;  %v1900_v50 = vpop.f32.mrb[39].mxu0 }
 0x141   :  { %v1989_v25 = vadd.f32 %v1988_v24, %v1987_v17  ;;  %v2715_v31 = vadd.f32 %v1900_v50, %v1899_v21  ;;  %v2717_v32 = vadd.f32 %v1986_v15, %v930_v44 }
 0x143   :  { %v2719_v33 = vadd.f32 %v1989_v25, %v933_v11  ;;  %v954_v25 = vadd.f32 %v1892_v59, %v2677_v38 }
 0x145   :  { %v1990_v36 = vpop.f32.mrb[40].mxu1  ;;  %v1902_v18 = vpop.f32.mrb[40].mxu0 }
 0x146   :  { %v1991_v37 = vpop.f32.mrb[41].mxu1  ;;  %v1903_v61 = vpop.f32.mrb[41].mxu0 }
 0x147   :  { %v1992_v41 = vadd.f32 %v1991_v37, %v1990_v36  ;;  %v1993_v42 = vpop.f32.mrb[42].mxu1  ;;  %v2722_v43 = vadd.f32 %v1903_v61, %v1902_v18  ;;  %v1905_v23 = vpop.f32.mrb[42].mxu0 }
 0x148   :  { %v1994_v45 = vpop.f32.mrb[43].mxu1  ;;  %v1906_v5 = vpop.f32.mrb[43].mxu0 }
 0x149   :  { %v1995_v53 = vadd.f32 %v1994_v45, %v1993_v42  ;;  %v2725_v54 = vadd.f32 %v1906_v5, %v1905_v23  ;;  %v2727_v55 = vadd.f32 %v1992_v41, %v938_v39  ;;  %v957_v42 = vadd.f32 %v2705_v63, %v2677_v38 }
 0x14b   :  { %v2729_v30 = vadd.f32 %v1995_v53, %v941_v49 }
 0x14d   :  { %v1996_v57 = vpop.f32.mrb[44].mxu1  ;;  %v1908_v58 = vpop.f32.mrb[44].mxu0 }
 0x14e   :  { %v1997_v60 = vpop.f32.mrb[45].mxu1  ;;  %v1909_v19 = vpop.f32.mrb[45].mxu0 }
 0x14f   :  { %v1998_v1 = vadd.f32 %v1997_v60, %v1996_v57  ;;  %v1999_v35 = vpop.f32.mrb[46].mxu1  ;;  %v2732_v2 = vadd.f32 %v1909_v19, %v1908_v58  ;;  %v1911_v12 = vpop.f32.mrb[46].mxu0 }
 0x150   :  { %v2000_v13 = vpop.f32.mrb[47].mxu1  ;;  %v1912_v26 = vpop.f32.mrb[47].mxu0 }
 0x151   :  { %v2001_v6 = vadd.f32 %v2000_v13, %v1999_v35  ;;  %v2735_v44 = vadd.f32 %v1912_v26, %v1911_v12  ;;  %v2737_v15 = vadd.f32 %v1998_v1, %v946_v0  ;;  %v962_v0 = vadd.f32 %v2712_v20, %v2677_v38 }
 0x153   :  { %v2739_v17 = vadd.f32 %v2001_v6, %v949_v14 }
 0x155   :  { %v2002_v21 = vpop.f32.mrb[48].mxu1  ;;  %v2080_v24 = vpop.f32.mrb[48].mxu0 }
 0x156   :  { %v1220_v40 = vadd.f32 %v2080_v24, %v2687_v7  ;;  %v2003_v50 = vpop.f32.mrb[49].mxu1  ;;  %v1211_v11 = vpop.f32.mrb[49].mxu0 }
 0x157   :  { %v2004_v36 = vadd.f32 %v2003_v50, %v2002_v21  ;;  %v1212_v18 = vadd.f32 %v1211_v11, %v2681_v51  ;;  %v2005_v37 = vpop.f32.mrb[50].mxu1  ;;  %v2081_v46 = vpop.f32.mrb[50].mxu0 }
 0x158   :  { %v1223_v61 = vadd.f32 %v2081_v46, %v2689_v8  ;;  %v2006_v39 = vpop.f32.mrb[51].mxu1  ;;  %v1214_v41 = vpop.f32.mrb[51].mxu0  ;;  %v1340_v5 = vmax.f32 %v1220_v40, 0.0 }
 0x159   :  { %v2007_v23 = vadd.f32 %v2006_v39, %v2005_v37  ;;  %v1215_v45 = vadd.f32 %v1214_v41, %v2683_v52  ;;  %v2748_v7 = vadd.f32 %v2004_v36, %v954_v25  ;;  %v1338_v59 = vmax.f32 %v1212_v18, 0.0 }
 0x15a   :  { %v1341_v49 = vmax.f32 %v1223_v61, 0.0  ;;  %v970_v61 = vadd.f32 %v2722_v43, %v2677_v38 }
 0x15b   :  { %v1339_v53 = vmax.f32 %v1215_v45, 0.0  ;;  %v2750_v57 = vadd.f32 %v2007_v23, %v957_v42 }
 0x15c   :  { %v1739_v51 = vpack.c.bf16 %v1341_v49, %v1340_v5 }
 0x15d   :  { %v1734_v58 = vpack.c.bf16 %v1339_v53, %v1338_v59  ;;  %v2008_v60 = vpop.f32.mrb[52].mxu1  ;;  %v2084_v8 = vpop.f32.mrb[52].mxu0 }
 0x15e   :  { %1811 = vst [vmem:[%s2857_s3 + $0x8] sm:$0xff] %v1739_v51   ;;  %v1236_v63 = vadd.f32 %v2084_v8, %v2699_v47  ;;  %v2009_v19 = vpop.f32.mrb[53].mxu1  ;;  %v1227_v52 = vpop.f32.mrb[53].mxu0  ;;  %v965_v47 = vadd.f32 %v2715_v31, %v2677_v38 }
 0x15f   :  { %1735 = vst [vmem:[%s2857_s3] sm:$0xff] %v1734_v58   ;;  %v2010_v1 = vadd.f32 %v2009_v19, %v2008_v60  ;;  %v1228_v35 = vadd.f32 %v1227_v52, %v2693_v27  ;;  %v2011_v12 = vpop.f32.mrb[54].mxu1  ;;  %v2085_v13 = vpop.f32.mrb[54].mxu0 }
 0x160   :  { %v1239_v26 = vadd.f32 %v2085_v13, %v2701_v48  ;;  %v2012_v14 = vpop.f32.mrb[55].mxu1  ;;  %v1230_v6 = vpop.f32.mrb[55].mxu0  ;;  %v1344_v40 = vmax.f32 %v1236_v63, 0.0 }
 0x161   :  { %v2013_v21 = vadd.f32 %v2012_v14, %v2011_v12  ;;  %v1231_v24 = vadd.f32 %v1230_v6, %v2695_v29  ;;  %v2766_v20 = vadd.f32 %v2010_v1, %v962_v0  ;;  %v1342_v11 = vmax.f32 %v1228_v35, 0.0 }
 0x162   :  { %v1345_v50 = vmax.f32 %v1239_v26, 0.0  ;;  %v978_v1 = vadd.f32 %v2732_v2, %v2677_v38 }
 0x163   :  { %v1343_v25 = vmax.f32 %v1231_v24, 0.0  ;;  %v2768_v36 = vadd.f32 %v2013_v21, %v965_v47 }
 0x164   :  { %v1749_v27 = vpack.c.bf16 %v1345_v50, %v1344_v40 }
 0x165   :  { %v1744_v18 = vpack.c.bf16 %v1343_v25, %v1342_v11  ;;  %v2014_v37 = vpop.f32.mrb[56].mxu1  ;;  %v2088_v48 = vpop.f32.mrb[56].mxu0 }
 0x166   :  { %1813 = vst [vmem:[%s2857_s3 + $0x18] sm:$0xff] %v1749_v27   ;;  %v1252_v31 = vadd.f32 %v2088_v48, %v2717_v32  ;;  %v2015_v46 = vpop.f32.mrb[57].mxu1  ;;  %v1243_v29 = vpop.f32.mrb[57].mxu0  ;;  %v973_v32 = vadd.f32 %v2725_v54, %v2677_v38 }
 0x167   :  { %1812 = vst [vmem:[%s2857_s3 + $0x10] sm:$0xff] %v1744_v18   ;;  %v2016_v39 = vadd.f32 %v2015_v46, %v2014_v37  ;;  %v1244_v41 = vadd.f32 %v1243_v29, %v2707_v3  ;;  %v2017_v42 = vpop.f32.mrb[58].mxu1  ;;  %v2089_v23 = vpop.f32.mrb[58].mxu0 }
 0x168   :  { %v1255_v45 = vadd.f32 %v2089_v23, %v2719_v33  ;;  %v2018_v5 = vpop.f32.mrb[59].mxu1  ;;  %v1246_v49 = vpop.f32.mrb[59].mxu0  ;;  %v1348_v51 = vmax.f32 %v1252_v31, 0.0 }
 0x169   :  { %v2019_v59 = vadd.f32 %v2018_v5, %v2017_v42  ;;  %v1247_v53 = vadd.f32 %v1246_v49, %v2709_v9  ;;  %v2784_v43 = vadd.f32 %v2016_v39, %v970_v61  ;;  %v1346_v60 = vmax.f32 %v1244_v41, 0.0 }
 0x16a   :  { %v1349_v58 = vmax.f32 %v1255_v45, 0.0 }
 0x16b   :  { %v1347_v8 = vmax.f32 %v1247_v53, 0.0  ;;  %v2786_v63 = vadd.f32 %v2019_v59, %v973_v32 }
 0x16c   :  { %v1759_v3 = vpack.c.bf16 %v1349_v58, %v1348_v51 }
 0x16d   :  { %v1754_v19 = vpack.c.bf16 %v1347_v8, %v1346_v60  ;;  %v2020_v52 = vpop.f32.mrb[60].mxu1  ;;  %v2092_v33 = vpop.f32.mrb[60].mxu0 }
 0x16e   :  { %1815 = vst [vmem:[%s2857_s3 + $0x28] sm:$0xff] %v1759_v3   ;;  %v1268_v54 = vadd.f32 %v2092_v33, %v2737_v15  ;;  %v2021_v0 = vpop.f32.mrb[61].mxu1  ;;  %v1259_v9 = vpop.f32.mrb[61].mxu0  ;;  %v981_v15 = vadd.f32 %v2735_v44, %v2677_v38 }
 0x16f   :  { %1814 = vst [vmem:[%s2857_s3 + $0x20] sm:$0xff] %v1754_v19   ;;  %v2022_v35 = vadd.f32 %v2021_v0, %v2020_v52  ;;  %v1260_v12 = vadd.f32 %v1259_v9, %v2727_v55  ;;  %v2023_v13 = vpop.f32.mrb[62].mxu1  ;;  %v2093_v26 = vpop.f32.mrb[62].mxu0 }
 0x170   :  { %v1271_v14 = vadd.f32 %v2093_v26, %v2739_v17  ;;  %v2024_v6 = vpop.f32.mrb[63].mxu1  ;;  %v1262_v47 = vpop.f32.mrb[63].mxu0  ;;  %v1352_v40 = vmax.f32 %v1268_v54, 0.0 }
 0x171   :  { %v2025_v21 = vadd.f32 %v2024_v6, %v2023_v13  ;;  %v1263_v24 = vadd.f32 %v1262_v47, %v2729_v30  ;;  %v1139_v2 = vadd.f32 %v2022_v35, %v978_v1  ;;  %v1350_v11 = vmax.f32 %v1260_v12, 0.0 }
 0x172   :  { %v1353_v50 = vmax.f32 %v1271_v14, 0.0  ;;  %v986_v30 = vadd.f32 %v2658_v56, %v2677_v38  ;;  %v997_v35 = vadd.f32 %v2664_v10, %v2677_v38 }
 0x173   :  { %v1351_v25 = vmax.f32 %v1263_v24, 0.0  ;;  %v1142_v27 = vadd.f32 %v2025_v21, %v981_v15 }
 0x174   :  { %v1769_v18 = vpack.c.bf16 %v1353_v50, %v1352_v40 }
 0x175   :  { %v1764_v55 = vpack.c.bf16 %v1351_v25, %v1350_v11  ;;  %v2026_v37 = vpop.f32.mrb[64].mxu1  ;;  %v2096_v48 = vpop.f32.mrb[64].mxu0 }
 0x176   :  { %1817 = vst [vmem:[%s2857_s3 + $0x38] sm:$0xff] %v1769_v18   ;;  %v1284_v17 = vadd.f32 %v2096_v48, %v2766_v20  ;;  %v2027_v44 = vpop.f32.mrb[65].mxu1  ;;  %v1275_v31 = vpop.f32.mrb[65].mxu0  ;;  %v989_v20 = vadd.f32 %v2660_v62, %v2677_v38 }
 0x177   :  { %1816 = vst [vmem:[%s2857_s3 + $0x30] sm:$0xff] %v1764_v55   ;;  %v2028_v46 = vadd.f32 %v2027_v44, %v2026_v37  ;;  %v1276_v29 = vadd.f32 %v1275_v31, %v2748_v7  ;;  %v2029_v61 = vpop.f32.mrb[66].mxu1  ;;  %v2097_v39 = vpop.f32.mrb[66].mxu0 }
 0x178   :  { %v1287_v41 = vadd.f32 %v2097_v39, %v2768_v36  ;;  %v2030_v42 = vpop.f32.mrb[67].mxu1  ;;  %v1278_v23 = vpop.f32.mrb[67].mxu0  ;;  %v1356_v49 = vmax.f32 %v1284_v17, 0.0  ;;  %v1005_v17 = vadd.f32 %v2668_v22, %v2677_v38  ;;  %v1010_v22 = vadd.f32 %v2670_v28, %v2677_v38 }
 0x179   :  { %v2031_v45 = vadd.f32 %v2030_v42, %v2029_v61  ;;  %v1279_v5 = vadd.f32 %v1278_v23, %v2750_v57  ;;  %v1147_v56 = vadd.f32 %v2028_v46, %v986_v30  ;;  %v1354_v59 = vmax.f32 %v1276_v29, 0.0 }
 0x17a   :  { %v1357_v32 = vmax.f32 %v1287_v41, 0.0  ;;  %v994_v57 = vadd.f32 %v2662_v4, %v2677_v38 }
 0x17b   :  { %v1355_v53 = vmax.f32 %v1279_v5, 0.0  ;;  %v1150_v51 = vadd.f32 %v2031_v45, %v989_v20 }
 0x17c   :  { %v1779_v58 = vpack.c.bf16 %v1357_v32, %v1356_v49 }
 0x17d   :  { %v1774_v7 = vpack.c.bf16 %v1355_v53, %v1354_v59  ;;  %v2032_v60 = vpop.f32.mrb[68].mxu1  ;;  %v2100_v8 = vpop.f32.mrb[68].mxu0 }
 0x17e   :  { %1819 = vst [vmem:[%s2857_s3 + $0x48] sm:$0xff] %v1779_v58   ;;  %v1300_v36 = vadd.f32 %v2100_v8, %v1139_v2  ;;  %v2033_v3 = vpop.f32.mrb[69].mxu1  ;;  %v1291_v62 = vpop.f32.mrb[69].mxu0  ;;  %v1013_v58 = vadd.f32 %v2672_v34, %v2677_v38 }
 0x17f   :  { %1818 = vst [vmem:[%s2857_s3 + $0x40] sm:$0xff] %v1774_v7   ;;  %v2034_v19 = vadd.f32 %v2033_v3, %v2032_v60  ;;  %v1292_v52 = vadd.f32 %v1291_v62, %v2784_v43  ;;  %v2035_v33 = vpop.f32.mrb[70].mxu1  ;;  %v2101_v54 = vpop.f32.mrb[70].mxu0 }
 0x180   :  { %v1303_v0 = vadd.f32 %v2101_v54, %v1142_v27  ;;  %v2036_v9 = vpop.f32.mrb[71].mxu1  ;;  %v1294_v1 = vpop.f32.mrb[71].mxu0  ;;  %v1360_v4 = vmax.f32 %v1300_v36, 0.0 }
 0x181   :  { %v2037_v12 = vadd.f32 %v2036_v9, %v2035_v33  ;;  %v1295_v13 = vadd.f32 %v1294_v1, %v2786_v63  ;;  %v1155_v26 = vadd.f32 %v2034_v19, %v994_v57  ;;  %v1358_v6 = vmax.f32 %v1292_v52, 0.0 }
 0x182   :  { %v1361_v14 = vmax.f32 %v1303_v0, 0.0  ;;  %v1002_v63 = vadd.f32 %v2666_v16, %v2677_v38 }
 0x183   :  { %v1359_v47 = vmax.f32 %v1295_v13, 0.0  ;;  %v1158_v15 = vadd.f32 %v2037_v12, %v997_v35 }
 0x184   :  { %v1789_v21 = vpack.c.bf16 %v1361_v14, %v1360_v4 }
 0x185   :  { %v1784_v24 = vpack.c.bf16 %v1359_v47, %v1358_v6  ;;  %v2038_v43 = vpop.f32.mrb[72].mxu1  ;;  %v2104_v2 = vpop.f32.mrb[72].mxu0 }
 0x186   :  { %1821 = vst [vmem:[%s2857_s3 + $0x58] sm:$0xff] %v1789_v21   ;;  %v1316_v40 = vadd.f32 %v2104_v2, %v1155_v26  ;;  %v2039_v50 = vpop.f32.mrb[73].mxu1  ;;  %v1307_v10 = vpop.f32.mrb[73].mxu0 }
 0x187   :  { %1820 = vst [vmem:[%s2857_s3 + $0x50] sm:$0xff] %v1784_v24   ;;  %v2040_v11 = vadd.f32 %v2039_v50, %v2038_v43  ;;  %v1308_v25 = vadd.f32 %v1307_v10, %v1147_v56  ;;  %v2041_v27 = vpop.f32.mrb[74].mxu1  ;;  %v2105_v18 = vpop.f32.mrb[74].mxu0 }
 0x188   :  { %v1319_v55 = vadd.f32 %v2105_v18, %v1158_v15  ;;  %v2042_v37 = vpop.f32.mrb[75].mxu1  ;;  %v1310_v48 = vpop.f32.mrb[75].mxu0  ;;  %v1364_v46 = vmax.f32 %v1316_v40, 0.0 }
 0x189   :  { %v2043_v44 = vadd.f32 %v2042_v37, %v2041_v27  ;;  %v1311_v31 = vadd.f32 %v1310_v48, %v1150_v51  ;;  %v1163_v30 = vadd.f32 %v2040_v11, %v1002_v63  ;;  %v1362_v16 = vmax.f32 %v1308_v25, 0.0 }
 0x18a   :  { %v1365_v29 = vmax.f32 %v1319_v55, 0.0 }
 0x18b   :  { %v1363_v61 = vmax.f32 %v1311_v31, 0.0  ;;  %v1166_v39 = vadd.f32 %v2043_v44, %v1005_v17 }
 0x18c   :  { %v1799_v41 = vpack.c.bf16 %v1365_v29, %v1364_v46 }
 0x18d   :  { %v1794_v42 = vpack.c.bf16 %v1363_v61, %v1362_v16  ;;  %v2044_v23 = vpop.f32.mrb[76].mxu1  ;;  %v2108_v20 = vpop.f32.mrb[76].mxu0 }
 0x18e   :  { %1823 = vst [vmem:[%s2857_s3 + $0x68] sm:$0xff] %v1799_v41   ;;  %v2045_v45 = vpop.f32.mrb[77].mxu1  ;;  %v1323_v5 = vpop.f32.mrb[77].mxu0 }
 0x18f   :  { %1822 = vst [vmem:[%s2857_s3 + $0x60] sm:$0xff] %v1794_v42   ;;  %v2046_v56 = vadd.f32 %v2045_v45, %v2044_v23  ;;  %v1324_v49 = vadd.f32 %v1323_v5, %v1163_v30  ;;  %v2047_v32 = vpop.f32.mrb[78].mxu1  ;;  %v2109_v59 = vpop.f32.mrb[78].mxu0 }
 0x190   :  { %v2048_v53 = vpop.f32.mrb[79].mxu1  ;;  %v1326_v51 = vpop.f32.mrb[79].mxu0 }
 0x191   :  { %v1171_v7 = vadd.f32 %v2046_v56, %v1010_v22  ;;  %v2049_v60 = vadd.f32 %v2048_v53, %v2047_v32  ;;  %v1327_v8 = vadd.f32 %v1326_v51, %v1166_v39  ;;  %v1366_v3 = vmax.f32 %v1324_v49, 0.0 }
 0x193   :  { %v1332_v36 = vadd.f32 %v2108_v20, %v1171_v7  ;;  %v1174_v62 = vadd.f32 %v2049_v60, %v1013_v58  ;;  %v1367_v28 = vmax.f32 %v1327_v8, 0.0 }
 0x195   :  { %v1335_v57 = vadd.f32 %v2109_v59, %v1174_v62  ;;  %v1804_v19 = vpack.c.bf16 %v1367_v28, %v1366_v3  ;;  %v1368_v52 = vmax.f32 %v1332_v36, 0.0 }
 0x197   :  { %v1369_v33 = vmax.f32 %v1335_v57, 0.0  ;;  %1824 = vst [vmem:[%s2857_s3 + $0x70] sm:$0xff] %v1804_v19  }
 0x199   :  { %v1809_v54 = vpack.c.bf16 %v1369_v33, %v1368_v52 }
 0x19b   :  { %1825 = vst [vmem:[%s2857_s3 + $0x78] sm:$0xff] %v1809_v54  }

// kernel: _lambda_.10
= control target key start
LH: loop header
LB: loop body
LE: loop exit
PB: predicated region body
PF: predicated region fallthrough
CT: control target
= control target key end

     0   :  { %vm434_vm0 = vcmask 523264   ;;  %s1173_s1 = inlined_call_operand.vmem [shape: bf16[576,128], index: 1, kind: input, shape index: {}]   ;;  %s1174_s0 = inlined_call_operand.vmem [shape: bf16[64,576], index: 0, kind: input, shape index: {}]   ;;  %s1175_s2 = inlined_call_operand.vmem [shape: f32[1,128], index: 2, kind: input, shape index: {}]   ;;  %s1176_s3 = inlined_call_operand.vmem [shape: bf16[64,128], index: 3, kind: output, shape index: {}]  }
   0x1   :  { %v906_v0 = vld [vmem:[%s1173_s1 + $0x40] sm:$0xff]   ;;  %v910_v4 = vld [vmem:[%s1173_s1 + $0x48] sm:$0xff]   ;;  %v914_v8 = vld [vmem:[%s1173_s1 + $0x50] sm:$0xff]  }
   0x2   :  { %v907_v1 = vld [vmem:[%s1173_s1 + $0xc0] sm:$0xff]   ;;  %794 = vmatprep.subr.bf16.mxu0 %v906_v0  ;;  %v911_v5 = vld [vmem:[%s1173_s1 + $0xc8] sm:$0xff]   ;;  %v915_v9 = vld [vmem:[%s1173_s1 + $0xd0] sm:$0xff]  }
   0x3   :  { %v908_v2 = vld [vmem:[%s1173_s1] sm:$0xff]   ;;  %834 = vmatprep.subr.bf16.mxu1 %v907_v1  ;;  %v912_v6 = vld [vmem:[%s1173_s1 + $0x8] sm:$0xff]   ;;  %v916_v10 = vld [vmem:[%s1173_s1 + $0x10] sm:$0xff]  }
   0x4   :  { %v909_v3 = vld [vmem:[%s1173_s1 + $0x80] sm:$0xff]   ;;  %795 = vmatpush3.bf16.msra.mxu0 %v908_v2  ;;  %v913_v7 = vld [vmem:[%s1173_s1 + $0x88] sm:$0xff]   ;;  %v917_v11 = vld [vmem:[%s1173_s1 + $0x90] sm:$0xff]  }
   0x5   :  { %835 = vmatpush3.bf16.msra.mxu1 %v909_v3  ;;  %796 = vmatprep.subr.bf16.mxu0 %v910_v4  ;;  %v918_v12 = vld [vmem:[%s1173_s1 + $0x58] sm:$0xff]   ;;  %v922_v16 = vld [vmem:[%s1173_s1 + $0x60] sm:$0xff]   ;;  %v926_v20 = vld [vmem:[%s1173_s1 + $0x68] sm:$0xff]  }
   0x6   :  { %836 = vmatprep.subr.bf16.mxu1 %v911_v5  ;;  %v919_v13 = vld [vmem:[%s1173_s1 + $0xd8] sm:$0xff]   ;;  %v923_v17 = vld [vmem:[%s1173_s1 + $0xe0] sm:$0xff]   ;;  %v927_v21 = vld [vmem:[%s1173_s1 + $0xe8] sm:$0xff]  }
   0x7   :  { %v920_v14 = vld [vmem:[%s1173_s1 + $0x18] sm:$0xff]   ;;  %v924_v18 = vld [vmem:[%s1173_s1 + $0x20] sm:$0xff]   ;;  %v928_v22 = vld [vmem:[%s1173_s1 + $0x28] sm:$0xff]  }
   0x8   :  { %797 = vmatpush3.bf16.msra.mxu0 %v912_v6  ;;  %v921_v15 = vld [vmem:[%s1173_s1 + $0x98] sm:$0xff]   ;;  %v925_v19 = vld [vmem:[%s1173_s1 + $0xa0] sm:$0xff]   ;;  %v929_v23 = vld [vmem:[%s1173_s1 + $0xa8] sm:$0xff]  }
   0x9   :  { %837 = vmatpush3.bf16.msra.mxu1 %v913_v7  ;;  %798 = vmatprep.subr.bf16.mxu0 %v914_v8  ;;  %v930_v24 = vld [vmem:[%s1173_s1 + $0x70] sm:$0xff]   ;;  %v934_v28 = vld [vmem:[%s1173_s1 + $0x78] sm:$0xff]   ;;  %v943_v35 = vld [vmem:[%s1174_s0 + $0xc] ss:$20 sps:$4 sm:$0xff]  }
   0xa   :  { %838 = vmatprep.subr.bf16.mxu1 %v915_v9  ;;  %v931_v25 = vld [vmem:[%s1173_s1 + $0xf0] sm:$0xff]   ;;  %v935_v29 = vld [vmem:[%s1173_s1 + $0xf8] sm:$0xff]   ;;  %v944_v36 = vld [vmem:[%s1173_s1 + $0x100] sm:$0xff]   ;;  %544 = vmatprep.mubr.bf16.mxu1 %v943_v35 }
   0xb   :  { %v932_v26 = vld [vmem:[%s1173_s1 + $0x30] sm:$0xff]   ;;  %v936_v30 = vld [vmem:[%s1173_s1 + $0x38] sm:$0xff]   ;;  %v945_v37 = vld [vmem:[%s1174_s0 + $0x2c] ss:$20 sps:$4 sm:$0xff]  }
   0xc   :  { %799 = vmatpush3.bf16.msra.mxu0 %v916_v10  ;;  %v933_v27 = vld [vmem:[%s1173_s1 + $0xb0] sm:$0xff]   ;;  %v937_v31 = vld [vmem:[%s1173_s1 + $0xb8] sm:$0xff]   ;;  %v951_v39 = vld [vmem:[%s1173_s1 + $0x108] sm:$0xff]  }
   0xd   :  { %839 = vmatpush3.bf16.msra.mxu1 %v917_v11  ;;  %800 = vmatprep.subr.bf16.mxu0 %v918_v12  ;;  %v938_v32 = vld [vmem:[%s1174_s0] ss:$20 sps:$4 sm:$0xff]   ;;  %v940_v33 = vld [vmem:[%s1174_s0 + $0x4] ss:$20 sps:$4 sm:$0xff]   ;;  %v941_v34 = vld [vmem:[%s1174_s0 + $0x8] ss:$20 sps:$4 sm:$0xff]  }
   0xe   :  { %840 = vmatprep.subr.bf16.mxu1 %v919_v13  ;;  %479 = vmatprep.mubr.bf16.mxu0 %v940_v33  ;;  %v947_v38 = vld [vmem:[%s1174_s0 + $0x34] ss:$20 sps:$4 sm:$0xff]   ;;  %v950_v41 = vld [vmem:[%s1174_s0 + $0x30] ss:$20 sps:$4 sm:$0xff]   ;;  %v965_v45 = vld [vmem:[%s1173_s1 + $0x118] sm:$0xff]  }
   0xf   :  { %v949_v40 = vld [vmem:[%s1174_s0 + $0x28] ss:$20 sps:$4 sm:$0xff]   ;;  %v958_v44 = vld [vmem:[%s1173_s1 + $0x110] sm:$0xff]   ;;  %v957_v47 = vld [vmem:[%s1174_s0 + $0x58] ss:$20 sps:$4 sm:$0xff]  }
  0x10   :  { %801 = vmatpush3.bf16.msra.mxu0 %v920_v14  ;;  %v952_v42 = vld [vmem:[%s1174_s0 + $0x54] ss:$20 sps:$4 sm:$0xff]   ;;  %v954_v43 = vld [vmem:[%s1174_s0 + $0x5c] ss:$20 sps:$4 sm:$0xff]   ;;  %v961_v49 = vld [vmem:[%s1174_s0 + $0x84] ss:$20 sps:$4 sm:$0xff]  }
  0x11   :  { %841 = vmatpush3.bf16.msra.mxu1 %v921_v15  ;;  %802 = vmatprep.subr.bf16.mxu0 %v922_v16  ;;  %v956_v46 = vld [vmem:[%s1174_s0 + $0x50] ss:$20 sps:$4 sm:$0xff]   ;;  %v963_v50 = vld [vmem:[%s1174_s0 + $0x78] ss:$20 sps:$4 sm:$0xff]   ;;  %v964_v51 = vld [vmem:[%s1174_s0 + $0x80] ss:$20 sps:$4 sm:$0xff]  }
  0x12   :  { %842 = vmatprep.subr.bf16.mxu1 %v923_v17  ;;  %v959_v48 = vld [vmem:[%s1174_s0 + $0x7c] ss:$20 sps:$4 sm:$0xff]   ;;  %v967_v53 = vld [vmem:[%s1174_s0 + $0x60] ss:$20 sps:$4 sm:$0xff]   ;;  %v968_v54 = vld [vmem:[%s1174_s0 + $0x38] ss:$20 sps:$4 sm:$0xff]  }
  0x13   :  { %v966_v52 = vld [vmem:[%s1174_s0 + $0x10] ss:$20 sps:$4 sm:$0xff]   ;;  %v969_v55 = vld [vmem:[%s1174_s0 + $0x88] ss:$20 sps:$4 sm:$0xff]   ;;  %v694_v58 = vld [vmem:[%s1175_s2] ss:$0 sm:$0xff] }
  0x14   :  { %803 = vmatpush3.bf16.msra.mxu0 %v924_v18 }
  0x15   :  { %843 = vmatpush3.bf16.msra.mxu1 %v925_v19  ;;  %804 = vmatprep.subr.bf16.mxu0 %v926_v20 }
  0x16   :  { %844 = vmatprep.subr.bf16.mxu1 %v927_v21 }
  0x18   :  { %805 = vmatpush3.bf16.msra.mxu0 %v928_v22 }
  0x19   :  { %845 = vmatpush3.bf16.msra.mxu1 %v929_v23  ;;  %806 = vmatprep.subr.bf16.mxu0 %v930_v24 }
  0x1a   :  { %846 = vmatprep.subr.bf16.mxu1 %v931_v25 }
  0x1c   :  { %807 = vmatpush3.bf16.msra.mxu0 %v932_v26 }
  0x1d   :  { %847 = vmatpush3.bf16.msra.mxu1 %v933_v27  ;;  %808 = vmatprep.subr.bf16.mxu0 %v934_v28 }
  0x1e   :  { %848 = vmatprep.subr.bf16.mxu1 %v935_v29 }
  0x20   :  { %809 = vmatpush3.bf16.msra.mxu0 %v936_v30 }
  0x21   :  { %849 = vmatpush3.bf16.msra.mxu1 %v937_v31  ;;  %882 = vmatprep.subr.bf16.mxu0 %v944_v36 }
  0x22   :  { %898 = vmatprep.subr.bf16.mxu1 %v944_v36 }
  0x23   :  { %480 = vmatmul.mubr.bf16.vlgmr.msra.gmra.mrb[0].mxu0 %v938_v32 }
  0x24   :  { %545 = vmatmul.mubr.bf16.vlgmr.msra.gmra.mrb[0].mxu1 %v941_v34  ;;  %883 = vmatpush3.bf16.msra.mxu0 %v944_v36 }
  0x25   :  { %902 = vmatpush3.bf16.msra.mxu1 %v944_v36  ;;  %487 = vmatprep.mubr.bf16.mxu0 %v945_v37 }
  0x26   :  { %552 = vmatprep.mubr.bf16.mxu1 %v947_v38  ;;  %884 = vmatprep.subr.bf16.mxu0 %v951_v39 }
  0x27   :  { %899 = vmatprep.subr.bf16.mxu1 %v951_v39 }
  0x28   :  { %885 = vmatpush3.bf16.msra.mxu0 %v951_v39 }
  0x29   :  { %903 = vmatpush3.bf16.msra.mxu1 %v951_v39  ;;  %886 = vmatprep.subr.bf16.mxu0 %v958_v44 }
  0x2a   :  { %900 = vmatprep.subr.bf16.mxu1 %v958_v44 }
  0x2b   :  { %488 = vmatmul.mubr.bf16.gmra.mrb[4].mxu0 %v949_v40 }
  0x2c   :  { %553 = vmatmul.mubr.bf16.gmra.mrb[4].mxu1 %v950_v41  ;;  %495 = vmatprep.mubr.bf16.mxu0 %v952_v42 }
  0x2d   :  { %560 = vmatprep.mubr.bf16.mxu1 %v954_v43  ;;  %887 = vmatpush3.bf16.msra.mxu0 %v958_v44 }
  0x2e   :  { %904 = vmatpush3.bf16.msra.mxu1 %v958_v44  ;;  %888 = vmatprep.subr.bf16.mxu0 %v965_v45 }
  0x2f   :  { %901 = vmatprep.subr.bf16.mxu1 %v965_v45 }
  0x31   :  { %889 = vmatpush3.bf16.msra.mxu0 %v965_v45 }
  0x32   :  { %905 = vmatpush3.bf16.msra.mxu1 %v965_v45 }
  0x33   :  { %496 = vmatmul.mubr.bf16.gmra.mrb[8].mxu0 %v956_v46 }
  0x34   :  { %561 = vmatmul.mubr.bf16.gmra.mrb[8].mxu1 %v957_v47  ;;  %503 = vmatprep.mubr.bf16.mxu0 %v959_v48 }
  0x35   :  { %568 = vmatprep.mubr.bf16.mxu1 %v961_v49 }
  0x3b   :  { %504 = vmatmul.mubr.bf16.gmra.mrb[12].mxu0 %v963_v50 }
  0x3c   :  { %569 = vmatmul.mubr.bf16.gmra.mrb[12].mxu1 %v964_v51  ;;  %890 = vmatprep.mubr.msk.bf16.mxu0 %vm434_vm0, %v966_v52 }
  0x3d   :  { %894 = vmatprep.mubr.msk.bf16.mxu1 %vm434_vm0, %v967_v53 }
  0x43   :  { %891 = vmatmul.mubr.msk.bf16.vlgmr.msra.gmra.mrb[16].mxu0 %vm434_vm0, %v968_v54 }
  0x44   :  { %895 = vmatmul.mubr.msk.bf16.vlgmr.msra.gmra.mrb[16].mxu1 %vm434_vm0, %v969_v55 }
  0xf6   :  { %v810_v56 = vpop.f32.mrb[0].mxu0 }
  0xf7   :  { %v850_v57 = vpop.f32.mrb[0].mxu1  ;;  %v811_v59 = vpop.f32.mrb[1].mxu0 }
  0xf8   :  { %v812_v60 = vadd.f32 %v811_v59, %v810_v56  ;;  %v851_v61 = vpop.f32.mrb[1].mxu1  ;;  %v813_v62 = vpop.f32.mrb[2].mxu0 }
  0xf9   :  { %v852_v63 = vadd.f32 %v851_v61, %v850_v57  ;;  %v853_v0 = vpop.f32.mrb[2].mxu1  ;;  %v814_v1 = vpop.f32.mrb[3].mxu0 }
  0xfa   :  { %v482_v2 = vadd.f32 %v812_v60, %v694_v58  ;;  %v815_v3 = vadd.f32 %v814_v1, %v813_v62  ;;  %v854_v4 = vpop.f32.mrb[3].mxu1 }
  0xfb   :  { %v855_v5 = vadd.f32 %v854_v4, %v853_v0 }
  0xfc   :  { %v485_v6 = vadd.f32 %v815_v3, %v694_v58  ;;  %v547_v7 = vadd.f32 %v852_v63, %v482_v2 }
  0xfe   :  { %v816_v8 = vpop.f32.mrb[4].mxu0  ;;  %v550_v9 = vadd.f32 %v855_v5, %v485_v6 }
  0xff   :  { %v856_v10 = vpop.f32.mrb[4].mxu1  ;;  %v817_v11 = vpop.f32.mrb[5].mxu0 }
 0x100   :  { %v818_v12 = vadd.f32 %v817_v11, %v816_v8  ;;  %v857_v13 = vpop.f32.mrb[5].mxu1  ;;  %v819_v14 = vpop.f32.mrb[6].mxu0 }
 0x101   :  { %v858_v15 = vadd.f32 %v857_v13, %v856_v10  ;;  %v859_v16 = vpop.f32.mrb[6].mxu1  ;;  %v820_v17 = vpop.f32.mrb[7].mxu0 }
 0x102   :  { %v490_v18 = vadd.f32 %v818_v12, %v694_v58  ;;  %v821_v19 = vadd.f32 %v820_v17, %v819_v14  ;;  %v860_v20 = vpop.f32.mrb[7].mxu1 }
 0x103   :  { %v861_v21 = vadd.f32 %v860_v20, %v859_v16 }
 0x104   :  { %v493_v22 = vadd.f32 %v821_v19, %v694_v58  ;;  %v555_v23 = vadd.f32 %v858_v15, %v490_v18 }
 0x106   :  { %v822_v24 = vpop.f32.mrb[8].mxu0  ;;  %v558_v25 = vadd.f32 %v861_v21, %v493_v22 }
 0x107   :  { %v862_v26 = vpop.f32.mrb[8].mxu1  ;;  %v823_v27 = vpop.f32.mrb[9].mxu0 }
 0x108   :  { %v824_v28 = vadd.f32 %v823_v27, %v822_v24  ;;  %v863_v29 = vpop.f32.mrb[9].mxu1  ;;  %v825_v30 = vpop.f32.mrb[10].mxu0 }
 0x109   :  { %v864_v31 = vadd.f32 %v863_v29, %v862_v26  ;;  %v865_v32 = vpop.f32.mrb[10].mxu1  ;;  %v826_v33 = vpop.f32.mrb[11].mxu0 }
 0x10a   :  { %v498_v34 = vadd.f32 %v824_v28, %v694_v58  ;;  %v827_v35 = vadd.f32 %v826_v33, %v825_v30  ;;  %v866_v36 = vpop.f32.mrb[11].mxu1 }
 0x10b   :  { %v867_v37 = vadd.f32 %v866_v36, %v865_v32 }
 0x10c   :  { %v501_v38 = vadd.f32 %v827_v35, %v694_v58  ;;  %v563_v39 = vadd.f32 %v864_v31, %v498_v34 }
 0x10e   :  { %v828_v40 = vpop.f32.mrb[12].mxu0  ;;  %v566_v41 = vadd.f32 %v867_v37, %v501_v38 }
 0x10f   :  { %v868_v42 = vpop.f32.mrb[12].mxu1  ;;  %v829_v43 = vpop.f32.mrb[13].mxu0 }
 0x110   :  { %v830_v44 = vadd.f32 %v829_v43, %v828_v40  ;;  %v869_v45 = vpop.f32.mrb[13].mxu1  ;;  %v831_v46 = vpop.f32.mrb[14].mxu0 }
 0x111   :  { %v870_v47 = vadd.f32 %v869_v45, %v868_v42  ;;  %v871_v48 = vpop.f32.mrb[14].mxu1  ;;  %v832_v49 = vpop.f32.mrb[15].mxu0 }
 0x112   :  { %v506_v50 = vadd.f32 %v830_v44, %v694_v58  ;;  %v833_v51 = vadd.f32 %v832_v49, %v831_v46  ;;  %v872_v52 = vpop.f32.mrb[15].mxu1 }
 0x113   :  { %v873_v53 = vadd.f32 %v872_v52, %v871_v48 }
 0x114   :  { %v509_v54 = vadd.f32 %v833_v51, %v694_v58  ;;  %v571_v55 = vadd.f32 %v870_v47, %v506_v50 }
 0x116   :  { %v892_v56 = vpop.f32.mrb[16].mxu0  ;;  %v574_v57 = vadd.f32 %v873_v53, %v509_v54 }
 0x117   :  { %v620_v59 = vadd.f32 %v892_v56, %v555_v23  ;;  %v896_v60 = vpop.f32.mrb[16].mxu1  ;;  %v611_v61 = vpop.f32.mrb[17].mxu0 }
 0x118   :  { %v636_v62 = vadd.f32 %v896_v60, %v571_v55  ;;  %v612_v63 = vadd.f32 %v611_v61, %v547_v7  ;;  %v627_v0 = vpop.f32.mrb[17].mxu1  ;;  %v893_v1 = vpop.f32.mrb[18].mxu0 }
 0x119   :  { %v628_v2 = vadd.f32 %v627_v0, %v563_v39  ;;  %v623_v3 = vadd.f32 %v893_v1, %v558_v25  ;;  %v897_v4 = vpop.f32.mrb[18].mxu1  ;;  %v614_v5 = vpop.f32.mrb[19].mxu0  ;;  %v644_v11 = vmax.f32 %v620_v59, 0.0 }
 0x11a   :  { %v639_v6 = vadd.f32 %v897_v4, %v574_v57  ;;  %v615_v8 = vadd.f32 %v614_v5, %v550_v9  ;;  %v630_v10 = vpop.f32.mrb[19].mxu1  ;;  %v648_v13 = vmax.f32 %v636_v62, 0.0  ;;  %v642_v14 = vmax.f32 %v612_v63, 0.0 }
 0x11b   :  { %v645_v12 = vmax.f32 %v623_v3, 0.0  ;;  %v631_v58 = vadd.f32 %v630_v10, %v566_v41  ;;  %v646_v17 = vmax.f32 %v628_v2, 0.0 }
 0x11c   :  { %v649_v15 = vmax.f32 %v639_v6, 0.0  ;;  %v643_v16 = vmax.f32 %v615_v8, 0.0 }
 0x11d   :  { %v779_v18 = vpack.c.bf16 %v645_v12, %v644_v11  ;;  %v647_v19 = vmax.f32 %v631_v58, 0.0 }
 0x11e   :  { %v789_v7 = vpack.c.bf16 %v649_v15, %v648_v13  ;;  %v774_v20 = vpack.c.bf16 %v643_v16, %v642_v14 }
 0x11f   :  { %791 = vst [vmem:[%s1176_s3 + $0x8] sm:$0xff] %v779_v18   ;;  %v784_v21 = vpack.c.bf16 %v647_v19, %v646_v17 }
 0x120   :  { %793 = vst [vmem:[%s1176_s3 + $0x18] sm:$0xff] %v789_v7   ;;  %775 = vst [vmem:[%s1176_s3] sm:$0xff] %v774_v20  }
 0x121   :  { %792 = vst [vmem:[%s1176_s3 + $0x10] sm:$0xff] %v784_v21  }

// kernel: _lambda_.11
= control target key start
LH: loop header
LB: loop body
LE: loop exit
PB: predicated region body
PF: predicated region fallthrough
CT: control target
= control target key end

     0   :  { %vm446_vm0 = vcmask 523264   ;;  %s4983_s1 = inlined_call_operand.vmem [shape: bf16[576,128], index: 1, kind: input, shape index: {}]   ;;  %s4984_s0 = inlined_call_operand.vmem [shape: bf16[64,576], index: 0, kind: input, shape index: {}]   ;;  %s4985_s5 = inlined_call_operand.vmem [shape: bf16[8,64,64], index: 5, kind: input, shape index: {}]   ;;  %s4986_s3 = inlined_call_operand.vmem [shape: bf16[9,128,128], index: 3, kind: input, shape index: {}]   ;;  %s4987_s2 = inlined_call_operand.vmem [shape: f32[1,128], index: 2, kind: input, shape index: {}, may-alias: {2,4}]   ;;  %s4988_s6 = inlined_call_operand.vmem [shape: bf16[64,128], index: 6, kind: input, shape index: {}]   ;;  %s4989_s4 = inlined_call_operand.vmem [shape: f32[1,128], index: 4, kind: input, shape index: {}, may-alias: {2,4}]   ;;  %s4990_s7 = inlined_call_operand.vmem [shape: bf16[64,128], index: 7, kind: output, shape index: {}]  }
   0x1   :  { %v3985_v0 = vld [vmem:[%s4983_s1 + $0x40] sm:$0xff]   ;;  %v3987_v2 = vld [vmem:[%s4983_s1 + $0x48] sm:$0xff]   ;;  %v3989_v4 = vld [vmem:[%s4983_s1 + $0x50] sm:$0xff]  }
   0x2   :  { %v3986_v1 = vld [vmem:[%s4983_s1] sm:$0xff]   ;;  %3301 = vmatprep.subr.bf16.mxu0 %v3985_v0  ;;  %v3988_v3 = vld [vmem:[%s4983_s1 + $0x8] sm:$0xff]   ;;  %v3990_v5 = vld [vmem:[%s4983_s1 + $0x10] sm:$0xff]  }
   0x3   :  { %3302 = vmatpush3.bf16.msra.mxu0 %v3986_v1  ;;  %v3991_v6 = vld [vmem:[%s4983_s1 + $0x58] sm:$0xff]   ;;  %v3993_v8 = vld [vmem:[%s4983_s1 + $0x60] sm:$0xff]   ;;  %v3995_v10 = vld [vmem:[%s4983_s1 + $0x68] sm:$0xff]  }
   0x4   :  { %3303 = vmatprep.subr.bf16.mxu0 %v3987_v2  ;;  %v3992_v7 = vld [vmem:[%s4983_s1 + $0x18] sm:$0xff]   ;;  %v3994_v9 = vld [vmem:[%s4983_s1 + $0x20] sm:$0xff]   ;;  %v3996_v12 = vld [vmem:[%s4983_s1 + $0x28] sm:$0xff]  }
   0x5   :  { %v4003_v11 = vld [vmem:[%s4984_s0 + $0x4] ss:$20 sps:$4 sm:$0xff]   ;;  %v3997_v13 = vld [vmem:[%s4983_s1 + $0x70] sm:$0xff]   ;;  %v4008_v20 = vld [vmem:[%s4984_s0 + $0x2c] ss:$20 sps:$4 sm:$0xff]  }
   0x6   :  { %491 = vmatprep.mubr.bf16.mxu0 %v4003_v11  ;;  %v3998_v14 = vld [vmem:[%s4983_s1 + $0x30] sm:$0xff]   ;;  %v3999_v15 = vld [vmem:[%s4983_s1 + $0x78] sm:$0xff]   ;;  %v4004_v17 = vld [vmem:[%s4983_s1 + $0xc0] sm:$0xff]  }
   0x7   :  { %3304 = vmatpush3.bf16.msra.mxu0 %v3988_v3  ;;  %v4000_v16 = vld [vmem:[%s4983_s1 + $0x38] sm:$0xff]   ;;  %v4001_v18 = vld [vmem:[%s4984_s0] ss:$20 sps:$4 sm:$0xff]   ;;  %v4006_v21 = vld [vmem:[%s4983_s1 + $0xc8] sm:$0xff]  }
   0x8   :  { %3305 = vmatprep.subr.bf16.mxu0 %v3989_v4  ;;  %v4005_v19 = vld [vmem:[%s4983_s1 + $0x80] sm:$0xff]   ;;  %v4007_v22 = vld [vmem:[%s4983_s1 + $0x88] sm:$0xff]   ;;  %v4011_v23 = vld [vmem:[%s4983_s1 + $0xd0] sm:$0xff]  }
   0x9   :  { %v4010_v24 = vld [vmem:[%s4984_s0 + $0x28] ss:$20 sps:$4 sm:$0xff]   ;;  %v4012_v25 = vld [vmem:[%s4983_s1 + $0x90] sm:$0xff]   ;;  %v4018_v29 = vld [vmem:[%s4983_s1 + $0xe0] sm:$0xff]  }
   0xa   :  { %v4015_v26 = vld [vmem:[%s4984_s0 + $0x54] ss:$20 sps:$4 sm:$0xff]   ;;  %v4013_v27 = vld [vmem:[%s4983_s1 + $0xd8] sm:$0xff]   ;;  %v4017_v30 = vld [vmem:[%s4984_s0 + $0x50] ss:$20 sps:$4 sm:$0xff]  }
   0xb   :  { %3306 = vmatpush3.bf16.msra.mxu0 %v3990_v5  ;;  %v4014_v28 = vld [vmem:[%s4983_s1 + $0x98] sm:$0xff]   ;;  %v4019_v31 = vld [vmem:[%s4983_s1 + $0xa0] sm:$0xff]   ;;  %v4020_v33 = vld [vmem:[%s4983_s1 + $0xe8] sm:$0xff]  }
   0xc   :  { %3307 = vmatprep.subr.bf16.mxu0 %v3991_v6  ;;  %v4022_v32 = vld [vmem:[%s4984_s0 + $0x7c] ss:$20 sps:$4 sm:$0xff]   ;;  %v4021_v34 = vld [vmem:[%s4983_s1 + $0xa8] sm:$0xff]   ;;  %v4032_v41 = vld [vmem:[%s4983_s1 + $0x100] sm:$0xff]  }
   0xd   :  { %v4025_v35 = vld [vmem:[%s4983_s1 + $0xf0] sm:$0xff]   ;;  %v4024_v36 = vld [vmem:[%s4984_s0 + $0x78] ss:$20 sps:$4 sm:$0xff]   ;;  %v4029_v42 = vld [vmem:[%s4984_s0 + $0x8] ss:$20 sps:$4 sm:$0xff]  }
   0xe   :  { %v4026_v37 = vld [vmem:[%s4983_s1 + $0xb0] sm:$0xff]   ;;  %v4031_v38 = vld [vmem:[%s4984_s0 + $0xc] ss:$20 sps:$4 sm:$0xff]   ;;  %v4027_v39 = vld [vmem:[%s4983_s1 + $0xf8] sm:$0xff]  }
   0xf   :  { %3308 = vmatpush3.bf16.msra.mxu0 %v3992_v7  ;;  %v4028_v40 = vld [vmem:[%s4983_s1 + $0xb8] sm:$0xff]   ;;  %v4033_v43 = vld [vmem:[%s4984_s0 + $0x34] ss:$20 sps:$4 sm:$0xff]   ;;  %v4035_v46 = vld [vmem:[%s4984_s0 + $0x30] ss:$20 sps:$4 sm:$0xff]  }
  0x10   :  { %3309 = vmatprep.subr.bf16.mxu0 %v3993_v8  ;;  %v4036_v44 = vld [vmem:[%s4983_s1 + $0x108] sm:$0xff]   ;;  %v4040_v45 = vld [vmem:[%s4983_s1 + $0x110] sm:$0xff]   ;;  %v4044_v48 = vld [vmem:[%s4983_s1 + $0x118] sm:$0xff]  }
  0x11   :  { %v4037_v47 = vld [vmem:[%s4984_s0 + $0x5c] ss:$20 sps:$4 sm:$0xff]   ;;  %v4039_v49 = vld [vmem:[%s4984_s0 + $0x58] ss:$20 sps:$4 sm:$0xff]   ;;  %v4043_v51 = vld [vmem:[%s4984_s0 + $0x80] ss:$20 sps:$4 sm:$0xff]  }
  0x12   :  { %v4041_v50 = vld [vmem:[%s4984_s0 + $0x84] ss:$20 sps:$4 sm:$0xff]   ;;  %v4047_v54 = vld [vmem:[%s4984_s0 + $0x60] ss:$20 sps:$4 sm:$0xff]   ;;  %v4048_v55 = vld [vmem:[%s4984_s0 + $0x88] ss:$20 sps:$4 sm:$0xff]  }
  0x13   :  { %3310 = vmatpush3.bf16.msra.mxu0 %v3994_v9  ;;  %v4045_v52 = vld [vmem:[%s4984_s0 + $0x10] ss:$20 sps:$4 sm:$0xff]   ;;  %v4046_v53 = vld [vmem:[%s4984_s0 + $0x38] ss:$20 sps:$4 sm:$0xff]  }
  0x14   :  { %3311 = vmatprep.subr.bf16.mxu0 %v3995_v10  ;;  %v4049_v56 = vld [vmem:[%s4985_s5] sm:$0xff]   ;;  %v4066_v1 = vld [vmem:[%s4986_s3 + $0x8] sm:$0xff]   ;;  %v4067_v6 = vld [vmem:[%s4986_s3 + $0x10] sm:$0xff]  }
  0x15   :  { %v4065_v0 = vld [vmem:[%s4986_s3] sm:$0xff]   ;;  %v4068_v9 = vld [vmem:[%s4986_s3 + $0x18] sm:$0xff]  }
  0x16   :  { %3633 = vmatprep.subr.bf16.mxu1 %v4065_v0 }
  0x17   :  { %3312 = vmatpush3.bf16.msra.mxu0 %v3996_v12  ;;  %3634 = vmatpush3.bf16.msra.mxu1 %v4065_v0 }
  0x18   :  { %3313 = vmatprep.subr.bf16.mxu0 %v3997_v13  ;;  %3635 = vmatprep.subr.bf16.mxu1 %v4066_v1 }
  0x1b   :  { %3314 = vmatpush3.bf16.msra.mxu0 %v3998_v14  ;;  %3636 = vmatpush3.bf16.msra.mxu1 %v4066_v1  ;;  %v4069_v14 = vld [vmem:[%s4986_s3 + $0x20] sm:$0xff]  }
  0x1c   :  { %3315 = vmatprep.subr.bf16.mxu0 %v3999_v15  ;;  %3637 = vmatprep.subr.bf16.mxu1 %v4067_v6 }
  0x1f   :  { %3316 = vmatpush3.bf16.msra.mxu0 %v4000_v16  ;;  %3638 = vmatpush3.bf16.msra.mxu1 %v4067_v6 }
  0x20   :  { %3341 = vmatprep.subr.bf16.mxu0 %v4004_v17  ;;  %3639 = vmatprep.subr.bf16.mxu1 %v4068_v9  ;;  %v4070_v17 = vld [vmem:[%s4986_s3 + $0x28] sm:$0xff]  }
  0x22   :  { %492 = vmatmul.mubr.bf16.vlgmr.msra.gmra.mrb[0].mxu0 %v4001_v18 }
  0x23   :  { %3342 = vmatpush3.bf16.msra.mxu0 %v4005_v19  ;;  %499 = vmatprep.mubr.bf16.mxu0 %v4008_v20 }
  0x24   :  { %3343 = vmatprep.subr.bf16.mxu0 %v4006_v21  ;;  %3640 = vmatpush3.bf16.msra.mxu1 %v4068_v9 }
  0x25   :  { %3641 = vmatprep.subr.bf16.mxu1 %v4069_v14 }
  0x27   :  { %3344 = vmatpush3.bf16.msra.mxu0 %v4007_v22  ;;  %v4071_v22 = vld [vmem:[%s4986_s3 + $0x30] sm:$0xff]  }
  0x28   :  { %3345 = vmatprep.subr.bf16.mxu0 %v4011_v23  ;;  %3642 = vmatpush3.bf16.msra.mxu1 %v4069_v14 }
  0x29   :  { %3643 = vmatprep.subr.bf16.mxu1 %v4070_v17 }
  0x2a   :  { %500 = vmatmul.mubr.bf16.gmra.mrb[4].mxu0 %v4010_v24  ;;  %v2861_v24 = vld [vmem:[%s4987_s2] ss:$0 sm:$0xff] }
  0x2b   :  { %3346 = vmatpush3.bf16.msra.mxu0 %v4012_v25  ;;  %507 = vmatprep.mubr.bf16.mxu0 %v4015_v26 }
  0x2c   :  { %3347 = vmatprep.subr.bf16.mxu0 %v4013_v27  ;;  %3644 = vmatpush3.bf16.msra.mxu1 %v4070_v17 }
  0x2d   :  { %3645 = vmatprep.subr.bf16.mxu1 %v4071_v22 }
  0x2f   :  { %3348 = vmatpush3.bf16.msra.mxu0 %v4014_v28 }
  0x30   :  { %3349 = vmatprep.subr.bf16.mxu0 %v4018_v29  ;;  %3646 = vmatpush3.bf16.msra.mxu1 %v4071_v22 }
  0x32   :  { %508 = vmatmul.mubr.bf16.gmra.mrb[8].mxu0 %v4017_v30 }
  0x33   :  { %3350 = vmatpush3.bf16.msra.mxu0 %v4019_v31  ;;  %515 = vmatprep.mubr.bf16.mxu0 %v4022_v32 }
  0x34   :  { %3351 = vmatprep.subr.bf16.mxu0 %v4020_v33 }
  0x37   :  { %3352 = vmatpush3.bf16.msra.mxu0 %v4021_v34 }
  0x38   :  { %3353 = vmatprep.subr.bf16.mxu0 %v4025_v35 }
  0x3a   :  { %516 = vmatmul.mubr.bf16.gmra.mrb[12].mxu0 %v4024_v36 }
  0x3b   :  { %3354 = vmatpush3.bf16.msra.mxu0 %v4026_v37  ;;  %556 = vmatprep.mubr.bf16.mxu0 %v4031_v38 }
  0x3c   :  { %3355 = vmatprep.subr.bf16.mxu0 %v4027_v39 }
  0x3f   :  { %3356 = vmatpush3.bf16.msra.mxu0 %v4028_v40 }
  0x40   :  { %3561 = vmatprep.subr.bf16.mxu0 %v4032_v41 }
  0x42   :  { %557 = vmatmul.mubr.bf16.vlgmr.msra.gmra.mrb[16].mxu0 %v4029_v42 }
  0x43   :  { %3562 = vmatpush3.bf16.msra.mxu0 %v4032_v41  ;;  %564 = vmatprep.mubr.bf16.mxu0 %v4033_v43 }
  0x44   :  { %3563 = vmatprep.subr.bf16.mxu0 %v4036_v44 }
  0x47   :  { %3564 = vmatpush3.bf16.msra.mxu0 %v4036_v44 }
  0x48   :  { %3565 = vmatprep.subr.bf16.mxu0 %v4040_v45 }
  0x4a   :  { %565 = vmatmul.mubr.bf16.gmra.mrb[20].mxu0 %v4035_v46 }
  0x4b   :  { %572 = vmatprep.mubr.bf16.mxu0 %v4037_v47  ;;  %3566 = vmatpush3.bf16.msra.mxu0 %v4040_v45 }
  0x4c   :  { %3567 = vmatprep.subr.bf16.mxu0 %v4044_v48 }
  0x4f   :  { %3568 = vmatpush3.bf16.msra.mxu0 %v4044_v48 }
  0x52   :  { %573 = vmatmul.mubr.bf16.gmra.mrb[24].mxu0 %v4039_v49 }
  0x53   :  { %580 = vmatprep.mubr.bf16.mxu0 %v4041_v50 }
  0x5a   :  { %581 = vmatmul.mubr.bf16.gmra.mrb[28].mxu0 %v4043_v51 }
  0x5b   :  { %3569 = vmatprep.mubr.msk.bf16.mxu0 %vm446_vm0, %v4045_v52 }
  0x62   :  { %3570 = vmatmul.mubr.msk.bf16.vlgmr.msra.gmra.mrb[32].mxu0 %vm446_vm0, %v4046_v53 }
  0x63   :  { %3573 = vmatprep.mubr.msk.bf16.mxu0 %vm446_vm0, %v4047_v54 }
  0x6a   :  { %3574 = vmatmul.mubr.msk.bf16.gmra.mrb[36].mxu0 %vm446_vm0, %v4048_v55 }
  0x6b   :  { %3585 = vmatprep.mubr.msk.bf16.mxu0 %vm446_vm0, %v4049_v56 }
  0xf5   :  { %v3317_v57 = vpop.f32.mrb[0].mxu0 }
  0xf6   :  { %v3318_v58 = vpop.f32.mrb[1].mxu0 }
  0xf7   :  { %v3319_v59 = vadd.f32 %v3318_v58, %v3317_v57  ;;  %v3320_v60 = vpop.f32.mrb[2].mxu0 }
  0xf8   :  { %v3321_v61 = vpop.f32.mrb[3].mxu0 }
  0xf9   :  { %v3322_v62 = vadd.f32 %v3321_v61, %v3320_v60  ;;  %v494_v27 = vadd.f32 %v3319_v59, %v2861_v24 }
  0xfb   :  { %v497_v31 = vadd.f32 %v3322_v62, %v2861_v24 }
  0xfd   :  { %v3323_v63 = vpop.f32.mrb[4].mxu0 }
  0xfe   :  { %v3324_v2 = vpop.f32.mrb[5].mxu0 }
  0xff   :  { %v3325_v3 = vadd.f32 %v3324_v2, %v3323_v63  ;;  %v3326_v4 = vpop.f32.mrb[6].mxu0 }
 0x100   :  { %v3327_v5 = vpop.f32.mrb[7].mxu0 }
 0x101   :  { %v3328_v7 = vadd.f32 %v3327_v5, %v3326_v4  ;;  %v502_v37 = vadd.f32 %v3325_v3, %v2861_v24 }
 0x103   :  { %v505_v41 = vadd.f32 %v3328_v7, %v2861_v24 }
 0x105   :  { %v3329_v8 = vpop.f32.mrb[8].mxu0 }
 0x106   :  { %v3330_v10 = vpop.f32.mrb[9].mxu0 }
 0x107   :  { %v3331_v11 = vadd.f32 %v3330_v10, %v3329_v8  ;;  %v3332_v12 = vpop.f32.mrb[10].mxu0 }
 0x108   :  { %v3333_v13 = vpop.f32.mrb[11].mxu0 }
 0x109   :  { %v3334_v15 = vadd.f32 %v3333_v13, %v3332_v12  ;;  %v510_v47 = vadd.f32 %v3331_v11, %v2861_v24 }
 0x10b   :  { %v513_v51 = vadd.f32 %v3334_v15, %v2861_v24 }
 0x10d   :  { %v3335_v16 = vpop.f32.mrb[12].mxu0 }
 0x10e   :  { %v3336_v18 = vpop.f32.mrb[13].mxu0 }
 0x10f   :  { %v3337_v19 = vadd.f32 %v3336_v18, %v3335_v16  ;;  %v3338_v20 = vpop.f32.mrb[14].mxu0 }
 0x110   :  { %v3339_v21 = vpop.f32.mrb[15].mxu0 }
 0x111   :  { %v3340_v23 = vadd.f32 %v3339_v21, %v3338_v20  ;;  %v518_v57 = vadd.f32 %v3337_v19, %v2861_v24 }
 0x113   :  { %v521_v61 = vadd.f32 %v3340_v23, %v2861_v24 }
 0x115   :  { %v3357_v25 = vpop.f32.mrb[16].mxu0 }
 0x116   :  { %v3358_v26 = vpop.f32.mrb[17].mxu0 }
 0x117   :  { %v3359_v28 = vadd.f32 %v3358_v26, %v3357_v25  ;;  %v3360_v29 = vpop.f32.mrb[18].mxu0 }
 0x118   :  { %v3361_v30 = vpop.f32.mrb[19].mxu0 }
 0x119   :  { %v3362_v32 = vadd.f32 %v3361_v30, %v3360_v29  ;;  %v559_v33 = vadd.f32 %v3359_v28, %v494_v27  ;;  %v4050_v29 = vld [vmem:[%s4985_s5 + $0x8] sm:$0xff]   ;;  %v4051_v30 = vld [vmem:[%s4985_s5 + $0x10] sm:$0xff]  }
 0x11b   :  { %v562_v34 = vadd.f32 %v3362_v32, %v497_v31  ;;  %v4052_v31 = vld [vmem:[%s4985_s5 + $0x18] sm:$0xff]   ;;  %v4053_v32 = vld [vmem:[%s4985_s5 + $0x20] sm:$0xff]  }
 0x11d   :  { %v3363_v35 = vpop.f32.mrb[20].mxu0 }
 0x11e   :  { %v3364_v36 = vpop.f32.mrb[21].mxu0 }
 0x11f   :  { %v3365_v38 = vadd.f32 %v3364_v36, %v3363_v35  ;;  %v3366_v39 = vpop.f32.mrb[22].mxu0  ;;  %v4057_v35 = vld [vmem:[%s4985_s5 + $0x30] sm:$0xff]   ;;  %v4056_v36 = vld [vmem:[%s4986_s3 + $0x48] sm:$0xff]  }
 0x120   :  { %v3367_v40 = vpop.f32.mrb[23].mxu0 }
 0x121   :  { %v3368_v42 = vadd.f32 %v3367_v40, %v3366_v39  ;;  %v567_v43 = vadd.f32 %v3365_v38, %v502_v37  ;;  %v4059_v37 = vld [vmem:[%s4986_s3 + $0x50] sm:$0xff]   ;;  %v4058_v38 = vld [vmem:[%s4985_s5 + $0x38] sm:$0xff]   ;;  %v4061_v40 = vld [vmem:[%s4986_s3 + $0x60] sm:$0xff]  }
 0x122   :  { %v4060_v39 = vld [vmem:[%s4986_s3 + $0x58] sm:$0xff]  }
 0x123   :  { %v570_v44 = vadd.f32 %v3368_v42, %v505_v41  ;;  %v4062_v41 = vld [vmem:[%s4986_s3 + $0x68] sm:$0xff]   ;;  %v4063_v42 = vld [vmem:[%s4986_s3 + $0x70] sm:$0xff]  }
 0x125   :  { %v3369_v45 = vpop.f32.mrb[24].mxu0 }
 0x126   :  { %v3370_v46 = vpop.f32.mrb[25].mxu0 }
 0x127   :  { %v3371_v48 = vadd.f32 %v3370_v46, %v3369_v45  ;;  %v3372_v49 = vpop.f32.mrb[26].mxu0  ;;  %v4093_v45 = vld [vmem:[%s4986_s3 + $0x80] sm:$0xff]  }
 0x128   :  { %v3373_v50 = vpop.f32.mrb[27].mxu0 }
 0x129   :  { %v3374_v52 = vadd.f32 %v3373_v50, %v3372_v49  ;;  %v575_v53 = vadd.f32 %v3371_v48, %v510_v47 }
 0x12b   :  { %v578_v54 = vadd.f32 %v3374_v52, %v513_v51  ;;  %v4095_v52 = vld [vmem:[%s4986_s3 + $0x88] sm:$0xff]  }
 0x12d   :  { %v3375_v55 = vpop.f32.mrb[28].mxu0 }
 0x12e   :  { %v3376_v56 = vpop.f32.mrb[29].mxu0 }
 0x12f   :  { %v3377_v58 = vadd.f32 %v3376_v56, %v3375_v55  ;;  %v3378_v59 = vpop.f32.mrb[30].mxu0  ;;  %v4097_v55 = vld [vmem:[%s4986_s3 + $0x90] sm:$0xff]  }
 0x130   :  { %v3379_v60 = vpop.f32.mrb[31].mxu0 }
 0x131   :  { %v3380_v62 = vadd.f32 %v3379_v60, %v3378_v59  ;;  %v583_v63 = vadd.f32 %v3377_v58, %v518_v57 }
 0x133   :  { %v586_v0 = vadd.f32 %v3380_v62, %v521_v61 }
 0x135   :  { %v3571_v1 = vpop.f32.mrb[32].mxu0 }
 0x136   :  { %v632_v2 = vadd.f32 %v3571_v1, %v567_v43  ;;  %v623_v3 = vpop.f32.mrb[33].mxu0  ;;  %v4064_v43 = vld [vmem:[%s4986_s3 + $0x78] sm:$0xff]  }
 0x137   :  { %v624_v4 = vadd.f32 %v623_v3, %v559_v33  ;;  %v3572_v5 = vpop.f32.mrb[34].mxu0  ;;  %v4055_v33 = vld [vmem:[%s4986_s3 + $0x40] sm:$0xff]  }
 0x138   :  { %v635_v6 = vadd.f32 %v3572_v5, %v570_v44  ;;  %v626_v7 = vpop.f32.mrb[35].mxu0  ;;  %v656_v9 = vmax.f32 %v632_v2, 0.0  ;;  %v4072_v44 = vld [vmem:[%s4986_s3 + $0x38] sm:$0xff]  }
 0x139   :  { %v627_v8 = vadd.f32 %v626_v7, %v562_v34  ;;  %v654_v11 = vmax.f32 %v624_v4, 0.0  ;;  %v4054_v34 = vld [vmem:[%s4985_s5 + $0x28] sm:$0xff]   ;;  %3647 = vmatprep.subr.bf16.mxu1 %v4072_v44 }
 0x13a   :  { %v657_v10 = vmax.f32 %v635_v6, 0.0  ;;  %3648 = vmatpush3.bf16.msra.mxu1 %v4072_v44 }
 0x13b   :  { %v655_v12 = vmax.f32 %v627_v8, 0.0  ;;  %3673 = vmatprep.subr.bf16.mxu1 %v4093_v45  ;;  %v4073_v8 = vld [vmem:[%s4985_s5 + $0x40] sm:$0xff]  }
 0x13c   :  { %v4393_v13 = vpack.c.bf16 %v657_v10, %v656_v9  ;;  %v4074_v9 = vld [vmem:[%s4985_s5 + $0x48] sm:$0xff]   ;;  %v4075_v10 = vld [vmem:[%s4985_s5 + $0x50] sm:$0xff]  }
 0x13d   :  { %v4395_v14 = vpack.c.bf16 %v655_v12, %v654_v11  ;;  %v3575_v15 = vpop.f32.mrb[36].mxu0  ;;  %v4076_v11 = vld [vmem:[%s4985_s5 + $0x58] sm:$0xff]   ;;  %v4077_v12 = vld [vmem:[%s4985_s5 + $0x60] sm:$0xff]  }
 0x13e   :  { %v648_v16 = vadd.f32 %v3575_v15, %v583_v63  ;;  %v639_v17 = vpop.f32.mrb[37].mxu0  ;;  %v4078_v15 = vld [vmem:[%s4985_s5 + $0x68] sm:$0xff]  }
 0x13f   :  { %v640_v18 = vadd.f32 %v639_v17, %v575_v53  ;;  %v3576_v19 = vpop.f32.mrb[38].mxu0  ;;  %3577 = vmatprep.subr.bf16.mxu0 %v4395_v14  ;;  %v4080_v17 = vld [vmem:[%s4985_s5 + $0x78] sm:$0xff]  }
 0x140   :  { %v651_v20 = vadd.f32 %v3576_v19, %v586_v0  ;;  %v642_v21 = vpop.f32.mrb[39].mxu0  ;;  %3578 = vmatpush3.bf16.msra.mxu0 %v4395_v14  ;;  %v660_v23 = vmax.f32 %v648_v16, 0.0  ;;  %v4079_v16 = vld [vmem:[%s4985_s5 + $0x70] sm:$0xff]   ;;  %v4082_v19 = vld [vmem:[%s4985_s5 + $0x88] sm:$0xff]  }
 0x141   :  { %v643_v22 = vadd.f32 %v642_v21, %v578_v54  ;;  %3579 = vmatprep.subr.bf16.mxu0 %v4393_v13  ;;  %v658_v25 = vmax.f32 %v640_v18, 0.0  ;;  %v4081_v18 = vld [vmem:[%s4985_s5 + $0x80] sm:$0xff]   ;;  %v4084_v21 = vld [vmem:[%s4985_s5 + $0x98] sm:$0xff]  }
 0x142   :  { %v661_v24 = vmax.f32 %v651_v20, 0.0  ;;  %v4083_v20 = vld [vmem:[%s4985_s5 + $0x90] sm:$0xff]  }
 0x143   :  { %v659_v26 = vmax.f32 %v643_v22, 0.0  ;;  %v4085_v22 = vld [vmem:[%s4985_s5 + $0xa0] sm:$0xff]  }
 0x144   :  { %v4400_v27 = vpack.c.bf16 %v661_v24, %v660_v23  ;;  %3580 = vmatpush3.bf16.msra.mxu0 %v4393_v13  ;;  %v4086_v23 = vld [vmem:[%s4985_s5 + $0xa8] sm:$0xff]   ;;  %v4087_v24 = vld [vmem:[%s4985_s5 + $0xb0] sm:$0xff]  }
 0x145   :  { %v4403_v28 = vpack.c.bf16 %v659_v26, %v658_v25  ;;  %v4088_v25 = vld [vmem:[%s4985_s5 + $0xb8] sm:$0xff]   ;;  %v4089_v26 = vld [vmem:[%s4985_s5 + $0xc0] sm:$0xff]  }
 0x147   :  { %3581 = vmatprep.subr.bf16.mxu0 %v4403_v28 }
 0x148   :  { %3582 = vmatpush3.bf16.msra.mxu0 %v4403_v28 }
 0x149   :  { %3583 = vmatprep.subr.bf16.mxu0 %v4400_v27 }
 0x14c   :  { %3584 = vmatpush3.bf16.msra.mxu0 %v4400_v27 }
 0x14d   :  { %3593 = vmatprep.subr.bf16.mxu0 %v4395_v14 }
 0x14f   :  { %3586 = vmatmul.mubr.msk.bf16.vlgmr.msra.gmra.mrb[40].mxu0 %vm446_vm0, %v4050_v29  ;;  %v4090_v29 = vld [vmem:[%s4985_s5 + $0xc8] sm:$0xff]  }
 0x150   :  { %3594 = vmatpush3.bf16.msra.mxu0 %v4395_v14  ;;  %3589 = vmatprep.mubr.msk.bf16.mxu0 %vm446_vm0, %v4051_v30  ;;  %v4091_v30 = vld [vmem:[%s4985_s5 + $0xd0] sm:$0xff]  }
 0x151   :  { %3595 = vmatprep.subr.bf16.mxu0 %v4393_v13 }
 0x154   :  { %3596 = vmatpush3.bf16.msra.mxu0 %v4393_v13 }
 0x155   :  { %3597 = vmatprep.subr.bf16.mxu0 %v4403_v28 }
 0x157   :  { %3590 = vmatmul.mubr.msk.bf16.gmra.mrb[44].mxu0 %vm446_vm0, %v4052_v31  ;;  %v4092_v31 = vld [vmem:[%s4985_s5 + $0xd8] sm:$0xff]  }
 0x158   :  { %3598 = vmatpush3.bf16.msra.mxu0 %v4403_v28  ;;  %3601 = vmatprep.mubr.msk.bf16.mxu0 %vm446_vm0, %v4053_v32  ;;  %v4099_v32 = vld [vmem:[%s4986_s3 + $0x98] sm:$0xff]  }
 0x159   :  { %3599 = vmatprep.subr.bf16.mxu0 %v4400_v27 }
 0x15c   :  { %3600 = vmatpush3.bf16.msra.mxu0 %v4400_v27 }
 0x15d   :  { %3609 = vmatprep.subr.bf16.mxu0 %v4055_v33 }
 0x15f   :  { %3602 = vmatmul.mubr.msk.bf16.vlgmr.msra.gmra.mrb[48].mxu0 %vm446_vm0, %v4054_v34  ;;  %v4101_v34 = vld [vmem:[%s4986_s3 + $0xa0] sm:$0xff]  }
 0x160   :  { %3610 = vmatpush3.bf16.msra.mxu0 %v4055_v33  ;;  %3605 = vmatprep.mubr.msk.bf16.mxu0 %vm446_vm0, %v4057_v35  ;;  %v4094_v33 = vld [vmem:[%s4985_s5 + $0xe0] sm:$0xff]   ;;  %v4096_v35 = vld [vmem:[%s4985_s5 + $0xe8] sm:$0xff]  }
 0x161   :  { %3611 = vmatprep.subr.bf16.mxu0 %v4056_v36 }
 0x164   :  { %3612 = vmatpush3.bf16.msra.mxu0 %v4056_v36  ;;  %v4102_v36 = vld [vmem:[%s4986_s3 + $0xa8] sm:$0xff]  }
 0x165   :  { %3613 = vmatprep.subr.bf16.mxu0 %v4059_v37 }
 0x167   :  { %3606 = vmatmul.mubr.msk.bf16.gmra.mrb[52].mxu0 %vm446_vm0, %v4058_v38  ;;  %v4103_v38 = vld [vmem:[%s4986_s3 + $0xb0] sm:$0xff]  }
 0x168   :  { %3614 = vmatpush3.bf16.msra.mxu0 %v4059_v37  ;;  %v4098_v37 = vld [vmem:[%s4985_s5 + $0xf0] sm:$0xff]  }
 0x169   :  { %3615 = vmatprep.subr.bf16.mxu0 %v4060_v39 }
 0x16c   :  { %3616 = vmatpush3.bf16.msra.mxu0 %v4060_v39  ;;  %v4100_v39 = vld [vmem:[%s4985_s5 + $0xf8] sm:$0xff]  }
 0x16d   :  { %3617 = vmatprep.subr.bf16.mxu0 %v4061_v40 }
 0x170   :  { %3618 = vmatpush3.bf16.msra.mxu0 %v4061_v40  ;;  %v4104_v40 = vld [vmem:[%s4986_s3 + $0xb8] sm:$0xff]  }
 0x171   :  { %3619 = vmatprep.subr.bf16.mxu0 %v4062_v41 }
 0x174   :  { %3620 = vmatpush3.bf16.msra.mxu0 %v4062_v41  ;;  %v4105_v41 = vld [vmem:[%s4986_s3 + $0xc0] sm:$0xff]  }
 0x175   :  { %3621 = vmatprep.subr.bf16.mxu0 %v4063_v42 }
 0x178   :  { %3622 = vmatpush3.bf16.msra.mxu0 %v4063_v42 }
 0x179   :  { %3623 = vmatprep.subr.bf16.mxu0 %v4064_v43 }
 0x17c   :  { %3624 = vmatpush3.bf16.msra.mxu0 %v4064_v43 }
 0x17d   :  { %3657 = vmatprep.subr.bf16.mxu0 %v4395_v14 }
 0x222   :  { %v3587_v46 = vpop.f32.mrb[40].mxu0 }
 0x223   :  { %v740_v47 = vpop.f32.mrb[41].mxu0 }
 0x224   :  { %v3588_v48 = vpop.f32.mrb[42].mxu0 }
 0x225   :  { %v772_v49 = vpack.c.bf16 %v3588_v48, %v3587_v46  ;;  %v743_v50 = vpop.f32.mrb[43].mxu0 }
 0x226   :  { %v771_v51 = vpack.c.bf16 %v743_v50, %v740_v47 }
 0x228   :  { %3649 = vmatprep.mubr.bf16.mxu1 %v771_v51 }
 0x229   :  { %3650 = vmatmul.mubr.bf16.vlgmr.msra.gmra.mrb[0].mxu1 %v772_v49 }
 0x22a   :  { %v3591_v53 = vpop.f32.mrb[44].mxu0  ;;  %3674 = vmatpush3.bf16.msra.mxu1 %v4093_v45 }
 0x22b   :  { %v756_v54 = vpop.f32.mrb[45].mxu0  ;;  %3675 = vmatprep.subr.bf16.mxu1 %v4095_v52 }
 0x22c   :  { %v3592_v56 = vpop.f32.mrb[46].mxu0 }
 0x22d   :  { %v774_v57 = vpack.c.bf16 %v3592_v56, %v3591_v53  ;;  %v759_v58 = vpop.f32.mrb[47].mxu0  ;;  %v4106_v56 = vld [vmem:[%s4986_s3 + $0xc8] sm:$0xff]  }
 0x22e   :  { %v773_v59 = vpack.c.bf16 %v759_v58, %v756_v54  ;;  %3676 = vmatpush3.bf16.msra.mxu1 %v4095_v52  ;;  %v4107_v58 = vld [vmem:[%s4986_s3 + $0xd0] sm:$0xff]  }
 0x22f   :  { %3677 = vmatprep.subr.bf16.mxu1 %v4097_v55 }
 0x230   :  { %3653 = vmatprep.mubr.bf16.mxu1 %v773_v59 }
 0x231   :  { %3654 = vmatmul.mubr.bf16.gmra.mrb[4].mxu1 %v774_v57 }
 0x232   :  { %v3603_v60 = vpop.f32.mrb[48].mxu0  ;;  %3678 = vmatpush3.bf16.msra.mxu1 %v4097_v55 }
 0x233   :  { %v866_v61 = vpop.f32.mrb[49].mxu0  ;;  %3679 = vmatprep.subr.bf16.mxu1 %v4099_v32 }
 0x234   :  { %v3604_v62 = vpop.f32.mrb[50].mxu0 }
 0x235   :  { %v898_v63 = vpack.c.bf16 %v3604_v62, %v3603_v60  ;;  %v869_v0 = vpop.f32.mrb[51].mxu0 }
 0x236   :  { %v897_v1 = vpack.c.bf16 %v869_v0, %v866_v61  ;;  %3680 = vmatpush3.bf16.msra.mxu1 %v4099_v32  ;;  %v4108_v0 = vld [vmem:[%s4986_s3 + $0xd8] sm:$0xff]  }
 0x237   :  { %3681 = vmatprep.subr.bf16.mxu1 %v4101_v34 }
 0x238   :  { %3625 = vmatprep.mubr.bf16.mxu0 %v897_v1 }
 0x239   :  { %3626 = vmatmul.mubr.bf16.vlgmr.msra.gmra.mrb[56].mxu0 %v898_v63 }
 0x23a   :  { %3658 = vmatpush3.bf16.msra.mxu0 %v4395_v14  ;;  %v3607_v2 = vpop.f32.mrb[52].mxu0  ;;  %3682 = vmatpush3.bf16.msra.mxu1 %v4101_v34 }
 0x23b   :  { %3659 = vmatprep.subr.bf16.mxu0 %v4393_v13  ;;  %v882_v3 = vpop.f32.mrb[53].mxu0  ;;  %3683 = vmatprep.subr.bf16.mxu1 %v4102_v36 }
 0x23c   :  { %v3608_v4 = vpop.f32.mrb[54].mxu0 }
 0x23d   :  { %v900_v5 = vpack.c.bf16 %v3608_v4, %v3607_v2  ;;  %v885_v6 = vpop.f32.mrb[55].mxu0  ;;  %v4109_v2 = vld [vmem:[%s4986_s3 + $0xe0] sm:$0xff]  }
 0x23e   :  { %v899_v7 = vpack.c.bf16 %v885_v6, %v882_v3  ;;  %3660 = vmatpush3.bf16.msra.mxu0 %v4393_v13  ;;  %3684 = vmatpush3.bf16.msra.mxu1 %v4102_v36  ;;  %v4116_v36 = vld [vmem:[%s4986_s3 + $0x118] sm:$0xff]  }
 0x23f   :  { %3661 = vmatprep.subr.bf16.mxu0 %v4403_v28  ;;  %3685 = vmatprep.subr.bf16.mxu1 %v4103_v38 }
 0x240   :  { %3629 = vmatprep.mubr.bf16.mxu0 %v899_v7 }
 0x241   :  { %3630 = vmatmul.mubr.bf16.gmra.mrb[60].mxu0 %v900_v5 }
 0x242   :  { %3662 = vmatpush3.bf16.msra.mxu0 %v4403_v28  ;;  %3665 = vmatprep.mubr.msk.bf16.mxu0 %vm446_vm0, %v4073_v8  ;;  %v4110_v8 = vld [vmem:[%s4986_s3 + $0xe8] sm:$0xff]  }
 0x243   :  { %3663 = vmatprep.subr.bf16.mxu0 %v4400_v27  ;;  %3686 = vmatpush3.bf16.msra.mxu1 %v4103_v38  ;;  %v4117_v38 = vld [vmem:[%s4986_s3 + $0x120] sm:$0xff]  }
 0x244   :  { %3687 = vmatprep.subr.bf16.mxu1 %v4104_v40 }
 0x246   :  { %3664 = vmatpush3.bf16.msra.mxu0 %v4400_v27 }
 0x247   :  { %3697 = vmatprep.subr.bf16.mxu0 %v4395_v14  ;;  %3688 = vmatpush3.bf16.msra.mxu1 %v4104_v40 }
 0x248   :  { %3713 = vmatprep.subr.bf16.mxu1 %v4105_v41 }
 0x249   :  { %3666 = vmatmul.mubr.msk.bf16.vlgmr.msra.gmra.mrb[64].mxu0 %vm446_vm0, %v4074_v9 }
 0x24a   :  { %3698 = vmatpush3.bf16.msra.mxu0 %v4395_v14  ;;  %3669 = vmatprep.mubr.msk.bf16.mxu0 %vm446_vm0, %v4075_v10  ;;  %v4111_v10 = vld [vmem:[%s4986_s3 + $0xf0] sm:$0xff]  }
 0x24b   :  { %3699 = vmatprep.subr.bf16.mxu0 %v4393_v13 }
 0x24e   :  { %3700 = vmatpush3.bf16.msra.mxu0 %v4393_v13 }
 0x24f   :  { %3701 = vmatprep.subr.bf16.mxu0 %v4403_v28 }
 0x251   :  { %3670 = vmatmul.mubr.msk.bf16.gmra.mrb[68].mxu0 %vm446_vm0, %v4076_v11 }
 0x252   :  { %3702 = vmatpush3.bf16.msra.mxu0 %v4403_v28  ;;  %3705 = vmatprep.mubr.msk.bf16.mxu0 %vm446_vm0, %v4077_v12 }
 0x253   :  { %3703 = vmatprep.subr.bf16.mxu0 %v4400_v27 }
 0x256   :  { %3704 = vmatpush3.bf16.msra.mxu0 %v4400_v27 }
 0x257   :  { %3761 = vmatprep.subr.bf16.mxu0 %v4395_v14 }
 0x259   :  { %3706 = vmatmul.mubr.msk.bf16.vlgmr.msra.gmra.mrb[72].mxu0 %vm446_vm0, %v4078_v15 }
 0x25a   :  { %3762 = vmatpush3.bf16.msra.mxu0 %v4395_v14  ;;  %3709 = vmatprep.mubr.msk.bf16.mxu0 %vm446_vm0, %v4079_v16 }
 0x25b   :  { %3763 = vmatprep.subr.bf16.mxu0 %v4393_v13 }
 0x25e   :  { %3764 = vmatpush3.bf16.msra.mxu0 %v4393_v13 }
 0x25f   :  { %3765 = vmatprep.subr.bf16.mxu0 %v4403_v28 }
 0x261   :  { %3710 = vmatmul.mubr.msk.bf16.gmra.mrb[76].mxu0 %vm446_vm0, %v4080_v17 }
 0x262   :  { %3766 = vmatpush3.bf16.msra.mxu0 %v4403_v28  ;;  %3769 = vmatprep.mubr.msk.bf16.mxu0 %vm446_vm0, %v4081_v18  ;;  %v4112_v18 = vld [vmem:[%s4986_s3 + $0xf8] sm:$0xff]  }
 0x263   :  { %3767 = vmatprep.subr.bf16.mxu0 %v4400_v27 }
 0x266   :  { %3768 = vmatpush3.bf16.msra.mxu0 %v4400_v27 }
 0x267   :  { %3801 = vmatprep.subr.bf16.mxu0 %v4395_v14 }
 0x269   :  { %3770 = vmatmul.mubr.msk.bf16.vlgmr.msra.gmra.mrb[80].mxu0 %vm446_vm0, %v4082_v19 }
 0x26a   :  { %3802 = vmatpush3.bf16.msra.mxu0 %v4395_v14  ;;  %3773 = vmatprep.mubr.msk.bf16.mxu0 %vm446_vm0, %v4083_v20  ;;  %v4113_v20 = vld [vmem:[%s4986_s3 + $0x100] sm:$0xff]  }
 0x26b   :  { %3803 = vmatprep.subr.bf16.mxu0 %v4393_v13 }
 0x26e   :  { %3804 = vmatpush3.bf16.msra.mxu0 %v4393_v13 }
 0x26f   :  { %3805 = vmatprep.subr.bf16.mxu0 %v4403_v28 }
 0x271   :  { %3774 = vmatmul.mubr.msk.bf16.gmra.mrb[84].mxu0 %vm446_vm0, %v4084_v21 }
 0x272   :  { %3806 = vmatpush3.bf16.msra.mxu0 %v4403_v28  ;;  %3809 = vmatprep.mubr.msk.bf16.mxu0 %vm446_vm0, %v4085_v22 }
 0x273   :  { %3807 = vmatprep.subr.bf16.mxu0 %v4400_v27 }
 0x276   :  { %3808 = vmatpush3.bf16.msra.mxu0 %v4400_v27 }
 0x277   :  { %3841 = vmatprep.subr.bf16.mxu0 %v4395_v14 }
 0x279   :  { %3810 = vmatmul.mubr.msk.bf16.vlgmr.msra.gmra.mrb[88].mxu0 %vm446_vm0, %v4086_v23 }
 0x27a   :  { %3842 = vmatpush3.bf16.msra.mxu0 %v4395_v14  ;;  %3813 = vmatprep.mubr.msk.bf16.mxu0 %vm446_vm0, %v4087_v24 }
 0x27b   :  { %3843 = vmatprep.subr.bf16.mxu0 %v4393_v13 }
 0x27e   :  { %3844 = vmatpush3.bf16.msra.mxu0 %v4393_v13 }
 0x27f   :  { %3845 = vmatprep.subr.bf16.mxu0 %v4403_v28 }
 0x281   :  { %3814 = vmatmul.mubr.msk.bf16.gmra.mrb[92].mxu0 %vm446_vm0, %v4088_v25 }
 0x282   :  { %3846 = vmatpush3.bf16.msra.mxu0 %v4403_v28  ;;  %3849 = vmatprep.mubr.msk.bf16.mxu0 %vm446_vm0, %v4089_v26  ;;  %v4114_v26 = vld [vmem:[%s4986_s3 + $0x108] sm:$0xff]  }
 0x283   :  { %3847 = vmatprep.subr.bf16.mxu0 %v4400_v27 }
 0x286   :  { %3848 = vmatpush3.bf16.msra.mxu0 %v4400_v27 }
 0x287   :  { %3881 = vmatprep.subr.bf16.mxu0 %v4395_v14 }
 0x289   :  { %3850 = vmatmul.mubr.msk.bf16.vlgmr.msra.gmra.mrb[96].mxu0 %vm446_vm0, %v4090_v29 }
 0x28a   :  { %3882 = vmatpush3.bf16.msra.mxu0 %v4395_v14  ;;  %3853 = vmatprep.mubr.msk.bf16.mxu0 %vm446_vm0, %v4091_v30  ;;  %v4115_v30 = vld [vmem:[%s4986_s3 + $0x110] sm:$0xff]  }
 0x28b   :  { %3883 = vmatprep.subr.bf16.mxu0 %v4393_v13 }
 0x28e   :  { %3884 = vmatpush3.bf16.msra.mxu0 %v4393_v13 }
 0x28f   :  { %3885 = vmatprep.subr.bf16.mxu0 %v4403_v28 }
 0x291   :  { %3854 = vmatmul.mubr.msk.bf16.gmra.mrb[100].mxu0 %vm446_vm0, %v4092_v31 }
 0x292   :  { %3886 = vmatpush3.bf16.msra.mxu0 %v4403_v28  ;;  %3889 = vmatprep.mubr.msk.bf16.mxu0 %vm446_vm0, %v4094_v33 }
 0x293   :  { %3887 = vmatprep.subr.bf16.mxu0 %v4400_v27 }
 0x296   :  { %3888 = vmatpush3.bf16.msra.mxu0 %v4400_v27 }
 0x299   :  { %3890 = vmatmul.mubr.msk.bf16.vlgmr.msra.gmra.mrb[104].mxu0 %vm446_vm0, %v4096_v35 }
 0x29a   :  { %3893 = vmatprep.mubr.msk.bf16.mxu0 %vm446_vm0, %v4098_v37 }
 0x2a1   :  { %3894 = vmatmul.mubr.msk.bf16.gmra.mrb[108].mxu0 %vm446_vm0, %v4100_v39 }
 0x30c   :  { %v4643_v42 = vpop.f32.mrb[56].mxu0 }
 0x30d   :  { %v4645_v43 = vpop.f32.mrb[57].mxu0 }
 0x30e   :  { %v4647_v44 = vpop.f32.mrb[58].mxu0 }
 0x30f   :  { %v4649_v45 = vpop.f32.mrb[59].mxu0 }
 0x314   :  { %v4651_v46 = vpop.f32.mrb[60].mxu0 }
 0x315   :  { %v4653_v47 = vpop.f32.mrb[61].mxu0 }
 0x316   :  { %v4655_v48 = vpop.f32.mrb[62].mxu0 }
 0x317   :  { %v4657_v49 = vpop.f32.mrb[63].mxu0 }
 0x31c   :  { %v3667_v50 = vpop.f32.mrb[64].mxu0 }
 0x31d   :  { %v1219_v51 = vpop.f32.mrb[65].mxu0 }
 0x31e   :  { %v3668_v52 = vpop.f32.mrb[66].mxu0 }
 0x31f   :  { %v1251_v53 = vpack.c.bf16 %v3668_v52, %v3667_v50  ;;  %v1222_v54 = vpop.f32.mrb[67].mxu0 }
 0x320   :  { %v1250_v55 = vpack.c.bf16 %v1222_v54, %v1219_v51  ;;  %v4118_v51 = vld [vmem:[%s4986_s3 + $0x128] sm:$0xff]  }
 0x322   :  { %3689 = vmatprep.mubr.bf16.mxu1 %v1250_v55 }
 0x323   :  { %3690 = vmatmul.mubr.bf16.vlgmr.msra.gmra.mrb[0].mxu1 %v1251_v53  ;;  %v4119_v53 = vld [vmem:[%s4986_s3 + $0x130] sm:$0xff]  }
 0x324   :  { %3714 = vmatpush3.bf16.msra.mxu1 %v4105_v41  ;;  %v3671_v57 = vpop.f32.mrb[68].mxu0 }
 0x325   :  { %3715 = vmatprep.subr.bf16.mxu1 %v4106_v56  ;;  %v1235_v59 = vpop.f32.mrb[69].mxu0 }
 0x326   :  { %v3672_v60 = vpop.f32.mrb[70].mxu0 }
 0x327   :  { %v1253_v61 = vpack.c.bf16 %v3672_v60, %v3671_v57  ;;  %v1238_v62 = vpop.f32.mrb[71].mxu0 }
 0x328   :  { %3716 = vmatpush3.bf16.msra.mxu1 %v4106_v56  ;;  %v1252_v63 = vpack.c.bf16 %v1238_v62, %v1235_v59  ;;  %v4120_v59 = vld [vmem:[%s4986_s3 + $0x138] sm:$0xff]  }
 0x329   :  { %3717 = vmatprep.subr.bf16.mxu1 %v4107_v58 }
 0x32a   :  { %3693 = vmatprep.mubr.bf16.mxu1 %v1252_v63 }
 0x32b   :  { %3694 = vmatmul.mubr.bf16.gmra.mrb[4].mxu1 %v1253_v61  ;;  %v4121_v61 = vld [vmem:[%s4986_s3 + $0x140] sm:$0xff]  }
 0x32c   :  { %3718 = vmatpush3.bf16.msra.mxu1 %v4107_v58  ;;  %v3707_v1 = vpop.f32.mrb[72].mxu0 }
 0x32d   :  { %3719 = vmatprep.subr.bf16.mxu1 %v4108_v0  ;;  %v1467_v3 = vpop.f32.mrb[73].mxu0 }
 0x32e   :  { %v3708_v4 = vpop.f32.mrb[74].mxu0 }
 0x32f   :  { %v1499_v5 = vpack.c.bf16 %v3708_v4, %v3707_v1  ;;  %v1470_v6 = vpop.f32.mrb[75].mxu0 }
 0x330   :  { %3720 = vmatpush3.bf16.msra.mxu1 %v4108_v0  ;;  %v1498_v7 = vpack.c.bf16 %v1470_v6, %v1467_v3  ;;  %v4122_v3 = vld [vmem:[%s4986_s3 + $0x148] sm:$0xff]  }
 0x331   :  { %3721 = vmatprep.subr.bf16.mxu1 %v4109_v2 }
 0x332   :  { %3729 = vmatprep.mubr.bf16.mxu1 %v1498_v7 }
 0x334   :  { %3722 = vmatpush3.bf16.msra.mxu1 %v4109_v2  ;;  %v3711_v9 = vpop.f32.mrb[76].mxu0 }
 0x335   :  { %3723 = vmatprep.subr.bf16.mxu1 %v4110_v8  ;;  %v1483_v11 = vpop.f32.mrb[77].mxu0 }
 0x336   :  { %v3712_v12 = vpop.f32.mrb[78].mxu0 }
 0x337   :  { %v1501_v15 = vpack.c.bf16 %v3712_v12, %v3711_v9  ;;  %v1486_v16 = vpop.f32.mrb[79].mxu0 }
 0x338   :  { %3724 = vmatpush3.bf16.msra.mxu1 %v4110_v8  ;;  %v1500_v17 = vpack.c.bf16 %v1486_v16, %v1483_v11  ;;  %v4125_v11 = vld [vmem:[%s4986_s3 + $0x160] sm:$0xff]  }
 0x339   :  { %3725 = vmatprep.subr.bf16.mxu1 %v4111_v10 }
 0x33c   :  { %3726 = vmatpush3.bf16.msra.mxu1 %v4111_v10  ;;  %v4680_v19 = vpop.f32.mrb[80].mxu0 }
 0x33d   :  { %3727 = vmatprep.subr.bf16.mxu1 %v4112_v18  ;;  %v4685_v21 = vpop.f32.mrb[81].mxu0 }
 0x33e   :  { %v4687_v22 = vpop.f32.mrb[82].mxu0 }
 0x33f   :  { %v1885_v23 = vpack.c.bf16 %v4687_v22, %v4680_v19  ;;  %v4691_v24 = vpop.f32.mrb[83].mxu0  ;;  %v4133_v19 = vld [vmem:[%s4986_s3 + $0x1a0] sm:$0xff]   ;;  %v4134_v22 = vld [vmem:[%s4986_s3 + $0x1a8] sm:$0xff]  }
 0x340   :  { %3728 = vmatpush3.bf16.msra.mxu1 %v4112_v18  ;;  %v1884_v25 = vpack.c.bf16 %v4691_v24, %v4685_v21  ;;  %v4126_v18 = vld [vmem:[%s4986_s3 + $0x168] sm:$0xff]   ;;  %v4127_v21 = vld [vmem:[%s4986_s3 + $0x170] sm:$0xff]  }
 0x341   :  { %3737 = vmatprep.subr.bf16.mxu1 %v4113_v20 }
 0x343   :  { %3730 = vmatmul.mubr.bf16.vlgmr.msra.gmra.mrb[0].mxu1 %v1499_v5  ;;  %v4123_v5 = vld [vmem:[%s4986_s3 + $0x150] sm:$0xff]  }
 0x344   :  { %3738 = vmatpush3.bf16.msra.mxu1 %v4113_v20  ;;  %3733 = vmatprep.mubr.bf16.mxu1 %v1500_v17  ;;  %v4698_v29 = vpop.f32.mrb[84].mxu0 }
 0x345   :  { %3739 = vmatprep.subr.bf16.mxu1 %v4114_v26  ;;  %v4703_v31 = vpop.f32.mrb[85].mxu0 }
 0x346   :  { %v4705_v32 = vpop.f32.mrb[86].mxu0 }
 0x347   :  { %v1887_v33 = vpack.c.bf16 %v4705_v32, %v4698_v29  ;;  %v4709_v34 = vpop.f32.mrb[87].mxu0  ;;  %v4136_v29 = vld [vmem:[%s4986_s3 + $0x1b8] sm:$0xff]   ;;  %v4138_v32 = vld [vmem:[%s4986_s3 + $0x1c8] sm:$0xff]  }
 0x348   :  { %3740 = vmatpush3.bf16.msra.mxu1 %v4114_v26  ;;  %v1886_v35 = vpack.c.bf16 %v4709_v34, %v4703_v31  ;;  %v4137_v31 = vld [vmem:[%s4986_s3 + $0x1c0] sm:$0xff]   ;;  %v4140_v34 = vld [vmem:[%s4986_s3 + $0x1d8] sm:$0xff]  }
 0x349   :  { %3741 = vmatprep.subr.bf16.mxu1 %v4115_v30 }
 0x34b   :  { %3734 = vmatmul.mubr.bf16.gmra.mrb[4].mxu1 %v1501_v15 }
 0x34c   :  { %3742 = vmatpush3.bf16.msra.mxu1 %v4115_v30  ;;  %3753 = vmatprep.mubr.bf16.mxu1 %v4395_v14  ;;  %v4717_v37 = vpop.f32.mrb[88].mxu0 }
 0x34d   :  { %3743 = vmatprep.subr.bf16.mxu1 %v4116_v36  ;;  %v4722_v39 = vpop.f32.mrb[89].mxu0 }
 0x34e   :  { %v4724_v40 = vpop.f32.mrb[90].mxu0 }
 0x34f   :  { %v2133_v41 = vpack.c.bf16 %v4724_v40, %v4717_v37  ;;  %v4728_v50 = vpop.f32.mrb[91].mxu0  ;;  %v4142_v37 = vld [vmem:[%s4986_s3 + $0x1e8] sm:$0xff]   ;;  %v4144_v40 = vld [vmem:[%s4986_s3 + $0x1f8] sm:$0xff]  }
 0x350   :  { %3744 = vmatpush3.bf16.msra.mxu1 %v4116_v36  ;;  %v2132_v14 = vpack.c.bf16 %v4728_v50, %v4722_v39  ;;  %v4143_v39 = vld [vmem:[%s4986_s3 + $0x1f0] sm:$0xff]   ;;  %v4146_v50 = vld [vmem:[%s4986_s3 + $0x208] sm:$0xff]  }
 0x351   :  { %3745 = vmatprep.subr.bf16.mxu1 %v4117_v38 }
 0x354   :  { %3746 = vmatpush3.bf16.msra.mxu1 %v4117_v38  ;;  %v4735_v52 = vpop.f32.mrb[92].mxu0  ;;  %v4128_v38 = vld [vmem:[%s4986_s3 + $0x178] sm:$0xff]  }
 0x355   :  { %3747 = vmatprep.subr.bf16.mxu1 %v4118_v51  ;;  %v4740_v54 = vpop.f32.mrb[93].mxu0 }
 0x356   :  { %v4742_v55 = vpop.f32.mrb[94].mxu0 }
 0x357   :  { %v2135_v56 = vpack.c.bf16 %v4742_v55, %v4735_v52  ;;  %v4746_v57 = vpop.f32.mrb[95].mxu0  ;;  %v4148_v52 = vld [vmem:[%s4986_s3 + $0x218] sm:$0xff]   ;;  %v4150_v55 = vld [vmem:[%s4986_s3 + $0x228] sm:$0xff]  }
 0x358   :  { %3748 = vmatpush3.bf16.msra.mxu1 %v4118_v51  ;;  %v2134_v58 = vpack.c.bf16 %v4746_v57, %v4740_v54  ;;  %v4129_v51 = vld [vmem:[%s4986_s3 + $0x180] sm:$0xff]   ;;  %v4152_v57 = vld [vmem:[%s4986_s3 + $0x238] sm:$0xff]  }
 0x359   :  { %3749 = vmatprep.subr.bf16.mxu1 %v4119_v53  ;;  %v4149_v54 = vld [vmem:[%s4986_s3 + $0x220] sm:$0xff]  }
 0x35c   :  { %3750 = vmatpush3.bf16.msra.mxu1 %v4119_v53  ;;  %v4753_v60 = vpop.f32.mrb[96].mxu0  ;;  %v4130_v53 = vld [vmem:[%s4986_s3 + $0x188] sm:$0xff]  }
 0x35d   :  { %3751 = vmatprep.subr.bf16.mxu1 %v4120_v59  ;;  %v4758_v62 = vpop.f32.mrb[97].mxu0 }
 0x35e   :  { %v4760_v63 = vpop.f32.mrb[98].mxu0 }
 0x35f   :  { %v2381_v0 = vpack.c.bf16 %v4760_v63, %v4753_v60  ;;  %v4764_v1 = vpop.f32.mrb[99].mxu0  ;;  %v3260_v60 = vld [vmem:[%s4988_s6] sm:$0xff]  }
 0x360   :  { %3752 = vmatpush3.bf16.msra.mxu1 %v4120_v59  ;;  %v2380_v2 = vpack.c.bf16 %v4764_v1, %v4758_v62  ;;  %v4131_v59 = vld [vmem:[%s4986_s3 + $0x190] sm:$0xff]   ;;  %v3242_v63 = vld [vmem:[%s4989_s4] ss:$0 sm:$0xff] }
 0x361   :  { %3777 = vmatprep.subr.bf16.mxu1 %v4121_v61 }
 0x363   :  { %3754 = vmatmul.mubr.bf16.vlgmr.msra.gmra.mrb[0].mxu1 %v4393_v13 }
 0x364   :  { %3757 = vmatprep.mubr.bf16.mxu1 %v4403_v28  ;;  %3778 = vmatpush3.bf16.msra.mxu1 %v4121_v61  ;;  %v4773_v4 = vpop.f32.mrb[100].mxu0  ;;  %v4124_v28 = vld [vmem:[%s4986_s3 + $0x158] sm:$0xff]  }
 0x365   :  { %3779 = vmatprep.subr.bf16.mxu1 %v4122_v3  ;;  %v4778_v6 = vpop.f32.mrb[101].mxu0  ;;  %v4132_v61 = vld [vmem:[%s4986_s3 + $0x198] sm:$0xff]  }
 0x366   :  { %v4780_v7 = vpop.f32.mrb[102].mxu0 }
 0x367   :  { %v2383_v8 = vpack.c.bf16 %v4780_v7, %v4773_v4  ;;  %v4784_v9 = vpop.f32.mrb[103].mxu0  ;;  %v3261_v4 = vunpack.c.l.bf16 %v3260_v60 }
 0x368   :  { %3780 = vmatpush3.bf16.msra.mxu1 %v4122_v3  ;;  %v2382_v13 = vpack.c.bf16 %v4784_v9, %v4778_v6 }
 0x369   :  { %3781 = vmatprep.subr.bf16.mxu1 %v4123_v5 }
 0x36b   :  { %3758 = vmatmul.mubr.bf16.gmra.mrb[4].mxu1 %v4400_v27 }
 0x36c   :  { %3782 = vmatpush3.bf16.msra.mxu1 %v4123_v5  ;;  %3793 = vmatprep.mubr.bf16.mxu1 %v1884_v25  ;;  %v4795_v10 = vpop.f32.mrb[104].mxu0 }
 0x36d   :  { %3783 = vmatprep.subr.bf16.mxu1 %v4124_v28  ;;  %v4800_v12 = vpop.f32.mrb[105].mxu0 }
 0x36e   :  { %v4802_v15 = vpop.f32.mrb[106].mxu0 }
 0x36f   :  { %v2629_v16 = vpack.c.bf16 %v4802_v15, %v4795_v10  ;;  %v4806_v27 = vpop.f32.mrb[107].mxu0  ;;  %v3262_v10 = vunpack.c.h.bf16 %v3260_v60 }
 0x370   :  { %3784 = vmatpush3.bf16.msra.mxu1 %v4124_v28  ;;  %v2628_v17 = vpack.c.bf16 %v4806_v27, %v4800_v12  ;;  %v3296_v27 = vld [vmem:[%s4988_s6 + $0x10] sm:$0xff]  }
 0x371   :  { %3785 = vmatprep.subr.bf16.mxu1 %v4125_v11 }
 0x374   :  { %3786 = vmatpush3.bf16.msra.mxu1 %v4125_v11  ;;  %v4813_v20 = vpop.f32.mrb[108].mxu0 }
 0x375   :  { %3787 = vmatprep.subr.bf16.mxu1 %v4126_v18  ;;  %v4818_v24 = vpop.f32.mrb[109].mxu0 }
 0x376   :  { %v4820_v25 = vpop.f32.mrb[110].mxu0 }
 0x377   :  { %v2631_v26 = vpack.c.bf16 %v4820_v25, %v4813_v20  ;;  %v4824_v30 = vpop.f32.mrb[111].mxu0 }
 0x378   :  { %3788 = vmatpush3.bf16.msra.mxu1 %v4126_v18  ;;  %v2630_v36 = vpack.c.bf16 %v4824_v30, %v4818_v24 }
 0x379   :  { %3789 = vmatprep.subr.bf16.mxu1 %v4127_v21 }
 0x37c   :  { %3790 = vmatpush3.bf16.msra.mxu1 %v4127_v21 }
 0x37d   :  { %3791 = vmatprep.subr.bf16.mxu1 %v4128_v38 }
 0x380   :  { %3792 = vmatpush3.bf16.msra.mxu1 %v4128_v38 }
 0x381   :  { %3817 = vmatprep.subr.bf16.mxu1 %v4129_v51 }
 0x383   :  { %3794 = vmatmul.mubr.bf16.vlgmr.msra.gmra.mrb[0].mxu1 %v1885_v23  ;;  %v4135_v23 = vld [vmem:[%s4986_s3 + $0x1b0] sm:$0xff]  }
 0x384   :  { %3818 = vmatpush3.bf16.msra.mxu1 %v4129_v51  ;;  %3797 = vmatprep.mubr.bf16.mxu1 %v1886_v35  ;;  %v4141_v35 = vld [vmem:[%s4986_s3 + $0x1e0] sm:$0xff]  }
 0x385   :  { %3819 = vmatprep.subr.bf16.mxu1 %v4130_v53 }
 0x388   :  { %3820 = vmatpush3.bf16.msra.mxu1 %v4130_v53 }
 0x389   :  { %3821 = vmatprep.subr.bf16.mxu1 %v4131_v59 }
 0x38b   :  { %3798 = vmatmul.mubr.bf16.gmra.mrb[4].mxu1 %v1887_v33  ;;  %v4139_v33 = vld [vmem:[%s4986_s3 + $0x1d0] sm:$0xff]  }
 0x38c   :  { %3822 = vmatpush3.bf16.msra.mxu1 %v4131_v59  ;;  %3833 = vmatprep.mubr.bf16.mxu1 %v2132_v14  ;;  %v4147_v14 = vld [vmem:[%s4986_s3 + $0x210] sm:$0xff]  }
 0x38d   :  { %3823 = vmatprep.subr.bf16.mxu1 %v4132_v61 }
 0x390   :  { %3824 = vmatpush3.bf16.msra.mxu1 %v4132_v61 }
 0x391   :  { %3825 = vmatprep.subr.bf16.mxu1 %v4133_v19 }
 0x394   :  { %3826 = vmatpush3.bf16.msra.mxu1 %v4133_v19 }
 0x395   :  { %3827 = vmatprep.subr.bf16.mxu1 %v4134_v22 }
 0x398   :  { %3828 = vmatpush3.bf16.msra.mxu1 %v4134_v22 }
 0x399   :  { %3829 = vmatprep.subr.bf16.mxu1 %v4135_v23 }
 0x39c   :  { %3830 = vmatpush3.bf16.msra.mxu1 %v4135_v23 }
 0x39d   :  { %3831 = vmatprep.subr.bf16.mxu1 %v4136_v29 }
 0x3a0   :  { %3832 = vmatpush3.bf16.msra.mxu1 %v4136_v29 }
 0x3a1   :  { %3857 = vmatprep.subr.bf16.mxu1 %v4137_v31 }
 0x3a3   :  { %3834 = vmatmul.mubr.bf16.vlgmr.msra.gmra.mrb[0].mxu1 %v2133_v41  ;;  %v4145_v41 = vld [vmem:[%s4986_s3 + $0x200] sm:$0xff]  }
 0x3a4   :  { %3858 = vmatpush3.bf16.msra.mxu1 %v4137_v31  ;;  %3837 = vmatprep.mubr.bf16.mxu1 %v2134_v58  ;;  %v3295_v58 = vld [vmem:[%s4988_s6 + $0x8] sm:$0xff]   ;;  %v3270_v31 = vunpack.c.h.bf16 %v3296_v27 }
 0x3a5   :  { %3859 = vmatprep.subr.bf16.mxu1 %v4138_v32  ;;  %v3265_v1 = vunpack.c.l.bf16 %v3295_v58 }
 0x3a8   :  { %3860 = vmatpush3.bf16.msra.mxu1 %v4138_v32 }
 0x3a9   :  { %3861 = vmatprep.subr.bf16.mxu1 %v4139_v33 }
 0x3ab   :  { %3838 = vmatmul.mubr.bf16.gmra.mrb[4].mxu1 %v2135_v56  ;;  %v4151_v56 = vld [vmem:[%s4986_s3 + $0x230] sm:$0xff]  }
 0x3ac   :  { %3862 = vmatpush3.bf16.msra.mxu1 %v4139_v33  ;;  %3873 = vmatprep.mubr.bf16.mxu1 %v2380_v2 }
 0x3ad   :  { %3863 = vmatprep.subr.bf16.mxu1 %v4140_v34 }
 0x3b0   :  { %3864 = vmatpush3.bf16.msra.mxu1 %v4140_v34 }
 0x3b1   :  { %3865 = vmatprep.subr.bf16.mxu1 %v4141_v35 }
 0x3b4   :  { %3866 = vmatpush3.bf16.msra.mxu1 %v4141_v35 }
 0x3b5   :  { %3867 = vmatprep.subr.bf16.mxu1 %v4142_v37 }
 0x3b8   :  { %3868 = vmatpush3.bf16.msra.mxu1 %v4142_v37 }
 0x3b9   :  { %3869 = vmatprep.subr.bf16.mxu1 %v4143_v39 }
 0x3bc   :  { %3870 = vmatpush3.bf16.msra.mxu1 %v4143_v39 }
 0x3bd   :  { %3871 = vmatprep.subr.bf16.mxu1 %v4144_v40 }
 0x3c0   :  { %3872 = vmatpush3.bf16.msra.mxu1 %v4144_v40 }
 0x3c1   :  { %3897 = vmatprep.subr.bf16.mxu1 %v4145_v41 }
 0x3c3   :  { %3874 = vmatmul.mubr.bf16.vlgmr.msra.gmra.mrb[0].mxu1 %v2381_v0 }
 0x3c4   :  { %3898 = vmatpush3.bf16.msra.mxu1 %v4145_v41  ;;  %3877 = vmatprep.mubr.bf16.mxu1 %v2382_v13 }
 0x3c5   :  { %3899 = vmatprep.subr.bf16.mxu1 %v4146_v50 }
 0x3c8   :  { %3900 = vmatpush3.bf16.msra.mxu1 %v4146_v50 }
 0x3c9   :  { %3901 = vmatprep.subr.bf16.mxu1 %v4147_v14 }
 0x3cb   :  { %3878 = vmatmul.mubr.bf16.gmra.mrb[4].mxu1 %v2383_v8  ;;  %v3266_v8 = vunpack.c.h.bf16 %v3295_v58 }
 0x3cc   :  { %3902 = vmatpush3.bf16.msra.mxu1 %v4147_v14  ;;  %3913 = vmatprep.mubr.bf16.mxu1 %v2628_v17 }
 0x3cd   :  { %3903 = vmatprep.subr.bf16.mxu1 %v4148_v52 }
 0x3d0   :  { %3904 = vmatpush3.bf16.msra.mxu1 %v4148_v52 }
 0x3d1   :  { %3905 = vmatprep.subr.bf16.mxu1 %v4149_v54 }
 0x3d4   :  { %3906 = vmatpush3.bf16.msra.mxu1 %v4149_v54 }
 0x3d5   :  { %3907 = vmatprep.subr.bf16.mxu1 %v4150_v55 }
 0x3d8   :  { %3908 = vmatpush3.bf16.msra.mxu1 %v4150_v55 }
 0x3d9   :  { %3909 = vmatprep.subr.bf16.mxu1 %v4151_v56 }
 0x3dc   :  { %3910 = vmatpush3.bf16.msra.mxu1 %v4151_v56 }
 0x3dd   :  { %3911 = vmatprep.subr.bf16.mxu1 %v4152_v57 }
 0x3e0   :  { %3912 = vmatpush3.bf16.msra.mxu1 %v4152_v57 }
 0x3e3   :  { %3914 = vmatmul.mubr.bf16.vlgmr.msra.gmra.mrb[0].mxu1 %v2629_v16 }
 0x3e4   :  { %3917 = vmatprep.mubr.bf16.mxu1 %v2630_v36  ;;  %v3269_v36 = vunpack.c.l.bf16 %v3296_v27 }
 0x3eb   :  { %3918 = vmatmul.mubr.bf16.gmra.mrb[4].mxu1 %v2631_v26 }
 0x4b6   :  { %v3915_v62 = vpop.f32.mrb[0].mxu1 }
 0x4b7   :  { %v3921_v0 = vadd.f32 %v3915_v62, %v4643_v42  ;;  %v2731_v2 = vpop.f32.mrb[1].mxu1  ;;  %v3297_v42 = vld [vmem:[%s4988_s6 + $0x18] sm:$0xff]  }
 0x4b8   :  { %v3922_v3 = vadd.f32 %v2731_v2, %v4645_v43  ;;  %v3916_v5 = vpop.f32.mrb[2].mxu1  ;;  %v3273_v21 = vunpack.c.l.bf16 %v3297_v42  ;;  %v3274_v61 = vunpack.c.h.bf16 %v3297_v42 }
 0x4b9   :  { %v2779_v6 = vadd.f32 %v3921_v0, %v3242_v63  ;;  %v3923_v7 = vadd.f32 %v3916_v5, %v4647_v44  ;;  %v2734_v9 = vpop.f32.mrb[3].mxu1 }
 0x4ba   :  { %v2777_v13 = vadd.f32 %v3922_v3, %v3242_v63  ;;  %v3924_v28 = vadd.f32 %v2734_v9, %v4649_v45 }
 0x4bb   :  { %v2803_v11 = vadd.f32 %v3265_v1, %v2779_v6  ;;  %v2780_v12 = vadd.f32 %v3923_v7, %v3242_v63 }
 0x4bc   :  { %v2801_v15 = vadd.f32 %v3261_v4, %v2777_v13  ;;  %v2778_v16 = vadd.f32 %v3924_v28, %v3242_v63 }
 0x4bd   :  { %v2804_v43 = vadd.f32 %v3266_v8, %v2780_v12  ;;  %v2811_v18 = vmax.f32 %v2803_v11, 0.0 }
 0x4be   :  { %v2802_v44 = vadd.f32 %v3262_v10, %v2778_v16  ;;  %v3919_v17 = vpop.f32.mrb[4].mxu1  ;;  %v2809_v25 = vmax.f32 %v2801_v15, 0.0 }
 0x4bf   :  { %v2812_v20 = vmax.f32 %v2804_v43, 0.0  ;;  %v3925_v45 = vadd.f32 %v3919_v17, %v4651_v46  ;;  %v2747_v24 = vpop.f32.mrb[5].mxu1 }
 0x4c0   :  { %v2810_v26 = vmax.f32 %v2802_v44, 0.0  ;;  %v3926_v30 = vadd.f32 %v2747_v24, %v4653_v47  ;;  %v3920_v38 = vpop.f32.mrb[6].mxu1 }
 0x4c1   :  { %v3283_v51 = vpack.c.bf16 %v2812_v20, %v2811_v18  ;;  %v2783_v53 = vadd.f32 %v3925_v45, %v3242_v63  ;;  %v3927_v59 = vadd.f32 %v3920_v38, %v4655_v48  ;;  %v2750_v19 = vpop.f32.mrb[7].mxu1 }
 0x4c2   :  { %v3278_v22 = vpack.c.bf16 %v2810_v26, %v2809_v25  ;;  %v2781_v23 = vadd.f32 %v3926_v30, %v3242_v63  ;;  %v3928_v29 = vadd.f32 %v2750_v19, %v4657_v49 }
 0x4c3   :  { %3298 = vst [vmem:[%s4990_s7 + $0x8] sm:$0xff] %v3283_v51   ;;  %v2807_v46 = vadd.f32 %v3273_v21, %v2783_v53  ;;  %v2784_v32 = vadd.f32 %v3927_v59, %v3242_v63 }
 0x4c4   :  { %3279 = vst [vmem:[%s4990_s7] sm:$0xff] %v3278_v22   ;;  %v2805_v47 = vadd.f32 %v3269_v36, %v2781_v23  ;;  %v2782_v33 = vadd.f32 %v3928_v29, %v3242_v63 }
 0x4c5   :  { %v2808_v48 = vadd.f32 %v3274_v61, %v2784_v32  ;;  %v2815_v35 = vmax.f32 %v2807_v46, 0.0 }
 0x4c6   :  { %v2806_v34 = vadd.f32 %v3270_v31, %v2782_v33  ;;  %v2813_v39 = vmax.f32 %v2805_v47, 0.0 }
 0x4c7   :  { %v2816_v37 = vmax.f32 %v2808_v48, 0.0 }
 0x4c8   :  { %v2814_v40 = vmax.f32 %v2806_v34, 0.0 }
 0x4c9   :  { %v3293_v49 = vpack.c.bf16 %v2816_v37, %v2815_v35 }
 0x4ca   :  { %v3288_v41 = vpack.c.bf16 %v2814_v40, %v2813_v39 }
 0x4cb   :  { %3300 = vst [vmem:[%s4990_s7 + $0x18] sm:$0xff] %v3293_v49  }
 0x4cc   :  { %3299 = vst [vmem:[%s4990_s7 + $0x10] sm:$0xff] %v3288_v41  }

// kernel: _lambda_.13
= control target key start
LH: loop header
LB: loop body
LE: loop exit
PB: predicated region body
PF: predicated region fallthrough
CT: control target
= control target key end

     0   :  { %s2769_s1 = inlined_call_operand.vmem [shape: bf16[1152,256], index: 1, kind: input, shape index: {}]   ;;  %s2770_s0 = inlined_call_operand.vmem [shape: bf16[8,1152], index: 0, kind: input, shape index: {}]   ;;  %s2771_s3 = inlined_call_operand.vmem [shape: bf16[1,256,256], index: 3, kind: input, shape index: {}]   ;;  %s2772_s6 = inlined_call_operand.vmem [shape: bf16[128,256], index: 6, kind: input, shape index: {}]   ;;  %s2773_s2 = inlined_call_operand.vmem [shape: f32[1,256], index: 2, kind: input, shape index: {}, may-alias: {2,4,7}]   ;;  %s2774_s5 = inlined_call_operand.vmem [shape: bf16[8,128], index: 5, kind: input, shape index: {}]   ;;  %s2775_s4 = inlined_call_operand.vmem [shape: f32[1,256], index: 4, kind: input, shape index: {}, may-alias: {2,4,7}]   ;;  %s2776_s7 = inlined_call_operand.vmem [shape: f32[1,256], index: 7, kind: input, shape index: {}, may-alias: {2,4,7}]   ;;  %s2777_s8 = inlined_call_operand.vmem [shape: bf16[8,256], index: 8, kind: output, shape index: {}]  }
   0x1   :  { %v1790_v0 = vld [vmem:[%s2769_s1 + $0x104] ss:$8 sps:$4 sm:$0xff]   ;;  %v1792_v1 = vld [vmem:[%s2769_s1 + $0x100] ss:$8 sps:$4 sm:$0xff]   ;;  %v1793_v2 = vld [vmem:[%s2769_s1 + $0x114] ss:$8 sps:$4 sm:$0xff]  }
   0x2   :  { %984 = vmatprep.subr.bf16.mxu0 %v1790_v0  ;;  %v1795_v3 = vld [vmem:[%s2769_s1 + $0x110] ss:$8 sps:$4 sm:$0xff]   ;;  %v1796_v4 = vld [vmem:[%s2769_s1 + $0x124] ss:$8 sps:$4 sm:$0xff]   ;;  %v1798_v5 = vld [vmem:[%s2769_s1 + $0x120] ss:$8 sps:$4 sm:$0xff]  }
   0x3   :  { %985 = vmatpush1.bf16.msra.mxu0 %v1792_v1  ;;  %v1799_v6 = vld [vmem:[%s2769_s1 + $0x134] ss:$8 sps:$4 sm:$0xff]   ;;  %v1801_v7 = vld [vmem:[%s2769_s1 + $0x130] ss:$8 sps:$4 sm:$0xff]   ;;  %v1802_v8 = vld [vmem:[%s2769_s1 + $0x144] ss:$8 sps:$4 sm:$0xff]  }
   0x4   :  { %986 = vmatprep.subr.bf16.mxu0 %v1793_v2  ;;  %v1804_v9 = vld [vmem:[%s2769_s1 + $0x140] ss:$8 sps:$4 sm:$0xff]   ;;  %v1805_v10 = vld [vmem:[%s2769_s1 + $0x154] ss:$8 sps:$4 sm:$0xff]   ;;  %v1807_v11 = vld [vmem:[%s2769_s1 + $0x150] ss:$8 sps:$4 sm:$0xff]  }
   0x5   :  { %v1808_v12 = vld [vmem:[%s2769_s1 + $0x164] ss:$8 sps:$4 sm:$0xff]   ;;  %v1810_v15 = vld [vmem:[%s2769_s1 + $0x160] ss:$8 sps:$4 sm:$0xff]   ;;  %v1811_v16 = vld [vmem:[%s2769_s1 + $0x174] ss:$8 sps:$4 sm:$0xff]  }
   0x6   :  { %v2175_v13 = vld [vmem:[%s2770_s0 + $0x8] sm:$0xff]  ;;  %v1813_v17 = vld [vmem:[%s2769_s1 + $0x170] ss:$8 sps:$4 sm:$0xff]   ;;  %v1817_v20 = vld [vmem:[%s2769_s1 + $0x194] ss:$8 sps:$4 sm:$0xff]  }
   0x7   :  { %987 = vmatpush1.bf16.msra.mxu0 %v1795_v3  ;;  %v1567_v14 = vcombine.high %v2175_v13, %v2175_v13  ;;  %v1814_v18 = vld [vmem:[%s2769_s1 + $0x184] ss:$8 sps:$4 sm:$0xff]   ;;  %v1816_v19 = vld [vmem:[%s2769_s1 + $0x180] ss:$8 sps:$4 sm:$0xff]   ;;  %v1819_v23 = vld [vmem:[%s2769_s1 + $0x190] ss:$8 sps:$4 sm:$0xff]   ;;  %v1566_v53 = vcombine.low %v2175_v13, %v2175_v13 }
   0x8   :  { %988 = vmatprep.subr.bf16.mxu0 %v1796_v4  ;;  %v1864_v21 = vld [vmem:[%s2769_s1 + $0x4] ss:$8 sps:$4 sm:$0xff]   ;;  %v1866_v22 = vld [vmem:[%s2769_s1] ss:$8 sps:$4 sm:$0xff]   ;;  %v1870_v25 = vld [vmem:[%s2769_s1 + $0x14] ss:$8 sps:$4 sm:$0xff]  }
   0x9   :  { %1016 = vmatprep.mubr.bf16.mxu0 %v1567_v14  ;;  %v1820_v24 = vld [vmem:[%s2769_s1 + $0x1a4] ss:$8 sps:$4 sm:$0xff]   ;;  %943 = vmatprep.subr.bf16.mxu1 %v1864_v21  ;;  %v1872_v26 = vld [vmem:[%s2769_s1 + $0x10] ss:$8 sps:$4 sm:$0xff]   ;;  %v1822_v27 = vld [vmem:[%s2769_s1 + $0x1a0] ss:$8 sps:$4 sm:$0xff]  }
   0xa   :  { %944 = vmatpush1.bf16.msra.mxu1 %v1866_v22  ;;  %v1876_v28 = vld [vmem:[%s2769_s1 + $0x24] ss:$8 sps:$4 sm:$0xff]   ;;  %v1823_v29 = vld [vmem:[%s2769_s1 + $0x1b4] ss:$8 sps:$4 sm:$0xff]   ;;  %v1878_v30 = vld [vmem:[%s2769_s1 + $0x20] ss:$8 sps:$4 sm:$0xff]  }
   0xb   :  { %989 = vmatpush1.bf16.msra.mxu0 %v1798_v5  ;;  %945 = vmatprep.subr.bf16.mxu1 %v1870_v25  ;;  %v1882_v31 = vld [vmem:[%s2769_s1 + $0x34] ss:$8 sps:$4 sm:$0xff]   ;;  %v1825_v32 = vld [vmem:[%s2769_s1 + $0x1b0] ss:$8 sps:$4 sm:$0xff]   ;;  %v1826_v33 = vld [vmem:[%s2769_s1 + $0x1c4] ss:$8 sps:$4 sm:$0xff]  }
   0xc   :  { %990 = vmatprep.subr.bf16.mxu0 %v1799_v6  ;;  %v1884_v34 = vld [vmem:[%s2769_s1 + $0x30] ss:$8 sps:$4 sm:$0xff]   ;;  %v1888_v35 = vld [vmem:[%s2769_s1 + $0x44] ss:$8 sps:$4 sm:$0xff]   ;;  %v1828_v36 = vld [vmem:[%s2769_s1 + $0x1c0] ss:$8 sps:$4 sm:$0xff]  }
   0xd   :  { %v1829_v37 = vld [vmem:[%s2769_s1 + $0x1d4] ss:$8 sps:$4 sm:$0xff]   ;;  %v1890_v38 = vld [vmem:[%s2769_s1 + $0x40] ss:$8 sps:$4 sm:$0xff]   ;;  %v1831_v40 = vld [vmem:[%s2769_s1 + $0x1d0] ss:$8 sps:$4 sm:$0xff]  }
   0xe   :  { %946 = vmatpush1.bf16.msra.mxu1 %v1872_v26  ;;  %v1894_v39 = vld [vmem:[%s2769_s1 + $0x54] ss:$8 sps:$4 sm:$0xff]   ;;  %v1832_v41 = vld [vmem:[%s2769_s1 + $0x1e4] ss:$8 sps:$4 sm:$0xff]   ;;  %v1896_v42 = vld [vmem:[%s2769_s1 + $0x50] ss:$8 sps:$4 sm:$0xff]  }
   0xf   :  { %991 = vmatpush1.bf16.msra.mxu0 %v1801_v7  ;;  %947 = vmatprep.subr.bf16.mxu1 %v1876_v28  ;;  %v1900_v43 = vld [vmem:[%s2769_s1 + $0x64] ss:$8 sps:$4 sm:$0xff]   ;;  %v1834_v44 = vld [vmem:[%s2769_s1 + $0x1e0] ss:$8 sps:$4 sm:$0xff]   ;;  %v1835_v45 = vld [vmem:[%s2769_s1 + $0x1f4] ss:$8 sps:$4 sm:$0xff]  }
  0x10   :  { %992 = vmatprep.subr.bf16.mxu0 %v1802_v8  ;;  %v1902_v46 = vld [vmem:[%s2769_s1 + $0x60] ss:$8 sps:$4 sm:$0xff]   ;;  %v1906_v47 = vld [vmem:[%s2769_s1 + $0x74] ss:$8 sps:$4 sm:$0xff]   ;;  %v1837_v48 = vld [vmem:[%s2769_s1 + $0x1f0] ss:$8 sps:$4 sm:$0xff]  }
  0x11   :  { %v1842_v49 = vld [vmem:[%s2769_s1 + $0x204] ss:$8 sps:$4 sm:$0xff]   ;;  %v1908_v50 = vld [vmem:[%s2769_s1 + $0x70] ss:$8 sps:$4 sm:$0xff]   ;;  %v1840_v54 = vld [vmem:[%s2769_s1 + $0x200] ss:$8 sps:$4 sm:$0xff]  }
  0x12   :  { %948 = vmatpush1.bf16.msra.mxu1 %v1878_v30  ;;  %v2290_v51 = vld [vmem:[%s2770_s0 + $0x10] sm:$0xff]  ;;  %v1912_v52 = vld [vmem:[%s2769_s1 + $0x84] ss:$8 sps:$4 sm:$0xff]   ;;  %v1914_v57 = vld [vmem:[%s2769_s1 + $0x80] ss:$8 sps:$4 sm:$0xff]  }
  0x13   :  { %993 = vmatpush1.bf16.msra.mxu0 %v1804_v9  ;;  %949 = vmatprep.subr.bf16.mxu1 %v1882_v31  ;;  %v1569_v55 = vcombine.high %v2290_v51, %v2290_v51  ;;  %v1845_v56 = vld [vmem:[%s2769_s1 + $0x214] ss:$8 sps:$4 sm:$0xff]   ;;  %v1843_v59 = vld [vmem:[%s2769_s1 + $0x210] ss:$8 sps:$4 sm:$0xff]   ;;  %v1848_v60 = vld [vmem:[%s2769_s1 + $0x224] ss:$8 sps:$4 sm:$0xff]  }
  0x14   :  { %994 = vmatprep.subr.bf16.mxu0 %v1805_v10  ;;  %v1920_v58 = vld [vmem:[%s2769_s1 + $0x94] ss:$8 sps:$4 sm:$0xff]   ;;  %v1922_v61 = vld [vmem:[%s2769_s1 + $0x90] ss:$8 sps:$4 sm:$0xff]   ;;  %v1926_v62 = vld [vmem:[%s2769_s1 + $0xa4] ss:$8 sps:$4 sm:$0xff]  }
  0x15   :  { %v1846_v63 = vld [vmem:[%s2769_s1 + $0x220] ss:$8 sps:$4 sm:$0xff]   ;;  %v1851_v0 = vld [vmem:[%s2769_s1 + $0x234] ss:$8 sps:$4 sm:$0xff]   ;;  %v1849_v3 = vld [vmem:[%s2769_s1 + $0x230] ss:$8 sps:$4 sm:$0xff]  }
  0x16   :  { %950 = vmatpush1.bf16.msra.mxu1 %v1884_v34  ;;  %v1928_v1 = vld [vmem:[%s2769_s1 + $0xa0] ss:$8 sps:$4 sm:$0xff]   ;;  %v1932_v2 = vld [vmem:[%s2769_s1 + $0xb4] ss:$8 sps:$4 sm:$0xff]   ;;  %v1854_v5 = vld [vmem:[%s2769_s1 + $0x244] ss:$8 sps:$4 sm:$0xff]  }
  0x17   :  { %995 = vmatpush1.bf16.msra.mxu0 %v1807_v11  ;;  %951 = vmatprep.subr.bf16.mxu1 %v1888_v35  ;;  %v30_v4 = vld [vmem:[%s2770_s0] sm:$0xff]  ;;  %v1934_v6 = vld [vmem:[%s2769_s1 + $0xb0] ss:$8 sps:$4 sm:$0xff]   ;;  %v1857_v10 = vld [vmem:[%s2769_s1 + $0x254] ss:$8 sps:$4 sm:$0xff]   ;;  %v2087_v34 = vmov 0  }
  0x18   :  { %996 = vmatprep.subr.bf16.mxu0 %v1808_v12  ;;  %v1565_v7 = vcombine.high %v30_v4, %v30_v4  ;;  %v1938_v8 = vld [vmem:[%s2769_s1 + $0xc4] ss:$8 sps:$4 sm:$0xff]   ;;  %v1852_v9 = vld [vmem:[%s2769_s1 + $0x240] ss:$8 sps:$4 sm:$0xff]   ;;  %v1944_v12 = vld [vmem:[%s2769_s1 + $0xd4] ss:$8 sps:$4 sm:$0xff]   ;;  %v1564_v26 = vcombine.low %v30_v4, %v30_v4 }
  0x19   :  { %v1940_v11 = vld [vmem:[%s2769_s1 + $0xc0] ss:$8 sps:$4 sm:$0xff]   ;;  %v1855_v13 = vld [vmem:[%s2769_s1 + $0x250] ss:$8 sps:$4 sm:$0xff]   ;;  %v1860_v14 = vld [vmem:[%s2769_s1 + $0x264] ss:$8 sps:$4 sm:$0xff]  }
  0x1a   :  { %952 = vmatpush1.bf16.msra.mxu1 %v1890_v38  ;;  %975 = vmatprep.mubr.bf16.mxu1 %v1565_v7  ;;  %v1861_v21 = vld [vmem:[%s2769_s1 + $0x270] ss:$8 sps:$4 sm:$0xff]   ;;  %v1869_v22 = vld [vmem:[%s2769_s1 + $0x284] ss:$8 sps:$4 sm:$0xff]   ;;  %v1867_v25 = vld [vmem:[%s2769_s1 + $0x280] ss:$8 sps:$4 sm:$0xff]  }
  0x1b   :  { %997 = vmatpush1.bf16.msra.mxu0 %v1810_v15  ;;  %953 = vmatprep.subr.bf16.mxu1 %v1894_v39  ;;  %v1946_v15 = vld [vmem:[%s2769_s1 + $0xd0] ss:$8 sps:$4 sm:$0xff]   ;;  %v1964_v28 = vld [vmem:[%s2769_s1 + $0x400] ss:$8 sps:$4 sm:$0xff]   ;;  %v1881_v31 = vld [vmem:[%s2769_s1 + $0x2a4] ss:$8 sps:$4 sm:$0xff]  }
  0x1c   :  { %998 = vmatprep.subr.bf16.mxu0 %v1811_v16  ;;  %v1950_v16 = vld [vmem:[%s2769_s1 + $0xe4] ss:$8 sps:$4 sm:$0xff]   ;;  %v1873_v30 = vld [vmem:[%s2769_s1 + $0x290] ss:$8 sps:$4 sm:$0xff]   ;;  %v1879_v35 = vld [vmem:[%s2769_s1 + $0x2a0] ss:$8 sps:$4 sm:$0xff]  }
  0x1d   :  { %v1885_v38 = vld [vmem:[%s2769_s1 + $0x2b0] ss:$8 sps:$4 sm:$0xff]   ;;  %v1984_v39 = vld [vmem:[%s2769_s1 + $0x434] ss:$8 sps:$4 sm:$0xff]   ;;  %v1931_v4 = vld [vmem:[%s2769_s1 + $0x324] ss:$8 sps:$4 sm:$0xff]  }
  0x1e   :  { %954 = vmatpush1.bf16.msra.mxu1 %v1896_v42  ;;  %v1990_v42 = vld [vmem:[%s2769_s1 + $0x444] ss:$8 sps:$4 sm:$0xff]   ;;  %v1929_v7 = vld [vmem:[%s2769_s1 + $0x320] ss:$8 sps:$4 sm:$0xff]  }
  0x1f   :  { %999 = vmatpush1.bf16.msra.mxu0 %v1813_v17  ;;  %955 = vmatprep.subr.bf16.mxu1 %v1900_v43  ;;  %v1858_v17 = vld [vmem:[%s2769_s1 + $0x260] ss:$8 sps:$4 sm:$0xff]  }
  0x20   :  { %1000 = vmatprep.subr.bf16.mxu0 %v1814_v18  ;;  %v1863_v18 = vld [vmem:[%s2769_s1 + $0x274] ss:$8 sps:$4 sm:$0xff]   ;;  %v1891_v43 = vld [vmem:[%s2769_s1 + $0x2c0] ss:$8 sps:$4 sm:$0xff]  }
  0x22   :  { %956 = vmatpush1.bf16.msra.mxu1 %v1902_v46  ;;  %v1996_v46 = vld [vmem:[%s2769_s1 + $0x454] ss:$8 sps:$4 sm:$0xff]  }
  0x23   :  { %1001 = vmatpush1.bf16.msra.mxu0 %v1816_v19  ;;  %957 = vmatprep.subr.bf16.mxu1 %v1906_v47  ;;  %v1952_v19 = vld [vmem:[%s2769_s1 + $0xe0] ss:$8 sps:$4 sm:$0xff]   ;;  %v1897_v47 = vld [vmem:[%s2769_s1 + $0x2d0] ss:$8 sps:$4 sm:$0xff]  }
  0x24   :  { %1002 = vmatprep.subr.bf16.mxu0 %v1817_v20  ;;  %v1956_v20 = vld [vmem:[%s2769_s1 + $0xf4] ss:$8 sps:$4 sm:$0xff]  }
  0x26   :  { %958 = vmatpush1.bf16.msra.mxu1 %v1908_v50  ;;  %v2002_v50 = vld [vmem:[%s2769_s1 + $0x464] ss:$8 sps:$4 sm:$0xff]  }
  0x27   :  { %1003 = vmatpush1.bf16.msra.mxu0 %v1819_v23  ;;  %959 = vmatprep.subr.bf16.mxu1 %v1912_v52  ;;  %v1958_v23 = vld [vmem:[%s2769_s1 + $0xf0] ss:$8 sps:$4 sm:$0xff]   ;;  %v1903_v52 = vld [vmem:[%s2769_s1 + $0x2e0] ss:$8 sps:$4 sm:$0xff]  }
  0x28   :  { %1004 = vmatprep.subr.bf16.mxu0 %v1820_v24  ;;  %v1966_v24 = vld [vmem:[%s2769_s1 + $0x404] ss:$8 sps:$4 sm:$0xff]  }
  0x2a   :  { %960 = vmatpush1.bf16.msra.mxu1 %v1914_v57  ;;  %v1919_v57 = vld [vmem:[%s2769_s1 + $0x304] ss:$8 sps:$4 sm:$0xff]  }
  0x2b   :  { %1005 = vmatpush1.bf16.msra.mxu0 %v1822_v27  ;;  %961 = vmatprep.subr.bf16.mxu1 %v1920_v58  ;;  %v1875_v27 = vld [vmem:[%s2769_s1 + $0x294] ss:$8 sps:$4 sm:$0xff]   ;;  %v2006_v58 = vld [vmem:[%s2769_s1 + $0x470] ss:$8 sps:$4 sm:$0xff]  }
  0x2c   :  { %1006 = vmatprep.subr.bf16.mxu0 %v1823_v29  ;;  %v1972_v29 = vld [vmem:[%s2769_s1 + $0x414] ss:$8 sps:$4 sm:$0xff]  }
  0x2e   :  { %962 = vmatpush1.bf16.msra.mxu1 %v1922_v61  ;;  %v1568_v61 = vcombine.low %v2290_v51, %v2290_v51  ;;  %v2015_v51 = vld [vmem:[%s2771_s3] ss:$8 sps:$4 sm:$0xff]  }
  0x2f   :  { %1007 = vmatpush1.bf16.msra.mxu0 %v1825_v32  ;;  %963 = vmatprep.subr.bf16.mxu1 %v1926_v62  ;;  %v1970_v32 = vld [vmem:[%s2769_s1 + $0x410] ss:$8 sps:$4 sm:$0xff]   ;;  %v1917_v62 = vld [vmem:[%s2769_s1 + $0x300] ss:$8 sps:$4 sm:$0xff]  }
  0x30   :  { %1008 = vmatprep.subr.bf16.mxu0 %v1826_v33  ;;  %v1978_v33 = vld [vmem:[%s2769_s1 + $0x424] ss:$8 sps:$4 sm:$0xff]  }
  0x32   :  { %964 = vmatpush1.bf16.msra.mxu1 %v1928_v1  ;;  %v2014_v1 = vld [vmem:[%s2770_s0 + $0x20] ss:$0 sps:$4 sm:$0xff]  }
  0x33   :  { %1009 = vmatpush1.bf16.msra.mxu0 %v1828_v36  ;;  %965 = vmatprep.subr.bf16.mxu1 %v1932_v2  ;;  %v1887_v36 = vld [vmem:[%s2769_s1 + $0x2b4] ss:$8 sps:$4 sm:$0xff]  }
  0x34   :  { %1010 = vmatprep.subr.bf16.mxu0 %v1829_v37  ;;  %v1976_v37 = vld [vmem:[%s2769_s1 + $0x420] ss:$8 sps:$4 sm:$0xff]   ;;  %v2020_v2 = vld [vmem:[%s2771_s3 + $0x14] ss:$8 sps:$4 sm:$0xff]  }
  0x36   :  { %966 = vmatpush1.bf16.msra.mxu1 %v1934_v6  ;;  %v2023_v6 = vld [vmem:[%s2771_s3 + $0x24] ss:$8 sps:$4 sm:$0xff]  }
  0x37   :  { %1011 = vmatpush1.bf16.msra.mxu0 %v1831_v40  ;;  %967 = vmatprep.subr.bf16.mxu1 %v1938_v8  ;;  %v1893_v40 = vld [vmem:[%s2769_s1 + $0x2c4] ss:$8 sps:$4 sm:$0xff]   ;;  %v1937_v8 = vld [vmem:[%s2769_s1 + $0x334] ss:$8 sps:$4 sm:$0xff]  }
  0x38   :  { %1012 = vmatprep.subr.bf16.mxu0 %v1832_v41  ;;  %v1982_v41 = vld [vmem:[%s2769_s1 + $0x430] ss:$8 sps:$4 sm:$0xff]  }
  0x3a   :  { %968 = vmatpush1.bf16.msra.mxu1 %v1940_v11  ;;  %v1935_v11 = vld [vmem:[%s2769_s1 + $0x330] ss:$8 sps:$4 sm:$0xff]  }
  0x3b   :  { %1013 = vmatpush1.bf16.msra.mxu0 %v1834_v44  ;;  %969 = vmatprep.subr.bf16.mxu1 %v1944_v12  ;;  %v1899_v44 = vld [vmem:[%s2769_s1 + $0x2d4] ss:$8 sps:$4 sm:$0xff]   ;;  %v1943_v12 = vld [vmem:[%s2769_s1 + $0x344] ss:$8 sps:$4 sm:$0xff]  }
  0x3c   :  { %1014 = vmatprep.subr.bf16.mxu0 %v1835_v45  ;;  %v1988_v45 = vld [vmem:[%s2769_s1 + $0x440] ss:$8 sps:$4 sm:$0xff]  }
  0x3e   :  { %970 = vmatpush1.bf16.msra.mxu1 %v1946_v15  ;;  %v1941_v15 = vld [vmem:[%s2769_s1 + $0x340] ss:$8 sps:$4 sm:$0xff]  }
  0x3f   :  { %1015 = vmatpush1.bf16.msra.mxu0 %v1837_v48  ;;  %971 = vmatprep.subr.bf16.mxu1 %v1950_v16  ;;  %v1905_v48 = vld [vmem:[%s2769_s1 + $0x2e4] ss:$8 sps:$4 sm:$0xff]   ;;  %v1949_v16 = vld [vmem:[%s2769_s1 + $0x354] ss:$8 sps:$4 sm:$0xff]  }
  0x40   :  { %1025 = vmatprep.subr.bf16.mxu0 %v1842_v49  ;;  %v1994_v49 = vld [vmem:[%s2769_s1 + $0x450] ss:$8 sps:$4 sm:$0xff]  }
  0x42   :  { %1017 = vmatmul.mubr.bf16.vlgmr.msra.gmra.mrb[0].mxu0 %v1566_v53  ;;  %972 = vmatpush1.bf16.msra.mxu1 %v1952_v19  ;;  %v1911_v53 = vld [vmem:[%s2769_s1 + $0x2f4] ss:$8 sps:$4 sm:$0xff]   ;;  %v1947_v19 = vld [vmem:[%s2769_s1 + $0x350] ss:$8 sps:$4 sm:$0xff]  }
  0x43   :  { %1026 = vmatpush1.bf16.msra.mxu0 %v1840_v54  ;;  %1057 = vmatprep.mubr.bf16.mxu0 %v1569_v55  ;;  %v2000_v54 = vld [vmem:[%s2769_s1 + $0x460] ss:$8 sps:$4 sm:$0xff]   ;;  %v2008_v55 = vld [vmem:[%s2769_s1 + $0x474] ss:$8 sps:$4 sm:$0xff]  }
  0x44   :  { %1027 = vmatprep.subr.bf16.mxu0 %v1845_v56  ;;  %973 = vmatprep.subr.bf16.mxu1 %v1956_v20  ;;  %v1909_v56 = vld [vmem:[%s2769_s1 + $0x2f0] ss:$8 sps:$4 sm:$0xff]   ;;  %v1955_v20 = vld [vmem:[%s2769_s1 + $0x364] ss:$8 sps:$4 sm:$0xff]  }
  0x46   :  { %974 = vmatpush1.bf16.msra.mxu1 %v1958_v23  ;;  %v1961_v23 = vld [vmem:[%s2769_s1 + $0x374] ss:$8 sps:$4 sm:$0xff]  }
  0x47   :  { %1028 = vmatpush1.bf16.msra.mxu0 %v1843_v59  ;;  %1107 = vmatprep.subr.bf16.mxu1 %v1966_v24  ;;  %v2495_v59 = vld [vmem:[%s2770_s0 + $0x18] sm:$0xff] }
  0x48   :  { %1029 = vmatprep.subr.bf16.mxu0 %v1848_v60  ;;  %v2017_v60 = vld [vmem:[%s2771_s3 + $0x4] ss:$8 sps:$4 sm:$0xff]   ;;  %v1959_v24 = vld [vmem:[%s2769_s1 + $0x370] ss:$8 sps:$4 sm:$0xff]  }
  0x49   :  { %976 = vmatmul.mubr.bf16.vlgmr.msra.gmra.mrb[0].mxu1 %v1564_v26  ;;  %v1967_v26 = vld [vmem:[%s2769_s1 + $0x380] ss:$8 sps:$4 sm:$0xff]  }
  0x4a   :  { %1108 = vmatpush1.bf16.msra.mxu1 %v1964_v28  ;;  %1139 = vmatprep.mubr.bf16.mxu1 %v2087_v34  ;;  %v1973_v28 = vld [vmem:[%s2769_s1 + $0x390] ss:$8 sps:$4 sm:$0xff]  }
  0x4b   :  { %1030 = vmatpush1.bf16.msra.mxu0 %v1846_v63  ;;  %1109 = vmatprep.subr.bf16.mxu1 %v1972_v29  ;;  %v1571_v63 = vcombine.high %v2495_v59, %v2495_v59  ;;  %v1981_v29 = vld [vmem:[%s2769_s1 + $0x3a4] ss:$8 sps:$4 sm:$0xff]  }
  0x4c   :  { %1031 = vmatprep.subr.bf16.mxu0 %v1851_v0  ;;  %v1925_v0 = vld [vmem:[%s2769_s1 + $0x314] ss:$8 sps:$4 sm:$0xff]  }
  0x4e   :  { %1110 = vmatpush1.bf16.msra.mxu1 %v1970_v32  ;;  %v1985_v32 = vld [vmem:[%s2769_s1 + $0x3b0] ss:$8 sps:$4 sm:$0xff]  }
  0x4f   :  { %1032 = vmatpush1.bf16.msra.mxu0 %v1849_v3  ;;  %1111 = vmatprep.subr.bf16.mxu1 %v1978_v33  ;;  %v1923_v3 = vld [vmem:[%s2769_s1 + $0x310] ss:$8 sps:$4 sm:$0xff]   ;;  %v1993_v33 = vld [vmem:[%s2769_s1 + $0x3c4] ss:$8 sps:$4 sm:$0xff]  }
  0x50   :  { %1033 = vmatprep.subr.bf16.mxu0 %v1854_v5  ;;  %v2018_v5 = vld [vmem:[%s2771_s3 + $0x10] ss:$8 sps:$4 sm:$0xff]  }
  0x52   :  { %1112 = vmatpush1.bf16.msra.mxu1 %v1976_v37  ;;  %v1997_v37 = vld [vmem:[%s2769_s1 + $0x3d0] ss:$8 sps:$4 sm:$0xff]  }
  0x53   :  { %1034 = vmatpush1.bf16.msra.mxu0 %v1852_v9  ;;  %1113 = vmatprep.subr.bf16.mxu1 %v1984_v39  ;;  %v2021_v9 = vld [vmem:[%s2771_s3 + $0x20] ss:$8 sps:$4 sm:$0xff]  }
  0x54   :  { %1035 = vmatprep.subr.bf16.mxu0 %v1857_v10  ;;  %v2026_v10 = vld [vmem:[%s2771_s3 + $0x34] ss:$8 sps:$4 sm:$0xff]   ;;  %v2003_v39 = vld [vmem:[%s2769_s1 + $0x3e0] ss:$8 sps:$4 sm:$0xff]  }
  0x56   :  { %1114 = vmatpush1.bf16.msra.mxu1 %v1982_v41  ;;  %v2033_v41 = vld [vmem:[%s2771_s3 + $0x60] ss:$8 sps:$4 sm:$0xff]  }
  0x57   :  { %1036 = vmatpush1.bf16.msra.mxu0 %v1855_v13  ;;  %1115 = vmatprep.subr.bf16.mxu1 %v1990_v42  ;;  %v2024_v13 = vld [vmem:[%s2771_s3 + $0x30] ss:$8 sps:$4 sm:$0xff]   ;;  %v2035_v42 = vld [vmem:[%s2771_s3 + $0x64] ss:$8 sps:$4 sm:$0xff]  }
  0x58   :  { %1037 = vmatprep.subr.bf16.mxu0 %v1860_v14  ;;  %v2029_v14 = vld [vmem:[%s2771_s3 + $0x44] ss:$8 sps:$4 sm:$0xff]  }
  0x5a   :  { %1116 = vmatpush1.bf16.msra.mxu1 %v1988_v45  ;;  %v2036_v45 = vld [vmem:[%s2771_s3 + $0x70] ss:$8 sps:$4 sm:$0xff]  }
  0x5b   :  { %1038 = vmatpush1.bf16.msra.mxu0 %v1858_v17  ;;  %1117 = vmatprep.subr.bf16.mxu1 %v1996_v46  ;;  %v2027_v17 = vld [vmem:[%s2771_s3 + $0x40] ss:$8 sps:$4 sm:$0xff]   ;;  %v2041_v46 = vld [vmem:[%s2771_s3 + $0x84] ss:$8 sps:$4 sm:$0xff]  }
  0x5c   :  { %1039 = vmatprep.subr.bf16.mxu0 %v1863_v18  ;;  %v2032_v18 = vld [vmem:[%s2771_s3 + $0x54] ss:$8 sps:$4 sm:$0xff]  }
  0x5e   :  { %1118 = vmatpush1.bf16.msra.mxu1 %v1994_v49  ;;  %v2044_v49 = vld [vmem:[%s2771_s3 + $0x94] ss:$8 sps:$4 sm:$0xff]  }
  0x5f   :  { %1040 = vmatpush1.bf16.msra.mxu0 %v1861_v21  ;;  %1119 = vmatprep.subr.bf16.mxu1 %v2002_v50  ;;  %v2030_v21 = vld [vmem:[%s2771_s3 + $0x50] ss:$8 sps:$4 sm:$0xff]  }
  0x60   :  { %1041 = vmatprep.subr.bf16.mxu0 %v1869_v22  ;;  %v1953_v22 = vld [vmem:[%s2769_s1 + $0x360] ss:$8 sps:$4 sm:$0xff]   ;;  %v2042_v50 = vld [vmem:[%s2771_s3 + $0x90] ss:$8 sps:$4 sm:$0xff]  }
  0x62   :  { %1120 = vmatpush1.bf16.msra.mxu1 %v2000_v54  ;;  %v2050_v54 = vld [vmem:[%s2771_s3 + $0xb4] ss:$8 sps:$4 sm:$0xff]  }
  0x63   :  { %1042 = vmatpush1.bf16.msra.mxu0 %v1867_v25  ;;  %1121 = vmatprep.subr.bf16.mxu1 %v2008_v55  ;;  %v1969_v25 = vld [vmem:[%s2769_s1 + $0x384] ss:$8 sps:$4 sm:$0xff]   ;;  %v2048_v55 = vld [vmem:[%s2771_s3 + $0xb0] ss:$8 sps:$4 sm:$0xff]  }
  0x64   :  { %1043 = vmatprep.subr.bf16.mxu0 %v1875_v27  ;;  %v1975_v27 = vld [vmem:[%s2769_s1 + $0x394] ss:$8 sps:$4 sm:$0xff]  }
  0x66   :  { %1122 = vmatpush1.bf16.msra.mxu1 %v2006_v58  ;;  %v2056_v58 = vld [vmem:[%s2771_s3 + $0xd4] ss:$8 sps:$4 sm:$0xff]  }
  0x67   :  { %1044 = vmatpush1.bf16.msra.mxu0 %v1873_v30  ;;  %1356 = vmatprep.subr.bf16.mxu1 %v2017_v60  ;;  %v1979_v30 = vld [vmem:[%s2769_s1 + $0x3a0] ss:$8 sps:$4 sm:$0xff]   ;;  %v2059_v60 = vld [vmem:[%s2771_s3 + $0xe4] ss:$8 sps:$4 sm:$0xff]  }
  0x68   :  { %1045 = vmatprep.subr.bf16.mxu0 %v1881_v31  ;;  %v1987_v31 = vld [vmem:[%s2769_s1 + $0x3b4] ss:$8 sps:$4 sm:$0xff]  }
  0x69   :  { %1140 = vmatmul.mubr.bf16.vlgmr.msra.gmra.mrb[4].mxu1 %v2014_v1 }
  0x6a   :  { %1357 = vmatpush1.bf16.msra.mxu1 %v2015_v51 }
  0x6b   :  { %1046 = vmatpush1.bf16.msra.mxu0 %v1879_v35  ;;  %1358 = vmatprep.subr.bf16.mxu1 %v2020_v2  ;;  %v1991_v35 = vld [vmem:[%s2769_s1 + $0x3c0] ss:$8 sps:$4 sm:$0xff]  }
  0x6c   :  { %1047 = vmatprep.subr.bf16.mxu0 %v1887_v36  ;;  %v1999_v36 = vld [vmem:[%s2769_s1 + $0x3d4] ss:$8 sps:$4 sm:$0xff]  }
  0x6e   :  { %1359 = vmatpush1.bf16.msra.mxu1 %v2018_v5 }
  0x6f   :  { %1048 = vmatpush1.bf16.msra.mxu0 %v1885_v38  ;;  %1360 = vmatprep.subr.bf16.mxu1 %v2023_v6  ;;  %v2005_v38 = vld [vmem:[%s2769_s1 + $0x3e4] ss:$8 sps:$4 sm:$0xff]  }
  0x70   :  { %1049 = vmatprep.subr.bf16.mxu0 %v1893_v40  ;;  %v2011_v40 = vld [vmem:[%s2769_s1 + $0x3f4] ss:$8 sps:$4 sm:$0xff]  }
  0x72   :  { %1361 = vmatpush1.bf16.msra.mxu1 %v2021_v9 }
  0x73   :  { %1050 = vmatpush1.bf16.msra.mxu0 %v1891_v43  ;;  %1362 = vmatprep.subr.bf16.mxu1 %v2026_v10  ;;  %v2038_v43 = vld [vmem:[%s2771_s3 + $0x74] ss:$8 sps:$4 sm:$0xff]  }
  0x74   :  { %1051 = vmatprep.subr.bf16.mxu0 %v1899_v44  ;;  %v2009_v44 = vld [vmem:[%s2769_s1 + $0x3f0] ss:$8 sps:$4 sm:$0xff]  }
  0x76   :  { %1363 = vmatpush1.bf16.msra.mxu1 %v2024_v13 }
  0x77   :  { %1052 = vmatpush1.bf16.msra.mxu0 %v1897_v47  ;;  %1364 = vmatprep.subr.bf16.mxu1 %v2029_v14  ;;  %v1570_v47 = vcombine.low %v2495_v59, %v2495_v59  ;;  %v2054_v59 = vld [vmem:[%s2771_s3 + $0xd0] ss:$8 sps:$4 sm:$0xff]  }
  0x78   :  { %1053 = vmatprep.subr.bf16.mxu0 %v1905_v48  ;;  %v2039_v48 = vld [vmem:[%s2771_s3 + $0x80] ss:$8 sps:$4 sm:$0xff]  }
  0x7a   :  { %1365 = vmatpush1.bf16.msra.mxu1 %v2027_v17 }
  0x7b   :  { %1054 = vmatpush1.bf16.msra.mxu0 %v1903_v52  ;;  %1366 = vmatprep.subr.bf16.mxu1 %v2032_v18  ;;  %v2047_v52 = vld [vmem:[%s2771_s3 + $0xa4] ss:$8 sps:$4 sm:$0xff]  }
  0x7c   :  { %1055 = vmatprep.subr.bf16.mxu0 %v1911_v53  ;;  %v2045_v53 = vld [vmem:[%s2771_s3 + $0xa0] ss:$8 sps:$4 sm:$0xff]  }
  0x7e   :  { %1367 = vmatpush1.bf16.msra.mxu1 %v2030_v21 }
  0x7f   :  { %1056 = vmatpush1.bf16.msra.mxu0 %v1909_v56  ;;  %1368 = vmatprep.subr.bf16.mxu1 %v2035_v42  ;;  %v2053_v56 = vld [vmem:[%s2771_s3 + $0xc4] ss:$8 sps:$4 sm:$0xff]   ;;  %v2086_v42 = vld [vmem:[%s2772_s6 + $0x74] ss:$8 sps:$4 sm:$0xff]  }
  0x80   :  { %1066 = vmatprep.subr.bf16.mxu0 %v1919_v57  ;;  %v2051_v57 = vld [vmem:[%s2771_s3 + $0xc0] ss:$8 sps:$4 sm:$0xff]  }
  0x82   :  { %1058 = vmatmul.mubr.bf16.vlgmr.msra.gmra.mrb[0].mxu0 %v1568_v61  ;;  %1369 = vmatpush1.bf16.msra.mxu1 %v2033_v41  ;;  %v2057_v61 = vld [vmem:[%s2771_s3 + $0xe0] ss:$8 sps:$4 sm:$0xff]  }
  0x83   :  { %1067 = vmatpush1.bf16.msra.mxu0 %v1917_v62  ;;  %1098 = vmatprep.mubr.bf16.mxu0 %v1571_v63  ;;  %v2062_v62 = vld [vmem:[%s2771_s3 + $0xf4] ss:$8 sps:$4 sm:$0xff]   ;;  %v2060_v63 = vld [vmem:[%s2771_s3 + $0xf0] ss:$8 sps:$4 sm:$0xff]   ;;  %v2081_v41 = vld [vmem:[%s2772_s6 + $0x60] ss:$8 sps:$4 sm:$0xff]  }
  0x84   :  { %1068 = vmatprep.subr.bf16.mxu0 %v1925_v0  ;;  %1370 = vmatprep.subr.bf16.mxu1 %v2038_v43  ;;  %v2065_v0 = vld [vmem:[%s2772_s6 + $0x4] ss:$8 sps:$4 sm:$0xff]   ;;  %v2084_v43 = vld [vmem:[%s2772_s6 + $0x70] ss:$8 sps:$4 sm:$0xff]  }
  0x86   :  { %1371 = vmatpush1.bf16.msra.mxu1 %v2036_v45  ;;  %v1184_v45 = vld [vmem:[%s2775_s4] sm:$0x3] }
  0x87   :  { %1069 = vmatpush1.bf16.msra.mxu0 %v1923_v3  ;;  %1372 = vmatprep.subr.bf16.mxu1 %v2041_v46  ;;  %v1414_v46 = vld [vmem:[%s2776_s7] sm:$0x3] }
  0x88   :  { %1070 = vmatprep.subr.bf16.mxu0 %v1931_v4 }
  0x8a   :  { %1373 = vmatpush1.bf16.msra.mxu1 %v2039_v48 }
  0x8b   :  { %1071 = vmatpush1.bf16.msra.mxu0 %v1929_v7  ;;  %1374 = vmatprep.subr.bf16.mxu1 %v2044_v49 }
  0x8c   :  { %1072 = vmatprep.subr.bf16.mxu0 %v1937_v8  ;;  %v181_v8 = vlaneseq }
  0x8e   :  { %1375 = vmatpush1.bf16.msra.mxu1 %v2042_v50  ;;  %v182_v9 = vshrl.u32 %v181_v8, 7 }
  0x8f   :  { %1073 = vmatpush1.bf16.msra.mxu0 %v1935_v11  ;;  %1376 = vmatprep.subr.bf16.mxu1 %v2047_v52  ;;  %v179_v11 = vld [vmem:[%s2773_s2] sm:$0x3] }
  0x90   :  { %1074 = vmatprep.subr.bf16.mxu0 %v1943_v12  ;;  %v2698_v10 = vsub.s32 0, %v182_v9  ;;  %v2703_v12 = vsub.s32 1, %v182_v9 }
  0x92   :  { %1377 = vmatpush1.bf16.msra.mxu1 %v2045_v53  ;;  %v184_v13 = vrot.slane %v179_v11, %v2698_v10  ;;  %v188_v14 = vrot.slane %v179_v11, %v2703_v12  ;;  %v1419_v48 = vrot.slane %v1414_v46, %v2698_v10  ;;  %v1193_v49 = vrot.slane %v1184_v45, %v2703_v12 }
  0x93   :  { %1075 = vmatpush1.bf16.msra.mxu0 %v1941_v15  ;;  %1378 = vmatprep.subr.bf16.mxu1 %v2050_v54  ;;  %v1423_v50 = vrot.slane %v1414_v46, %v2703_v12 }
  0x94   :  { %1076 = vmatprep.subr.bf16.mxu0 %v1949_v16 }
  0x95   :  { %v1775_v53 = vadd.f32 %v1423_v50, %v1193_v49 }
  0x96   :  { %1379 = vmatpush1.bf16.msra.mxu1 %v2048_v55 }
  0x97   :  { %1077 = vmatpush1.bf16.msra.mxu0 %v1947_v19  ;;  %1380 = vmatprep.subr.bf16.mxu1 %v2053_v56 }
  0x98   :  { %1078 = vmatprep.subr.bf16.mxu0 %v1955_v20 }
  0x9a   :  { %1381 = vmatpush1.bf16.msra.mxu1 %v2051_v57 }
  0x9b   :  { %1079 = vmatpush1.bf16.msra.mxu0 %v1953_v22  ;;  %1382 = vmatprep.subr.bf16.mxu1 %v2056_v58 }
  0x9c   :  { %1080 = vmatprep.subr.bf16.mxu0 %v1961_v23 }
  0x9e   :  { %1383 = vmatpush1.bf16.msra.mxu1 %v2054_v59 }
  0x9f   :  { %1081 = vmatpush1.bf16.msra.mxu0 %v1959_v24  ;;  %1384 = vmatprep.subr.bf16.mxu1 %v2059_v60 }
  0xa0   :  { %1082 = vmatprep.subr.bf16.mxu0 %v1969_v25 }
  0xa2   :  { %1385 = vmatpush1.bf16.msra.mxu1 %v2057_v61 }
  0xa3   :  { %1083 = vmatpush1.bf16.msra.mxu0 %v1967_v26  ;;  %1386 = vmatprep.subr.bf16.mxu1 %v2062_v62 }
  0xa4   :  { %1084 = vmatprep.subr.bf16.mxu0 %v1975_v27 }
  0xa6   :  { %1387 = vmatpush1.bf16.msra.mxu1 %v2060_v63 }
  0xa7   :  { %1085 = vmatpush1.bf16.msra.mxu0 %v1973_v28  ;;  %1506 = vmatprep.subr.bf16.mxu1 %v2065_v0  ;;  %v2063_v28 = vld [vmem:[%s2772_s6] ss:$8 sps:$4 sm:$0xff]  }
  0xa8   :  { %1086 = vmatprep.subr.bf16.mxu0 %v1981_v29 }
  0xab   :  { %1087 = vmatpush1.bf16.msra.mxu0 %v1979_v30  ;;  %v2068_v30 = vld [vmem:[%s2772_s6 + $0x14] ss:$8 sps:$4 sm:$0xff]  }
  0xac   :  { %1088 = vmatprep.subr.bf16.mxu0 %v1987_v31  ;;  %v2066_v31 = vld [vmem:[%s2772_s6 + $0x10] ss:$8 sps:$4 sm:$0xff]  }
  0xaf   :  { %1089 = vmatpush1.bf16.msra.mxu0 %v1985_v32  ;;  %v2071_v32 = vld [vmem:[%s2772_s6 + $0x24] ss:$8 sps:$4 sm:$0xff]  }
  0xb0   :  { %1090 = vmatprep.subr.bf16.mxu0 %v1993_v33  ;;  %v2069_v33 = vld [vmem:[%s2772_s6 + $0x20] ss:$8 sps:$4 sm:$0xff]  }
  0xb3   :  { %1091 = vmatpush1.bf16.msra.mxu0 %v1991_v35  ;;  %v2074_v35 = vld [vmem:[%s2772_s6 + $0x34] ss:$8 sps:$4 sm:$0xff]  }
  0xb4   :  { %1092 = vmatprep.subr.bf16.mxu0 %v1999_v36  ;;  %v2077_v36 = vld [vmem:[%s2772_s6 + $0x44] ss:$8 sps:$4 sm:$0xff]  }
  0xb7   :  { %1093 = vmatpush1.bf16.msra.mxu0 %v1997_v37  ;;  %v2075_v37 = vld [vmem:[%s2772_s6 + $0x40] ss:$8 sps:$4 sm:$0xff]  }
  0xb8   :  { %1094 = vmatprep.subr.bf16.mxu0 %v2005_v38  ;;  %v2080_v38 = vld [vmem:[%s2772_s6 + $0x54] ss:$8 sps:$4 sm:$0xff]  }
  0xbb   :  { %1095 = vmatpush1.bf16.msra.mxu0 %v2003_v39  ;;  %v2078_v39 = vld [vmem:[%s2772_s6 + $0x50] ss:$8 sps:$4 sm:$0xff]  }
  0xbc   :  { %1096 = vmatprep.subr.bf16.mxu0 %v2011_v40  ;;  %v2083_v40 = vld [vmem:[%s2772_s6 + $0x64] ss:$8 sps:$4 sm:$0xff]  }
  0xbf   :  { %1097 = vmatpush1.bf16.msra.mxu0 %v2009_v44  ;;  %v1397_v44 = vld [vmem:[%s2774_s5] sm:$0xf] }
  0xc2   :  { %1099 = vmatmul.mubr.bf16.vlgmr.msra.gmra.mrb[0].mxu0 %v1570_v47  ;;  %v1189_v47 = vrot.slane %v1184_v45, %v2698_v10 }
  0xc4   :  { %v1773_v52 = vadd.f32 %v1419_v48, %v1189_v47 }
 0x11c   :  { %v977_v1 = vpop.f32.mrb[0].mxu1 }
 0x11d   :  { %v979_v51 = vpop.f32.mrb[1].mxu1  ;;  %v978_v15 = vadd.f32 %v977_v1, %v184_v13 }
 0x11e   :  { %v981_v2 = vpop.f32.mrb[2].mxu1  ;;  %v980_v16 = vadd.f32 %v979_v51, %v188_v14 }
 0x11f   :  { %v982_v3 = vpop.f32.mrb[3].mxu1 }
 0x13c   :  { %v1141_v4 = vpop.f32.mrb[4].mxu1 }
 0x13d   :  { %v1143_v5 = vpop.f32.mrb[5].mxu1 }
 0x13e   :  { %v1145_v6 = vpop.f32.mrb[6].mxu1 }
 0x13f   :  { %v1146_v7 = vpop.f32.mrb[7].mxu1 }
 0x195   :  { %v1100_v17 = vpop.f32.mrb[0].mxu0 }
 0x196   :  { %v1768_v18 = vadd.f32 %v1100_v17, %v978_v15  ;;  %v1102_v19 = vpop.f32.mrb[1].mxu0 }
 0x197   :  { %v1771_v20 = vadd.f32 %v1102_v19, %v980_v16  ;;  %v1104_v21 = vpop.f32.mrb[2].mxu0 }
 0x198   :  { %v1769_v22 = vadd.f32 %v1768_v18, %v1141_v4  ;;  %v1105_v23 = vpop.f32.mrb[3].mxu0 }
 0x199   :  { %v1772_v24 = vadd.f32 %v1771_v20, %v1143_v5 }
 0x19a   :  { %v1148_v25 = vmax.f32 %v1769_v22, 0.0 }
 0x19b   :  { %v1149_v26 = vmax.f32 %v1772_v24, 0.0 }
 0x19c   :  { %v1150_v29 = vpack.c.bf16 %v1148_v25, %v1148_v25 }
 0x19d   :  { %v1151_v27 = vpack.c.bf16 %v1149_v26, %v1149_v26 }
 0x19f   :  { %1388 = vmatprep.mubr.bf16.mxu1 %v1151_v27 }
 0x1a0   :  { %1389 = vmatmul.mubr.bf16.vlgmr.msra.gmra.mrb[8].mxu1 %v1150_v29 }
 0x1a1   :  { %1507 = vmatpush1.bf16.msra.mxu1 %v2063_v28  ;;  %1538 = vmatprep.mubr.bf16.mxu1 %v2087_v34  ;;  %v2072_v34 = vld [vmem:[%s2772_s6 + $0x30] ss:$8 sps:$4 sm:$0xff]  }
 0x1a2   :  { %1508 = vmatprep.subr.bf16.mxu1 %v2068_v30 }
 0x1a5   :  { %1509 = vmatpush1.bf16.msra.mxu1 %v2066_v31 }
 0x1a6   :  { %1510 = vmatprep.subr.bf16.mxu1 %v2071_v32 }
 0x1a9   :  { %1511 = vmatpush1.bf16.msra.mxu1 %v2069_v33 }
 0x1aa   :  { %1512 = vmatprep.subr.bf16.mxu1 %v2074_v35 }
 0x1ad   :  { %1513 = vmatpush1.bf16.msra.mxu1 %v2072_v34 }
 0x1ae   :  { %1514 = vmatprep.subr.bf16.mxu1 %v2077_v36 }
 0x1b1   :  { %1515 = vmatpush1.bf16.msra.mxu1 %v2075_v37 }
 0x1b2   :  { %1516 = vmatprep.subr.bf16.mxu1 %v2080_v38 }
 0x1b5   :  { %1517 = vmatpush1.bf16.msra.mxu1 %v2078_v39 }
 0x1b6   :  { %1518 = vmatprep.subr.bf16.mxu1 %v2083_v40 }
 0x1b9   :  { %1519 = vmatpush1.bf16.msra.mxu1 %v2081_v41 }
 0x1ba   :  { %1520 = vmatprep.subr.bf16.mxu1 %v2086_v42 }
 0x1bd   :  { %1521 = vmatpush1.bf16.msra.mxu1 %v2084_v43 }
 0x1c0   :  { %1539 = vmatmul.mubr.bf16.vlgmr.msra.gmra.mrb[8].mxu1 %v1397_v44 }
 0x293   :  { %v1540_v54 = vpop.f32.mrb[8].mxu1 }
 0x294   :  { %v1774_v55 = vadd.f32 %v1773_v52, %v1540_v54  ;;  %v1542_v56 = vpop.f32.mrb[9].mxu1 }
 0x295   :  { %v1776_v57 = vadd.f32 %v1775_v53, %v1542_v56  ;;  %v1544_v58 = vpop.f32.mrb[10].mxu1 }
 0x296   :  { %v1549_v59 = vmax.f32 %v1774_v55, 0.0  ;;  %v1545_v60 = vpop.f32.mrb[11].mxu1 }
 0x297   :  { %v1550_v61 = vmax.f32 %v1776_v57, 0.0 }
 0x299   :  { %v1766_v62 = vpack.c.bf16 %v1550_v61, %v1549_v59 }
 0x29b   :  { %1559 = vst [vmem:[%s2777_s8] sm:$0xff] %v1766_v62 }

// kernel: _lambda_.12
= control target key start
LH: loop header
LB: loop body
LE: loop exit
PB: predicated region body
PF: predicated region fallthrough
CT: control target
= control target key end

     0   :  { %v2858_v1 = vmov 0.0   ;;  %vm2859_vm0 = vmmov 0   ;;  %vm359_vm1 = vcmask 523264   ;;  %vm496_vm2 = vcmask 130048   ;;  %s3486_s1 = inlined_call_operand.vmem [shape: bf16[576,128], index: 1, kind: input, shape index: {}]   ;;  %s3487_s0 = inlined_call_operand.vmem [shape: bf16[16,576], index: 0, kind: input, shape index: {}]   ;;  %s3488_s5 = inlined_call_operand.vmem [shape: bf16[8,16,16], index: 5, kind: input, shape index: {}]   ;;  %s3489_s3 = inlined_call_operand.vmem [shape: bf16[9,128,128], index: 3, kind: input, shape index: {}]   ;;  %s3490_s2 = inlined_call_operand.vmem [shape: f32[1,128], index: 2, kind: input, shape index: {}, may-alias: {2,4,8}]   ;;  %s3491_s7 = inlined_call_operand.vmem [shape: bf16[64,128], index: 7, kind: input, shape index: {}]   ;;  %s3492_s6 = inlined_call_operand.vmem [shape: bf16[16,64], index: 6, kind: input, shape index: {}]   ;;  %s3493_s4 = inlined_call_operand.vmem [shape: f32[1,128], index: 4, kind: input, shape index: {}, may-alias: {2,4,8}]   ;;  %s3494_s8 = inlined_call_operand.vmem [shape: f32[1,128], index: 8, kind: input, shape index: {}, may-alias: {2,4,8}]   ;;  %s3495_s9 = inlined_call_operand.vmem [shape: bf16[16,128], index: 9, kind: output, shape index: {}]  }
   0x1   :  { %v2730_v0 = vld [vmem:[%s3486_s1 + $0x40] sm:$0xff]   ;;  %2438 = vmatprep.subr.bf16.mxu0 %v2858_v1  ;;  %2446 = vmatprep.mubr.msk.bf16.mxu0 %vm2859_vm0, %v2858_v1  ;;  %v2732_v3 = vld [vmem:[%s3486_s1 + $0x48] sm:$0xff]   ;;  %v2734_v5 = vld [vmem:[%s3486_s1 + $0x50] sm:$0xff]  }
   0x2   :  { %v2731_v2 = vld [vmem:[%s3486_s1] sm:$0xff]   ;;  %2287 = vmatprep.subr.bf16.mxu1 %v2730_v0  ;;  %v2733_v4 = vld [vmem:[%s3486_s1 + $0x8] sm:$0xff]   ;;  %v2735_v6 = vld [vmem:[%s3486_s1 + $0x10] sm:$0xff]  }
   0x3   :  { %2288 = vmatpush3.bf16.msra.mxu1 %v2731_v2  ;;  %v2736_v7 = vld [vmem:[%s3486_s1 + $0x58] sm:$0xff]   ;;  %v2738_v9 = vld [vmem:[%s3486_s1 + $0x60] sm:$0xff]   ;;  %v2740_v11 = vld [vmem:[%s3486_s1 + $0x68] sm:$0xff]  }
   0x4   :  { %2289 = vmatprep.subr.bf16.mxu1 %v2732_v3  ;;  %v2737_v8 = vld [vmem:[%s3486_s1 + $0x18] sm:$0xff]   ;;  %v2739_v10 = vld [vmem:[%s3486_s1 + $0x20] sm:$0xff]   ;;  %v2741_v13 = vld [vmem:[%s3486_s1 + $0x28] sm:$0xff]  }
   0x5   :  { %v2748_v12 = vld [vmem:[%s3487_s0 + $0x4] ss:$20 sps:$4 sm:$0xff]   ;;  %v2742_v14 = vld [vmem:[%s3486_s1 + $0x70] sm:$0xff]   ;;  %v2762_v22 = vld [vmem:[%s3486_s1 + $0x108] sm:$0xff]  }
   0x6   :  { %395 = vmatprep.mubr.bf16.mxu1 %v2748_v12  ;;  %v2743_v15 = vld [vmem:[%s3486_s1 + $0x30] sm:$0xff]   ;;  %v2744_v16 = vld [vmem:[%s3486_s1 + $0x78] sm:$0xff]   ;;  %v2749_v18 = vld [vmem:[%s3486_s1 + $0xc0] sm:$0xff]  }
   0x7   :  { %2290 = vmatpush3.bf16.msra.mxu1 %v2733_v4  ;;  %v2745_v17 = vld [vmem:[%s3486_s1 + $0x38] sm:$0xff]   ;;  %v2759_v19 = vld [vmem:[%s3486_s1 + $0x100] sm:$0xff]   ;;  %v2751_v23 = vld [vmem:[%s3486_s1 + $0xc8] sm:$0xff]  }
   0x8   :  { %2291 = vmatprep.subr.bf16.mxu1 %v2734_v5  ;;  %v2746_v20 = vld [vmem:[%s3487_s0] ss:$20 sps:$4 sm:$0xff]   ;;  %2439 = vmatpush3.bf16.msra.mxu0 %v2759_v19  ;;  %v2752_v25 = vld [vmem:[%s3486_s1 + $0x88] sm:$0xff]   ;;  %v2771_v28 = vld [vmem:[%s3486_s1 + $0x118] sm:$0xff]  }
   0x9   :  { %v2750_v21 = vld [vmem:[%s3486_s1 + $0x80] sm:$0xff]   ;;  %2440 = vmatprep.subr.bf16.mxu0 %v2858_v1  ;;  %v2765_v24 = vld [vmem:[%s3486_s1 + $0x110] sm:$0xff]   ;;  %v2755_v30 = vld [vmem:[%s3486_s1 + $0xd8] sm:$0xff]  }
   0xa   :  { %v2753_v26 = vld [vmem:[%s3486_s1 + $0xd0] sm:$0xff]   ;;  %v2770_v27 = vld [vmem:[%s3487_s0 + $0xc] ss:$20 sps:$4 sm:$0xff]   ;;  %v2756_v32 = vld [vmem:[%s3486_s1 + $0x98] sm:$0xff]  }
   0xb   :  { %2292 = vmatpush3.bf16.msra.mxu1 %v2735_v6  ;;  %v2754_v29 = vld [vmem:[%s3486_s1 + $0x90] sm:$0xff]   ;;  %v2757_v33 = vld [vmem:[%s3486_s1 + $0xe0] sm:$0xff]   ;;  %v2760_v35 = vld [vmem:[%s3486_s1 + $0xe8] sm:$0xff]  }
   0xc   :  { %2293 = vmatprep.subr.bf16.mxu1 %v2736_v7  ;;  %2441 = vmatpush3.bf16.msra.mxu0 %v2762_v22  ;;  %v2772_v31 = vld [vmem:[%s3487_s0 + $0x10] ss:$20 sps:$4 sm:$0xff]   ;;  %v2761_v36 = vld [vmem:[%s3486_s1 + $0xa8] sm:$0xff]   ;;  %v2766_v39 = vld [vmem:[%s3486_s1 + $0xf8] sm:$0xff]  }
   0xd   :  { %2442 = vmatprep.subr.bf16.mxu0 %v2858_v1  ;;  %v2758_v34 = vld [vmem:[%s3486_s1 + $0xa0] sm:$0xff]   ;;  %v2763_v37 = vld [vmem:[%s3486_s1 + $0xf0] sm:$0xff]   ;;  %v2767_v40 = vld [vmem:[%s3486_s1 + $0xb8] sm:$0xff]  }
   0xe   :  { %v2764_v38 = vld [vmem:[%s3486_s1 + $0xb0] sm:$0xff]   ;;  %v2768_v41 = vld [vmem:[%s3487_s0 + $0x8] ss:$20 sps:$4 sm:$0xff]   ;;  %v1997_v52 = vld [vmem:[%s3490_s2] ss:$0 sm:$0xff] }
   0xf   :  { %2294 = vmatpush3.bf16.msra.mxu1 %v2737_v8  ;;  %v2773_v5 = vld [vmem:[%s3488_s5] sm:$0xff]   ;;  %v2774_v6 = vld [vmem:[%s3488_s5 + $0x8] sm:$0xff]  }
  0x10   :  { %2295 = vmatprep.subr.bf16.mxu1 %v2738_v9  ;;  %2443 = vmatpush3.bf16.msra.mxu0 %v2765_v24  ;;  %v2775_v7 = vld [vmem:[%s3489_s3 + $0x40] sm:$0xff]   ;;  %v2776_v8 = vld [vmem:[%s3489_s3 + $0x48] sm:$0xff]   ;;  %v2777_v9 = vld [vmem:[%s3489_s3 + $0x50] sm:$0xff]  }
  0x11   :  { %2444 = vmatprep.subr.bf16.mxu0 %v2858_v1  ;;  %v2780_v12 = vld [vmem:[%s3489_s3 + $0x68] sm:$0xff]  }
  0x13   :  { %2296 = vmatpush3.bf16.msra.mxu1 %v2739_v10  ;;  %v2778_v10 = vld [vmem:[%s3489_s3 + $0x58] sm:$0xff]  }
  0x14   :  { %2297 = vmatprep.subr.bf16.mxu1 %v2740_v11  ;;  %2445 = vmatpush3.bf16.msra.mxu0 %v2771_v28  ;;  %v2779_v11 = vld [vmem:[%s3489_s3 + $0x60] sm:$0xff]   ;;  %v2786_v28 = vld [vmem:[%s3489_s3 + $0x18] sm:$0xff]  }
  0x15   :  { %2534 = vmatprep.subr.bf16.mxu0 %v2858_v1 }
  0x17   :  { %2298 = vmatpush3.bf16.msra.mxu1 %v2741_v13  ;;  %2447 = vmatmul.mubr.msk.bf16.vlgmr.msra.gmra.mrb[0].mxu0 %vm359_vm1, %v2772_v31  ;;  %v2781_v13 = vld [vmem:[%s3489_s3 + $0x70] sm:$0xff]  }
  0x18   :  { %2299 = vmatprep.subr.bf16.mxu1 %v2742_v14  ;;  %2550 = vmatprep.mubr.msk.bf16.mxu0 %vm2859_vm0, %v2858_v1  ;;  %v2782_v14 = vld [vmem:[%s3489_s3 + $0x78] sm:$0xff]   ;;  %v2789_v31 = vld [vmem:[%s3489_s3 + $0x30] sm:$0xff]  }
  0x1b   :  { %2300 = vmatpush3.bf16.msra.mxu1 %v2743_v15 }
  0x1c   :  { %2301 = vmatprep.subr.bf16.mxu1 %v2744_v16 }
  0x1f   :  { %2302 = vmatpush3.bf16.msra.mxu1 %v2745_v17 }
  0x20   :  { %2309 = vmatprep.subr.bf16.mxu1 %v2749_v18 }
  0x22   :  { %396 = vmatmul.mubr.bf16.vlgmr.msra.gmra.mrb[0].mxu1 %v2746_v20 }
  0x23   :  { %2310 = vmatpush3.bf16.msra.mxu1 %v2750_v21  ;;  %436 = vmatprep.mubr.bf16.mxu1 %v2770_v27  ;;  %v2785_v27 = vld [vmem:[%s3489_s3 + $0x10] sm:$0xff]  }
  0x24   :  { %2311 = vmatprep.subr.bf16.mxu1 %v2751_v23  ;;  %v2783_v23 = vld [vmem:[%s3489_s3] sm:$0xff]  }
  0x27   :  { %2312 = vmatpush3.bf16.msra.mxu1 %v2752_v25 }
  0x28   :  { %2313 = vmatprep.subr.bf16.mxu1 %v2753_v26  ;;  %v2784_v26 = vld [vmem:[%s3489_s3 + $0x8] sm:$0xff]  }
  0x2b   :  { %2314 = vmatpush3.bf16.msra.mxu1 %v2754_v29  ;;  %v2787_v29 = vld [vmem:[%s3489_s3 + $0x20] sm:$0xff]  }
  0x2c   :  { %2315 = vmatprep.subr.bf16.mxu1 %v2755_v30  ;;  %v2788_v30 = vld [vmem:[%s3489_s3 + $0x28] sm:$0xff]  }
  0x2f   :  { %2316 = vmatpush3.bf16.msra.mxu1 %v2756_v32  ;;  %v2790_v32 = vld [vmem:[%s3489_s3 + $0x38] sm:$0xff]  }
  0x30   :  { %2317 = vmatprep.subr.bf16.mxu1 %v2757_v33  ;;  %v2791_v33 = vld [vmem:[%s3488_s5 + $0x10] sm:$0xff]  }
  0x33   :  { %2318 = vmatpush3.bf16.msra.mxu1 %v2758_v34  ;;  %v2792_v34 = vld [vmem:[%s3489_s3 + $0x80] sm:$0xff]  }
  0x34   :  { %2319 = vmatprep.subr.bf16.mxu1 %v2760_v35  ;;  %v2793_v35 = vld [vmem:[%s3489_s3 + $0x88] sm:$0xff]  }
  0x37   :  { %2320 = vmatpush3.bf16.msra.mxu1 %v2761_v36  ;;  %v2794_v36 = vld [vmem:[%s3489_s3 + $0x90] sm:$0xff]  }
  0x38   :  { %2321 = vmatprep.subr.bf16.mxu1 %v2763_v37  ;;  %v2795_v37 = vld [vmem:[%s3489_s3 + $0x98] sm:$0xff]  }
  0x3b   :  { %2322 = vmatpush3.bf16.msra.mxu1 %v2764_v38  ;;  %v2796_v38 = vld [vmem:[%s3489_s3 + $0xa0] sm:$0xff]  }
  0x3c   :  { %2323 = vmatprep.subr.bf16.mxu1 %v2766_v39  ;;  %v2797_v39 = vld [vmem:[%s3489_s3 + $0xa8] sm:$0xff]  }
  0x3f   :  { %2324 = vmatpush3.bf16.msra.mxu1 %v2767_v40  ;;  %v2798_v40 = vld [vmem:[%s3489_s3 + $0xb0] sm:$0xff]  }
  0x40   :  { %2450 = vmatprep.subr.bf16.mxu1 %v2858_v1 }
  0x42   :  { %437 = vmatmul.mubr.bf16.vlgmr.msra.gmra.mrb[4].mxu1 %v2768_v41  ;;  %v2799_v41 = vld [vmem:[%s3489_s3 + $0xb8] sm:$0xff]  }
  0x43   :  { %2452 = vmatprep.mubr.msk.bf16.mxu1 %vm2859_vm0, %v2858_v1 }
  0xea   :  { %v479_v48 = vpop.f32.mrb[0].mxu0 }
  0xeb   :  { %v2448_v49 = vpop.f32.mrb[1].mxu0 }
  0xec   :  { %v482_v50 = vpop.f32.mrb[2].mxu0 }
  0xed   :  { %v2449_v51 = vpop.f32.mrb[3].mxu0 }
  0xf5   :  { %v2303_v42 = vpop.f32.mrb[0].mxu1 }
  0xf6   :  { %v2304_v43 = vpop.f32.mrb[1].mxu1 }
  0xf7   :  { %v2305_v44 = vadd.f32 %v2304_v43, %v2303_v42  ;;  %v2306_v45 = vpop.f32.mrb[2].mxu1  ;;  %v2805_v42 = vld [vmem:[%s3489_s3 + $0xc0] sm:$0xff]   ;;  %v2806_v43 = vld [vmem:[%s3489_s3 + $0xc8] sm:$0xff]  }
  0xf8   :  { %v2307_v46 = vpop.f32.mrb[3].mxu1  ;;  %2535 = vmatpush3.bf16.msra.mxu0 %v2805_v42  ;;  %v2829_v42 = vld [vmem:[%s3489_s3 + $0x180] sm:$0xff]  }
  0xf9   :  { %v2308_v47 = vadd.f32 %v2307_v46, %v2306_v45  ;;  %v398_v55 = vadd.f32 %v2305_v44, %v1997_v52  ;;  %2536 = vmatprep.subr.bf16.mxu0 %v2858_v1  ;;  %v2807_v44 = vld [vmem:[%s3489_s3 + $0xd0] sm:$0xff]   ;;  %v2808_v45 = vld [vmem:[%s3489_s3 + $0xd8] sm:$0xff]   ;;  %v2809_v46 = vld [vmem:[%s3489_s3 + $0xe0] sm:$0xff]  }
  0xfb   :  { %v401_v59 = vadd.f32 %v2308_v47, %v1997_v52  ;;  %v2800_v52 = vld [vmem:[%s3488_s5 + $0x18] sm:$0xff]  }
  0xfc   :  { %2537 = vmatpush3.bf16.msra.mxu0 %v2806_v43  ;;  %v2830_v43 = vld [vmem:[%s3489_s3 + $0x188] sm:$0xff]  }
  0xfd   :  { %2538 = vmatprep.subr.bf16.mxu0 %v2858_v1 }
 0x100   :  { %2539 = vmatpush3.bf16.msra.mxu0 %v2807_v44  ;;  %v2831_v44 = vld [vmem:[%s3489_s3 + $0x190] sm:$0xff]  }
 0x101   :  { %2540 = vmatprep.subr.bf16.mxu0 %v2858_v1 }
 0x104   :  { %2541 = vmatpush3.bf16.msra.mxu0 %v2808_v45  ;;  %v2832_v45 = vld [vmem:[%s3489_s3 + $0x198] sm:$0xff]  }
 0x105   :  { %2542 = vmatprep.subr.bf16.mxu0 %v2858_v1 }
 0x108   :  { %2543 = vmatpush3.bf16.msra.mxu0 %v2809_v46  ;;  %v2833_v46 = vld [vmem:[%s3489_s3 + $0x1a0] sm:$0xff]  }
 0x109   :  { %2544 = vmatprep.subr.bf16.mxu0 %v2858_v1 }
 0x115   :  { %v2325_v53 = vpop.f32.mrb[4].mxu1 }
 0x116   :  { %v2326_v54 = vpop.f32.mrb[5].mxu1 }
 0x117   :  { %v2327_v56 = vadd.f32 %v2326_v54, %v2325_v53  ;;  %v2328_v57 = vpop.f32.mrb[6].mxu1  ;;  %v2801_v53 = vld [vmem:[%s3488_s5 + $0x20] sm:$0xff]   ;;  %v2802_v54 = vld [vmem:[%s3488_s5 + $0x28] sm:$0xff]  }
 0x118   :  { %v2329_v58 = vpop.f32.mrb[7].mxu1 }
 0x119   :  { %v439_v60 = vadd.f32 %v2327_v56, %v398_v55  ;;  %v2330_v61 = vadd.f32 %v2329_v58, %v2328_v57  ;;  %v2803_v55 = vld [vmem:[%s3488_s5 + $0x30] sm:$0xff]   ;;  %v2804_v56 = vld [vmem:[%s3488_s5 + $0x38] sm:$0xff]   ;;  %v2810_v57 = vld [vmem:[%s3489_s3 + $0xe8] sm:$0xff]  }
 0x11a   :  { %2545 = vmatpush3.bf16.msra.mxu0 %v2810_v57  ;;  %v2811_v58 = vld [vmem:[%s3489_s3 + $0xf0] sm:$0xff]   ;;  %v2844_v57 = vld [vmem:[%s3489_s3 + $0x1f8] sm:$0xff]  }
 0x11b   :  { %v480_v62 = vadd.f32 %v479_v48, %v439_v60  ;;  %v442_v63 = vadd.f32 %v2330_v61, %v401_v59  ;;  %2546 = vmatprep.subr.bf16.mxu0 %v2858_v1  ;;  %v2812_v59 = vld [vmem:[%s3489_s3 + $0xf8] sm:$0xff]  }
 0x11d   :  { %v483_v0 = vadd.f32 %v482_v50, %v442_v63  ;;  %v486_v2 = vmax.f32 %v480_v62, 0.0 }
 0x11e   :  { %2547 = vmatpush3.bf16.msra.mxu0 %v2811_v58  ;;  %v2845_v58 = vld [vmem:[%s3489_s3 + $0x200] sm:$0xff]  }
 0x11f   :  { %v487_v3 = vmax.f32 %v483_v0, 0.0  ;;  %2548 = vmatprep.subr.bf16.mxu0 %v2858_v1 }
 0x121   :  { %v3049_v4 = vpack.c.bf16 %v487_v3, %v486_v2 }
 0x122   :  { %2549 = vmatpush3.bf16.msra.mxu0 %v2812_v59  ;;  %v2846_v59 = vld [vmem:[%s3489_s3 + $0x208] sm:$0xff]  }
 0x123   :  { %2451 = vmatpush3.bf16.msra.mxu1 %v3049_v4  ;;  %2554 = vmatprep.subr.bf16.mxu0 %v2858_v1 }
 0x124   :  { %2456 = vmatprep.subr.bf16.mxu1 %v2858_v1 }
 0x126   :  { %2453 = vmatmul.mubr.msk.bf16.vlgmr.msra.gmra.mrb[8].mxu1 %vm496_vm2, %v2773_v5  ;;  %v2813_v5 = vld [vmem:[%s3489_s3 + $0x100] sm:$0xff]  }
 0x127   :  { %2457 = vmatpush3.bf16.msra.mxu1 %v3049_v4  ;;  %2458 = vmatprep.mubr.msk.bf16.mxu1 %vm2859_vm0, %v2858_v1 }
 0x128   :  { %2462 = vmatprep.subr.bf16.mxu1 %v2858_v1 }
 0x12e   :  { %2459 = vmatmul.mubr.msk.bf16.vlgmr.msra.gmra.mrb[12].mxu1 %vm496_vm2, %v2774_v6 }
 0x12f   :  { %2463 = vmatpush3.bf16.msra.mxu1 %v2775_v7  ;;  %2478 = vmatprep.mubr.msk.bf16.mxu1 %vm2859_vm0, %v2858_v1 }
 0x130   :  { %2464 = vmatprep.subr.bf16.mxu1 %v2858_v1 }
 0x133   :  { %2465 = vmatpush3.bf16.msra.mxu1 %v2776_v8  ;;  %v2814_v8 = vld [vmem:[%s3489_s3 + $0x108] sm:$0xff]  }
 0x134   :  { %2466 = vmatprep.subr.bf16.mxu1 %v2858_v1 }
 0x137   :  { %2467 = vmatpush3.bf16.msra.mxu1 %v2777_v9 }
 0x138   :  { %2468 = vmatprep.subr.bf16.mxu1 %v2858_v1 }
 0x13b   :  { %2469 = vmatpush3.bf16.msra.mxu1 %v2778_v10 }
 0x13c   :  { %2470 = vmatprep.subr.bf16.mxu1 %v2858_v1 }
 0x13f   :  { %2471 = vmatpush3.bf16.msra.mxu1 %v2779_v11  ;;  %v2815_v11 = vld [vmem:[%s3489_s3 + $0x110] sm:$0xff]  }
 0x140   :  { %2472 = vmatprep.subr.bf16.mxu1 %v2858_v1 }
 0x143   :  { %2473 = vmatpush3.bf16.msra.mxu1 %v2780_v12 }
 0x144   :  { %2474 = vmatprep.subr.bf16.mxu1 %v2858_v1 }
 0x147   :  { %2475 = vmatpush3.bf16.msra.mxu1 %v2781_v13 }
 0x148   :  { %2476 = vmatprep.subr.bf16.mxu1 %v2858_v1 }
 0x14b   :  { %2477 = vmatpush3.bf16.msra.mxu1 %v2782_v14 }
 0x14c   :  { %2482 = vmatprep.subr.bf16.mxu1 %v2858_v1 }
 0x1f9   :  { %v534_v15 = vpop.f32.mrb[8].mxu1 }
 0x1fa   :  { %v2454_v16 = vpop.f32.mrb[9].mxu1 }
 0x1fb   :  { %v537_v17 = vpop.f32.mrb[10].mxu1 }
 0x1fc   :  { %v541_v18 = vpack.c.bf16 %v537_v17, %v534_v15  ;;  %v2455_v19 = vpop.f32.mrb[11].mxu1  ;;  %v2816_v15 = vld [vmem:[%s3489_s3 + $0x118] sm:$0xff]  }
 0x201   :  { %v603_v20 = vpop.f32.mrb[12].mxu1 }
 0x202   :  { %v2460_v21 = vpop.f32.mrb[13].mxu1 }
 0x203   :  { %v606_v22 = vpop.f32.mrb[14].mxu1 }
 0x204   :  { %v610_v24 = vpack.c.bf16 %v606_v22, %v603_v20  ;;  %v2461_v25 = vpop.f32.mrb[15].mxu1  ;;  %v2818_v22 = vld [vmem:[%s3489_s3 + $0x128] sm:$0xff]  }
 0x205   :  { %v2819_v25 = vld [vmem:[%s3489_s3 + $0x130] sm:$0xff]  }
 0x206   :  { %2479 = vmatmul.mubr.bf16.vlgmr.msra.gmra.mrb[16].mxu1 %v610_v24 }
 0x207   :  { %2483 = vmatpush3.bf16.msra.mxu1 %v2783_v23  ;;  %2498 = vmatprep.mubr.msk.bf16.mxu1 %vm2859_vm0, %v2858_v1 }
 0x208   :  { %2484 = vmatprep.subr.bf16.mxu1 %v2858_v1 }
 0x20b   :  { %2485 = vmatpush3.bf16.msra.mxu1 %v2784_v26 }
 0x20c   :  { %2486 = vmatprep.subr.bf16.mxu1 %v2858_v1 }
 0x20f   :  { %2487 = vmatpush3.bf16.msra.mxu1 %v2785_v27 }
 0x210   :  { %2488 = vmatprep.subr.bf16.mxu1 %v2858_v1 }
 0x213   :  { %2489 = vmatpush3.bf16.msra.mxu1 %v2786_v28 }
 0x214   :  { %2490 = vmatprep.subr.bf16.mxu1 %v2858_v1 }
 0x217   :  { %2491 = vmatpush3.bf16.msra.mxu1 %v2787_v29  ;;  %v2820_v29 = vld [vmem:[%s3489_s3 + $0x138] sm:$0xff]  }
 0x218   :  { %2492 = vmatprep.subr.bf16.mxu1 %v2858_v1 }
 0x21b   :  { %2493 = vmatpush3.bf16.msra.mxu1 %v2788_v30 }
 0x21c   :  { %2494 = vmatprep.subr.bf16.mxu1 %v2858_v1 }
 0x21f   :  { %2495 = vmatpush3.bf16.msra.mxu1 %v2789_v31 }
 0x220   :  { %2496 = vmatprep.subr.bf16.mxu1 %v2858_v1 }
 0x223   :  { %2497 = vmatpush3.bf16.msra.mxu1 %v2790_v32  ;;  %v2821_v32 = vld [vmem:[%s3489_s3 + $0x140] sm:$0xff]  }
 0x224   :  { %2502 = vmatprep.subr.bf16.mxu1 %v2858_v1 }
 0x226   :  { %2499 = vmatmul.mubr.bf16.vlgmr.msra.gmra.mrb[16].mxu1 %v541_v18  ;;  %v2817_v18 = vld [vmem:[%s3489_s3 + $0x120] sm:$0xff]  }
 0x227   :  { %2503 = vmatpush3.bf16.msra.mxu1 %v3049_v4  ;;  %2504 = vmatprep.mubr.msk.bf16.mxu1 %vm2859_vm0, %v2858_v1 }
 0x228   :  { %2508 = vmatprep.subr.bf16.mxu1 %v2858_v1 }
 0x22e   :  { %2505 = vmatmul.mubr.msk.bf16.vlgmr.msra.gmra.mrb[20].mxu1 %vm496_vm2, %v2791_v33 }
 0x22f   :  { %2509 = vmatpush3.bf16.msra.mxu1 %v2792_v34  ;;  %2524 = vmatprep.mubr.msk.bf16.mxu1 %vm2859_vm0, %v2858_v1 }
 0x230   :  { %2510 = vmatprep.subr.bf16.mxu1 %v2858_v1 }
 0x233   :  { %2511 = vmatpush3.bf16.msra.mxu1 %v2793_v35 }
 0x234   :  { %2512 = vmatprep.subr.bf16.mxu1 %v2858_v1 }
 0x237   :  { %2513 = vmatpush3.bf16.msra.mxu1 %v2794_v36  ;;  %v2822_v36 = vld [vmem:[%s3489_s3 + $0x148] sm:$0xff]  }
 0x238   :  { %2514 = vmatprep.subr.bf16.mxu1 %v2858_v1 }
 0x23b   :  { %2515 = vmatpush3.bf16.msra.mxu1 %v2795_v37  ;;  %v2823_v37 = vld [vmem:[%s3489_s3 + $0x150] sm:$0xff]  }
 0x23c   :  { %2516 = vmatprep.subr.bf16.mxu1 %v2858_v1 }
 0x23f   :  { %2517 = vmatpush3.bf16.msra.mxu1 %v2796_v38  ;;  %v2824_v38 = vld [vmem:[%s3489_s3 + $0x158] sm:$0xff]  }
 0x240   :  { %2518 = vmatprep.subr.bf16.mxu1 %v2858_v1 }
 0x243   :  { %2519 = vmatpush3.bf16.msra.mxu1 %v2797_v39  ;;  %v2826_v39 = vld [vmem:[%s3489_s3 + $0x168] sm:$0xff]  }
 0x244   :  { %2520 = vmatprep.subr.bf16.mxu1 %v2858_v1 }
 0x247   :  { %2521 = vmatpush3.bf16.msra.mxu1 %v2798_v40  ;;  %v2827_v40 = vld [vmem:[%s3489_s3 + $0x170] sm:$0xff]  }
 0x248   :  { %2522 = vmatprep.subr.bf16.mxu1 %v2858_v1 }
 0x24b   :  { %2523 = vmatpush3.bf16.msra.mxu1 %v2799_v41  ;;  %v2828_v41 = vld [vmem:[%s3489_s3 + $0x178] sm:$0xff]  }
 0x24c   :  { %2528 = vmatprep.subr.bf16.mxu1 %v2858_v1 }
 0x301   :  { %v851_v47 = vpop.f32.mrb[20].mxu1 }
 0x302   :  { %v2506_v48 = vpop.f32.mrb[21].mxu1 }
 0x303   :  { %v854_v49 = vpop.f32.mrb[22].mxu1  ;;  %v2835_v48 = vld [vmem:[%s3489_s3 + $0x1b0] sm:$0xff]  }
 0x304   :  { %v858_v50 = vpack.c.bf16 %v854_v49, %v851_v47  ;;  %v2507_v51 = vpop.f32.mrb[23].mxu1  ;;  %v2834_v47 = vld [vmem:[%s3489_s3 + $0x1a8] sm:$0xff]   ;;  %v2836_v49 = vld [vmem:[%s3489_s3 + $0x1b8] sm:$0xff]  }
 0x305   :  { %v2838_v51 = vld [vmem:[%s3489_s3 + $0x1c8] sm:$0xff]  }
 0x306   :  { %2525 = vmatmul.mubr.bf16.vlgmr.msra.gmra.mrb[16].mxu1 %v858_v50  ;;  %v2837_v50 = vld [vmem:[%s3489_s3 + $0x1c0] sm:$0xff]  }
 0x307   :  { %2529 = vmatpush3.bf16.msra.mxu1 %v3049_v4  ;;  %2530 = vmatprep.mubr.msk.bf16.mxu1 %vm2859_vm0, %v2858_v1 }
 0x308   :  { %2574 = vmatprep.subr.bf16.mxu1 %v2858_v1 }
 0x30e   :  { %2531 = vmatmul.mubr.msk.bf16.vlgmr.msra.gmra.mrb[24].mxu1 %vm496_vm2, %v2800_v52  ;;  %v2839_v52 = vld [vmem:[%s3489_s3 + $0x1d0] sm:$0xff]  }
 0x30f   :  { %2575 = vmatpush3.bf16.msra.mxu1 %v3049_v4  ;;  %2576 = vmatprep.mubr.msk.bf16.mxu1 %vm2859_vm0, %v2858_v1 }
 0x310   :  { %2600 = vmatprep.subr.bf16.mxu1 %v2858_v1 }
 0x316   :  { %2577 = vmatmul.mubr.msk.bf16.vlgmr.msra.gmra.mrb[28].mxu1 %vm496_vm2, %v2801_v53  ;;  %v2840_v53 = vld [vmem:[%s3489_s3 + $0x1d8] sm:$0xff]  }
 0x317   :  { %2601 = vmatpush3.bf16.msra.mxu1 %v3049_v4  ;;  %2602 = vmatprep.mubr.msk.bf16.mxu1 %vm2859_vm0, %v2858_v1 }
 0x318   :  { %2626 = vmatprep.subr.bf16.mxu1 %v2858_v1 }
 0x31e   :  { %2603 = vmatmul.mubr.msk.bf16.vlgmr.msra.gmra.mrb[32].mxu1 %vm496_vm2, %v2802_v54  ;;  %v2841_v54 = vld [vmem:[%s3489_s3 + $0x1e0] sm:$0xff]  }
 0x31f   :  { %2627 = vmatpush3.bf16.msra.mxu1 %v3049_v4  ;;  %2628 = vmatprep.mubr.msk.bf16.mxu1 %vm2859_vm0, %v2858_v1 }
 0x320   :  { %2652 = vmatprep.subr.bf16.mxu1 %v2858_v1 }
 0x326   :  { %2629 = vmatmul.mubr.msk.bf16.vlgmr.msra.gmra.mrb[36].mxu1 %vm496_vm2, %v2803_v55  ;;  %v2842_v55 = vld [vmem:[%s3489_s3 + $0x1e8] sm:$0xff]  }
 0x327   :  { %2653 = vmatpush3.bf16.msra.mxu1 %v3049_v4  ;;  %2654 = vmatprep.mubr.msk.bf16.mxu1 %vm2859_vm0, %v2858_v1 }
 0x32e   :  { %2655 = vmatmul.mubr.msk.bf16.vlgmr.msra.gmra.mrb[40].mxu1 %vm496_vm2, %v2804_v56  ;;  %v2843_v56 = vld [vmem:[%s3489_s3 + $0x1f0] sm:$0xff]  }
 0x3d9   :  { %v3246_v60 = vpop.f32.mrb[16].mxu1 }
 0x3da   :  { %v2526_v61 = vpop.f32.mrb[17].mxu1 }
 0x3db   :  { %v3248_v62 = vpop.f32.mrb[18].mxu1  ;;  %v2847_v61 = vld [vmem:[%s3489_s3 + $0x210] sm:$0xff]  }
 0x3dc   :  { %v2527_v63 = vpop.f32.mrb[19].mxu1 }
 0x3dd   :  { %v2848_v63 = vld [vmem:[%s3489_s3 + $0x218] sm:$0xff]  }
 0x3e1   :  { %v1012_v0 = vpop.f32.mrb[24].mxu1 }
 0x3e2   :  { %v2532_v2 = vpop.f32.mrb[25].mxu1 }
 0x3e3   :  { %v1015_v3 = vpop.f32.mrb[26].mxu1  ;;  %v2850_v2 = vld [vmem:[%s3489_s3 + $0x228] sm:$0xff]  }
 0x3e4   :  { %v1019_v6 = vpack.c.bf16 %v1015_v3, %v1012_v0  ;;  %v2533_v7 = vpop.f32.mrb[27].mxu1  ;;  %v2849_v0 = vld [vmem:[%s3489_s3 + $0x220] sm:$0xff]   ;;  %v2851_v3 = vld [vmem:[%s3489_s3 + $0x230] sm:$0xff]  }
 0x3e5   :  { %v2854_v7 = vld [vmem:[%s3491_s7 + $0x8] sm:$0xff]  }
 0x3e6   :  { %2551 = vmatmul.mubr.bf16.vlgmr.msra.gmra.mrb[4].mxu0 %v1019_v6  ;;  %v2853_v6 = vld [vmem:[%s3491_s7] sm:$0xff]  }
 0x3e7   :  { %2555 = vmatpush3.bf16.msra.mxu0 %v2813_v5  ;;  %2570 = vmatprep.mubr.msk.bf16.mxu0 %vm2859_vm0, %v2858_v1  ;;  %v2852_v5 = vld [vmem:[%s3489_s3 + $0x238] sm:$0xff]  }
 0x3e8   :  { %2556 = vmatprep.subr.bf16.mxu0 %v2858_v1 }
 0x3e9   :  { %v3259_v9 = vpop.f32.mrb[28].mxu1 }
 0x3ea   :  { %v2578_v10 = vpop.f32.mrb[29].mxu1 }
 0x3eb   :  { %2557 = vmatpush3.bf16.msra.mxu0 %v2814_v8  ;;  %v3264_v12 = vpop.f32.mrb[30].mxu1  ;;  %v2855_v8 = vld [vmem:[%s3491_s7 + $0x10] sm:$0xff]   ;;  %v2857_v10 = vld [vmem:[%s3492_s6] sm:$0xff]  }
 0x3ec   :  { %2558 = vmatprep.subr.bf16.mxu0 %v2858_v1  ;;  %v1288_v13 = vpack.c.bf16 %v3264_v12, %v3259_v9  ;;  %v2579_v14 = vpop.f32.mrb[31].mxu1  ;;  %v2856_v9 = vld [vmem:[%s3491_s7 + $0x18] sm:$0xff]  }
 0x3ef   :  { %2559 = vmatpush3.bf16.msra.mxu0 %v2815_v11  ;;  %v2270_v11 = vld [vmem:[%s3493_s4] ss:$0 sm:$0xff] }
 0x3f0   :  { %2560 = vmatprep.subr.bf16.mxu0 %v2858_v1  ;;  %v2690_v12 = vadd.f32 %v2270_v11, %v3246_v60  ;;  %v2693_v14 = vadd.f32 %v2270_v11, %v3248_v62 }
 0x3f1   :  { %v3273_v16 = vpop.f32.mrb[32].mxu1 }
 0x3f2   :  { %v2604_v17 = vpop.f32.mrb[33].mxu1 }
 0x3f3   :  { %2561 = vmatpush3.bf16.msra.mxu0 %v2816_v15  ;;  %v3278_v19 = vpop.f32.mrb[34].mxu1 }
 0x3f4   :  { %2562 = vmatprep.subr.bf16.mxu0 %v2858_v1  ;;  %v1449_v20 = vpack.c.bf16 %v3278_v19, %v3273_v16  ;;  %v2605_v21 = vpop.f32.mrb[35].mxu1 }
 0x3f7   :  { %2563 = vmatpush3.bf16.msra.mxu0 %v2817_v18 }
 0x3f8   :  { %2564 = vmatprep.subr.bf16.mxu0 %v2858_v1 }
 0x3f9   :  { %v3287_v23 = vpop.f32.mrb[36].mxu1 }
 0x3fa   :  { %v2630_v24 = vpop.f32.mrb[37].mxu1 }
 0x3fb   :  { %2565 = vmatpush3.bf16.msra.mxu0 %v2818_v22  ;;  %v3292_v26 = vpop.f32.mrb[38].mxu1 }
 0x3fc   :  { %2566 = vmatprep.subr.bf16.mxu0 %v2858_v1  ;;  %v1610_v27 = vpack.c.bf16 %v3292_v26, %v3287_v23  ;;  %v2631_v28 = vpop.f32.mrb[39].mxu1 }
 0x3ff   :  { %2567 = vmatpush3.bf16.msra.mxu0 %v2819_v25 }
 0x400   :  { %2568 = vmatprep.subr.bf16.mxu0 %v2858_v1 }
 0x401   :  { %v3301_v30 = vpop.f32.mrb[40].mxu1 }
 0x402   :  { %v2656_v31 = vpop.f32.mrb[41].mxu1 }
 0x403   :  { %2569 = vmatpush3.bf16.msra.mxu0 %v2820_v29  ;;  %v3306_v33 = vpop.f32.mrb[42].mxu1 }
 0x404   :  { %2580 = vmatprep.subr.bf16.mxu0 %v2858_v1  ;;  %v1771_v34 = vpack.c.bf16 %v3306_v33, %v3301_v30  ;;  %v2657_v35 = vpop.f32.mrb[43].mxu1 }
 0x406   :  { %2571 = vmatmul.mubr.bf16.vlgmr.msra.gmra.mrb[4].mxu0 %v3049_v4  ;;  %v2825_v4 = vld [vmem:[%s3489_s3 + $0x160] sm:$0xff]  }
 0x407   :  { %2581 = vmatpush3.bf16.msra.mxu0 %v2821_v32  ;;  %2596 = vmatprep.mubr.msk.bf16.mxu0 %vm2859_vm0, %v2858_v1 }
 0x408   :  { %2582 = vmatprep.subr.bf16.mxu0 %v2858_v1 }
 0x40b   :  { %2583 = vmatpush3.bf16.msra.mxu0 %v2822_v36 }
 0x40c   :  { %2584 = vmatprep.subr.bf16.mxu0 %v2858_v1 }
 0x40f   :  { %2585 = vmatpush3.bf16.msra.mxu0 %v2823_v37 }
 0x410   :  { %2586 = vmatprep.subr.bf16.mxu0 %v2858_v1 }
 0x413   :  { %2587 = vmatpush3.bf16.msra.mxu0 %v2824_v38 }
 0x414   :  { %2588 = vmatprep.subr.bf16.mxu0 %v2858_v1 }
 0x417   :  { %2589 = vmatpush3.bf16.msra.mxu0 %v2825_v4 }
 0x418   :  { %2590 = vmatprep.subr.bf16.mxu0 %v2858_v1 }
 0x41b   :  { %2591 = vmatpush3.bf16.msra.mxu0 %v2826_v39 }
 0x41c   :  { %2592 = vmatprep.subr.bf16.mxu0 %v2858_v1 }
 0x41f   :  { %2593 = vmatpush3.bf16.msra.mxu0 %v2827_v40 }
 0x420   :  { %2594 = vmatprep.subr.bf16.mxu0 %v2858_v1 }
 0x423   :  { %2595 = vmatpush3.bf16.msra.mxu0 %v2828_v41 }
 0x424   :  { %2606 = vmatprep.subr.bf16.mxu0 %v2858_v1 }
 0x426   :  { %2597 = vmatmul.mubr.bf16.vlgmr.msra.gmra.mrb[4].mxu0 %v1288_v13  ;;  %v2271_v13 = vld [vmem:[%s3494_s8] ss:$0 sm:$0xff] }
 0x427   :  { %2607 = vmatpush3.bf16.msra.mxu0 %v2829_v42  ;;  %2622 = vmatprep.mubr.msk.bf16.mxu0 %vm2859_vm0, %v2858_v1  ;;  %v2694_v18 = vadd.f32 %v2693_v14, %v2271_v13 }
 0x428   :  { %2608 = vmatprep.subr.bf16.mxu0 %v2858_v1 }
 0x42b   :  { %2609 = vmatpush3.bf16.msra.mxu0 %v2830_v43 }
 0x42c   :  { %2610 = vmatprep.subr.bf16.mxu0 %v2858_v1 }
 0x42f   :  { %2611 = vmatpush3.bf16.msra.mxu0 %v2831_v44 }
 0x430   :  { %2612 = vmatprep.subr.bf16.mxu0 %v2858_v1 }
 0x433   :  { %2613 = vmatpush3.bf16.msra.mxu0 %v2832_v45 }
 0x434   :  { %2614 = vmatprep.subr.bf16.mxu0 %v2858_v1 }
 0x437   :  { %2615 = vmatpush3.bf16.msra.mxu0 %v2833_v46 }
 0x438   :  { %2616 = vmatprep.subr.bf16.mxu0 %v2858_v1 }
 0x43b   :  { %2617 = vmatpush3.bf16.msra.mxu0 %v2834_v47 }
 0x43c   :  { %2618 = vmatprep.subr.bf16.mxu0 %v2858_v1 }
 0x43f   :  { %2619 = vmatpush3.bf16.msra.mxu0 %v2835_v48 }
 0x440   :  { %2620 = vmatprep.subr.bf16.mxu0 %v2858_v1 }
 0x443   :  { %2621 = vmatpush3.bf16.msra.mxu0 %v2836_v49 }
 0x444   :  { %2632 = vmatprep.subr.bf16.mxu0 %v2858_v1 }
 0x446   :  { %2623 = vmatmul.mubr.bf16.vlgmr.msra.gmra.mrb[4].mxu0 %v1449_v20 }
 0x447   :  { %2633 = vmatpush3.bf16.msra.mxu0 %v2837_v50  ;;  %2648 = vmatprep.mubr.msk.bf16.mxu0 %vm2859_vm0, %v2858_v1 }
 0x448   :  { %2634 = vmatprep.subr.bf16.mxu0 %v2858_v1 }
 0x44b   :  { %2635 = vmatpush3.bf16.msra.mxu0 %v2838_v51 }
 0x44c   :  { %2636 = vmatprep.subr.bf16.mxu0 %v2858_v1 }
 0x44f   :  { %2637 = vmatpush3.bf16.msra.mxu0 %v2839_v52 }
 0x450   :  { %2638 = vmatprep.subr.bf16.mxu0 %v2858_v1 }
 0x453   :  { %2639 = vmatpush3.bf16.msra.mxu0 %v2840_v53 }
 0x454   :  { %2640 = vmatprep.subr.bf16.mxu0 %v2858_v1 }
 0x457   :  { %2641 = vmatpush3.bf16.msra.mxu0 %v2841_v54 }
 0x458   :  { %2642 = vmatprep.subr.bf16.mxu0 %v2858_v1 }
 0x45b   :  { %2643 = vmatpush3.bf16.msra.mxu0 %v2842_v55 }
 0x45c   :  { %2644 = vmatprep.subr.bf16.mxu0 %v2858_v1 }
 0x45f   :  { %2645 = vmatpush3.bf16.msra.mxu0 %v2843_v56 }
 0x460   :  { %2646 = vmatprep.subr.bf16.mxu0 %v2858_v1 }
 0x463   :  { %2647 = vmatpush3.bf16.msra.mxu0 %v2844_v57 }
 0x464   :  { %2658 = vmatprep.subr.bf16.mxu0 %v2858_v1 }
 0x466   :  { %2649 = vmatmul.mubr.bf16.vlgmr.msra.gmra.mrb[4].mxu0 %v1610_v27 }
 0x467   :  { %2659 = vmatpush3.bf16.msra.mxu0 %v2845_v58  ;;  %2674 = vmatprep.mubr.msk.bf16.mxu0 %vm2859_vm0, %v2858_v1 }
 0x468   :  { %2660 = vmatprep.subr.bf16.mxu0 %v2858_v1 }
 0x46b   :  { %2661 = vmatpush3.bf16.msra.mxu0 %v2846_v59 }
 0x46c   :  { %2662 = vmatprep.subr.bf16.mxu0 %v2858_v1 }
 0x46f   :  { %2663 = vmatpush3.bf16.msra.mxu0 %v2847_v61 }
 0x470   :  { %2664 = vmatprep.subr.bf16.mxu0 %v2858_v1 }
 0x473   :  { %2665 = vmatpush3.bf16.msra.mxu0 %v2848_v63 }
 0x474   :  { %2666 = vmatprep.subr.bf16.mxu0 %v2858_v1 }
 0x477   :  { %2667 = vmatpush3.bf16.msra.mxu0 %v2849_v0 }
 0x478   :  { %2668 = vmatprep.subr.bf16.mxu0 %v2858_v1 }
 0x47b   :  { %2669 = vmatpush3.bf16.msra.mxu0 %v2850_v2 }
 0x47c   :  { %2670 = vmatprep.subr.bf16.mxu0 %v2858_v1 }
 0x47f   :  { %2671 = vmatpush3.bf16.msra.mxu0 %v2851_v3 }
 0x480   :  { %2672 = vmatprep.subr.bf16.mxu0 %v2858_v1 }
 0x483   :  { %2673 = vmatpush3.bf16.msra.mxu0 %v2852_v5 }
 0x484   :  { %2678 = vmatprep.subr.bf16.mxu0 %v2858_v1 }
 0x486   :  { %2675 = vmatmul.mubr.bf16.vlgmr.msra.gmra.mrb[4].mxu0 %v1771_v34 }
 0x487   :  { %2679 = vmatpush3.bf16.msra.mxu0 %v2853_v6  ;;  %2686 = vmatprep.mubr.msk.bf16.mxu0 %vm2859_vm0, %v2858_v1 }
 0x488   :  { %2680 = vmatprep.subr.bf16.mxu0 %v2858_v1 }
 0x48b   :  { %2681 = vmatpush3.bf16.msra.mxu0 %v2854_v7 }
 0x48c   :  { %2682 = vmatprep.subr.bf16.mxu0 %v2858_v1 }
 0x48f   :  { %2683 = vmatpush3.bf16.msra.mxu0 %v2855_v8 }
 0x490   :  { %2684 = vmatprep.subr.bf16.mxu0 %v2858_v1  ;;  %v2691_v1 = vadd.f32 %v2690_v12, %v2271_v13 }
 0x493   :  { %2685 = vmatpush3.bf16.msra.mxu0 %v2856_v9 }
 0x496   :  { %2687 = vmatmul.mubr.msk.bf16.vlgmr.msra.gmra.mrb[4].mxu0 %vm359_vm1, %v2857_v10 }
 0x569   :  { %v1972_v15 = vpop.f32.mrb[4].mxu0 }
 0x56a   :  { %v2692_v16 = vadd.f32 %v2691_v1, %v1972_v15  ;;  %v2688_v17 = vpop.f32.mrb[5].mxu0 }
 0x56b   :  { %v1975_v19 = vpop.f32.mrb[6].mxu0 }
 0x56c   :  { %v2695_v20 = vadd.f32 %v2694_v18, %v1975_v19  ;;  %v2689_v21 = vpop.f32.mrb[7].mxu0  ;;  %v1981_v22 = vmax.f32 %v2692_v16, 0.0 }
 0x56e   :  { %v1982_v23 = vmax.f32 %v2695_v20, 0.0 }
 0x570   :  { %v2285_v24 = vpack.c.bf16 %v1982_v23, %v1981_v22 }
 0x572   :  { %2286 = vst [vmem:[%s3495_s9] sm:$0xff] %v2285_v24  }

// kernel: _lambda_.15
= control target key start
LH: loop header
LB: loop body
LE: loop exit
PB: predicated region body
PF: predicated region fallthrough
CT: control target
= control target key end

     0   :  { %v32_v24 = vlaneseq  ;;  %vm232_vm0 = vcmask 1041409   ;;  %s846_s0 = inlined_call_operand.vmem [shape: bf16[4,1,512], index: 0, kind: input, shape index: {}]   ;;  %s847_s1 = inlined_call_operand.vmem [shape: bf16[512,128], index: 1, kind: input, shape index: {}]   ;;  %s848_s2 = inlined_call_operand.vmem [shape: f32[1,128], index: 2, kind: input, shape index: {}]   ;;  %s849_s3 = inlined_call_operand.hbm [shape: f32[4,128], index: 3, kind: output, shape index: {}]  }
   0x1   :  { %v640_v0 = vld [vmem:[%s847_s1 + $0x40] sm:$0xff]   ;;  %v644_v4 = vld [vmem:[%s847_s1 + $0x48] sm:$0xff]   ;;  %v648_v8 = vld [vmem:[%s847_s1 + $0x50] sm:$0xff]  }
   0x2   :  { %v641_v1 = vld [vmem:[%s847_s1 + $0xc0] sm:$0xff]   ;;  %595 = vmatprep.subr.bf16.mxu0 %v640_v0  ;;  %v645_v5 = vld [vmem:[%s847_s1 + $0xc8] sm:$0xff]   ;;  %v649_v9 = vld [vmem:[%s847_s1 + $0xd0] sm:$0xff]   ;;  %v33_v29 = vshrl.u32 %v32_v24, 7 }
   0x3   :  { %v642_v2 = vld [vmem:[%s847_s1] sm:$0xff]   ;;  %617 = vmatprep.subr.bf16.mxu1 %v641_v1  ;;  %v646_v6 = vld [vmem:[%s847_s1 + $0x8] sm:$0xff]   ;;  %v650_v10 = vld [vmem:[%s847_s1 + $0x10] sm:$0xff]  }
   0x4   :  { %v643_v3 = vld [vmem:[%s847_s1 + $0x80] sm:$0xff]   ;;  %596 = vmatpush3.bf16.msra.mxu0 %v642_v2  ;;  %v647_v7 = vld [vmem:[%s847_s1 + $0x88] sm:$0xff]   ;;  %v651_v11 = vld [vmem:[%s847_s1 + $0x90] sm:$0xff]   ;;  %v38_v34 = vsub.s32 2, %v33_v29  ;;  %v46_v37 = vsub.s32 6, %v33_v29 }
   0x5   :  { %618 = vmatpush3.bf16.msra.mxu1 %v643_v3  ;;  %597 = vmatprep.subr.bf16.mxu0 %v644_v4  ;;  %v652_v12 = vld [vmem:[%s847_s1 + $0x58] sm:$0xff]   ;;  %v656_v16 = vld [vmem:[%s847_s1 + $0x60] sm:$0xff]   ;;  %v660_v20 = vld [vmem:[%s847_s1 + $0x68] sm:$0xff]  }
   0x6   :  { %619 = vmatprep.subr.bf16.mxu1 %v645_v5  ;;  %v653_v13 = vld [vmem:[%s847_s1 + $0xd8] sm:$0xff]   ;;  %v657_v17 = vld [vmem:[%s847_s1 + $0xe0] sm:$0xff]   ;;  %v661_v21 = vld [vmem:[%s847_s1 + $0xe8] sm:$0xff]  }
   0x7   :  { %v654_v14 = vld [vmem:[%s847_s1 + $0x18] sm:$0xff]   ;;  %v658_v18 = vld [vmem:[%s847_s1 + $0x20] sm:$0xff]   ;;  %v662_v22 = vld [vmem:[%s847_s1 + $0x28] sm:$0xff]  }
   0x8   :  { %598 = vmatpush3.bf16.msra.mxu0 %v646_v6  ;;  %v655_v15 = vld [vmem:[%s847_s1 + $0x98] sm:$0xff]   ;;  %v659_v19 = vld [vmem:[%s847_s1 + $0xa0] sm:$0xff]   ;;  %v663_v23 = vld [vmem:[%s847_s1 + $0xa8] sm:$0xff]  }
   0x9   :  { %620 = vmatpush3.bf16.msra.mxu1 %v647_v7  ;;  %599 = vmatprep.subr.bf16.mxu0 %v648_v8  ;;  %v664_v25 = vld [vmem:[%s847_s1 + $0x70] sm:$0xff]   ;;  %v668_v30 = vld [vmem:[%s847_s1 + $0x78] sm:$0xff]   ;;  %v587_v35 = vld [vmem:[%s846_s0] sm:$0xff]  }
   0xa   :  { %621 = vmatprep.subr.bf16.mxu1 %v649_v9  ;;  %v665_v26 = vld [vmem:[%s847_s1 + $0xf0] sm:$0xff]   ;;  %v669_v31 = vld [vmem:[%s847_s1 + $0xf8] sm:$0xff]   ;;  %v594_v36 = vld [vmem:[%s846_s0 + $0x8] sm:$0xff]  }
   0xb   :  { %v666_v27 = vld [vmem:[%s847_s1 + $0x30] sm:$0xff]   ;;  %v670_v32 = vld [vmem:[%s847_s1 + $0x38] sm:$0xff]  }
   0xc   :  { %600 = vmatpush3.bf16.msra.mxu0 %v650_v10  ;;  %v667_v28 = vld [vmem:[%s847_s1 + $0xb0] sm:$0xff]   ;;  %v671_v33 = vld [vmem:[%s847_s1 + $0xb8] sm:$0xff]  }
   0xd   :  { %622 = vmatpush3.bf16.msra.mxu1 %v651_v11  ;;  %601 = vmatprep.subr.bf16.mxu0 %v652_v12 }
   0xe   :  { %623 = vmatprep.subr.bf16.mxu1 %v653_v13 }
  0x10   :  { %602 = vmatpush3.bf16.msra.mxu0 %v654_v14 }
  0x11   :  { %624 = vmatpush3.bf16.msra.mxu1 %v655_v15  ;;  %603 = vmatprep.subr.bf16.mxu0 %v656_v16 }
  0x12   :  { %625 = vmatprep.subr.bf16.mxu1 %v657_v17 }
  0x14   :  { %604 = vmatpush3.bf16.msra.mxu0 %v658_v18 }
  0x15   :  { %626 = vmatpush3.bf16.msra.mxu1 %v659_v19  ;;  %605 = vmatprep.subr.bf16.mxu0 %v660_v20 }
  0x16   :  { %627 = vmatprep.subr.bf16.mxu1 %v661_v21 }
  0x18   :  { %606 = vmatpush3.bf16.msra.mxu0 %v662_v22 }
  0x19   :  { %628 = vmatpush3.bf16.msra.mxu1 %v663_v23  ;;  %607 = vmatprep.subr.bf16.mxu0 %v664_v25 }
  0x1a   :  { %629 = vmatprep.subr.bf16.mxu1 %v665_v26 }
  0x1c   :  { %608 = vmatpush3.bf16.msra.mxu0 %v666_v27 }
  0x1d   :  { %630 = vmatpush3.bf16.msra.mxu1 %v667_v28  ;;  %609 = vmatprep.subr.bf16.mxu0 %v668_v30 }
  0x1e   :  { %631 = vmatprep.subr.bf16.mxu1 %v669_v31 }
  0x20   :  { %610 = vmatpush3.bf16.msra.mxu0 %v670_v32 }
  0x21   :  { %8 = vsyncpa [#allocation3], 0  ;;  %632 = vmatpush3.bf16.msra.mxu1 %v671_v33  ;;  %v588_v38 = vunpack.c.l.bf16 %v587_v35  ;;  %v589_v39 = vunpack.c.h.bf16 %v587_v35  ;;  %v592_v40 = vunpack.c.l.bf16 %v594_v36  ;;  %v593_v41 = vunpack.c.h.bf16 %v594_v36  ;;  %s696_s26 = smov [#allocation2]  }
  0x22   :  { %vm235_vm1 = vcmask 1042434   ;;  %vm238_vm2 = vcmask 1043459   ;;  %v34_v42 = vsub.s32 0, %v33_v29  ;;  %v42_v43 = vsub.s32 4, %v33_v29  ;;  %s545_s27 = sshll.u32 %s696_s26, 4  ;;  %s546_s27 = int_to_ptr.vmem [resolvable:$true] %s545_s27 }
  0x23   :  { %v39_v44 = vrot.slane %v588_v38, %v38_v34  ;;  %v55_v45 = vrot.slane %v589_v39, %v38_v34  ;;  %v71_v46 = vrot.slane %v592_v40, %v38_v34  ;;  %v87_v47 = vrot.slane %v593_v41, %v38_v34  ;;  %s672_s28 = scalar_lea.vmem %s546_s27, 64  ;;  %p677_p1 = scmp.lt.s32.totalorder %s546_s27, %s546_s27 }
  0x24   :  { %v47_v48 = vrot.slane %v588_v38, %v46_v37  ;;  %v63_v49 = vrot.slane %v589_v39, %v46_v37  ;;  %v79_v50 = vrot.slane %v592_v40, %v46_v37  ;;  %v95_v51 = vrot.slane %v593_v41, %v46_v37  ;;  %p673_p0 = scmp.ne.s32.totalorder %s546_s27, %s672_s28  ;;  %p678_p2 = scmp.lt.s32.totalorder %s672_s28, %s672_s28 }
  0x25   :  { %v113_v52 = vpack.c.bf16 %v39_v44, %v39_v44  ;;  %v117_v53 = vpack.c.bf16 %v55_v45, %v55_v45  ;;  %v121_v54 = vpack.c.bf16 %v71_v46, %v71_v46  ;;  %v125_v55 = vpack.c.bf16 %v87_v47, %v87_v47 }
  0x26   :  { %v115_v56 = vpack.c.bf16 %v47_v48, %v47_v48  ;;  %v119_v57 = vpack.c.bf16 %v63_v49, %v63_v49  ;;  %v123_v58 = vpack.c.bf16 %v79_v50, %v79_v50  ;;  %v127_v59 = vpack.c.bf16 %v95_v51, %v95_v51  ;;  %p679_p3 = por %p678_p2, %p677_p1 }
  0x27   :  { %v216_v60 = vunpack.c.l.b16 %v113_v52  ;;  %v220_v61 = vunpack.c.l.b16 %v117_v53  ;;  %v224_v62 = vunpack.c.l.b16 %v121_v54  ;;  %v228_v63 = vunpack.c.l.b16 %v125_v55 }
  0x28   :  { %v218_v0 = vunpack.c.l.b16 %v115_v56  ;;  %v222_v1 = vunpack.c.l.b16 %v119_v57  ;;  %v226_v2 = vunpack.c.l.b16 %v123_v58  ;;  %v230_v3 = vunpack.c.l.b16 %v127_v59  ;;  %v553_v58 = vld [vmem:[%s848_s2] ss:$0 sm:$0xff]  ;;  %p680_p4 = pnand %p679_p3, %p673_p0 }
  0x29   :  { %v240_v4 = vrot.slane %v220_v61, 7  ;;  %v242_v5 = vrot.slane %v224_v62, 6  ;;  %v244_v6 = vrot.slane %v228_v63, 5  ;;  %v35_v7 = vrot.slane %v588_v38, %v34_v42 }
  0x2a   :  { %v252_v8 = vrot.slane %v222_v1, 7  ;;  %v254_v9 = vrot.slane %v226_v2, 6  ;;  %v256_v10 = vrot.slane %v230_v3, 5  ;;  %v51_v11 = vrot.slane %v589_v39, %v34_v42 }
  0x2b   :  { %v241_v12 = vsel %vm232_vm0, %v240_v4, %v216_v60  ;;  %v67_v13 = vrot.slane %v592_v40, %v34_v42  ;;  %v83_v14 = vrot.slane %v593_v41, %v34_v42  ;;  %v112_v15 = vpack.c.bf16 %v35_v7, %v35_v7 }
  0x2c   :  { %v243_v16 = vsel %vm235_vm1, %v242_v5, %v241_v12  ;;  %v253_v17 = vsel %vm232_vm0, %v252_v8, %v218_v0  ;;  %v116_v18 = vpack.c.bf16 %v51_v11, %v51_v11  ;;  %v43_v19 = vrot.slane %v588_v38, %v42_v43 }
  0x2d   :  { %v245_v20 = vsel %vm238_vm2, %v244_v6, %v243_v16  ;;  %v255_v21 = vsel %vm235_vm1, %v254_v9, %v253_v17  ;;  %v120_v22 = vpack.c.bf16 %v67_v13, %v67_v13  ;;  %v124_v23 = vpack.c.bf16 %v83_v14, %v83_v14 }
  0x2e   :  { %v259_v24 = vpack.c.b16 %v245_v20, %v245_v20  ;;  %v257_v25 = vsel %vm238_vm2, %v256_v10, %v255_v21  ;;  %v215_v26 = vunpack.c.l.b16 %v112_v15  ;;  %v219_v27 = vunpack.c.l.b16 %v116_v18 }
  0x2f   :  { %v261_v28 = vpack.c.b16 %v257_v25, %v257_v25  ;;  %v223_v29 = vunpack.c.l.b16 %v120_v22  ;;  %v227_v30 = vunpack.c.l.b16 %v124_v23  ;;  %v59_v31 = vrot.slane %v589_v39, %v42_v43 }
  0x30   :  { %490 = vmatprep.mubr.bf16.mxu0 %v259_v24  ;;  %v231_v32 = vrot.slane %v219_v27, 7  ;;  %v75_v33 = vrot.slane %v592_v40, %v42_v43  ;;  %v91_v34 = vrot.slane %v593_v41, %v42_v43  ;;  %v114_v35 = vpack.c.bf16 %v43_v19, %v43_v19 }
  0x31   :  { %530 = vmatprep.mubr.bf16.mxu1 %v261_v28  ;;  %v234_v36 = vrot.slane %v223_v29, 6  ;;  %v237_v37 = vrot.slane %v227_v30, 5  ;;  %v118_v38 = vpack.c.bf16 %v59_v31, %v59_v31 }
  0x32   :  { %v233_v42 = vsel %vm232_vm0, %v231_v32, %v215_v26  ;;  %v122_v44 = vpack.c.bf16 %v75_v33, %v75_v33  ;;  %v126_v45 = vpack.c.bf16 %v91_v34, %v91_v34  ;;  %v217_v47 = vunpack.c.l.b16 %v114_v35 }
  0x33   :  { %v236_v46 = vsel %vm235_vm1, %v234_v36, %v233_v42  ;;  %v221_v48 = vunpack.c.l.b16 %v118_v38 }
  0x34   :  { %v239_v49 = vsel %vm238_vm2, %v237_v37, %v236_v46  ;;  %v225_v39 = vunpack.c.l.b16 %v122_v44  ;;  %v229_v50 = vunpack.c.l.b16 %v126_v45 }
  0x35   :  { %v258_v51 = vpack.c.b16 %v239_v49, %v239_v49  ;;  %v246_v40 = vrot.slane %v221_v48, 7 }
  0x36   :  { %v248_v41 = vrot.slane %v225_v39, 6  ;;  %v250_v43 = vrot.slane %v229_v50, 5 }
  0x37   :  { %491 = vmatmul.mubr.bf16.vlgmr.msra.gmra.mrb[0].mxu0 %v258_v51  ;;  %v247_v52 = vsel %vm232_vm0, %v246_v40, %v217_v47 }
  0x38   :  { %v249_v53 = vsel %vm235_vm1, %v248_v41, %v247_v52 }
  0x39   :  { %v251_v54 = vsel %vm238_vm2, %v250_v43, %v249_v53 }
  0x3a   :  { %v260_v55 = vpack.c.b16 %v251_v54, %v251_v54 }
  0x3c   :  { %531 = vmatmul.mubr.bf16.vlgmr.msra.gmra.mrb[0].mxu1 %v260_v55 }
 0x10a   :  { %v611_v56 = vpop.f32.mrb[0].mxu0 }
 0x10b   :  { %v612_v57 = vpop.f32.mrb[1].mxu0 }
 0x10c   :  { %v613_v59 = vadd.f32 %v612_v57, %v611_v56  ;;  %v614_v60 = vpop.f32.mrb[2].mxu0 }
 0x10d   :  { %v615_v61 = vpop.f32.mrb[3].mxu0 }
 0x10e   :  { %v493_v63 = vadd.f32 %v613_v59, %v553_v58 }
 0x10f   :  { %v633_v62 = vpop.f32.mrb[0].mxu1 }
 0x110   :  { %v634_v0 = vpop.f32.mrb[1].mxu1 }
 0x111   :  { %v635_v1 = vadd.f32 %v634_v0, %v633_v62  ;;  %v636_v2 = vpop.f32.mrb[2].mxu1 }
 0x112   :  { %v637_v3 = vpop.f32.mrb[3].mxu1 }
 0x113   :  { %v533_v4 = vadd.f32 %v635_v1, %v493_v63 }
 0x115   :  { %538 = vst [vmem:[#allocation2] sm:$0xf] %v533_v4 }
 0x116   :  { %683 = shalt.err (!%p680_p4)
}
 0x117   :  { %s684_s30 = scalar_lea.hbm %s849_s3, 64 }
 0x118   :  { %p685_p5 = scmp.ne.s32.totalorder %s849_s3, %s684_s30  ;;  %p688_p6 = scmp.lt.u32.totalorder %s684_s30, %s849_s3 }
 0x11a   :  { %p690_p7 = pnand %p688_p6, %p685_p5 }
 0x11c   :  { %693 = shalt.err (!%p690_p7)
}
 0x11d   :  { %548 = dma.vmem_to_hbm [thread:$0]  %s546_s27, 64, %s849_s3, [#allocation3]  }
 0x11e   :  { %694 = dma.done.wait [#allocation3], 64  }
 0x11f   :  { %695 = vsyncadd [#allocation3], 4294967232 }
 0x120   :  { %552 = vsyncpa [#allocation3], 1 }

// kernel: _lambda_.14
= control target key start
LH: loop header
LB: loop body
LE: loop exit
PB: predicated region body
PF: predicated region fallthrough
CT: control target
= control target key end

     0   :  { %s10344_s1 = inlined_call_operand.vmem [shape: bf16[2304,512], index: 1, kind: input, shape index: {}]   ;;  %s10345_s0 = inlined_call_operand.vmem [shape: bf16[8,2304], index: 0, kind: input, shape index: {}]   ;;  %s10346_s3 = inlined_call_operand.vmem [shape: bf16[1,512,512], index: 3, kind: input, shape index: {}]   ;;  %s10347_s6 = inlined_call_operand.vmem [shape: bf16[256,512], index: 6, kind: input, shape index: {}]   ;;  %s10348_s2 = inlined_call_operand.vmem [shape: f32[1,512], index: 2, kind: input, shape index: {}, may-alias: {2,4,7}]   ;;  %s10349_s5 = inlined_call_operand.vmem [shape: bf16[8,256], index: 5, kind: input, shape index: {}]   ;;  %s10350_s4 = inlined_call_operand.vmem [shape: f32[1,512], index: 4, kind: input, shape index: {}, may-alias: {2,4,7}]   ;;  %s10351_s7 = inlined_call_operand.vmem [shape: f32[1,512], index: 7, kind: input, shape index: {}, may-alias: {2,4,7}]   ;;  %s10352_s8 = inlined_call_operand.vmem [shape: bf16[8,512], index: 8, kind: output, shape index: {}]  }
   0x1   :  { %v6689_v0 = vld [vmem:[%s10344_s1 + $0x4] ss:$16 sps:$4 sm:$0xff]   ;;  %v6691_v1 = vld [vmem:[%s10344_s1 + $0xc] ss:$16 sps:$4 sm:$0xff]   ;;  %v6693_v2 = vld [vmem:[%s10344_s1] ss:$16 sps:$4 sm:$0xff]  }
   0x2   :  { %3579 = vmatprep.subr.bf16.mxu0 %v6689_v0  ;;  %v6694_v3 = vld [vmem:[%s10344_s1 + $0x8] ss:$16 sps:$4 sm:$0xff]   ;;  %3948 = vmatprep.subr.bf16.mxu1 %v6691_v1  ;;  %v6695_v4 = vld [vmem:[%s10344_s1 + $0x24] ss:$16 sps:$4 sm:$0xff]   ;;  %v6697_v5 = vld [vmem:[%s10344_s1 + $0x2c] ss:$16 sps:$4 sm:$0xff]  }
   0x3   :  { %3580 = vmatpush1.bf16.msra.mxu0 %v6693_v2  ;;  %3949 = vmatpush1.bf16.msra.mxu1 %v6694_v3  ;;  %v6699_v6 = vld [vmem:[%s10344_s1 + $0x20] ss:$16 sps:$4 sm:$0xff]   ;;  %v6700_v7 = vld [vmem:[%s10344_s1 + $0x28] ss:$16 sps:$4 sm:$0xff]   ;;  %v6701_v8 = vld [vmem:[%s10344_s1 + $0x44] ss:$16 sps:$4 sm:$0xff]  }
   0x4   :  { %3581 = vmatprep.subr.bf16.mxu0 %v6695_v4  ;;  %3950 = vmatprep.subr.bf16.mxu1 %v6697_v5  ;;  %v6703_v9 = vld [vmem:[%s10344_s1 + $0x4c] ss:$16 sps:$4 sm:$0xff]   ;;  %v6705_v10 = vld [vmem:[%s10344_s1 + $0x40] ss:$16 sps:$4 sm:$0xff]   ;;  %v6706_v11 = vld [vmem:[%s10344_s1 + $0x48] ss:$16 sps:$4 sm:$0xff]  }
   0x5   :  { %v6707_v12 = vld [vmem:[%s10344_s1 + $0x64] ss:$16 sps:$4 sm:$0xff]   ;;  %v6709_v13 = vld [vmem:[%s10344_s1 + $0x6c] ss:$16 sps:$4 sm:$0xff]   ;;  %v6711_v14 = vld [vmem:[%s10344_s1 + $0x60] ss:$16 sps:$4 sm:$0xff]  }
   0x6   :  { %v6712_v15 = vld [vmem:[%s10344_s1 + $0x68] ss:$16 sps:$4 sm:$0xff]   ;;  %v6713_v16 = vld [vmem:[%s10344_s1 + $0x84] ss:$16 sps:$4 sm:$0xff]   ;;  %v6715_v17 = vld [vmem:[%s10344_s1 + $0x8c] ss:$16 sps:$4 sm:$0xff]  }
   0x7   :  { %3582 = vmatpush1.bf16.msra.mxu0 %v6699_v6  ;;  %3951 = vmatpush1.bf16.msra.mxu1 %v6700_v7  ;;  %v6717_v18 = vld [vmem:[%s10344_s1 + $0x80] ss:$16 sps:$4 sm:$0xff]   ;;  %v6718_v19 = vld [vmem:[%s10344_s1 + $0x88] ss:$16 sps:$4 sm:$0xff]   ;;  %v6719_v20 = vld [vmem:[%s10344_s1 + $0xa4] ss:$16 sps:$4 sm:$0xff]  }
   0x8   :  { %3583 = vmatprep.subr.bf16.mxu0 %v6701_v8  ;;  %3952 = vmatprep.subr.bf16.mxu1 %v6703_v9  ;;  %v6721_v21 = vld [vmem:[%s10344_s1 + $0xac] ss:$16 sps:$4 sm:$0xff]   ;;  %v6723_v22 = vld [vmem:[%s10344_s1 + $0xa0] ss:$16 sps:$4 sm:$0xff]   ;;  %v6724_v23 = vld [vmem:[%s10344_s1 + $0xa8] ss:$16 sps:$4 sm:$0xff]  }
   0x9   :  { %v6725_v24 = vld [vmem:[%s10344_s1 + $0xc4] ss:$16 sps:$4 sm:$0xff]   ;;  %v6727_v25 = vld [vmem:[%s10344_s1 + $0xcc] ss:$16 sps:$4 sm:$0xff]   ;;  %v6729_v26 = vld [vmem:[%s10344_s1 + $0xc0] ss:$16 sps:$4 sm:$0xff]  }
   0xa   :  { %v6730_v27 = vld [vmem:[%s10344_s1 + $0xc8] ss:$16 sps:$4 sm:$0xff]   ;;  %v6731_v28 = vld [vmem:[%s10344_s1 + $0xe4] ss:$16 sps:$4 sm:$0xff]   ;;  %v6733_v29 = vld [vmem:[%s10344_s1 + $0xec] ss:$16 sps:$4 sm:$0xff]  }
   0xb   :  { %3584 = vmatpush1.bf16.msra.mxu0 %v6705_v10  ;;  %3953 = vmatpush1.bf16.msra.mxu1 %v6706_v11  ;;  %v6735_v30 = vld [vmem:[%s10344_s1 + $0xe0] ss:$16 sps:$4 sm:$0xff]   ;;  %v6736_v31 = vld [vmem:[%s10344_s1 + $0xe8] ss:$16 sps:$4 sm:$0xff]   ;;  %v6737_v32 = vld [vmem:[%s10344_s1 + $0x104] ss:$16 sps:$4 sm:$0xff]  }
   0xc   :  { %3585 = vmatprep.subr.bf16.mxu0 %v6707_v12  ;;  %3954 = vmatprep.subr.bf16.mxu1 %v6709_v13  ;;  %v6739_v33 = vld [vmem:[%s10344_s1 + $0x10c] ss:$16 sps:$4 sm:$0xff]   ;;  %v6741_v34 = vld [vmem:[%s10344_s1 + $0x100] ss:$16 sps:$4 sm:$0xff]   ;;  %v6742_v35 = vld [vmem:[%s10344_s1 + $0x108] ss:$16 sps:$4 sm:$0xff]  }
   0xd   :  { %v6743_v36 = vld [vmem:[%s10344_s1 + $0x124] ss:$16 sps:$4 sm:$0xff]   ;;  %v6745_v37 = vld [vmem:[%s10344_s1 + $0x12c] ss:$16 sps:$4 sm:$0xff]   ;;  %v6747_v38 = vld [vmem:[%s10344_s1 + $0x120] ss:$16 sps:$4 sm:$0xff]  }
   0xe   :  { %v6748_v39 = vld [vmem:[%s10344_s1 + $0x128] ss:$16 sps:$4 sm:$0xff]   ;;  %v6749_v40 = vld [vmem:[%s10344_s1 + $0x144] ss:$16 sps:$4 sm:$0xff]   ;;  %v6751_v41 = vld [vmem:[%s10344_s1 + $0x14c] ss:$16 sps:$4 sm:$0xff]  }
   0xf   :  { %3586 = vmatpush1.bf16.msra.mxu0 %v6711_v14  ;;  %3955 = vmatpush1.bf16.msra.mxu1 %v6712_v15  ;;  %v6753_v42 = vld [vmem:[%s10344_s1 + $0x140] ss:$16 sps:$4 sm:$0xff]   ;;  %v6754_v43 = vld [vmem:[%s10344_s1 + $0x148] ss:$16 sps:$4 sm:$0xff]   ;;  %v6755_v44 = vld [vmem:[%s10344_s1 + $0x164] ss:$16 sps:$4 sm:$0xff]  }
  0x10   :  { %3587 = vmatprep.subr.bf16.mxu0 %v6713_v16  ;;  %3956 = vmatprep.subr.bf16.mxu1 %v6715_v17  ;;  %v6757_v45 = vld [vmem:[%s10344_s1 + $0x16c] ss:$16 sps:$4 sm:$0xff]   ;;  %v29_v46 = vld [vmem:[%s10345_s0] sm:$0xff]  ;;  %v6760_v49 = vld [vmem:[%s10344_s1 + $0x168] ss:$16 sps:$4 sm:$0xff]  }
  0x11   :  { %v6759_v47 = vld [vmem:[%s10344_s1 + $0x160] ss:$16 sps:$4 sm:$0xff]   ;;  %v5806_v48 = vcombine.high %v29_v46, %v29_v46  ;;  %v6761_v50 = vld [vmem:[%s10344_s1 + $0x184] ss:$16 sps:$4 sm:$0xff]   ;;  %v6763_v51 = vld [vmem:[%s10344_s1 + $0x18c] ss:$16 sps:$4 sm:$0xff]   ;;  %v5805_v4 = vcombine.low %v29_v46, %v29_v46 }
  0x12   :  { %v6765_v52 = vld [vmem:[%s10344_s1 + $0x180] ss:$16 sps:$4 sm:$0xff]   ;;  %v6766_v53 = vld [vmem:[%s10344_s1 + $0x188] ss:$16 sps:$4 sm:$0xff]   ;;  %v6767_v54 = vld [vmem:[%s10344_s1 + $0x1a4] ss:$16 sps:$4 sm:$0xff]  }
  0x13   :  { %3588 = vmatpush1.bf16.msra.mxu0 %v6717_v18  ;;  %3957 = vmatpush1.bf16.msra.mxu1 %v6718_v19  ;;  %v6769_v55 = vld [vmem:[%s10344_s1 + $0x1ac] ss:$16 sps:$4 sm:$0xff]   ;;  %v6771_v56 = vld [vmem:[%s10344_s1 + $0x1a0] ss:$16 sps:$4 sm:$0xff]   ;;  %v6772_v57 = vld [vmem:[%s10344_s1 + $0x1a8] ss:$16 sps:$4 sm:$0xff]  }
  0x14   :  { %3589 = vmatprep.subr.bf16.mxu0 %v6719_v20  ;;  %3958 = vmatprep.subr.bf16.mxu1 %v6721_v21  ;;  %v6773_v58 = vld [vmem:[%s10344_s1 + $0x1c4] ss:$16 sps:$4 sm:$0xff]   ;;  %v6775_v59 = vld [vmem:[%s10344_s1 + $0x1cc] ss:$16 sps:$4 sm:$0xff]   ;;  %v6777_v60 = vld [vmem:[%s10344_s1 + $0x1c0] ss:$16 sps:$4 sm:$0xff]  }
  0x15   :  { %3611 = vmatprep.mubr.bf16.mxu0 %v5806_v48  ;;  %3980 = vmatprep.mubr.bf16.mxu1 %v5806_v48  ;;  %v6778_v61 = vld [vmem:[%s10344_s1 + $0x1c8] ss:$16 sps:$4 sm:$0xff]   ;;  %v6779_v62 = vld [vmem:[%s10344_s1 + $0x1e4] ss:$16 sps:$4 sm:$0xff]   ;;  %v6781_v63 = vld [vmem:[%s10344_s1 + $0x1ec] ss:$16 sps:$4 sm:$0xff]  }
  0x16   :  { %v6783_v0 = vld [vmem:[%s10344_s1 + $0x1e0] ss:$16 sps:$4 sm:$0xff]   ;;  %v6784_v1 = vld [vmem:[%s10344_s1 + $0x1e8] ss:$16 sps:$4 sm:$0xff]   ;;  %v6789_v2 = vld [vmem:[%s10344_s1 + $0x204] ss:$16 sps:$4 sm:$0xff]  }
  0x17   :  { %3590 = vmatpush1.bf16.msra.mxu0 %v6723_v22  ;;  %3959 = vmatpush1.bf16.msra.mxu1 %v6724_v23  ;;  %v6792_v3 = vld [vmem:[%s10344_s1 + $0x20c] ss:$16 sps:$4 sm:$0xff]   ;;  %v6787_v5 = vld [vmem:[%s10344_s1 + $0x200] ss:$16 sps:$4 sm:$0xff]   ;;  %v6790_v6 = vld [vmem:[%s10344_s1 + $0x208] ss:$16 sps:$4 sm:$0xff]  }
  0x18   :  { %3591 = vmatprep.subr.bf16.mxu0 %v6725_v24  ;;  %3960 = vmatprep.subr.bf16.mxu1 %v6727_v25  ;;  %v6795_v7 = vld [vmem:[%s10344_s1 + $0x224] ss:$16 sps:$4 sm:$0xff]   ;;  %v6798_v8 = vld [vmem:[%s10344_s1 + $0x22c] ss:$16 sps:$4 sm:$0xff]   ;;  %v6793_v9 = vld [vmem:[%s10344_s1 + $0x220] ss:$16 sps:$4 sm:$0xff]  }
  0x19   :  { %v6796_v10 = vld [vmem:[%s10344_s1 + $0x228] ss:$16 sps:$4 sm:$0xff]   ;;  %v6801_v11 = vld [vmem:[%s10344_s1 + $0x244] ss:$16 sps:$4 sm:$0xff]   ;;  %v6804_v12 = vld [vmem:[%s10344_s1 + $0x24c] ss:$16 sps:$4 sm:$0xff]  }
  0x1a   :  { %v6799_v13 = vld [vmem:[%s10344_s1 + $0x240] ss:$16 sps:$4 sm:$0xff]   ;;  %v6802_v14 = vld [vmem:[%s10344_s1 + $0x248] ss:$16 sps:$4 sm:$0xff]   ;;  %v6807_v15 = vld [vmem:[%s10344_s1 + $0x264] ss:$16 sps:$4 sm:$0xff]  }
  0x1b   :  { %3592 = vmatpush1.bf16.msra.mxu0 %v6729_v26  ;;  %3961 = vmatpush1.bf16.msra.mxu1 %v6730_v27  ;;  %v6810_v16 = vld [vmem:[%s10344_s1 + $0x26c] ss:$16 sps:$4 sm:$0xff]   ;;  %v6805_v17 = vld [vmem:[%s10344_s1 + $0x260] ss:$16 sps:$4 sm:$0xff]   ;;  %v6808_v18 = vld [vmem:[%s10344_s1 + $0x268] ss:$16 sps:$4 sm:$0xff]  }
  0x1c   :  { %3593 = vmatprep.subr.bf16.mxu0 %v6731_v28  ;;  %3962 = vmatprep.subr.bf16.mxu1 %v6733_v29  ;;  %v6813_v19 = vld [vmem:[%s10344_s1 + $0x284] ss:$16 sps:$4 sm:$0xff]   ;;  %v6816_v20 = vld [vmem:[%s10344_s1 + $0x28c] ss:$16 sps:$4 sm:$0xff]   ;;  %v6811_v21 = vld [vmem:[%s10344_s1 + $0x280] ss:$16 sps:$4 sm:$0xff]  }
  0x1d   :  { %v6814_v22 = vld [vmem:[%s10344_s1 + $0x288] ss:$16 sps:$4 sm:$0xff]   ;;  %v6819_v23 = vld [vmem:[%s10344_s1 + $0x2a4] ss:$16 sps:$4 sm:$0xff]   ;;  %v6822_v24 = vld [vmem:[%s10344_s1 + $0x2ac] ss:$16 sps:$4 sm:$0xff]  }
  0x1e   :  { %v6817_v25 = vld [vmem:[%s10344_s1 + $0x2a0] ss:$16 sps:$4 sm:$0xff]   ;;  %v6820_v26 = vld [vmem:[%s10344_s1 + $0x2a8] ss:$16 sps:$4 sm:$0xff]   ;;  %v6825_v27 = vld [vmem:[%s10344_s1 + $0x2c4] ss:$16 sps:$4 sm:$0xff]  }
  0x1f   :  { %3594 = vmatpush1.bf16.msra.mxu0 %v6735_v30  ;;  %3963 = vmatpush1.bf16.msra.mxu1 %v6736_v31  ;;  %v6828_v28 = vld [vmem:[%s10344_s1 + $0x2cc] ss:$16 sps:$4 sm:$0xff]   ;;  %v6823_v31 = vld [vmem:[%s10344_s1 + $0x2c0] ss:$16 sps:$4 sm:$0xff]   ;;  %v6850_v48 = vld [vmem:[%s10344_s1 + $0x348] ss:$16 sps:$4 sm:$0xff]  }
  0x20   :  { %3595 = vmatprep.subr.bf16.mxu0 %v6737_v32  ;;  %3964 = vmatprep.subr.bf16.mxu1 %v6739_v33  ;;  %v8182_v29 = vld [vmem:[%s10345_s0 + $0x8] sm:$0xff]  ;;  %v6831_v33 = vld [vmem:[%s10344_s1 + $0x2e4] ss:$16 sps:$4 sm:$0xff]  }
  0x21   :  { %v5808_v30 = vcombine.high %v8182_v29, %v8182_v29  ;;  %v6826_v32 = vld [vmem:[%s10344_s1 + $0x2c8] ss:$16 sps:$4 sm:$0xff]   ;;  %v6852_v46 = vld [vmem:[%s10344_s1 + $0x34c] ss:$16 sps:$4 sm:$0xff]  }
  0x23   :  { %3596 = vmatpush1.bf16.msra.mxu0 %v6741_v34  ;;  %3965 = vmatpush1.bf16.msra.mxu1 %v6742_v35  ;;  %v6834_v34 = vld [vmem:[%s10344_s1 + $0x2ec] ss:$16 sps:$4 sm:$0xff]   ;;  %v6829_v35 = vld [vmem:[%s10344_s1 + $0x2e0] ss:$16 sps:$4 sm:$0xff]  }
  0x24   :  { %3597 = vmatprep.subr.bf16.mxu0 %v6743_v36  ;;  %3966 = vmatprep.subr.bf16.mxu1 %v6745_v37  ;;  %v6832_v36 = vld [vmem:[%s10344_s1 + $0x2e8] ss:$16 sps:$4 sm:$0xff]   ;;  %v6837_v37 = vld [vmem:[%s10344_s1 + $0x304] ss:$16 sps:$4 sm:$0xff]  }
  0x27   :  { %3598 = vmatpush1.bf16.msra.mxu0 %v6747_v38  ;;  %3967 = vmatpush1.bf16.msra.mxu1 %v6748_v39  ;;  %v6840_v38 = vld [vmem:[%s10344_s1 + $0x30c] ss:$16 sps:$4 sm:$0xff]   ;;  %v6835_v39 = vld [vmem:[%s10344_s1 + $0x300] ss:$16 sps:$4 sm:$0xff]  }
  0x28   :  { %3599 = vmatprep.subr.bf16.mxu0 %v6749_v40  ;;  %3968 = vmatprep.subr.bf16.mxu1 %v6751_v41  ;;  %v6838_v40 = vld [vmem:[%s10344_s1 + $0x308] ss:$16 sps:$4 sm:$0xff]   ;;  %v6843_v41 = vld [vmem:[%s10344_s1 + $0x324] ss:$16 sps:$4 sm:$0xff]  }
  0x2b   :  { %3600 = vmatpush1.bf16.msra.mxu0 %v6753_v42  ;;  %3969 = vmatpush1.bf16.msra.mxu1 %v6754_v43  ;;  %v6846_v42 = vld [vmem:[%s10344_s1 + $0x32c] ss:$16 sps:$4 sm:$0xff]   ;;  %v6841_v43 = vld [vmem:[%s10344_s1 + $0x320] ss:$16 sps:$4 sm:$0xff]  }
  0x2c   :  { %3601 = vmatprep.subr.bf16.mxu0 %v6755_v44  ;;  %3970 = vmatprep.subr.bf16.mxu1 %v6757_v45  ;;  %v6844_v44 = vld [vmem:[%s10344_s1 + $0x328] ss:$16 sps:$4 sm:$0xff]   ;;  %v6849_v45 = vld [vmem:[%s10344_s1 + $0x344] ss:$16 sps:$4 sm:$0xff]  }
  0x2f   :  { %3602 = vmatpush1.bf16.msra.mxu0 %v6759_v47  ;;  %3971 = vmatpush1.bf16.msra.mxu1 %v6760_v49  ;;  %v6847_v47 = vld [vmem:[%s10344_s1 + $0x340] ss:$16 sps:$4 sm:$0xff]   ;;  %v6855_v49 = vld [vmem:[%s10344_s1 + $0x364] ss:$16 sps:$4 sm:$0xff]  }
  0x30   :  { %3603 = vmatprep.subr.bf16.mxu0 %v6761_v50  ;;  %3972 = vmatprep.subr.bf16.mxu1 %v6763_v51  ;;  %v6858_v50 = vld [vmem:[%s10344_s1 + $0x36c] ss:$16 sps:$4 sm:$0xff]   ;;  %v6853_v51 = vld [vmem:[%s10344_s1 + $0x360] ss:$16 sps:$4 sm:$0xff]  }
  0x33   :  { %3604 = vmatpush1.bf16.msra.mxu0 %v6765_v52  ;;  %3973 = vmatpush1.bf16.msra.mxu1 %v6766_v53  ;;  %v6856_v52 = vld [vmem:[%s10344_s1 + $0x368] ss:$16 sps:$4 sm:$0xff]   ;;  %v6861_v53 = vld [vmem:[%s10344_s1 + $0x384] ss:$16 sps:$4 sm:$0xff]  }
  0x34   :  { %3605 = vmatprep.subr.bf16.mxu0 %v6767_v54  ;;  %3974 = vmatprep.subr.bf16.mxu1 %v6769_v55  ;;  %v6864_v54 = vld [vmem:[%s10344_s1 + $0x38c] ss:$16 sps:$4 sm:$0xff]   ;;  %v6859_v55 = vld [vmem:[%s10344_s1 + $0x380] ss:$16 sps:$4 sm:$0xff]  }
  0x37   :  { %3606 = vmatpush1.bf16.msra.mxu0 %v6771_v56  ;;  %3975 = vmatpush1.bf16.msra.mxu1 %v6772_v57  ;;  %v6862_v56 = vld [vmem:[%s10344_s1 + $0x388] ss:$16 sps:$4 sm:$0xff]   ;;  %v6867_v57 = vld [vmem:[%s10344_s1 + $0x3a4] ss:$16 sps:$4 sm:$0xff]  }
  0x38   :  { %3607 = vmatprep.subr.bf16.mxu0 %v6773_v58  ;;  %3976 = vmatprep.subr.bf16.mxu1 %v6775_v59  ;;  %v6870_v58 = vld [vmem:[%s10344_s1 + $0x3ac] ss:$16 sps:$4 sm:$0xff]   ;;  %v6865_v59 = vld [vmem:[%s10344_s1 + $0x3a0] ss:$16 sps:$4 sm:$0xff]  }
  0x3b   :  { %3608 = vmatpush1.bf16.msra.mxu0 %v6777_v60  ;;  %3977 = vmatpush1.bf16.msra.mxu1 %v6778_v61  ;;  %v6868_v60 = vld [vmem:[%s10344_s1 + $0x3a8] ss:$16 sps:$4 sm:$0xff]   ;;  %v6873_v61 = vld [vmem:[%s10344_s1 + $0x3c4] ss:$16 sps:$4 sm:$0xff]  }
  0x3c   :  { %3609 = vmatprep.subr.bf16.mxu0 %v6779_v62  ;;  %3978 = vmatprep.subr.bf16.mxu1 %v6781_v63  ;;  %v6876_v62 = vld [vmem:[%s10344_s1 + $0x3cc] ss:$16 sps:$4 sm:$0xff]   ;;  %v6871_v63 = vld [vmem:[%s10344_s1 + $0x3c0] ss:$16 sps:$4 sm:$0xff]  }
  0x3f   :  { %3610 = vmatpush1.bf16.msra.mxu0 %v6783_v0  ;;  %3979 = vmatpush1.bf16.msra.mxu1 %v6784_v1  ;;  %v6874_v0 = vld [vmem:[%s10344_s1 + $0x3c8] ss:$16 sps:$4 sm:$0xff]   ;;  %v6879_v1 = vld [vmem:[%s10344_s1 + $0x3e4] ss:$16 sps:$4 sm:$0xff]  }
  0x40   :  { %3620 = vmatprep.subr.bf16.mxu0 %v6789_v2  ;;  %3989 = vmatprep.subr.bf16.mxu1 %v6792_v3  ;;  %v6882_v2 = vld [vmem:[%s10344_s1 + $0x3ec] ss:$16 sps:$4 sm:$0xff]   ;;  %v6877_v3 = vld [vmem:[%s10344_s1 + $0x3e0] ss:$16 sps:$4 sm:$0xff]  }
  0x42   :  { %3612 = vmatmul.mubr.bf16.vlgmr.msra.gmra.mrb[0].mxu0 %v5805_v4  ;;  %3981 = vmatmul.mubr.bf16.vlgmr.msra.gmra.mrb[0].mxu1 %v5805_v4  ;;  %v6880_v4 = vld [vmem:[%s10344_s1 + $0x3e8] ss:$16 sps:$4 sm:$0xff]  }
  0x43   :  { %3621 = vmatpush1.bf16.msra.mxu0 %v6787_v5  ;;  %3990 = vmatpush1.bf16.msra.mxu1 %v6790_v6  ;;  %v6887_v5 = vld [vmem:[%s10344_s1 + $0x404] ss:$16 sps:$4 sm:$0xff]   ;;  %v6890_v6 = vld [vmem:[%s10344_s1 + $0x40c] ss:$16 sps:$4 sm:$0xff]  }
  0x44   :  { %3622 = vmatprep.subr.bf16.mxu0 %v6795_v7  ;;  %3991 = vmatprep.subr.bf16.mxu1 %v6798_v8  ;;  %v5807_v7 = vcombine.low %v8182_v29, %v8182_v29  ;;  %v6885_v8 = vld [vmem:[%s10344_s1 + $0x400] ss:$16 sps:$4 sm:$0xff]   ;;  %v6920_v29 = vld [vmem:[%s10344_s1 + $0x4ac] ss:$16 sps:$4 sm:$0xff]  }
  0x45   :  { %3652 = vmatprep.mubr.bf16.mxu0 %v5808_v30  ;;  %4021 = vmatprep.mubr.bf16.mxu1 %v5808_v30  ;;  %v6915_v30 = vld [vmem:[%s10344_s1 + $0x4a0] ss:$16 sps:$4 sm:$0xff]  }
  0x47   :  { %3623 = vmatpush1.bf16.msra.mxu0 %v6793_v9  ;;  %3992 = vmatpush1.bf16.msra.mxu1 %v6796_v10  ;;  %v6888_v9 = vld [vmem:[%s10344_s1 + $0x408] ss:$16 sps:$4 sm:$0xff]   ;;  %v6893_v10 = vld [vmem:[%s10344_s1 + $0x424] ss:$16 sps:$4 sm:$0xff]  }
  0x48   :  { %3624 = vmatprep.subr.bf16.mxu0 %v6801_v11  ;;  %3993 = vmatprep.subr.bf16.mxu1 %v6804_v12  ;;  %v8320_v11 = vld [vmem:[%s10345_s0 + $0x10] sm:$0xff]  ;;  %v6896_v12 = vld [vmem:[%s10344_s1 + $0x42c] ss:$16 sps:$4 sm:$0xff]  }
  0x4b   :  { %3625 = vmatpush1.bf16.msra.mxu0 %v6799_v13  ;;  %3994 = vmatpush1.bf16.msra.mxu1 %v6802_v14  ;;  %v5810_v13 = vcombine.high %v8320_v11, %v8320_v11  ;;  %v6891_v14 = vld [vmem:[%s10344_s1 + $0x420] ss:$16 sps:$4 sm:$0xff]  }
  0x4c   :  { %3626 = vmatprep.subr.bf16.mxu0 %v6807_v15  ;;  %3995 = vmatprep.subr.bf16.mxu1 %v6810_v16  ;;  %v6894_v15 = vld [vmem:[%s10344_s1 + $0x428] ss:$16 sps:$4 sm:$0xff]   ;;  %v6899_v16 = vld [vmem:[%s10344_s1 + $0x444] ss:$16 sps:$4 sm:$0xff]  }
  0x4f   :  { %3627 = vmatpush1.bf16.msra.mxu0 %v6805_v17  ;;  %3996 = vmatpush1.bf16.msra.mxu1 %v6808_v18  ;;  %v6902_v17 = vld [vmem:[%s10344_s1 + $0x44c] ss:$16 sps:$4 sm:$0xff]   ;;  %v6897_v18 = vld [vmem:[%s10344_s1 + $0x440] ss:$16 sps:$4 sm:$0xff]  }
  0x50   :  { %3628 = vmatprep.subr.bf16.mxu0 %v6813_v19  ;;  %3997 = vmatprep.subr.bf16.mxu1 %v6816_v20  ;;  %v6900_v19 = vld [vmem:[%s10344_s1 + $0x448] ss:$16 sps:$4 sm:$0xff]   ;;  %v6905_v20 = vld [vmem:[%s10344_s1 + $0x464] ss:$16 sps:$4 sm:$0xff]  }
  0x53   :  { %3629 = vmatpush1.bf16.msra.mxu0 %v6811_v21  ;;  %3998 = vmatpush1.bf16.msra.mxu1 %v6814_v22  ;;  %v6908_v21 = vld [vmem:[%s10344_s1 + $0x46c] ss:$16 sps:$4 sm:$0xff]   ;;  %v6903_v22 = vld [vmem:[%s10344_s1 + $0x460] ss:$16 sps:$4 sm:$0xff]  }
  0x54   :  { %3630 = vmatprep.subr.bf16.mxu0 %v6819_v23  ;;  %3999 = vmatprep.subr.bf16.mxu1 %v6822_v24  ;;  %v6906_v23 = vld [vmem:[%s10344_s1 + $0x468] ss:$16 sps:$4 sm:$0xff]   ;;  %v6911_v24 = vld [vmem:[%s10344_s1 + $0x484] ss:$16 sps:$4 sm:$0xff]  }
  0x57   :  { %3631 = vmatpush1.bf16.msra.mxu0 %v6817_v25  ;;  %4000 = vmatpush1.bf16.msra.mxu1 %v6820_v26  ;;  %v6914_v25 = vld [vmem:[%s10344_s1 + $0x48c] ss:$16 sps:$4 sm:$0xff]   ;;  %v6909_v26 = vld [vmem:[%s10344_s1 + $0x480] ss:$16 sps:$4 sm:$0xff]  }
  0x58   :  { %3632 = vmatprep.subr.bf16.mxu0 %v6825_v27  ;;  %4001 = vmatprep.subr.bf16.mxu1 %v6828_v28  ;;  %v6912_v27 = vld [vmem:[%s10344_s1 + $0x488] ss:$16 sps:$4 sm:$0xff]   ;;  %v6917_v28 = vld [vmem:[%s10344_s1 + $0x4a4] ss:$16 sps:$4 sm:$0xff]  }
  0x5b   :  { %3633 = vmatpush1.bf16.msra.mxu0 %v6823_v31  ;;  %4002 = vmatpush1.bf16.msra.mxu1 %v6826_v32  ;;  %v6918_v31 = vld [vmem:[%s10344_s1 + $0x4a8] ss:$16 sps:$4 sm:$0xff]   ;;  %v6923_v32 = vld [vmem:[%s10344_s1 + $0x4c4] ss:$16 sps:$4 sm:$0xff]  }
  0x5c   :  { %3634 = vmatprep.subr.bf16.mxu0 %v6831_v33  ;;  %4003 = vmatprep.subr.bf16.mxu1 %v6834_v34  ;;  %v6926_v33 = vld [vmem:[%s10344_s1 + $0x4cc] ss:$16 sps:$4 sm:$0xff]   ;;  %v6921_v34 = vld [vmem:[%s10344_s1 + $0x4c0] ss:$16 sps:$4 sm:$0xff]  }
  0x5f   :  { %3635 = vmatpush1.bf16.msra.mxu0 %v6829_v35  ;;  %4004 = vmatpush1.bf16.msra.mxu1 %v6832_v36  ;;  %v6924_v35 = vld [vmem:[%s10344_s1 + $0x4c8] ss:$16 sps:$4 sm:$0xff]   ;;  %v6929_v36 = vld [vmem:[%s10344_s1 + $0x4e4] ss:$16 sps:$4 sm:$0xff]  }
  0x60   :  { %3636 = vmatprep.subr.bf16.mxu0 %v6837_v37  ;;  %4005 = vmatprep.subr.bf16.mxu1 %v6840_v38  ;;  %v6932_v37 = vld [vmem:[%s10344_s1 + $0x4ec] ss:$16 sps:$4 sm:$0xff]   ;;  %v6927_v38 = vld [vmem:[%s10344_s1 + $0x4e0] ss:$16 sps:$4 sm:$0xff]  }
  0x63   :  { %3637 = vmatpush1.bf16.msra.mxu0 %v6835_v39  ;;  %4006 = vmatpush1.bf16.msra.mxu1 %v6838_v40  ;;  %v6930_v39 = vld [vmem:[%s10344_s1 + $0x4e8] ss:$16 sps:$4 sm:$0xff]   ;;  %v6935_v40 = vld [vmem:[%s10344_s1 + $0x504] ss:$16 sps:$4 sm:$0xff]  }
  0x64   :  { %3638 = vmatprep.subr.bf16.mxu0 %v6843_v41  ;;  %4007 = vmatprep.subr.bf16.mxu1 %v6846_v42  ;;  %v6938_v41 = vld [vmem:[%s10344_s1 + $0x50c] ss:$16 sps:$4 sm:$0xff]   ;;  %v6933_v42 = vld [vmem:[%s10344_s1 + $0x500] ss:$16 sps:$4 sm:$0xff]  }
  0x67   :  { %3639 = vmatpush1.bf16.msra.mxu0 %v6841_v43  ;;  %4008 = vmatpush1.bf16.msra.mxu1 %v6844_v44  ;;  %v6936_v43 = vld [vmem:[%s10344_s1 + $0x508] ss:$16 sps:$4 sm:$0xff]   ;;  %v6941_v44 = vld [vmem:[%s10344_s1 + $0x524] ss:$16 sps:$4 sm:$0xff]  }
  0x68   :  { %3640 = vmatprep.subr.bf16.mxu0 %v6849_v45  ;;  %4009 = vmatprep.subr.bf16.mxu1 %v6852_v46  ;;  %v6944_v45 = vld [vmem:[%s10344_s1 + $0x52c] ss:$16 sps:$4 sm:$0xff]   ;;  %v6939_v46 = vld [vmem:[%s10344_s1 + $0x520] ss:$16 sps:$4 sm:$0xff]  }
  0x6b   :  { %3641 = vmatpush1.bf16.msra.mxu0 %v6847_v47  ;;  %4010 = vmatpush1.bf16.msra.mxu1 %v6850_v48  ;;  %v6942_v47 = vld [vmem:[%s10344_s1 + $0x528] ss:$16 sps:$4 sm:$0xff]   ;;  %v6947_v48 = vld [vmem:[%s10344_s1 + $0x544] ss:$16 sps:$4 sm:$0xff]  }
  0x6c   :  { %3642 = vmatprep.subr.bf16.mxu0 %v6855_v49  ;;  %4011 = vmatprep.subr.bf16.mxu1 %v6858_v50  ;;  %v6950_v49 = vld [vmem:[%s10344_s1 + $0x54c] ss:$16 sps:$4 sm:$0xff]   ;;  %v6945_v50 = vld [vmem:[%s10344_s1 + $0x540] ss:$16 sps:$4 sm:$0xff]  }
  0x6f   :  { %3643 = vmatpush1.bf16.msra.mxu0 %v6853_v51  ;;  %4012 = vmatpush1.bf16.msra.mxu1 %v6856_v52  ;;  %v6948_v51 = vld [vmem:[%s10344_s1 + $0x548] ss:$16 sps:$4 sm:$0xff]   ;;  %v6953_v52 = vld [vmem:[%s10344_s1 + $0x564] ss:$16 sps:$4 sm:$0xff]  }
  0x70   :  { %3644 = vmatprep.subr.bf16.mxu0 %v6861_v53  ;;  %4013 = vmatprep.subr.bf16.mxu1 %v6864_v54  ;;  %v6956_v53 = vld [vmem:[%s10344_s1 + $0x56c] ss:$16 sps:$4 sm:$0xff]   ;;  %v6951_v54 = vld [vmem:[%s10344_s1 + $0x560] ss:$16 sps:$4 sm:$0xff]  }
  0x73   :  { %3645 = vmatpush1.bf16.msra.mxu0 %v6859_v55  ;;  %4014 = vmatpush1.bf16.msra.mxu1 %v6862_v56  ;;  %v6954_v55 = vld [vmem:[%s10344_s1 + $0x568] ss:$16 sps:$4 sm:$0xff]   ;;  %v6959_v56 = vld [vmem:[%s10344_s1 + $0x584] ss:$16 sps:$4 sm:$0xff]  }
  0x74   :  { %3646 = vmatprep.subr.bf16.mxu0 %v6867_v57  ;;  %4015 = vmatprep.subr.bf16.mxu1 %v6870_v58  ;;  %v6962_v57 = vld [vmem:[%s10344_s1 + $0x58c] ss:$16 sps:$4 sm:$0xff]   ;;  %v6957_v58 = vld [vmem:[%s10344_s1 + $0x580] ss:$16 sps:$4 sm:$0xff]  }
  0x77   :  { %3647 = vmatpush1.bf16.msra.mxu0 %v6865_v59  ;;  %4016 = vmatpush1.bf16.msra.mxu1 %v6868_v60  ;;  %v6960_v59 = vld [vmem:[%s10344_s1 + $0x588] ss:$16 sps:$4 sm:$0xff]   ;;  %v6965_v60 = vld [vmem:[%s10344_s1 + $0x5a4] ss:$16 sps:$4 sm:$0xff]  }
  0x78   :  { %3648 = vmatprep.subr.bf16.mxu0 %v6873_v61  ;;  %4017 = vmatprep.subr.bf16.mxu1 %v6876_v62  ;;  %v6968_v61 = vld [vmem:[%s10344_s1 + $0x5ac] ss:$16 sps:$4 sm:$0xff]   ;;  %v6963_v62 = vld [vmem:[%s10344_s1 + $0x5a0] ss:$16 sps:$4 sm:$0xff]  }
  0x7b   :  { %3649 = vmatpush1.bf16.msra.mxu0 %v6871_v63  ;;  %4018 = vmatpush1.bf16.msra.mxu1 %v6874_v0  ;;  %v6966_v63 = vld [vmem:[%s10344_s1 + $0x5a8] ss:$16 sps:$4 sm:$0xff]   ;;  %v6971_v0 = vld [vmem:[%s10344_s1 + $0x5c4] ss:$16 sps:$4 sm:$0xff]  }
  0x7c   :  { %3650 = vmatprep.subr.bf16.mxu0 %v6879_v1  ;;  %4019 = vmatprep.subr.bf16.mxu1 %v6882_v2  ;;  %v6974_v1 = vld [vmem:[%s10344_s1 + $0x5cc] ss:$16 sps:$4 sm:$0xff]   ;;  %v6969_v2 = vld [vmem:[%s10344_s1 + $0x5c0] ss:$16 sps:$4 sm:$0xff]  }
  0x7f   :  { %3651 = vmatpush1.bf16.msra.mxu0 %v6877_v3  ;;  %4020 = vmatpush1.bf16.msra.mxu1 %v6880_v4  ;;  %v6972_v3 = vld [vmem:[%s10344_s1 + $0x5c8] ss:$16 sps:$4 sm:$0xff]   ;;  %v6977_v4 = vld [vmem:[%s10344_s1 + $0x5e4] ss:$16 sps:$4 sm:$0xff]  }
  0x80   :  { %3661 = vmatprep.subr.bf16.mxu0 %v6887_v5  ;;  %4030 = vmatprep.subr.bf16.mxu1 %v6890_v6  ;;  %v6980_v5 = vld [vmem:[%s10344_s1 + $0x5ec] ss:$16 sps:$4 sm:$0xff]   ;;  %v6975_v6 = vld [vmem:[%s10344_s1 + $0x5e0] ss:$16 sps:$4 sm:$0xff]  }
  0x82   :  { %3653 = vmatmul.mubr.bf16.vlgmr.msra.gmra.mrb[0].mxu0 %v5807_v7  ;;  %4022 = vmatmul.mubr.bf16.vlgmr.msra.gmra.mrb[0].mxu1 %v5807_v7  ;;  %v6978_v7 = vld [vmem:[%s10344_s1 + $0x5e8] ss:$16 sps:$4 sm:$0xff]  }
  0x83   :  { %3662 = vmatpush1.bf16.msra.mxu0 %v6885_v8  ;;  %4031 = vmatpush1.bf16.msra.mxu1 %v6888_v9  ;;  %v6985_v8 = vld [vmem:[%s10344_s1 + $0x604] ss:$16 sps:$4 sm:$0xff]   ;;  %v6988_v9 = vld [vmem:[%s10344_s1 + $0x60c] ss:$16 sps:$4 sm:$0xff]  }
  0x84   :  { %3663 = vmatprep.subr.bf16.mxu0 %v6893_v10  ;;  %4032 = vmatprep.subr.bf16.mxu1 %v6896_v12  ;;  %v6983_v10 = vld [vmem:[%s10344_s1 + $0x600] ss:$16 sps:$4 sm:$0xff]   ;;  %v5809_v12 = vcombine.low %v8320_v11, %v8320_v11  ;;  %v6994_v11 = vld [vmem:[%s10344_s1 + $0x62c] ss:$16 sps:$4 sm:$0xff]  }
  0x85   :  { %3693 = vmatprep.mubr.bf16.mxu0 %v5810_v13  ;;  %4062 = vmatprep.mubr.bf16.mxu1 %v5810_v13  ;;  %v6986_v13 = vld [vmem:[%s10344_s1 + $0x608] ss:$16 sps:$4 sm:$0xff]  }
  0x87   :  { %3664 = vmatpush1.bf16.msra.mxu0 %v6891_v14  ;;  %4033 = vmatpush1.bf16.msra.mxu1 %v6894_v15  ;;  %v8518_v14 = vld [vmem:[%s10345_s0 + $0x18] sm:$0xff]  ;;  %v6991_v15 = vld [vmem:[%s10344_s1 + $0x624] ss:$16 sps:$4 sm:$0xff]  }
  0x88   :  { %3665 = vmatprep.subr.bf16.mxu0 %v6899_v16  ;;  %4034 = vmatprep.subr.bf16.mxu1 %v6902_v17  ;;  %v5812_v16 = vcombine.high %v8518_v14, %v8518_v14  ;;  %v6989_v17 = vld [vmem:[%s10344_s1 + $0x620] ss:$16 sps:$4 sm:$0xff]  }
  0x8b   :  { %3666 = vmatpush1.bf16.msra.mxu0 %v6897_v18  ;;  %4035 = vmatpush1.bf16.msra.mxu1 %v6900_v19  ;;  %v6992_v18 = vld [vmem:[%s10344_s1 + $0x628] ss:$16 sps:$4 sm:$0xff]   ;;  %v6997_v19 = vld [vmem:[%s10344_s1 + $0x644] ss:$16 sps:$4 sm:$0xff]  }
  0x8c   :  { %3667 = vmatprep.subr.bf16.mxu0 %v6905_v20  ;;  %4036 = vmatprep.subr.bf16.mxu1 %v6908_v21  ;;  %v7000_v20 = vld [vmem:[%s10344_s1 + $0x64c] ss:$16 sps:$4 sm:$0xff]   ;;  %v6995_v21 = vld [vmem:[%s10344_s1 + $0x640] ss:$16 sps:$4 sm:$0xff]  }
  0x8f   :  { %3668 = vmatpush1.bf16.msra.mxu0 %v6903_v22  ;;  %4037 = vmatpush1.bf16.msra.mxu1 %v6906_v23  ;;  %v6998_v22 = vld [vmem:[%s10344_s1 + $0x648] ss:$16 sps:$4 sm:$0xff]   ;;  %v7003_v23 = vld [vmem:[%s10344_s1 + $0x664] ss:$16 sps:$4 sm:$0xff]  }
  0x90   :  { %3669 = vmatprep.subr.bf16.mxu0 %v6911_v24  ;;  %4038 = vmatprep.subr.bf16.mxu1 %v6914_v25  ;;  %v7006_v24 = vld [vmem:[%s10344_s1 + $0x66c] ss:$16 sps:$4 sm:$0xff]   ;;  %v7001_v25 = vld [vmem:[%s10344_s1 + $0x660] ss:$16 sps:$4 sm:$0xff]  }
  0x93   :  { %3670 = vmatpush1.bf16.msra.mxu0 %v6909_v26  ;;  %4039 = vmatpush1.bf16.msra.mxu1 %v6912_v27  ;;  %v7004_v26 = vld [vmem:[%s10344_s1 + $0x668] ss:$16 sps:$4 sm:$0xff]   ;;  %v7009_v27 = vld [vmem:[%s10344_s1 + $0x684] ss:$16 sps:$4 sm:$0xff]  }
  0x94   :  { %3671 = vmatprep.subr.bf16.mxu0 %v6917_v28  ;;  %4040 = vmatprep.subr.bf16.mxu1 %v6920_v29  ;;  %v7012_v28 = vld [vmem:[%s10344_s1 + $0x68c] ss:$16 sps:$4 sm:$0xff]   ;;  %v7007_v29 = vld [vmem:[%s10344_s1 + $0x680] ss:$16 sps:$4 sm:$0xff]  }
  0x97   :  { %3672 = vmatpush1.bf16.msra.mxu0 %v6915_v30  ;;  %4041 = vmatpush1.bf16.msra.mxu1 %v6918_v31  ;;  %v7010_v30 = vld [vmem:[%s10344_s1 + $0x688] ss:$16 sps:$4 sm:$0xff]   ;;  %v7015_v31 = vld [vmem:[%s10344_s1 + $0x6a4] ss:$16 sps:$4 sm:$0xff]  }
  0x98   :  { %3673 = vmatprep.subr.bf16.mxu0 %v6923_v32  ;;  %4042 = vmatprep.subr.bf16.mxu1 %v6926_v33  ;;  %v7018_v32 = vld [vmem:[%s10344_s1 + $0x6ac] ss:$16 sps:$4 sm:$0xff]   ;;  %v7013_v33 = vld [vmem:[%s10344_s1 + $0x6a0] ss:$16 sps:$4 sm:$0xff]  }
  0x9b   :  { %3674 = vmatpush1.bf16.msra.mxu0 %v6921_v34  ;;  %4043 = vmatpush1.bf16.msra.mxu1 %v6924_v35  ;;  %v7016_v34 = vld [vmem:[%s10344_s1 + $0x6a8] ss:$16 sps:$4 sm:$0xff]   ;;  %v7021_v35 = vld [vmem:[%s10344_s1 + $0x6c4] ss:$16 sps:$4 sm:$0xff]  }
  0x9c   :  { %3675 = vmatprep.subr.bf16.mxu0 %v6929_v36  ;;  %4044 = vmatprep.subr.bf16.mxu1 %v6932_v37  ;;  %v7024_v36 = vld [vmem:[%s10344_s1 + $0x6cc] ss:$16 sps:$4 sm:$0xff]   ;;  %v7019_v37 = vld [vmem:[%s10344_s1 + $0x6c0] ss:$16 sps:$4 sm:$0xff]  }
  0x9f   :  { %3676 = vmatpush1.bf16.msra.mxu0 %v6927_v38  ;;  %4045 = vmatpush1.bf16.msra.mxu1 %v6930_v39  ;;  %v7022_v38 = vld [vmem:[%s10344_s1 + $0x6c8] ss:$16 sps:$4 sm:$0xff]   ;;  %v7027_v39 = vld [vmem:[%s10344_s1 + $0x6e4] ss:$16 sps:$4 sm:$0xff]  }
  0xa0   :  { %3677 = vmatprep.subr.bf16.mxu0 %v6935_v40  ;;  %4046 = vmatprep.subr.bf16.mxu1 %v6938_v41  ;;  %v7030_v40 = vld [vmem:[%s10344_s1 + $0x6ec] ss:$16 sps:$4 sm:$0xff]   ;;  %v7025_v41 = vld [vmem:[%s10344_s1 + $0x6e0] ss:$16 sps:$4 sm:$0xff]  }
  0xa3   :  { %3678 = vmatpush1.bf16.msra.mxu0 %v6933_v42  ;;  %4047 = vmatpush1.bf16.msra.mxu1 %v6936_v43  ;;  %v7028_v42 = vld [vmem:[%s10344_s1 + $0x6e8] ss:$16 sps:$4 sm:$0xff]   ;;  %v7033_v43 = vld [vmem:[%s10344_s1 + $0x704] ss:$16 sps:$4 sm:$0xff]  }
  0xa4   :  { %3679 = vmatprep.subr.bf16.mxu0 %v6941_v44  ;;  %4048 = vmatprep.subr.bf16.mxu1 %v6944_v45  ;;  %v7036_v44 = vld [vmem:[%s10344_s1 + $0x70c] ss:$16 sps:$4 sm:$0xff]   ;;  %v7031_v45 = vld [vmem:[%s10344_s1 + $0x700] ss:$16 sps:$4 sm:$0xff]  }
  0xa7   :  { %3680 = vmatpush1.bf16.msra.mxu0 %v6939_v46  ;;  %4049 = vmatpush1.bf16.msra.mxu1 %v6942_v47  ;;  %v7034_v46 = vld [vmem:[%s10344_s1 + $0x708] ss:$16 sps:$4 sm:$0xff]   ;;  %v7039_v47 = vld [vmem:[%s10344_s1 + $0x724] ss:$16 sps:$4 sm:$0xff]  }
  0xa8   :  { %3681 = vmatprep.subr.bf16.mxu0 %v6947_v48  ;;  %4050 = vmatprep.subr.bf16.mxu1 %v6950_v49  ;;  %v7042_v48 = vld [vmem:[%s10344_s1 + $0x72c] ss:$16 sps:$4 sm:$0xff]   ;;  %v7037_v49 = vld [vmem:[%s10344_s1 + $0x720] ss:$16 sps:$4 sm:$0xff]  }
  0xab   :  { %3682 = vmatpush1.bf16.msra.mxu0 %v6945_v50  ;;  %4051 = vmatpush1.bf16.msra.mxu1 %v6948_v51  ;;  %v7040_v50 = vld [vmem:[%s10344_s1 + $0x728] ss:$16 sps:$4 sm:$0xff]   ;;  %v7045_v51 = vld [vmem:[%s10344_s1 + $0x744] ss:$16 sps:$4 sm:$0xff]  }
  0xac   :  { %3683 = vmatprep.subr.bf16.mxu0 %v6953_v52  ;;  %4052 = vmatprep.subr.bf16.mxu1 %v6956_v53  ;;  %v7048_v52 = vld [vmem:[%s10344_s1 + $0x74c] ss:$16 sps:$4 sm:$0xff]   ;;  %v7043_v53 = vld [vmem:[%s10344_s1 + $0x740] ss:$16 sps:$4 sm:$0xff]  }
  0xaf   :  { %3684 = vmatpush1.bf16.msra.mxu0 %v6951_v54  ;;  %4053 = vmatpush1.bf16.msra.mxu1 %v6954_v55  ;;  %v7046_v54 = vld [vmem:[%s10344_s1 + $0x748] ss:$16 sps:$4 sm:$0xff]   ;;  %v7051_v55 = vld [vmem:[%s10344_s1 + $0x764] ss:$16 sps:$4 sm:$0xff]  }
  0xb0   :  { %3685 = vmatprep.subr.bf16.mxu0 %v6959_v56  ;;  %4054 = vmatprep.subr.bf16.mxu1 %v6962_v57  ;;  %v7054_v56 = vld [vmem:[%s10344_s1 + $0x76c] ss:$16 sps:$4 sm:$0xff]   ;;  %v7049_v57 = vld [vmem:[%s10344_s1 + $0x760] ss:$16 sps:$4 sm:$0xff]  }
  0xb3   :  { %3686 = vmatpush1.bf16.msra.mxu0 %v6957_v58  ;;  %4055 = vmatpush1.bf16.msra.mxu1 %v6960_v59  ;;  %v7052_v58 = vld [vmem:[%s10344_s1 + $0x768] ss:$16 sps:$4 sm:$0xff]   ;;  %v7057_v59 = vld [vmem:[%s10344_s1 + $0x784] ss:$16 sps:$4 sm:$0xff]  }
  0xb4   :  { %3687 = vmatprep.subr.bf16.mxu0 %v6965_v60  ;;  %4056 = vmatprep.subr.bf16.mxu1 %v6968_v61  ;;  %v7060_v60 = vld [vmem:[%s10344_s1 + $0x78c] ss:$16 sps:$4 sm:$0xff]   ;;  %v7055_v61 = vld [vmem:[%s10344_s1 + $0x780] ss:$16 sps:$4 sm:$0xff]  }
  0xb7   :  { %3688 = vmatpush1.bf16.msra.mxu0 %v6963_v62  ;;  %4057 = vmatpush1.bf16.msra.mxu1 %v6966_v63  ;;  %v7058_v62 = vld [vmem:[%s10344_s1 + $0x788] ss:$16 sps:$4 sm:$0xff]   ;;  %v7063_v63 = vld [vmem:[%s10344_s1 + $0x7a4] ss:$16 sps:$4 sm:$0xff]  }
  0xb8   :  { %3689 = vmatprep.subr.bf16.mxu0 %v6971_v0  ;;  %4058 = vmatprep.subr.bf16.mxu1 %v6974_v1  ;;  %v7066_v0 = vld [vmem:[%s10344_s1 + $0x7ac] ss:$16 sps:$4 sm:$0xff]   ;;  %v7061_v1 = vld [vmem:[%s10344_s1 + $0x7a0] ss:$16 sps:$4 sm:$0xff]  }
  0xbb   :  { %3690 = vmatpush1.bf16.msra.mxu0 %v6969_v2  ;;  %4059 = vmatpush1.bf16.msra.mxu1 %v6972_v3  ;;  %v7064_v2 = vld [vmem:[%s10344_s1 + $0x7a8] ss:$16 sps:$4 sm:$0xff]   ;;  %v7069_v3 = vld [vmem:[%s10344_s1 + $0x7c4] ss:$16 sps:$4 sm:$0xff]  }
  0xbc   :  { %3691 = vmatprep.subr.bf16.mxu0 %v6977_v4  ;;  %4060 = vmatprep.subr.bf16.mxu1 %v6980_v5  ;;  %v7072_v4 = vld [vmem:[%s10344_s1 + $0x7cc] ss:$16 sps:$4 sm:$0xff]   ;;  %v7067_v5 = vld [vmem:[%s10344_s1 + $0x7c0] ss:$16 sps:$4 sm:$0xff]  }
  0xbf   :  { %3692 = vmatpush1.bf16.msra.mxu0 %v6975_v6  ;;  %4061 = vmatpush1.bf16.msra.mxu1 %v6978_v7  ;;  %v7070_v6 = vld [vmem:[%s10344_s1 + $0x7c8] ss:$16 sps:$4 sm:$0xff]   ;;  %v7075_v7 = vld [vmem:[%s10344_s1 + $0x7e4] ss:$16 sps:$4 sm:$0xff]  }
  0xc0   :  { %3702 = vmatprep.subr.bf16.mxu0 %v6985_v8  ;;  %4071 = vmatprep.subr.bf16.mxu1 %v6988_v9  ;;  %v7078_v8 = vld [vmem:[%s10344_s1 + $0x7ec] ss:$16 sps:$4 sm:$0xff]   ;;  %v7073_v9 = vld [vmem:[%s10344_s1 + $0x7e0] ss:$16 sps:$4 sm:$0xff]  }
  0xc2   :  { %3694 = vmatmul.mubr.bf16.vlgmr.msra.gmra.mrb[0].mxu0 %v5809_v12  ;;  %4063 = vmatmul.mubr.bf16.vlgmr.msra.gmra.mrb[0].mxu1 %v5809_v12  ;;  %v7083_v12 = vld [vmem:[%s10344_s1 + $0x804] ss:$16 sps:$4 sm:$0xff]  }
  0xc3   :  { %3703 = vmatpush1.bf16.msra.mxu0 %v6983_v10  ;;  %4072 = vmatpush1.bf16.msra.mxu1 %v6986_v13  ;;  %v7076_v10 = vld [vmem:[%s10344_s1 + $0x7e8] ss:$16 sps:$4 sm:$0xff]   ;;  %v7086_v13 = vld [vmem:[%s10344_s1 + $0x80c] ss:$16 sps:$4 sm:$0xff]  }
  0xc4   :  { %3704 = vmatprep.subr.bf16.mxu0 %v6991_v15  ;;  %4073 = vmatprep.subr.bf16.mxu1 %v6994_v11  ;;  %v7081_v15 = vld [vmem:[%s10344_s1 + $0x800] ss:$16 sps:$4 sm:$0xff]   ;;  %v5811_v11 = vcombine.low %v8518_v14, %v8518_v14  ;;  %v7092_v14 = vld [vmem:[%s10344_s1 + $0x82c] ss:$16 sps:$4 sm:$0xff]  }
  0xc5   :  { %3734 = vmatprep.mubr.bf16.mxu0 %v5812_v16  ;;  %4103 = vmatprep.mubr.bf16.mxu1 %v5812_v16  ;;  %v8716_v16 = vld [vmem:[%s10345_s0 + $0x20] sm:$0xff] }
  0xc7   :  { %3705 = vmatpush1.bf16.msra.mxu0 %v6989_v17  ;;  %4074 = vmatpush1.bf16.msra.mxu1 %v6992_v18  ;;  %v7084_v17 = vld [vmem:[%s10344_s1 + $0x808] ss:$16 sps:$4 sm:$0xff]   ;;  %v7089_v18 = vld [vmem:[%s10344_s1 + $0x824] ss:$16 sps:$4 sm:$0xff]  }
  0xc8   :  { %3706 = vmatprep.subr.bf16.mxu0 %v6997_v19  ;;  %4075 = vmatprep.subr.bf16.mxu1 %v7000_v20  ;;  %v5814_v19 = vcombine.high %v8716_v16, %v8716_v16  ;;  %v7087_v20 = vld [vmem:[%s10344_s1 + $0x820] ss:$16 sps:$4 sm:$0xff]  }
  0xcb   :  { %3707 = vmatpush1.bf16.msra.mxu0 %v6995_v21  ;;  %4076 = vmatpush1.bf16.msra.mxu1 %v6998_v22  ;;  %v7090_v21 = vld [vmem:[%s10344_s1 + $0x828] ss:$16 sps:$4 sm:$0xff]   ;;  %v7095_v22 = vld [vmem:[%s10344_s1 + $0x844] ss:$16 sps:$4 sm:$0xff]  }
  0xcc   :  { %3708 = vmatprep.subr.bf16.mxu0 %v7003_v23  ;;  %4077 = vmatprep.subr.bf16.mxu1 %v7006_v24  ;;  %v7098_v23 = vld [vmem:[%s10344_s1 + $0x84c] ss:$16 sps:$4 sm:$0xff]   ;;  %v7093_v24 = vld [vmem:[%s10344_s1 + $0x840] ss:$16 sps:$4 sm:$0xff]  }
  0xcf   :  { %3709 = vmatpush1.bf16.msra.mxu0 %v7001_v25  ;;  %4078 = vmatpush1.bf16.msra.mxu1 %v7004_v26  ;;  %v7096_v25 = vld [vmem:[%s10344_s1 + $0x848] ss:$16 sps:$4 sm:$0xff]   ;;  %v7101_v26 = vld [vmem:[%s10344_s1 + $0x864] ss:$16 sps:$4 sm:$0xff]  }
  0xd0   :  { %3710 = vmatprep.subr.bf16.mxu0 %v7009_v27  ;;  %4079 = vmatprep.subr.bf16.mxu1 %v7012_v28  ;;  %v7104_v27 = vld [vmem:[%s10344_s1 + $0x86c] ss:$16 sps:$4 sm:$0xff]   ;;  %v7099_v28 = vld [vmem:[%s10344_s1 + $0x860] ss:$16 sps:$4 sm:$0xff]  }
  0xd3   :  { %3711 = vmatpush1.bf16.msra.mxu0 %v7007_v29  ;;  %4080 = vmatpush1.bf16.msra.mxu1 %v7010_v30  ;;  %v7102_v29 = vld [vmem:[%s10344_s1 + $0x868] ss:$16 sps:$4 sm:$0xff]   ;;  %v7107_v30 = vld [vmem:[%s10344_s1 + $0x884] ss:$16 sps:$4 sm:$0xff]  }
  0xd4   :  { %3712 = vmatprep.subr.bf16.mxu0 %v7015_v31  ;;  %4081 = vmatprep.subr.bf16.mxu1 %v7018_v32  ;;  %v7110_v31 = vld [vmem:[%s10344_s1 + $0x88c] ss:$16 sps:$4 sm:$0xff]   ;;  %v7105_v32 = vld [vmem:[%s10344_s1 + $0x880] ss:$16 sps:$4 sm:$0xff]  }
  0xd7   :  { %3713 = vmatpush1.bf16.msra.mxu0 %v7013_v33  ;;  %4082 = vmatpush1.bf16.msra.mxu1 %v7016_v34  ;;  %v7108_v33 = vld [vmem:[%s10344_s1 + $0x888] ss:$16 sps:$4 sm:$0xff]   ;;  %v7113_v34 = vld [vmem:[%s10344_s1 + $0x8a4] ss:$16 sps:$4 sm:$0xff]  }
  0xd8   :  { %3714 = vmatprep.subr.bf16.mxu0 %v7021_v35  ;;  %4083 = vmatprep.subr.bf16.mxu1 %v7024_v36  ;;  %v7116_v35 = vld [vmem:[%s10344_s1 + $0x8ac] ss:$16 sps:$4 sm:$0xff]   ;;  %v7111_v36 = vld [vmem:[%s10344_s1 + $0x8a0] ss:$16 sps:$4 sm:$0xff]  }
  0xdb   :  { %3715 = vmatpush1.bf16.msra.mxu0 %v7019_v37  ;;  %4084 = vmatpush1.bf16.msra.mxu1 %v7022_v38  ;;  %v7114_v37 = vld [vmem:[%s10344_s1 + $0x8a8] ss:$16 sps:$4 sm:$0xff]   ;;  %v7119_v38 = vld [vmem:[%s10344_s1 + $0x8c4] ss:$16 sps:$4 sm:$0xff]  }
  0xdc   :  { %3716 = vmatprep.subr.bf16.mxu0 %v7027_v39  ;;  %4085 = vmatprep.subr.bf16.mxu1 %v7030_v40  ;;  %v7122_v39 = vld [vmem:[%s10344_s1 + $0x8cc] ss:$16 sps:$4 sm:$0xff]   ;;  %v7117_v40 = vld [vmem:[%s10344_s1 + $0x8c0] ss:$16 sps:$4 sm:$0xff]  }
  0xdf   :  { %3717 = vmatpush1.bf16.msra.mxu0 %v7025_v41  ;;  %4086 = vmatpush1.bf16.msra.mxu1 %v7028_v42  ;;  %v7120_v41 = vld [vmem:[%s10344_s1 + $0x8c8] ss:$16 sps:$4 sm:$0xff]   ;;  %v7125_v42 = vld [vmem:[%s10344_s1 + $0x8e4] ss:$16 sps:$4 sm:$0xff]  }
  0xe0   :  { %3718 = vmatprep.subr.bf16.mxu0 %v7033_v43  ;;  %4087 = vmatprep.subr.bf16.mxu1 %v7036_v44  ;;  %v7128_v43 = vld [vmem:[%s10344_s1 + $0x8ec] ss:$16 sps:$4 sm:$0xff]   ;;  %v7123_v44 = vld [vmem:[%s10344_s1 + $0x8e0] ss:$16 sps:$4 sm:$0xff]  }
  0xe3   :  { %3719 = vmatpush1.bf16.msra.mxu0 %v7031_v45  ;;  %4088 = vmatpush1.bf16.msra.mxu1 %v7034_v46  ;;  %v7126_v45 = vld [vmem:[%s10344_s1 + $0x8e8] ss:$16 sps:$4 sm:$0xff]   ;;  %v7131_v46 = vld [vmem:[%s10344_s1 + $0x904] ss:$16 sps:$4 sm:$0xff]  }
  0xe4   :  { %3720 = vmatprep.subr.bf16.mxu0 %v7039_v47  ;;  %4089 = vmatprep.subr.bf16.mxu1 %v7042_v48  ;;  %v7134_v47 = vld [vmem:[%s10344_s1 + $0x90c] ss:$16 sps:$4 sm:$0xff]   ;;  %v7129_v48 = vld [vmem:[%s10344_s1 + $0x900] ss:$16 sps:$4 sm:$0xff]  }
  0xe7   :  { %3721 = vmatpush1.bf16.msra.mxu0 %v7037_v49  ;;  %4090 = vmatpush1.bf16.msra.mxu1 %v7040_v50  ;;  %v7132_v49 = vld [vmem:[%s10344_s1 + $0x908] ss:$16 sps:$4 sm:$0xff]   ;;  %v7137_v50 = vld [vmem:[%s10344_s1 + $0x924] ss:$16 sps:$4 sm:$0xff]  }
  0xe8   :  { %3722 = vmatprep.subr.bf16.mxu0 %v7045_v51  ;;  %4091 = vmatprep.subr.bf16.mxu1 %v7048_v52  ;;  %v7140_v51 = vld [vmem:[%s10344_s1 + $0x92c] ss:$16 sps:$4 sm:$0xff]   ;;  %v7135_v52 = vld [vmem:[%s10344_s1 + $0x920] ss:$16 sps:$4 sm:$0xff]  }
  0xeb   :  { %3723 = vmatpush1.bf16.msra.mxu0 %v7043_v53  ;;  %4092 = vmatpush1.bf16.msra.mxu1 %v7046_v54  ;;  %v7138_v53 = vld [vmem:[%s10344_s1 + $0x928] ss:$16 sps:$4 sm:$0xff]   ;;  %v7143_v54 = vld [vmem:[%s10344_s1 + $0x944] ss:$16 sps:$4 sm:$0xff]  }
  0xec   :  { %3724 = vmatprep.subr.bf16.mxu0 %v7051_v55  ;;  %4093 = vmatprep.subr.bf16.mxu1 %v7054_v56  ;;  %v7146_v55 = vld [vmem:[%s10344_s1 + $0x94c] ss:$16 sps:$4 sm:$0xff]   ;;  %v7141_v56 = vld [vmem:[%s10344_s1 + $0x940] ss:$16 sps:$4 sm:$0xff]  }
  0xef   :  { %3725 = vmatpush1.bf16.msra.mxu0 %v7049_v57  ;;  %4094 = vmatpush1.bf16.msra.mxu1 %v7052_v58  ;;  %v7144_v57 = vld [vmem:[%s10344_s1 + $0x948] ss:$16 sps:$4 sm:$0xff]   ;;  %v7149_v58 = vld [vmem:[%s10344_s1 + $0x964] ss:$16 sps:$4 sm:$0xff]  }
  0xf0   :  { %3726 = vmatprep.subr.bf16.mxu0 %v7057_v59  ;;  %4095 = vmatprep.subr.bf16.mxu1 %v7060_v60  ;;  %v7152_v59 = vld [vmem:[%s10344_s1 + $0x96c] ss:$16 sps:$4 sm:$0xff]   ;;  %v7147_v60 = vld [vmem:[%s10344_s1 + $0x960] ss:$16 sps:$4 sm:$0xff]  }
  0xf3   :  { %3727 = vmatpush1.bf16.msra.mxu0 %v7055_v61  ;;  %4096 = vmatpush1.bf16.msra.mxu1 %v7058_v62  ;;  %v7150_v61 = vld [vmem:[%s10344_s1 + $0x968] ss:$16 sps:$4 sm:$0xff]   ;;  %v7155_v62 = vld [vmem:[%s10344_s1 + $0x984] ss:$16 sps:$4 sm:$0xff]  }
  0xf4   :  { %3728 = vmatprep.subr.bf16.mxu0 %v7063_v63  ;;  %4097 = vmatprep.subr.bf16.mxu1 %v7066_v0  ;;  %v7158_v63 = vld [vmem:[%s10344_s1 + $0x98c] ss:$16 sps:$4 sm:$0xff]   ;;  %v7153_v0 = vld [vmem:[%s10344_s1 + $0x980] ss:$16 sps:$4 sm:$0xff]  }
  0xf7   :  { %3729 = vmatpush1.bf16.msra.mxu0 %v7061_v1  ;;  %4098 = vmatpush1.bf16.msra.mxu1 %v7064_v2  ;;  %v7156_v1 = vld [vmem:[%s10344_s1 + $0x988] ss:$16 sps:$4 sm:$0xff]   ;;  %v7161_v2 = vld [vmem:[%s10344_s1 + $0x9a4] ss:$16 sps:$4 sm:$0xff]  }
  0xf8   :  { %3730 = vmatprep.subr.bf16.mxu0 %v7069_v3  ;;  %4099 = vmatprep.subr.bf16.mxu1 %v7072_v4  ;;  %v7164_v3 = vld [vmem:[%s10344_s1 + $0x9ac] ss:$16 sps:$4 sm:$0xff]   ;;  %v7159_v4 = vld [vmem:[%s10344_s1 + $0x9a0] ss:$16 sps:$4 sm:$0xff]  }
  0xfb   :  { %3731 = vmatpush1.bf16.msra.mxu0 %v7067_v5  ;;  %4100 = vmatpush1.bf16.msra.mxu1 %v7070_v6  ;;  %v7162_v5 = vld [vmem:[%s10344_s1 + $0x9a8] ss:$16 sps:$4 sm:$0xff]   ;;  %v7167_v6 = vld [vmem:[%s10344_s1 + $0x9c4] ss:$16 sps:$4 sm:$0xff]  }
  0xfc   :  { %3732 = vmatprep.subr.bf16.mxu0 %v7075_v7  ;;  %4101 = vmatprep.subr.bf16.mxu1 %v7078_v8  ;;  %v7170_v7 = vld [vmem:[%s10344_s1 + $0x9cc] ss:$16 sps:$4 sm:$0xff]   ;;  %v7165_v8 = vld [vmem:[%s10344_s1 + $0x9c0] ss:$16 sps:$4 sm:$0xff]  }
  0xff   :  { %3733 = vmatpush1.bf16.msra.mxu0 %v7073_v9  ;;  %4102 = vmatpush1.bf16.msra.mxu1 %v7076_v10  ;;  %v7168_v9 = vld [vmem:[%s10344_s1 + $0x9c8] ss:$16 sps:$4 sm:$0xff]   ;;  %v7173_v10 = vld [vmem:[%s10344_s1 + $0x9e4] ss:$16 sps:$4 sm:$0xff]  }
 0x100   :  { %3743 = vmatprep.subr.bf16.mxu0 %v7083_v12  ;;  %4112 = vmatprep.subr.bf16.mxu1 %v7086_v13  ;;  %v7176_v12 = vld [vmem:[%s10344_s1 + $0x9ec] ss:$16 sps:$4 sm:$0xff]   ;;  %v7171_v13 = vld [vmem:[%s10344_s1 + $0x9e0] ss:$16 sps:$4 sm:$0xff]  }
 0x102   :  { %3735 = vmatmul.mubr.bf16.vlgmr.msra.gmra.mrb[0].mxu0 %v5811_v11  ;;  %4104 = vmatmul.mubr.bf16.vlgmr.msra.gmra.mrb[0].mxu1 %v5811_v11  ;;  %v7181_v11 = vld [vmem:[%s10344_s1 + $0xa04] ss:$16 sps:$4 sm:$0xff]  }
 0x103   :  { %3744 = vmatpush1.bf16.msra.mxu0 %v7081_v15  ;;  %4113 = vmatpush1.bf16.msra.mxu1 %v7084_v17  ;;  %v7174_v15 = vld [vmem:[%s10344_s1 + $0x9e8] ss:$16 sps:$4 sm:$0xff]   ;;  %v7184_v17 = vld [vmem:[%s10344_s1 + $0xa0c] ss:$16 sps:$4 sm:$0xff]  }
 0x104   :  { %3745 = vmatprep.subr.bf16.mxu0 %v7089_v18  ;;  %4114 = vmatprep.subr.bf16.mxu1 %v7092_v14  ;;  %v8912_v18 = vld [vmem:[%s10345_s0 + $0x28] sm:$0xff]  ;;  %v5813_v14 = vcombine.low %v8716_v16, %v8716_v16 }
 0x105   :  { %3775 = vmatprep.mubr.bf16.mxu0 %v5814_v19  ;;  %4144 = vmatprep.mubr.bf16.mxu1 %v5814_v19  ;;  %v7179_v19 = vld [vmem:[%s10344_s1 + $0xa00] ss:$16 sps:$4 sm:$0xff]   ;;  %v7190_v16 = vld [vmem:[%s10344_s1 + $0xa2c] ss:$16 sps:$4 sm:$0xff]  }
 0x107   :  { %3746 = vmatpush1.bf16.msra.mxu0 %v7087_v20  ;;  %4115 = vmatpush1.bf16.msra.mxu1 %v7090_v21  ;;  %v7182_v20 = vld [vmem:[%s10344_s1 + $0xa08] ss:$16 sps:$4 sm:$0xff]   ;;  %v7187_v21 = vld [vmem:[%s10344_s1 + $0xa24] ss:$16 sps:$4 sm:$0xff]  }
 0x108   :  { %3747 = vmatprep.subr.bf16.mxu0 %v7095_v22  ;;  %4116 = vmatprep.subr.bf16.mxu1 %v7098_v23  ;;  %v5816_v22 = vcombine.high %v8912_v18, %v8912_v18  ;;  %v7185_v23 = vld [vmem:[%s10344_s1 + $0xa20] ss:$16 sps:$4 sm:$0xff]  }
 0x10b   :  { %3748 = vmatpush1.bf16.msra.mxu0 %v7093_v24  ;;  %4117 = vmatpush1.bf16.msra.mxu1 %v7096_v25  ;;  %v7188_v24 = vld [vmem:[%s10344_s1 + $0xa28] ss:$16 sps:$4 sm:$0xff]   ;;  %v7193_v25 = vld [vmem:[%s10344_s1 + $0xa44] ss:$16 sps:$4 sm:$0xff]  }
 0x10c   :  { %3749 = vmatprep.subr.bf16.mxu0 %v7101_v26  ;;  %4118 = vmatprep.subr.bf16.mxu1 %v7104_v27  ;;  %v7196_v26 = vld [vmem:[%s10344_s1 + $0xa4c] ss:$16 sps:$4 sm:$0xff]   ;;  %v7191_v27 = vld [vmem:[%s10344_s1 + $0xa40] ss:$16 sps:$4 sm:$0xff]  }
 0x10f   :  { %3750 = vmatpush1.bf16.msra.mxu0 %v7099_v28  ;;  %4119 = vmatpush1.bf16.msra.mxu1 %v7102_v29  ;;  %v7194_v28 = vld [vmem:[%s10344_s1 + $0xa48] ss:$16 sps:$4 sm:$0xff]   ;;  %v7199_v29 = vld [vmem:[%s10344_s1 + $0xa64] ss:$16 sps:$4 sm:$0xff]  }
 0x110   :  { %3751 = vmatprep.subr.bf16.mxu0 %v7107_v30  ;;  %4120 = vmatprep.subr.bf16.mxu1 %v7110_v31  ;;  %v7202_v30 = vld [vmem:[%s10344_s1 + $0xa6c] ss:$16 sps:$4 sm:$0xff]   ;;  %v7197_v31 = vld [vmem:[%s10344_s1 + $0xa60] ss:$16 sps:$4 sm:$0xff]  }
 0x113   :  { %3752 = vmatpush1.bf16.msra.mxu0 %v7105_v32  ;;  %4121 = vmatpush1.bf16.msra.mxu1 %v7108_v33  ;;  %v7200_v32 = vld [vmem:[%s10344_s1 + $0xa68] ss:$16 sps:$4 sm:$0xff]   ;;  %v7205_v33 = vld [vmem:[%s10344_s1 + $0xa84] ss:$16 sps:$4 sm:$0xff]  }
 0x114   :  { %3753 = vmatprep.subr.bf16.mxu0 %v7113_v34  ;;  %4122 = vmatprep.subr.bf16.mxu1 %v7116_v35  ;;  %v7208_v34 = vld [vmem:[%s10344_s1 + $0xa8c] ss:$16 sps:$4 sm:$0xff]   ;;  %v7203_v35 = vld [vmem:[%s10344_s1 + $0xa80] ss:$16 sps:$4 sm:$0xff]  }
 0x117   :  { %3754 = vmatpush1.bf16.msra.mxu0 %v7111_v36  ;;  %4123 = vmatpush1.bf16.msra.mxu1 %v7114_v37  ;;  %v7206_v36 = vld [vmem:[%s10344_s1 + $0xa88] ss:$16 sps:$4 sm:$0xff]   ;;  %v7211_v37 = vld [vmem:[%s10344_s1 + $0xaa4] ss:$16 sps:$4 sm:$0xff]  }
 0x118   :  { %3755 = vmatprep.subr.bf16.mxu0 %v7119_v38  ;;  %4124 = vmatprep.subr.bf16.mxu1 %v7122_v39  ;;  %v7214_v38 = vld [vmem:[%s10344_s1 + $0xaac] ss:$16 sps:$4 sm:$0xff]   ;;  %v7209_v39 = vld [vmem:[%s10344_s1 + $0xaa0] ss:$16 sps:$4 sm:$0xff]  }
 0x11b   :  { %3756 = vmatpush1.bf16.msra.mxu0 %v7117_v40  ;;  %4125 = vmatpush1.bf16.msra.mxu1 %v7120_v41  ;;  %v7212_v40 = vld [vmem:[%s10344_s1 + $0xaa8] ss:$16 sps:$4 sm:$0xff]   ;;  %v7217_v41 = vld [vmem:[%s10344_s1 + $0xac4] ss:$16 sps:$4 sm:$0xff]  }
 0x11c   :  { %3757 = vmatprep.subr.bf16.mxu0 %v7125_v42  ;;  %4126 = vmatprep.subr.bf16.mxu1 %v7128_v43  ;;  %v7220_v42 = vld [vmem:[%s10344_s1 + $0xacc] ss:$16 sps:$4 sm:$0xff]   ;;  %v7215_v43 = vld [vmem:[%s10344_s1 + $0xac0] ss:$16 sps:$4 sm:$0xff]  }
 0x11f   :  { %3758 = vmatpush1.bf16.msra.mxu0 %v7123_v44  ;;  %4127 = vmatpush1.bf16.msra.mxu1 %v7126_v45  ;;  %v7218_v44 = vld [vmem:[%s10344_s1 + $0xac8] ss:$16 sps:$4 sm:$0xff]   ;;  %v7223_v45 = vld [vmem:[%s10344_s1 + $0xae4] ss:$16 sps:$4 sm:$0xff]  }
 0x120   :  { %3759 = vmatprep.subr.bf16.mxu0 %v7131_v46  ;;  %4128 = vmatprep.subr.bf16.mxu1 %v7134_v47  ;;  %v7226_v46 = vld [vmem:[%s10344_s1 + $0xaec] ss:$16 sps:$4 sm:$0xff]   ;;  %v7221_v47 = vld [vmem:[%s10344_s1 + $0xae0] ss:$16 sps:$4 sm:$0xff]  }
 0x123   :  { %3760 = vmatpush1.bf16.msra.mxu0 %v7129_v48  ;;  %4129 = vmatpush1.bf16.msra.mxu1 %v7132_v49  ;;  %v7224_v48 = vld [vmem:[%s10344_s1 + $0xae8] ss:$16 sps:$4 sm:$0xff]   ;;  %v7229_v49 = vld [vmem:[%s10344_s1 + $0xb04] ss:$16 sps:$4 sm:$0xff]  }
 0x124   :  { %3761 = vmatprep.subr.bf16.mxu0 %v7137_v50  ;;  %4130 = vmatprep.subr.bf16.mxu1 %v7140_v51  ;;  %v7232_v50 = vld [vmem:[%s10344_s1 + $0xb0c] ss:$16 sps:$4 sm:$0xff]   ;;  %v7227_v51 = vld [vmem:[%s10344_s1 + $0xb00] ss:$16 sps:$4 sm:$0xff]  }
 0x127   :  { %3762 = vmatpush1.bf16.msra.mxu0 %v7135_v52  ;;  %4131 = vmatpush1.bf16.msra.mxu1 %v7138_v53  ;;  %v7230_v52 = vld [vmem:[%s10344_s1 + $0xb08] ss:$16 sps:$4 sm:$0xff]   ;;  %v7235_v53 = vld [vmem:[%s10344_s1 + $0xb24] ss:$16 sps:$4 sm:$0xff]  }
 0x128   :  { %3763 = vmatprep.subr.bf16.mxu0 %v7143_v54  ;;  %4132 = vmatprep.subr.bf16.mxu1 %v7146_v55  ;;  %v7238_v54 = vld [vmem:[%s10344_s1 + $0xb2c] ss:$16 sps:$4 sm:$0xff]   ;;  %v7233_v55 = vld [vmem:[%s10344_s1 + $0xb20] ss:$16 sps:$4 sm:$0xff]  }
 0x12b   :  { %3764 = vmatpush1.bf16.msra.mxu0 %v7141_v56  ;;  %4133 = vmatpush1.bf16.msra.mxu1 %v7144_v57  ;;  %v7236_v56 = vld [vmem:[%s10344_s1 + $0xb28] ss:$16 sps:$4 sm:$0xff]   ;;  %v7241_v57 = vld [vmem:[%s10344_s1 + $0xb44] ss:$16 sps:$4 sm:$0xff]  }
 0x12c   :  { %3765 = vmatprep.subr.bf16.mxu0 %v7149_v58  ;;  %4134 = vmatprep.subr.bf16.mxu1 %v7152_v59  ;;  %v7244_v58 = vld [vmem:[%s10344_s1 + $0xb4c] ss:$16 sps:$4 sm:$0xff]   ;;  %v7239_v59 = vld [vmem:[%s10344_s1 + $0xb40] ss:$16 sps:$4 sm:$0xff]  }
 0x12f   :  { %3766 = vmatpush1.bf16.msra.mxu0 %v7147_v60  ;;  %4135 = vmatpush1.bf16.msra.mxu1 %v7150_v61  ;;  %v7242_v60 = vld [vmem:[%s10344_s1 + $0xb48] ss:$16 sps:$4 sm:$0xff]   ;;  %v7247_v61 = vld [vmem:[%s10344_s1 + $0xb64] ss:$16 sps:$4 sm:$0xff]  }
 0x130   :  { %3767 = vmatprep.subr.bf16.mxu0 %v7155_v62  ;;  %4136 = vmatprep.subr.bf16.mxu1 %v7158_v63  ;;  %v7250_v62 = vld [vmem:[%s10344_s1 + $0xb6c] ss:$16 sps:$4 sm:$0xff]   ;;  %v7245_v63 = vld [vmem:[%s10344_s1 + $0xb60] ss:$16 sps:$4 sm:$0xff]  }
 0x133   :  { %3768 = vmatpush1.bf16.msra.mxu0 %v7153_v0  ;;  %4137 = vmatpush1.bf16.msra.mxu1 %v7156_v1  ;;  %v7248_v0 = vld [vmem:[%s10344_s1 + $0xb68] ss:$16 sps:$4 sm:$0xff]   ;;  %v7253_v1 = vld [vmem:[%s10344_s1 + $0xb84] ss:$16 sps:$4 sm:$0xff]  }
 0x134   :  { %3769 = vmatprep.subr.bf16.mxu0 %v7161_v2  ;;  %4138 = vmatprep.subr.bf16.mxu1 %v7164_v3  ;;  %v7256_v2 = vld [vmem:[%s10344_s1 + $0xb8c] ss:$16 sps:$4 sm:$0xff]   ;;  %v7251_v3 = vld [vmem:[%s10344_s1 + $0xb80] ss:$16 sps:$4 sm:$0xff]  }
 0x137   :  { %3770 = vmatpush1.bf16.msra.mxu0 %v7159_v4  ;;  %4139 = vmatpush1.bf16.msra.mxu1 %v7162_v5  ;;  %v7254_v4 = vld [vmem:[%s10344_s1 + $0xb88] ss:$16 sps:$4 sm:$0xff]   ;;  %v7259_v5 = vld [vmem:[%s10344_s1 + $0xba4] ss:$16 sps:$4 sm:$0xff]  }
 0x138   :  { %3771 = vmatprep.subr.bf16.mxu0 %v7167_v6  ;;  %4140 = vmatprep.subr.bf16.mxu1 %v7170_v7  ;;  %v7262_v6 = vld [vmem:[%s10344_s1 + $0xbac] ss:$16 sps:$4 sm:$0xff]   ;;  %v7257_v7 = vld [vmem:[%s10344_s1 + $0xba0] ss:$16 sps:$4 sm:$0xff]  }
 0x13b   :  { %3772 = vmatpush1.bf16.msra.mxu0 %v7165_v8  ;;  %4141 = vmatpush1.bf16.msra.mxu1 %v7168_v9  ;;  %v7260_v8 = vld [vmem:[%s10344_s1 + $0xba8] ss:$16 sps:$4 sm:$0xff]   ;;  %v7265_v9 = vld [vmem:[%s10344_s1 + $0xbc4] ss:$16 sps:$4 sm:$0xff]  }
 0x13c   :  { %3773 = vmatprep.subr.bf16.mxu0 %v7173_v10  ;;  %4142 = vmatprep.subr.bf16.mxu1 %v7176_v12  ;;  %v7268_v10 = vld [vmem:[%s10344_s1 + $0xbcc] ss:$16 sps:$4 sm:$0xff]   ;;  %v7263_v12 = vld [vmem:[%s10344_s1 + $0xbc0] ss:$16 sps:$4 sm:$0xff]  }
 0x13f   :  { %3774 = vmatpush1.bf16.msra.mxu0 %v7171_v13  ;;  %4143 = vmatpush1.bf16.msra.mxu1 %v7174_v15  ;;  %v7266_v13 = vld [vmem:[%s10344_s1 + $0xbc8] ss:$16 sps:$4 sm:$0xff]   ;;  %v7271_v15 = vld [vmem:[%s10344_s1 + $0xbe4] ss:$16 sps:$4 sm:$0xff]  }
 0x140   :  { %3784 = vmatprep.subr.bf16.mxu0 %v7181_v11  ;;  %4153 = vmatprep.subr.bf16.mxu1 %v7184_v17  ;;  %v7274_v11 = vld [vmem:[%s10344_s1 + $0xbec] ss:$16 sps:$4 sm:$0xff]   ;;  %v7269_v17 = vld [vmem:[%s10344_s1 + $0xbe0] ss:$16 sps:$4 sm:$0xff]  }
 0x142   :  { %3776 = vmatmul.mubr.bf16.vlgmr.msra.gmra.mrb[0].mxu0 %v5813_v14  ;;  %4145 = vmatmul.mubr.bf16.vlgmr.msra.gmra.mrb[0].mxu1 %v5813_v14  ;;  %v7272_v14 = vld [vmem:[%s10344_s1 + $0xbe8] ss:$16 sps:$4 sm:$0xff]  }
 0x143   :  { %3785 = vmatpush1.bf16.msra.mxu0 %v7179_v19  ;;  %4154 = vmatpush1.bf16.msra.mxu1 %v7182_v20  ;;  %v7279_v19 = vld [vmem:[%s10344_s1 + $0xc04] ss:$16 sps:$4 sm:$0xff]   ;;  %v7282_v20 = vld [vmem:[%s10344_s1 + $0xc0c] ss:$16 sps:$4 sm:$0xff]  }
 0x144   :  { %3786 = vmatprep.subr.bf16.mxu0 %v7187_v21  ;;  %4155 = vmatprep.subr.bf16.mxu1 %v7190_v16  ;;  %v5815_v21 = vcombine.low %v8912_v18, %v8912_v18  ;;  %v9115_v16 = vld [vmem:[%s10345_s0 + $0x30] sm:$0xff] }
 0x145   :  { %3816 = vmatprep.mubr.bf16.mxu0 %v5816_v22  ;;  %4185 = vmatprep.mubr.bf16.mxu1 %v5816_v22  ;;  %v7277_v22 = vld [vmem:[%s10344_s1 + $0xc00] ss:$16 sps:$4 sm:$0xff]   ;;  %v7285_v18 = vld [vmem:[%s10344_s1 + $0xc24] ss:$16 sps:$4 sm:$0xff]  }
 0x147   :  { %3787 = vmatpush1.bf16.msra.mxu0 %v7185_v23  ;;  %4156 = vmatpush1.bf16.msra.mxu1 %v7188_v24  ;;  %v7280_v23 = vld [vmem:[%s10344_s1 + $0xc08] ss:$16 sps:$4 sm:$0xff]   ;;  %v7288_v24 = vld [vmem:[%s10344_s1 + $0xc2c] ss:$16 sps:$4 sm:$0xff]  }
 0x148   :  { %3788 = vmatprep.subr.bf16.mxu0 %v7193_v25  ;;  %4157 = vmatprep.subr.bf16.mxu1 %v7196_v26  ;;  %v5818_v25 = vcombine.high %v9115_v16, %v9115_v16  ;;  %v7283_v26 = vld [vmem:[%s10344_s1 + $0xc20] ss:$16 sps:$4 sm:$0xff]  }
 0x14b   :  { %3789 = vmatpush1.bf16.msra.mxu0 %v7191_v27  ;;  %4158 = vmatpush1.bf16.msra.mxu1 %v7194_v28  ;;  %v7286_v27 = vld [vmem:[%s10344_s1 + $0xc28] ss:$16 sps:$4 sm:$0xff]   ;;  %v7291_v28 = vld [vmem:[%s10344_s1 + $0xc44] ss:$16 sps:$4 sm:$0xff]  }
 0x14c   :  { %3790 = vmatprep.subr.bf16.mxu0 %v7199_v29  ;;  %4159 = vmatprep.subr.bf16.mxu1 %v7202_v30  ;;  %v7294_v29 = vld [vmem:[%s10344_s1 + $0xc4c] ss:$16 sps:$4 sm:$0xff]   ;;  %v7289_v30 = vld [vmem:[%s10344_s1 + $0xc40] ss:$16 sps:$4 sm:$0xff]  }
 0x14f   :  { %3791 = vmatpush1.bf16.msra.mxu0 %v7197_v31  ;;  %4160 = vmatpush1.bf16.msra.mxu1 %v7200_v32  ;;  %v7292_v31 = vld [vmem:[%s10344_s1 + $0xc48] ss:$16 sps:$4 sm:$0xff]   ;;  %v7297_v32 = vld [vmem:[%s10344_s1 + $0xc64] ss:$16 sps:$4 sm:$0xff]  }
 0x150   :  { %3792 = vmatprep.subr.bf16.mxu0 %v7205_v33  ;;  %4161 = vmatprep.subr.bf16.mxu1 %v7208_v34  ;;  %v7300_v33 = vld [vmem:[%s10344_s1 + $0xc6c] ss:$16 sps:$4 sm:$0xff]   ;;  %v7295_v34 = vld [vmem:[%s10344_s1 + $0xc60] ss:$16 sps:$4 sm:$0xff]  }
 0x153   :  { %3793 = vmatpush1.bf16.msra.mxu0 %v7203_v35  ;;  %4162 = vmatpush1.bf16.msra.mxu1 %v7206_v36  ;;  %v7298_v35 = vld [vmem:[%s10344_s1 + $0xc68] ss:$16 sps:$4 sm:$0xff]   ;;  %v7303_v36 = vld [vmem:[%s10344_s1 + $0xc84] ss:$16 sps:$4 sm:$0xff]  }
 0x154   :  { %3794 = vmatprep.subr.bf16.mxu0 %v7211_v37  ;;  %4163 = vmatprep.subr.bf16.mxu1 %v7214_v38  ;;  %v7306_v37 = vld [vmem:[%s10344_s1 + $0xc8c] ss:$16 sps:$4 sm:$0xff]   ;;  %v7301_v38 = vld [vmem:[%s10344_s1 + $0xc80] ss:$16 sps:$4 sm:$0xff]  }
 0x157   :  { %3795 = vmatpush1.bf16.msra.mxu0 %v7209_v39  ;;  %4164 = vmatpush1.bf16.msra.mxu1 %v7212_v40  ;;  %v7304_v39 = vld [vmem:[%s10344_s1 + $0xc88] ss:$16 sps:$4 sm:$0xff]   ;;  %v7309_v40 = vld [vmem:[%s10344_s1 + $0xca4] ss:$16 sps:$4 sm:$0xff]  }
 0x158   :  { %3796 = vmatprep.subr.bf16.mxu0 %v7217_v41  ;;  %4165 = vmatprep.subr.bf16.mxu1 %v7220_v42  ;;  %v7312_v41 = vld [vmem:[%s10344_s1 + $0xcac] ss:$16 sps:$4 sm:$0xff]   ;;  %v7307_v42 = vld [vmem:[%s10344_s1 + $0xca0] ss:$16 sps:$4 sm:$0xff]  }
 0x15b   :  { %3797 = vmatpush1.bf16.msra.mxu0 %v7215_v43  ;;  %4166 = vmatpush1.bf16.msra.mxu1 %v7218_v44  ;;  %v7310_v43 = vld [vmem:[%s10344_s1 + $0xca8] ss:$16 sps:$4 sm:$0xff]   ;;  %v7315_v44 = vld [vmem:[%s10344_s1 + $0xcc4] ss:$16 sps:$4 sm:$0xff]  }
 0x15c   :  { %3798 = vmatprep.subr.bf16.mxu0 %v7223_v45  ;;  %4167 = vmatprep.subr.bf16.mxu1 %v7226_v46  ;;  %v7318_v45 = vld [vmem:[%s10344_s1 + $0xccc] ss:$16 sps:$4 sm:$0xff]   ;;  %v7313_v46 = vld [vmem:[%s10344_s1 + $0xcc0] ss:$16 sps:$4 sm:$0xff]  }
 0x15f   :  { %3799 = vmatpush1.bf16.msra.mxu0 %v7221_v47  ;;  %4168 = vmatpush1.bf16.msra.mxu1 %v7224_v48  ;;  %v7316_v47 = vld [vmem:[%s10344_s1 + $0xcc8] ss:$16 sps:$4 sm:$0xff]   ;;  %v7321_v48 = vld [vmem:[%s10344_s1 + $0xce4] ss:$16 sps:$4 sm:$0xff]  }
 0x160   :  { %3800 = vmatprep.subr.bf16.mxu0 %v7229_v49  ;;  %4169 = vmatprep.subr.bf16.mxu1 %v7232_v50  ;;  %v7324_v49 = vld [vmem:[%s10344_s1 + $0xcec] ss:$16 sps:$4 sm:$0xff]   ;;  %v7319_v50 = vld [vmem:[%s10344_s1 + $0xce0] ss:$16 sps:$4 sm:$0xff]  }
 0x163   :  { %3801 = vmatpush1.bf16.msra.mxu0 %v7227_v51  ;;  %4170 = vmatpush1.bf16.msra.mxu1 %v7230_v52  ;;  %v7322_v51 = vld [vmem:[%s10344_s1 + $0xce8] ss:$16 sps:$4 sm:$0xff]   ;;  %v7327_v52 = vld [vmem:[%s10344_s1 + $0xd04] ss:$16 sps:$4 sm:$0xff]  }
 0x164   :  { %3802 = vmatprep.subr.bf16.mxu0 %v7235_v53  ;;  %4171 = vmatprep.subr.bf16.mxu1 %v7238_v54  ;;  %v7330_v53 = vld [vmem:[%s10344_s1 + $0xd0c] ss:$16 sps:$4 sm:$0xff]   ;;  %v7325_v54 = vld [vmem:[%s10344_s1 + $0xd00] ss:$16 sps:$4 sm:$0xff]  }
 0x167   :  { %3803 = vmatpush1.bf16.msra.mxu0 %v7233_v55  ;;  %4172 = vmatpush1.bf16.msra.mxu1 %v7236_v56  ;;  %v7328_v55 = vld [vmem:[%s10344_s1 + $0xd08] ss:$16 sps:$4 sm:$0xff]   ;;  %v7333_v56 = vld [vmem:[%s10344_s1 + $0xd24] ss:$16 sps:$4 sm:$0xff]  }
 0x168   :  { %3804 = vmatprep.subr.bf16.mxu0 %v7241_v57  ;;  %4173 = vmatprep.subr.bf16.mxu1 %v7244_v58  ;;  %v7336_v57 = vld [vmem:[%s10344_s1 + $0xd2c] ss:$16 sps:$4 sm:$0xff]   ;;  %v7331_v58 = vld [vmem:[%s10344_s1 + $0xd20] ss:$16 sps:$4 sm:$0xff]  }
 0x16b   :  { %3805 = vmatpush1.bf16.msra.mxu0 %v7239_v59  ;;  %4174 = vmatpush1.bf16.msra.mxu1 %v7242_v60  ;;  %v7334_v59 = vld [vmem:[%s10344_s1 + $0xd28] ss:$16 sps:$4 sm:$0xff]   ;;  %v7339_v60 = vld [vmem:[%s10344_s1 + $0xd44] ss:$16 sps:$4 sm:$0xff]  }
 0x16c   :  { %3806 = vmatprep.subr.bf16.mxu0 %v7247_v61  ;;  %4175 = vmatprep.subr.bf16.mxu1 %v7250_v62  ;;  %v7342_v61 = vld [vmem:[%s10344_s1 + $0xd4c] ss:$16 sps:$4 sm:$0xff]   ;;  %v7337_v62 = vld [vmem:[%s10344_s1 + $0xd40] ss:$16 sps:$4 sm:$0xff]  }
 0x16f   :  { %3807 = vmatpush1.bf16.msra.mxu0 %v7245_v63  ;;  %4176 = vmatpush1.bf16.msra.mxu1 %v7248_v0  ;;  %v7340_v63 = vld [vmem:[%s10344_s1 + $0xd48] ss:$16 sps:$4 sm:$0xff]   ;;  %v7345_v0 = vld [vmem:[%s10344_s1 + $0xd64] ss:$16 sps:$4 sm:$0xff]  }
 0x170   :  { %3808 = vmatprep.subr.bf16.mxu0 %v7253_v1  ;;  %4177 = vmatprep.subr.bf16.mxu1 %v7256_v2  ;;  %v7348_v1 = vld [vmem:[%s10344_s1 + $0xd6c] ss:$16 sps:$4 sm:$0xff]   ;;  %v7343_v2 = vld [vmem:[%s10344_s1 + $0xd60] ss:$16 sps:$4 sm:$0xff]  }
 0x173   :  { %3809 = vmatpush1.bf16.msra.mxu0 %v7251_v3  ;;  %4178 = vmatpush1.bf16.msra.mxu1 %v7254_v4  ;;  %v7346_v3 = vld [vmem:[%s10344_s1 + $0xd68] ss:$16 sps:$4 sm:$0xff]   ;;  %v7351_v4 = vld [vmem:[%s10344_s1 + $0xd84] ss:$16 sps:$4 sm:$0xff]  }
 0x174   :  { %3810 = vmatprep.subr.bf16.mxu0 %v7259_v5  ;;  %4179 = vmatprep.subr.bf16.mxu1 %v7262_v6  ;;  %v7354_v5 = vld [vmem:[%s10344_s1 + $0xd8c] ss:$16 sps:$4 sm:$0xff]   ;;  %v7349_v6 = vld [vmem:[%s10344_s1 + $0xd80] ss:$16 sps:$4 sm:$0xff]  }
 0x177   :  { %3811 = vmatpush1.bf16.msra.mxu0 %v7257_v7  ;;  %4180 = vmatpush1.bf16.msra.mxu1 %v7260_v8  ;;  %v7352_v7 = vld [vmem:[%s10344_s1 + $0xd88] ss:$16 sps:$4 sm:$0xff]   ;;  %v7357_v8 = vld [vmem:[%s10344_s1 + $0xda4] ss:$16 sps:$4 sm:$0xff]  }
 0x178   :  { %3812 = vmatprep.subr.bf16.mxu0 %v7265_v9  ;;  %4181 = vmatprep.subr.bf16.mxu1 %v7268_v10  ;;  %v7360_v9 = vld [vmem:[%s10344_s1 + $0xdac] ss:$16 sps:$4 sm:$0xff]   ;;  %v7355_v10 = vld [vmem:[%s10344_s1 + $0xda0] ss:$16 sps:$4 sm:$0xff]  }
 0x17b   :  { %3813 = vmatpush1.bf16.msra.mxu0 %v7263_v12  ;;  %4182 = vmatpush1.bf16.msra.mxu1 %v7266_v13  ;;  %v7358_v12 = vld [vmem:[%s10344_s1 + $0xda8] ss:$16 sps:$4 sm:$0xff]   ;;  %v7363_v13 = vld [vmem:[%s10344_s1 + $0xdc4] ss:$16 sps:$4 sm:$0xff]  }
 0x17c   :  { %3814 = vmatprep.subr.bf16.mxu0 %v7271_v15  ;;  %4183 = vmatprep.subr.bf16.mxu1 %v7274_v11  ;;  %v7366_v15 = vld [vmem:[%s10344_s1 + $0xdcc] ss:$16 sps:$4 sm:$0xff]   ;;  %v7361_v11 = vld [vmem:[%s10344_s1 + $0xdc0] ss:$16 sps:$4 sm:$0xff]  }
 0x17f   :  { %3815 = vmatpush1.bf16.msra.mxu0 %v7269_v17  ;;  %4184 = vmatpush1.bf16.msra.mxu1 %v7272_v14  ;;  %v7364_v17 = vld [vmem:[%s10344_s1 + $0xdc8] ss:$16 sps:$4 sm:$0xff]   ;;  %v7369_v14 = vld [vmem:[%s10344_s1 + $0xde4] ss:$16 sps:$4 sm:$0xff]  }
 0x180   :  { %3825 = vmatprep.subr.bf16.mxu0 %v7279_v19  ;;  %4194 = vmatprep.subr.bf16.mxu1 %v7282_v20  ;;  %v7372_v19 = vld [vmem:[%s10344_s1 + $0xdec] ss:$16 sps:$4 sm:$0xff]   ;;  %v7367_v20 = vld [vmem:[%s10344_s1 + $0xde0] ss:$16 sps:$4 sm:$0xff]  }
 0x182   :  { %3817 = vmatmul.mubr.bf16.vlgmr.msra.gmra.mrb[0].mxu0 %v5815_v21  ;;  %4186 = vmatmul.mubr.bf16.vlgmr.msra.gmra.mrb[0].mxu1 %v5815_v21  ;;  %v7370_v21 = vld [vmem:[%s10344_s1 + $0xde8] ss:$16 sps:$4 sm:$0xff]  }
 0x183   :  { %3826 = vmatpush1.bf16.msra.mxu0 %v7277_v22  ;;  %4195 = vmatpush1.bf16.msra.mxu1 %v7280_v23  ;;  %v7377_v22 = vld [vmem:[%s10344_s1 + $0xe04] ss:$16 sps:$4 sm:$0xff]   ;;  %v7380_v23 = vld [vmem:[%s10344_s1 + $0xe0c] ss:$16 sps:$4 sm:$0xff]  }
 0x184   :  { %3827 = vmatprep.subr.bf16.mxu0 %v7285_v18  ;;  %4196 = vmatprep.subr.bf16.mxu1 %v7288_v24  ;;  %v5817_v18 = vcombine.low %v9115_v16, %v9115_v16  ;;  %v9316_v24 = vld [vmem:[%s10345_s0 + $0x38] sm:$0xff]  ;;  %v7383_v16 = vld [vmem:[%s10344_s1 + $0xe24] ss:$16 sps:$4 sm:$0xff]  }
 0x185   :  { %3857 = vmatprep.mubr.bf16.mxu0 %v5818_v25  ;;  %4226 = vmatprep.mubr.bf16.mxu1 %v5818_v25  ;;  %v7375_v25 = vld [vmem:[%s10344_s1 + $0xe00] ss:$16 sps:$4 sm:$0xff]  }
 0x187   :  { %3828 = vmatpush1.bf16.msra.mxu0 %v7283_v26  ;;  %4197 = vmatpush1.bf16.msra.mxu1 %v7286_v27  ;;  %v7378_v26 = vld [vmem:[%s10344_s1 + $0xe08] ss:$16 sps:$4 sm:$0xff]   ;;  %v7386_v27 = vld [vmem:[%s10344_s1 + $0xe2c] ss:$16 sps:$4 sm:$0xff]  }
 0x188   :  { %3829 = vmatprep.subr.bf16.mxu0 %v7291_v28  ;;  %4198 = vmatprep.subr.bf16.mxu1 %v7294_v29  ;;  %v5820_v28 = vcombine.high %v9316_v24, %v9316_v24  ;;  %v7381_v29 = vld [vmem:[%s10344_s1 + $0xe20] ss:$16 sps:$4 sm:$0xff]  }
 0x18b   :  { %3830 = vmatpush1.bf16.msra.mxu0 %v7289_v30  ;;  %4199 = vmatpush1.bf16.msra.mxu1 %v7292_v31  ;;  %v7384_v30 = vld [vmem:[%s10344_s1 + $0xe28] ss:$16 sps:$4 sm:$0xff]   ;;  %v7389_v31 = vld [vmem:[%s10344_s1 + $0xe44] ss:$16 sps:$4 sm:$0xff]  }
 0x18c   :  { %3831 = vmatprep.subr.bf16.mxu0 %v7297_v32  ;;  %4200 = vmatprep.subr.bf16.mxu1 %v7300_v33  ;;  %v7392_v32 = vld [vmem:[%s10344_s1 + $0xe4c] ss:$16 sps:$4 sm:$0xff]   ;;  %v7387_v33 = vld [vmem:[%s10344_s1 + $0xe40] ss:$16 sps:$4 sm:$0xff]  }
 0x18f   :  { %3832 = vmatpush1.bf16.msra.mxu0 %v7295_v34  ;;  %4201 = vmatpush1.bf16.msra.mxu1 %v7298_v35  ;;  %v7390_v34 = vld [vmem:[%s10344_s1 + $0xe48] ss:$16 sps:$4 sm:$0xff]   ;;  %v7395_v35 = vld [vmem:[%s10344_s1 + $0xe64] ss:$16 sps:$4 sm:$0xff]  }
 0x190   :  { %3833 = vmatprep.subr.bf16.mxu0 %v7303_v36  ;;  %4202 = vmatprep.subr.bf16.mxu1 %v7306_v37  ;;  %v7398_v36 = vld [vmem:[%s10344_s1 + $0xe6c] ss:$16 sps:$4 sm:$0xff]   ;;  %v7393_v37 = vld [vmem:[%s10344_s1 + $0xe60] ss:$16 sps:$4 sm:$0xff]  }
 0x193   :  { %3834 = vmatpush1.bf16.msra.mxu0 %v7301_v38  ;;  %4203 = vmatpush1.bf16.msra.mxu1 %v7304_v39  ;;  %v7396_v38 = vld [vmem:[%s10344_s1 + $0xe68] ss:$16 sps:$4 sm:$0xff]   ;;  %v7401_v39 = vld [vmem:[%s10344_s1 + $0xe84] ss:$16 sps:$4 sm:$0xff]  }
 0x194   :  { %3835 = vmatprep.subr.bf16.mxu0 %v7309_v40  ;;  %4204 = vmatprep.subr.bf16.mxu1 %v7312_v41  ;;  %v7404_v40 = vld [vmem:[%s10344_s1 + $0xe8c] ss:$16 sps:$4 sm:$0xff]   ;;  %v7399_v41 = vld [vmem:[%s10344_s1 + $0xe80] ss:$16 sps:$4 sm:$0xff]  }
 0x197   :  { %3836 = vmatpush1.bf16.msra.mxu0 %v7307_v42  ;;  %4205 = vmatpush1.bf16.msra.mxu1 %v7310_v43  ;;  %v7402_v42 = vld [vmem:[%s10344_s1 + $0xe88] ss:$16 sps:$4 sm:$0xff]   ;;  %v7407_v43 = vld [vmem:[%s10344_s1 + $0xea4] ss:$16 sps:$4 sm:$0xff]  }
 0x198   :  { %3837 = vmatprep.subr.bf16.mxu0 %v7315_v44  ;;  %4206 = vmatprep.subr.bf16.mxu1 %v7318_v45  ;;  %v7410_v44 = vld [vmem:[%s10344_s1 + $0xeac] ss:$16 sps:$4 sm:$0xff]   ;;  %v7405_v45 = vld [vmem:[%s10344_s1 + $0xea0] ss:$16 sps:$4 sm:$0xff]  }
 0x19b   :  { %3838 = vmatpush1.bf16.msra.mxu0 %v7313_v46  ;;  %4207 = vmatpush1.bf16.msra.mxu1 %v7316_v47  ;;  %v7408_v46 = vld [vmem:[%s10344_s1 + $0xea8] ss:$16 sps:$4 sm:$0xff]   ;;  %v7413_v47 = vld [vmem:[%s10344_s1 + $0xec4] ss:$16 sps:$4 sm:$0xff]  }
 0x19c   :  { %3839 = vmatprep.subr.bf16.mxu0 %v7321_v48  ;;  %4208 = vmatprep.subr.bf16.mxu1 %v7324_v49  ;;  %v7416_v48 = vld [vmem:[%s10344_s1 + $0xecc] ss:$16 sps:$4 sm:$0xff]   ;;  %v7411_v49 = vld [vmem:[%s10344_s1 + $0xec0] ss:$16 sps:$4 sm:$0xff]  }
 0x19f   :  { %3840 = vmatpush1.bf16.msra.mxu0 %v7319_v50  ;;  %4209 = vmatpush1.bf16.msra.mxu1 %v7322_v51  ;;  %v7414_v50 = vld [vmem:[%s10344_s1 + $0xec8] ss:$16 sps:$4 sm:$0xff]   ;;  %v7419_v51 = vld [vmem:[%s10344_s1 + $0xee4] ss:$16 sps:$4 sm:$0xff]  }
 0x1a0   :  { %3841 = vmatprep.subr.bf16.mxu0 %v7327_v52  ;;  %4210 = vmatprep.subr.bf16.mxu1 %v7330_v53  ;;  %v7422_v52 = vld [vmem:[%s10344_s1 + $0xeec] ss:$16 sps:$4 sm:$0xff]   ;;  %v7417_v53 = vld [vmem:[%s10344_s1 + $0xee0] ss:$16 sps:$4 sm:$0xff]  }
 0x1a3   :  { %3842 = vmatpush1.bf16.msra.mxu0 %v7325_v54  ;;  %4211 = vmatpush1.bf16.msra.mxu1 %v7328_v55  ;;  %v7420_v54 = vld [vmem:[%s10344_s1 + $0xee8] ss:$16 sps:$4 sm:$0xff]   ;;  %v7425_v55 = vld [vmem:[%s10344_s1 + $0xf04] ss:$16 sps:$4 sm:$0xff]  }
 0x1a4   :  { %3843 = vmatprep.subr.bf16.mxu0 %v7333_v56  ;;  %4212 = vmatprep.subr.bf16.mxu1 %v7336_v57  ;;  %v7428_v56 = vld [vmem:[%s10344_s1 + $0xf0c] ss:$16 sps:$4 sm:$0xff]   ;;  %v7423_v57 = vld [vmem:[%s10344_s1 + $0xf00] ss:$16 sps:$4 sm:$0xff]  }
 0x1a7   :  { %3844 = vmatpush1.bf16.msra.mxu0 %v7331_v58  ;;  %4213 = vmatpush1.bf16.msra.mxu1 %v7334_v59  ;;  %v7426_v58 = vld [vmem:[%s10344_s1 + $0xf08] ss:$16 sps:$4 sm:$0xff]   ;;  %v7431_v59 = vld [vmem:[%s10344_s1 + $0xf24] ss:$16 sps:$4 sm:$0xff]  }
 0x1a8   :  { %3845 = vmatprep.subr.bf16.mxu0 %v7339_v60  ;;  %4214 = vmatprep.subr.bf16.mxu1 %v7342_v61  ;;  %v7434_v60 = vld [vmem:[%s10344_s1 + $0xf2c] ss:$16 sps:$4 sm:$0xff]   ;;  %v7429_v61 = vld [vmem:[%s10344_s1 + $0xf20] ss:$16 sps:$4 sm:$0xff]  }
 0x1ab   :  { %3846 = vmatpush1.bf16.msra.mxu0 %v7337_v62  ;;  %4215 = vmatpush1.bf16.msra.mxu1 %v7340_v63  ;;  %v7432_v62 = vld [vmem:[%s10344_s1 + $0xf28] ss:$16 sps:$4 sm:$0xff]   ;;  %v7437_v63 = vld [vmem:[%s10344_s1 + $0xf44] ss:$16 sps:$4 sm:$0xff]  }
 0x1ac   :  { %3847 = vmatprep.subr.bf16.mxu0 %v7345_v0  ;;  %4216 = vmatprep.subr.bf16.mxu1 %v7348_v1  ;;  %v7440_v0 = vld [vmem:[%s10344_s1 + $0xf4c] ss:$16 sps:$4 sm:$0xff]   ;;  %v7435_v1 = vld [vmem:[%s10344_s1 + $0xf40] ss:$16 sps:$4 sm:$0xff]  }
 0x1af   :  { %3848 = vmatpush1.bf16.msra.mxu0 %v7343_v2  ;;  %4217 = vmatpush1.bf16.msra.mxu1 %v7346_v3  ;;  %v7438_v2 = vld [vmem:[%s10344_s1 + $0xf48] ss:$16 sps:$4 sm:$0xff]   ;;  %v7443_v3 = vld [vmem:[%s10344_s1 + $0xf64] ss:$16 sps:$4 sm:$0xff]  }
 0x1b0   :  { %3849 = vmatprep.subr.bf16.mxu0 %v7351_v4  ;;  %4218 = vmatprep.subr.bf16.mxu1 %v7354_v5  ;;  %v7446_v4 = vld [vmem:[%s10344_s1 + $0xf6c] ss:$16 sps:$4 sm:$0xff]   ;;  %v7441_v5 = vld [vmem:[%s10344_s1 + $0xf60] ss:$16 sps:$4 sm:$0xff]  }
 0x1b3   :  { %3850 = vmatpush1.bf16.msra.mxu0 %v7349_v6  ;;  %4219 = vmatpush1.bf16.msra.mxu1 %v7352_v7  ;;  %v7444_v6 = vld [vmem:[%s10344_s1 + $0xf68] ss:$16 sps:$4 sm:$0xff]   ;;  %v7449_v7 = vld [vmem:[%s10344_s1 + $0xf84] ss:$16 sps:$4 sm:$0xff]  }
 0x1b4   :  { %3851 = vmatprep.subr.bf16.mxu0 %v7357_v8  ;;  %4220 = vmatprep.subr.bf16.mxu1 %v7360_v9  ;;  %v7452_v8 = vld [vmem:[%s10344_s1 + $0xf8c] ss:$16 sps:$4 sm:$0xff]   ;;  %v7447_v9 = vld [vmem:[%s10344_s1 + $0xf80] ss:$16 sps:$4 sm:$0xff]  }
 0x1b7   :  { %3852 = vmatpush1.bf16.msra.mxu0 %v7355_v10  ;;  %4221 = vmatpush1.bf16.msra.mxu1 %v7358_v12  ;;  %v7450_v10 = vld [vmem:[%s10344_s1 + $0xf88] ss:$16 sps:$4 sm:$0xff]   ;;  %v7455_v12 = vld [vmem:[%s10344_s1 + $0xfa4] ss:$16 sps:$4 sm:$0xff]  }
 0x1b8   :  { %3853 = vmatprep.subr.bf16.mxu0 %v7363_v13  ;;  %4222 = vmatprep.subr.bf16.mxu1 %v7366_v15  ;;  %v7458_v13 = vld [vmem:[%s10344_s1 + $0xfac] ss:$16 sps:$4 sm:$0xff]   ;;  %v7453_v15 = vld [vmem:[%s10344_s1 + $0xfa0] ss:$16 sps:$4 sm:$0xff]  }
 0x1bb   :  { %3854 = vmatpush1.bf16.msra.mxu0 %v7361_v11  ;;  %4223 = vmatpush1.bf16.msra.mxu1 %v7364_v17  ;;  %v7456_v11 = vld [vmem:[%s10344_s1 + $0xfa8] ss:$16 sps:$4 sm:$0xff]   ;;  %v7461_v17 = vld [vmem:[%s10344_s1 + $0xfc4] ss:$16 sps:$4 sm:$0xff]  }
 0x1bc   :  { %3855 = vmatprep.subr.bf16.mxu0 %v7369_v14  ;;  %4224 = vmatprep.subr.bf16.mxu1 %v7372_v19  ;;  %v7464_v14 = vld [vmem:[%s10344_s1 + $0xfcc] ss:$16 sps:$4 sm:$0xff]   ;;  %v7459_v19 = vld [vmem:[%s10344_s1 + $0xfc0] ss:$16 sps:$4 sm:$0xff]  }
 0x1bf   :  { %3856 = vmatpush1.bf16.msra.mxu0 %v7367_v20  ;;  %4225 = vmatpush1.bf16.msra.mxu1 %v7370_v21  ;;  %v7462_v20 = vld [vmem:[%s10344_s1 + $0xfc8] ss:$16 sps:$4 sm:$0xff]   ;;  %v7467_v21 = vld [vmem:[%s10344_s1 + $0xfe4] ss:$16 sps:$4 sm:$0xff]  }
 0x1c0   :  { %3866 = vmatprep.subr.bf16.mxu0 %v7377_v22  ;;  %4235 = vmatprep.subr.bf16.mxu1 %v7380_v23  ;;  %v7470_v22 = vld [vmem:[%s10344_s1 + $0xfec] ss:$16 sps:$4 sm:$0xff]   ;;  %v7465_v23 = vld [vmem:[%s10344_s1 + $0xfe0] ss:$16 sps:$4 sm:$0xff]  }
 0x1c2   :  { %3858 = vmatmul.mubr.bf16.vlgmr.msra.gmra.mrb[0].mxu0 %v5817_v18  ;;  %4227 = vmatmul.mubr.bf16.vlgmr.msra.gmra.mrb[0].mxu1 %v5817_v18  ;;  %v7468_v18 = vld [vmem:[%s10344_s1 + $0xfe8] ss:$16 sps:$4 sm:$0xff]  }
 0x1c3   :  { %3867 = vmatpush1.bf16.msra.mxu0 %v7375_v25  ;;  %4236 = vmatpush1.bf16.msra.mxu1 %v7378_v26  ;;  %v7475_v25 = vld [vmem:[%s10344_s1 + $0x1004] ss:$16 sps:$4 sm:$0xff]   ;;  %v7478_v26 = vld [vmem:[%s10344_s1 + $0x100c] ss:$16 sps:$4 sm:$0xff]  }
 0x1c4   :  { %3868 = vmatprep.subr.bf16.mxu0 %v7383_v16  ;;  %4237 = vmatprep.subr.bf16.mxu1 %v7386_v27  ;;  %v9515_v16 = vld [vmem:[%s10345_s0 + $0x40] sm:$0xff] }
 0x1c5   :  { %3898 = vmatprep.mubr.bf16.mxu0 %v5820_v28  ;;  %4267 = vmatprep.mubr.bf16.mxu1 %v5820_v28  ;;  %v7473_v27 = vld [vmem:[%s10344_s1 + $0x1000] ss:$16 sps:$4 sm:$0xff]   ;;  %v7476_v28 = vld [vmem:[%s10344_s1 + $0x1008] ss:$16 sps:$4 sm:$0xff]  }
 0x1c7   :  { %3869 = vmatpush1.bf16.msra.mxu0 %v7381_v29  ;;  %4238 = vmatpush1.bf16.msra.mxu1 %v7384_v30  ;;  %v5819_v29 = vcombine.low %v9316_v24, %v9316_v24  ;;  %v7481_v30 = vld [vmem:[%s10344_s1 + $0x1024] ss:$16 sps:$4 sm:$0xff]   ;;  %v7479_v24 = vld [vmem:[%s10344_s1 + $0x1020] ss:$16 sps:$4 sm:$0xff]  }
 0x1c8   :  { %3870 = vmatprep.subr.bf16.mxu0 %v7389_v31  ;;  %4239 = vmatprep.subr.bf16.mxu1 %v7392_v32  ;;  %v7484_v31 = vld [vmem:[%s10344_s1 + $0x102c] ss:$16 sps:$4 sm:$0xff]   ;;  %v5822_v32 = vcombine.high %v9515_v16, %v9515_v16 }
 0x1cb   :  { %3871 = vmatpush1.bf16.msra.mxu0 %v7387_v33  ;;  %4240 = vmatpush1.bf16.msra.mxu1 %v7390_v34  ;;  %v7482_v33 = vld [vmem:[%s10344_s1 + $0x1028] ss:$16 sps:$4 sm:$0xff]   ;;  %v7487_v34 = vld [vmem:[%s10344_s1 + $0x1044] ss:$16 sps:$4 sm:$0xff]  }
 0x1cc   :  { %3872 = vmatprep.subr.bf16.mxu0 %v7395_v35  ;;  %4241 = vmatprep.subr.bf16.mxu1 %v7398_v36  ;;  %v7490_v35 = vld [vmem:[%s10344_s1 + $0x104c] ss:$16 sps:$4 sm:$0xff]   ;;  %v7485_v36 = vld [vmem:[%s10344_s1 + $0x1040] ss:$16 sps:$4 sm:$0xff]  }
 0x1cf   :  { %3873 = vmatpush1.bf16.msra.mxu0 %v7393_v37  ;;  %4242 = vmatpush1.bf16.msra.mxu1 %v7396_v38  ;;  %v7488_v37 = vld [vmem:[%s10344_s1 + $0x1048] ss:$16 sps:$4 sm:$0xff]   ;;  %v7493_v38 = vld [vmem:[%s10344_s1 + $0x1064] ss:$16 sps:$4 sm:$0xff]  }
 0x1d0   :  { %3874 = vmatprep.subr.bf16.mxu0 %v7401_v39  ;;  %4243 = vmatprep.subr.bf16.mxu1 %v7404_v40  ;;  %v7496_v39 = vld [vmem:[%s10344_s1 + $0x106c] ss:$16 sps:$4 sm:$0xff]   ;;  %v7491_v40 = vld [vmem:[%s10344_s1 + $0x1060] ss:$16 sps:$4 sm:$0xff]  }
 0x1d3   :  { %3875 = vmatpush1.bf16.msra.mxu0 %v7399_v41  ;;  %4244 = vmatpush1.bf16.msra.mxu1 %v7402_v42  ;;  %v7494_v41 = vld [vmem:[%s10344_s1 + $0x1068] ss:$16 sps:$4 sm:$0xff]   ;;  %v7499_v42 = vld [vmem:[%s10344_s1 + $0x1084] ss:$16 sps:$4 sm:$0xff]  }
 0x1d4   :  { %3876 = vmatprep.subr.bf16.mxu0 %v7407_v43  ;;  %4245 = vmatprep.subr.bf16.mxu1 %v7410_v44  ;;  %v7502_v43 = vld [vmem:[%s10344_s1 + $0x108c] ss:$16 sps:$4 sm:$0xff]   ;;  %v7497_v44 = vld [vmem:[%s10344_s1 + $0x1080] ss:$16 sps:$4 sm:$0xff]  }
 0x1d7   :  { %3877 = vmatpush1.bf16.msra.mxu0 %v7405_v45  ;;  %4246 = vmatpush1.bf16.msra.mxu1 %v7408_v46  ;;  %v7500_v45 = vld [vmem:[%s10344_s1 + $0x1088] ss:$16 sps:$4 sm:$0xff]   ;;  %v7505_v46 = vld [vmem:[%s10344_s1 + $0x10a4] ss:$16 sps:$4 sm:$0xff]  }
 0x1d8   :  { %3878 = vmatprep.subr.bf16.mxu0 %v7413_v47  ;;  %4247 = vmatprep.subr.bf16.mxu1 %v7416_v48  ;;  %v7508_v47 = vld [vmem:[%s10344_s1 + $0x10ac] ss:$16 sps:$4 sm:$0xff]   ;;  %v7503_v48 = vld [vmem:[%s10344_s1 + $0x10a0] ss:$16 sps:$4 sm:$0xff]  }
 0x1db   :  { %3879 = vmatpush1.bf16.msra.mxu0 %v7411_v49  ;;  %4248 = vmatpush1.bf16.msra.mxu1 %v7414_v50  ;;  %v7506_v49 = vld [vmem:[%s10344_s1 + $0x10a8] ss:$16 sps:$4 sm:$0xff]   ;;  %v7511_v50 = vld [vmem:[%s10344_s1 + $0x10c4] ss:$16 sps:$4 sm:$0xff]  }
 0x1dc   :  { %3880 = vmatprep.subr.bf16.mxu0 %v7419_v51  ;;  %4249 = vmatprep.subr.bf16.mxu1 %v7422_v52  ;;  %v7514_v51 = vld [vmem:[%s10344_s1 + $0x10cc] ss:$16 sps:$4 sm:$0xff]   ;;  %v7509_v52 = vld [vmem:[%s10344_s1 + $0x10c0] ss:$16 sps:$4 sm:$0xff]  }
 0x1df   :  { %3881 = vmatpush1.bf16.msra.mxu0 %v7417_v53  ;;  %4250 = vmatpush1.bf16.msra.mxu1 %v7420_v54  ;;  %v7512_v53 = vld [vmem:[%s10344_s1 + $0x10c8] ss:$16 sps:$4 sm:$0xff]   ;;  %v7517_v54 = vld [vmem:[%s10344_s1 + $0x10e4] ss:$16 sps:$4 sm:$0xff]  }
 0x1e0   :  { %3882 = vmatprep.subr.bf16.mxu0 %v7425_v55  ;;  %4251 = vmatprep.subr.bf16.mxu1 %v7428_v56  ;;  %v7520_v55 = vld [vmem:[%s10344_s1 + $0x10ec] ss:$16 sps:$4 sm:$0xff]   ;;  %v7515_v56 = vld [vmem:[%s10344_s1 + $0x10e0] ss:$16 sps:$4 sm:$0xff]  }
 0x1e3   :  { %3883 = vmatpush1.bf16.msra.mxu0 %v7423_v57  ;;  %4252 = vmatpush1.bf16.msra.mxu1 %v7426_v58  ;;  %v7518_v57 = vld [vmem:[%s10344_s1 + $0x10e8] ss:$16 sps:$4 sm:$0xff]   ;;  %v7523_v58 = vld [vmem:[%s10344_s1 + $0x1104] ss:$16 sps:$4 sm:$0xff]  }
 0x1e4   :  { %3884 = vmatprep.subr.bf16.mxu0 %v7431_v59  ;;  %4253 = vmatprep.subr.bf16.mxu1 %v7434_v60  ;;  %v7526_v59 = vld [vmem:[%s10344_s1 + $0x110c] ss:$16 sps:$4 sm:$0xff]   ;;  %v7521_v60 = vld [vmem:[%s10344_s1 + $0x1100] ss:$16 sps:$4 sm:$0xff]  }
 0x1e7   :  { %3885 = vmatpush1.bf16.msra.mxu0 %v7429_v61  ;;  %4254 = vmatpush1.bf16.msra.mxu1 %v7432_v62  ;;  %v7524_v61 = vld [vmem:[%s10344_s1 + $0x1108] ss:$16 sps:$4 sm:$0xff]   ;;  %v7529_v62 = vld [vmem:[%s10344_s1 + $0x1124] ss:$16 sps:$4 sm:$0xff]  }
 0x1e8   :  { %3886 = vmatprep.subr.bf16.mxu0 %v7437_v63  ;;  %4255 = vmatprep.subr.bf16.mxu1 %v7440_v0  ;;  %v7532_v63 = vld [vmem:[%s10344_s1 + $0x112c] ss:$16 sps:$4 sm:$0xff]   ;;  %v7527_v0 = vld [vmem:[%s10344_s1 + $0x1120] ss:$16 sps:$4 sm:$0xff]  }
 0x1eb   :  { %3887 = vmatpush1.bf16.msra.mxu0 %v7435_v1  ;;  %4256 = vmatpush1.bf16.msra.mxu1 %v7438_v2  ;;  %v7530_v1 = vld [vmem:[%s10344_s1 + $0x1128] ss:$16 sps:$4 sm:$0xff]   ;;  %v7535_v2 = vld [vmem:[%s10344_s1 + $0x1144] ss:$16 sps:$4 sm:$0xff]  }
 0x1ec   :  { %3888 = vmatprep.subr.bf16.mxu0 %v7443_v3  ;;  %4257 = vmatprep.subr.bf16.mxu1 %v7446_v4  ;;  %v7538_v3 = vld [vmem:[%s10344_s1 + $0x114c] ss:$16 sps:$4 sm:$0xff]   ;;  %v7533_v4 = vld [vmem:[%s10344_s1 + $0x1140] ss:$16 sps:$4 sm:$0xff]  }
 0x1ef   :  { %3889 = vmatpush1.bf16.msra.mxu0 %v7441_v5  ;;  %4258 = vmatpush1.bf16.msra.mxu1 %v7444_v6  ;;  %v7536_v5 = vld [vmem:[%s10344_s1 + $0x1148] ss:$16 sps:$4 sm:$0xff]   ;;  %v7541_v6 = vld [vmem:[%s10344_s1 + $0x1164] ss:$16 sps:$4 sm:$0xff]  }
 0x1f0   :  { %3890 = vmatprep.subr.bf16.mxu0 %v7449_v7  ;;  %4259 = vmatprep.subr.bf16.mxu1 %v7452_v8  ;;  %v7544_v7 = vld [vmem:[%s10344_s1 + $0x116c] ss:$16 sps:$4 sm:$0xff]   ;;  %v7539_v8 = vld [vmem:[%s10344_s1 + $0x1160] ss:$16 sps:$4 sm:$0xff]  }
 0x1f3   :  { %3891 = vmatpush1.bf16.msra.mxu0 %v7447_v9  ;;  %4260 = vmatpush1.bf16.msra.mxu1 %v7450_v10  ;;  %v7542_v9 = vld [vmem:[%s10344_s1 + $0x1168] ss:$16 sps:$4 sm:$0xff]   ;;  %v7547_v10 = vld [vmem:[%s10344_s1 + $0x1184] ss:$16 sps:$4 sm:$0xff]  }
 0x1f4   :  { %3892 = vmatprep.subr.bf16.mxu0 %v7455_v12  ;;  %4261 = vmatprep.subr.bf16.mxu1 %v7458_v13  ;;  %v7550_v12 = vld [vmem:[%s10344_s1 + $0x118c] ss:$16 sps:$4 sm:$0xff]   ;;  %v7545_v13 = vld [vmem:[%s10344_s1 + $0x1180] ss:$16 sps:$4 sm:$0xff]  }
 0x1f7   :  { %3893 = vmatpush1.bf16.msra.mxu0 %v7453_v15  ;;  %4262 = vmatpush1.bf16.msra.mxu1 %v7456_v11  ;;  %v7548_v15 = vld [vmem:[%s10344_s1 + $0x1188] ss:$16 sps:$4 sm:$0xff]   ;;  %v7553_v11 = vld [vmem:[%s10344_s1 + $0x11a4] ss:$16 sps:$4 sm:$0xff]  }
 0x1f8   :  { %3894 = vmatprep.subr.bf16.mxu0 %v7461_v17  ;;  %4263 = vmatprep.subr.bf16.mxu1 %v7464_v14  ;;  %v7556_v17 = vld [vmem:[%s10344_s1 + $0x11ac] ss:$16 sps:$4 sm:$0xff]   ;;  %v7551_v14 = vld [vmem:[%s10344_s1 + $0x11a0] ss:$16 sps:$4 sm:$0xff]  }
 0x1fb   :  { %3895 = vmatpush1.bf16.msra.mxu0 %v7459_v19  ;;  %4264 = vmatpush1.bf16.msra.mxu1 %v7462_v20  ;;  %v7554_v19 = vld [vmem:[%s10344_s1 + $0x11a8] ss:$16 sps:$4 sm:$0xff]   ;;  %v7559_v20 = vld [vmem:[%s10344_s1 + $0x11c4] ss:$16 sps:$4 sm:$0xff]  }
 0x1fc   :  { %3896 = vmatprep.subr.bf16.mxu0 %v7467_v21  ;;  %4265 = vmatprep.subr.bf16.mxu1 %v7470_v22  ;;  %v7562_v21 = vld [vmem:[%s10344_s1 + $0x11cc] ss:$16 sps:$4 sm:$0xff]   ;;  %v7557_v22 = vld [vmem:[%s10344_s1 + $0x11c0] ss:$16 sps:$4 sm:$0xff]  }
 0x1ff   :  { %3897 = vmatpush1.bf16.msra.mxu0 %v7465_v23  ;;  %4266 = vmatpush1.bf16.msra.mxu1 %v7468_v18  ;;  %v7560_v23 = vld [vmem:[%s10344_s1 + $0x11c8] ss:$16 sps:$4 sm:$0xff]   ;;  %v7565_v18 = vld [vmem:[%s10344_s1 + $0x11e4] ss:$16 sps:$4 sm:$0xff]  }
 0x200   :  { %3907 = vmatprep.subr.bf16.mxu0 %v7475_v25  ;;  %4276 = vmatprep.subr.bf16.mxu1 %v7478_v26  ;;  %v7568_v25 = vld [vmem:[%s10344_s1 + $0x11ec] ss:$16 sps:$4 sm:$0xff]   ;;  %v7563_v26 = vld [vmem:[%s10344_s1 + $0x11e0] ss:$16 sps:$4 sm:$0xff]  }
 0x202   :  { %3899 = vmatmul.mubr.bf16.vlgmr.msra.gmra.mrb[0].mxu0 %v5819_v29  ;;  %4268 = vmatmul.mubr.bf16.vlgmr.msra.gmra.mrb[0].mxu1 %v5819_v29  ;;  %v7576_v29 = vld [vmem:[%s10346_s3 + $0xc] ss:$16 sps:$4 sm:$0xff]  }
 0x203   :  { %3908 = vmatpush1.bf16.msra.mxu0 %v7473_v27  ;;  %4277 = vmatpush1.bf16.msra.mxu1 %v7476_v28  ;;  %v7566_v27 = vld [vmem:[%s10344_s1 + $0x11e8] ss:$16 sps:$4 sm:$0xff]   ;;  %v7573_v28 = vld [vmem:[%s10346_s3 + $0x4] ss:$16 sps:$4 sm:$0xff]  }
 0x204   :  { %3909 = vmatprep.subr.bf16.mxu0 %v7481_v30  ;;  %4278 = vmatprep.subr.bf16.mxu1 %v7484_v31  ;;  %v5821_v30 = vcombine.low %v9515_v16, %v9515_v16  ;;  %v7571_v31 = vld [vmem:[%s10346_s3] ss:$16 sps:$4 sm:$0xff]   ;;  %v7582_v16 = vld [vmem:[%s10346_s3 + $0x2c] ss:$16 sps:$4 sm:$0xff]  }
 0x205   :  { %3939 = vmatprep.mubr.bf16.mxu0 %v5822_v32  ;;  %4308 = vmatprep.mubr.bf16.mxu1 %v5822_v32  ;;  %v7574_v32 = vld [vmem:[%s10346_s3 + $0x8] ss:$16 sps:$4 sm:$0xff]  }
 0x207   :  { %3910 = vmatpush1.bf16.msra.mxu0 %v7479_v24  ;;  %4279 = vmatpush1.bf16.msra.mxu1 %v7482_v33  ;;  %v7579_v24 = vld [vmem:[%s10346_s3 + $0x24] ss:$16 sps:$4 sm:$0xff]   ;;  %v7577_v33 = vld [vmem:[%s10346_s3 + $0x20] ss:$16 sps:$4 sm:$0xff]  }
 0x208   :  { %3911 = vmatprep.subr.bf16.mxu0 %v7487_v34  ;;  %4280 = vmatprep.subr.bf16.mxu1 %v7490_v35  ;;  %v7580_v34 = vld [vmem:[%s10346_s3 + $0x28] ss:$16 sps:$4 sm:$0xff]   ;;  %v7585_v35 = vld [vmem:[%s10346_s3 + $0x44] ss:$16 sps:$4 sm:$0xff]  }
 0x20b   :  { %3912 = vmatpush1.bf16.msra.mxu0 %v7485_v36  ;;  %4281 = vmatpush1.bf16.msra.mxu1 %v7488_v37  ;;  %v7588_v36 = vld [vmem:[%s10346_s3 + $0x4c] ss:$16 sps:$4 sm:$0xff]   ;;  %v7583_v37 = vld [vmem:[%s10346_s3 + $0x40] ss:$16 sps:$4 sm:$0xff]  }
 0x20c   :  { %3913 = vmatprep.subr.bf16.mxu0 %v7493_v38  ;;  %4282 = vmatprep.subr.bf16.mxu1 %v7496_v39  ;;  %v7586_v38 = vld [vmem:[%s10346_s3 + $0x48] ss:$16 sps:$4 sm:$0xff]   ;;  %v7591_v39 = vld [vmem:[%s10346_s3 + $0x64] ss:$16 sps:$4 sm:$0xff]  }
 0x20f   :  { %3914 = vmatpush1.bf16.msra.mxu0 %v7491_v40  ;;  %4283 = vmatpush1.bf16.msra.mxu1 %v7494_v41  ;;  %v7594_v40 = vld [vmem:[%s10346_s3 + $0x6c] ss:$16 sps:$4 sm:$0xff]   ;;  %v7589_v41 = vld [vmem:[%s10346_s3 + $0x60] ss:$16 sps:$4 sm:$0xff]  }
 0x210   :  { %3915 = vmatprep.subr.bf16.mxu0 %v7499_v42  ;;  %4284 = vmatprep.subr.bf16.mxu1 %v7502_v43  ;;  %v7592_v42 = vld [vmem:[%s10346_s3 + $0x68] ss:$16 sps:$4 sm:$0xff]   ;;  %v7597_v43 = vld [vmem:[%s10346_s3 + $0x84] ss:$16 sps:$4 sm:$0xff]  }
 0x213   :  { %3916 = vmatpush1.bf16.msra.mxu0 %v7497_v44  ;;  %4285 = vmatpush1.bf16.msra.mxu1 %v7500_v45  ;;  %v7600_v44 = vld [vmem:[%s10346_s3 + $0x8c] ss:$16 sps:$4 sm:$0xff]   ;;  %v7595_v45 = vld [vmem:[%s10346_s3 + $0x80] ss:$16 sps:$4 sm:$0xff]  }
 0x214   :  { %3917 = vmatprep.subr.bf16.mxu0 %v7505_v46  ;;  %4286 = vmatprep.subr.bf16.mxu1 %v7508_v47  ;;  %v7598_v46 = vld [vmem:[%s10346_s3 + $0x88] ss:$16 sps:$4 sm:$0xff]   ;;  %v7603_v47 = vld [vmem:[%s10346_s3 + $0xa4] ss:$16 sps:$4 sm:$0xff]  }
 0x217   :  { %3918 = vmatpush1.bf16.msra.mxu0 %v7503_v48  ;;  %4287 = vmatpush1.bf16.msra.mxu1 %v7506_v49  ;;  %v7606_v48 = vld [vmem:[%s10346_s3 + $0xac] ss:$16 sps:$4 sm:$0xff]   ;;  %v7601_v49 = vld [vmem:[%s10346_s3 + $0xa0] ss:$16 sps:$4 sm:$0xff]  }
 0x218   :  { %3919 = vmatprep.subr.bf16.mxu0 %v7511_v50  ;;  %4288 = vmatprep.subr.bf16.mxu1 %v7514_v51  ;;  %v7604_v50 = vld [vmem:[%s10346_s3 + $0xa8] ss:$16 sps:$4 sm:$0xff]   ;;  %v7609_v51 = vld [vmem:[%s10346_s3 + $0xc4] ss:$16 sps:$4 sm:$0xff]  }
 0x21b   :  { %3920 = vmatpush1.bf16.msra.mxu0 %v7509_v52  ;;  %4289 = vmatpush1.bf16.msra.mxu1 %v7512_v53  ;;  %v7612_v52 = vld [vmem:[%s10346_s3 + $0xcc] ss:$16 sps:$4 sm:$0xff]   ;;  %v7607_v53 = vld [vmem:[%s10346_s3 + $0xc0] ss:$16 sps:$4 sm:$0xff]  }
 0x21c   :  { %3921 = vmatprep.subr.bf16.mxu0 %v7517_v54  ;;  %4290 = vmatprep.subr.bf16.mxu1 %v7520_v55  ;;  %v7610_v54 = vld [vmem:[%s10346_s3 + $0xc8] ss:$16 sps:$4 sm:$0xff]   ;;  %v7615_v55 = vld [vmem:[%s10346_s3 + $0xe4] ss:$16 sps:$4 sm:$0xff]  }
 0x21f   :  { %3922 = vmatpush1.bf16.msra.mxu0 %v7515_v56  ;;  %4291 = vmatpush1.bf16.msra.mxu1 %v7518_v57  ;;  %v7618_v56 = vld [vmem:[%s10346_s3 + $0xec] ss:$16 sps:$4 sm:$0xff]   ;;  %v7613_v57 = vld [vmem:[%s10346_s3 + $0xe0] ss:$16 sps:$4 sm:$0xff]  }
 0x220   :  { %3923 = vmatprep.subr.bf16.mxu0 %v7523_v58  ;;  %4292 = vmatprep.subr.bf16.mxu1 %v7526_v59  ;;  %v7616_v58 = vld [vmem:[%s10346_s3 + $0xe8] ss:$16 sps:$4 sm:$0xff]   ;;  %v7621_v59 = vld [vmem:[%s10346_s3 + $0x104] ss:$16 sps:$4 sm:$0xff]  }
 0x223   :  { %3924 = vmatpush1.bf16.msra.mxu0 %v7521_v60  ;;  %4293 = vmatpush1.bf16.msra.mxu1 %v7524_v61  ;;  %v7624_v60 = vld [vmem:[%s10346_s3 + $0x10c] ss:$16 sps:$4 sm:$0xff]   ;;  %v7619_v61 = vld [vmem:[%s10346_s3 + $0x100] ss:$16 sps:$4 sm:$0xff]  }
 0x224   :  { %3925 = vmatprep.subr.bf16.mxu0 %v7529_v62  ;;  %4294 = vmatprep.subr.bf16.mxu1 %v7532_v63  ;;  %v7622_v62 = vld [vmem:[%s10346_s3 + $0x108] ss:$16 sps:$4 sm:$0xff]   ;;  %v7627_v63 = vld [vmem:[%s10346_s3 + $0x124] ss:$16 sps:$4 sm:$0xff]  }
 0x227   :  { %3926 = vmatpush1.bf16.msra.mxu0 %v7527_v0  ;;  %4295 = vmatpush1.bf16.msra.mxu1 %v7530_v1  ;;  %v7630_v0 = vld [vmem:[%s10346_s3 + $0x12c] ss:$16 sps:$4 sm:$0xff]   ;;  %v7625_v1 = vld [vmem:[%s10346_s3 + $0x120] ss:$16 sps:$4 sm:$0xff]  }
 0x228   :  { %3927 = vmatprep.subr.bf16.mxu0 %v7535_v2  ;;  %4296 = vmatprep.subr.bf16.mxu1 %v7538_v3  ;;  %v7628_v2 = vld [vmem:[%s10346_s3 + $0x128] ss:$16 sps:$4 sm:$0xff]   ;;  %v7633_v3 = vld [vmem:[%s10346_s3 + $0x144] ss:$16 sps:$4 sm:$0xff]  }
 0x22b   :  { %3928 = vmatpush1.bf16.msra.mxu0 %v7533_v4  ;;  %4297 = vmatpush1.bf16.msra.mxu1 %v7536_v5  ;;  %v7636_v4 = vld [vmem:[%s10346_s3 + $0x14c] ss:$16 sps:$4 sm:$0xff]   ;;  %v7631_v5 = vld [vmem:[%s10346_s3 + $0x140] ss:$16 sps:$4 sm:$0xff]  }
 0x22c   :  { %3929 = vmatprep.subr.bf16.mxu0 %v7541_v6  ;;  %4298 = vmatprep.subr.bf16.mxu1 %v7544_v7  ;;  %v7634_v6 = vld [vmem:[%s10346_s3 + $0x148] ss:$16 sps:$4 sm:$0xff]   ;;  %v7639_v7 = vld [vmem:[%s10346_s3 + $0x164] ss:$16 sps:$4 sm:$0xff]  }
 0x22f   :  { %3930 = vmatpush1.bf16.msra.mxu0 %v7539_v8  ;;  %4299 = vmatpush1.bf16.msra.mxu1 %v7542_v9  ;;  %v7642_v8 = vld [vmem:[%s10346_s3 + $0x16c] ss:$16 sps:$4 sm:$0xff]   ;;  %v7637_v9 = vld [vmem:[%s10346_s3 + $0x160] ss:$16 sps:$4 sm:$0xff]  }
 0x230   :  { %3931 = vmatprep.subr.bf16.mxu0 %v7547_v10  ;;  %4300 = vmatprep.subr.bf16.mxu1 %v7550_v12  ;;  %v7640_v10 = vld [vmem:[%s10346_s3 + $0x168] ss:$16 sps:$4 sm:$0xff]   ;;  %v7645_v12 = vld [vmem:[%s10346_s3 + $0x184] ss:$16 sps:$4 sm:$0xff]  }
 0x233   :  { %3932 = vmatpush1.bf16.msra.mxu0 %v7545_v13  ;;  %4301 = vmatpush1.bf16.msra.mxu1 %v7548_v15  ;;  %v7648_v13 = vld [vmem:[%s10346_s3 + $0x18c] ss:$16 sps:$4 sm:$0xff]   ;;  %v7643_v15 = vld [vmem:[%s10346_s3 + $0x180] ss:$16 sps:$4 sm:$0xff]  }
 0x234   :  { %3933 = vmatprep.subr.bf16.mxu0 %v7553_v11  ;;  %4302 = vmatprep.subr.bf16.mxu1 %v7556_v17  ;;  %v7646_v11 = vld [vmem:[%s10346_s3 + $0x188] ss:$16 sps:$4 sm:$0xff]   ;;  %v7651_v17 = vld [vmem:[%s10346_s3 + $0x1a4] ss:$16 sps:$4 sm:$0xff]  }
 0x237   :  { %3934 = vmatpush1.bf16.msra.mxu0 %v7551_v14  ;;  %4303 = vmatpush1.bf16.msra.mxu1 %v7554_v19  ;;  %v7654_v14 = vld [vmem:[%s10346_s3 + $0x1ac] ss:$16 sps:$4 sm:$0xff]   ;;  %v7649_v19 = vld [vmem:[%s10346_s3 + $0x1a0] ss:$16 sps:$4 sm:$0xff]  }
 0x238   :  { %3935 = vmatprep.subr.bf16.mxu0 %v7559_v20  ;;  %4304 = vmatprep.subr.bf16.mxu1 %v7562_v21  ;;  %v7652_v20 = vld [vmem:[%s10346_s3 + $0x1a8] ss:$16 sps:$4 sm:$0xff]   ;;  %v7657_v21 = vld [vmem:[%s10346_s3 + $0x1c4] ss:$16 sps:$4 sm:$0xff]  }
 0x23b   :  { %3936 = vmatpush1.bf16.msra.mxu0 %v7557_v22  ;;  %4305 = vmatpush1.bf16.msra.mxu1 %v7560_v23  ;;  %v7660_v22 = vld [vmem:[%s10346_s3 + $0x1cc] ss:$16 sps:$4 sm:$0xff]   ;;  %v7655_v23 = vld [vmem:[%s10346_s3 + $0x1c0] ss:$16 sps:$4 sm:$0xff]  }
 0x23c   :  { %3937 = vmatprep.subr.bf16.mxu0 %v7565_v18  ;;  %4306 = vmatprep.subr.bf16.mxu1 %v7568_v25  ;;  %v7658_v18 = vld [vmem:[%s10346_s3 + $0x1c8] ss:$16 sps:$4 sm:$0xff]   ;;  %v7663_v25 = vld [vmem:[%s10346_s3 + $0x1e4] ss:$16 sps:$4 sm:$0xff]  }
 0x23f   :  { %3938 = vmatpush1.bf16.msra.mxu0 %v7563_v26  ;;  %4307 = vmatpush1.bf16.msra.mxu1 %v7566_v27  ;;  %v7666_v26 = vld [vmem:[%s10346_s3 + $0x1ec] ss:$16 sps:$4 sm:$0xff]   ;;  %v7661_v27 = vld [vmem:[%s10346_s3 + $0x1e0] ss:$16 sps:$4 sm:$0xff]  }
 0x240   :  { %5115 = vmatprep.subr.bf16.mxu0 %v7573_v28  ;;  %5197 = vmatprep.subr.bf16.mxu1 %v7576_v29  ;;  %v7664_v28 = vld [vmem:[%s10346_s3 + $0x1e8] ss:$16 sps:$4 sm:$0xff]   ;;  %v7669_v29 = vld [vmem:[%s10346_s3 + $0x204] ss:$16 sps:$4 sm:$0xff]  }
 0x242   :  { %3940 = vmatmul.mubr.bf16.vlgmr.msra.gmra.mrb[0].mxu0 %v5821_v30  ;;  %4309 = vmatmul.mubr.bf16.vlgmr.msra.gmra.mrb[0].mxu1 %v5821_v30  ;;  %v7672_v30 = vld [vmem:[%s10346_s3 + $0x20c] ss:$16 sps:$4 sm:$0xff]  }
 0x243   :  { %5116 = vmatpush1.bf16.msra.mxu0 %v7571_v31  ;;  %5198 = vmatpush1.bf16.msra.mxu1 %v7574_v32  ;;  %v616_v31 = vlaneseq }
 0x244   :  { %5117 = vmatprep.subr.bf16.mxu0 %v7579_v24  ;;  %5199 = vmatprep.subr.bf16.mxu1 %v7582_v16  ;;  %v9915_v16 = vld [vmem:[%s10348_s2] sm:$0xf] }
 0x245   :  { %v9907_v32 = vshrl.u32 %v616_v31, 7  ;;  %v7729_v31 = vld [vmem:[%s10346_s3 + $0x344] ss:$16 sps:$4 sm:$0xff]  }
 0x247   :  { %5118 = vmatpush1.bf16.msra.mxu0 %v7577_v33  ;;  %5200 = vmatpush1.bf16.msra.mxu1 %v7580_v34  ;;  %v9910_v24 = vsub.s32 0, %v9907_v32  ;;  %v9918_v33 = vsub.s32 1, %v9907_v32  ;;  %v9921_v34 = vsub.s32 3, %v9907_v32 }
 0x248   :  { %5119 = vmatprep.subr.bf16.mxu0 %v7585_v35  ;;  %5201 = vmatprep.subr.bf16.mxu1 %v7588_v36 }
 0x249   :  { %v619_v35 = vrot.slane %v9915_v16, %v9910_v24  ;;  %v623_v36 = vrot.slane %v9915_v16, %v9918_v33 }
 0x24b   :  { %5120 = vmatpush1.bf16.msra.mxu0 %v7583_v37  ;;  %5202 = vmatpush1.bf16.msra.mxu1 %v7586_v38  ;;  %v631_v37 = vrot.slane %v9915_v16, %v9921_v34 }
 0x24c   :  { %5121 = vmatprep.subr.bf16.mxu0 %v7591_v39  ;;  %5203 = vmatprep.subr.bf16.mxu1 %v7594_v40 }
 0x24f   :  { %5122 = vmatpush1.bf16.msra.mxu0 %v7589_v41  ;;  %5204 = vmatpush1.bf16.msra.mxu1 %v7592_v42 }
 0x250   :  { %5123 = vmatprep.subr.bf16.mxu0 %v7597_v43  ;;  %5205 = vmatprep.subr.bf16.mxu1 %v7600_v44 }
 0x253   :  { %5124 = vmatpush1.bf16.msra.mxu0 %v7595_v45  ;;  %5206 = vmatpush1.bf16.msra.mxu1 %v7598_v46 }
 0x254   :  { %5125 = vmatprep.subr.bf16.mxu0 %v7603_v47  ;;  %5207 = vmatprep.subr.bf16.mxu1 %v7606_v48 }
 0x257   :  { %5126 = vmatpush1.bf16.msra.mxu0 %v7601_v49  ;;  %5208 = vmatpush1.bf16.msra.mxu1 %v7604_v50 }
 0x258   :  { %5127 = vmatprep.subr.bf16.mxu0 %v7609_v51  ;;  %5209 = vmatprep.subr.bf16.mxu1 %v7612_v52 }
 0x25b   :  { %5128 = vmatpush1.bf16.msra.mxu0 %v7607_v53  ;;  %5210 = vmatpush1.bf16.msra.mxu1 %v7610_v54  ;;  %v7667_v53 = vld [vmem:[%s10346_s3 + $0x200] ss:$16 sps:$4 sm:$0xff]   ;;  %v7670_v54 = vld [vmem:[%s10346_s3 + $0x208] ss:$16 sps:$4 sm:$0xff]  }
 0x25c   :  { %5129 = vmatprep.subr.bf16.mxu0 %v7615_v55  ;;  %5211 = vmatprep.subr.bf16.mxu1 %v7618_v56  ;;  %v7675_v56 = vld [vmem:[%s10346_s3 + $0x224] ss:$16 sps:$4 sm:$0xff]  }
 0x25f   :  { %5130 = vmatpush1.bf16.msra.mxu0 %v7613_v57  ;;  %5212 = vmatpush1.bf16.msra.mxu1 %v7616_v58  ;;  %v7678_v57 = vld [vmem:[%s10346_s3 + $0x22c] ss:$16 sps:$4 sm:$0xff]  }
 0x260   :  { %5131 = vmatprep.subr.bf16.mxu0 %v7621_v59  ;;  %5213 = vmatprep.subr.bf16.mxu1 %v7624_v60  ;;  %v7673_v59 = vld [vmem:[%s10346_s3 + $0x220] ss:$16 sps:$4 sm:$0xff]   ;;  %v7676_v60 = vld [vmem:[%s10346_s3 + $0x228] ss:$16 sps:$4 sm:$0xff]  }
 0x263   :  { %5132 = vmatpush1.bf16.msra.mxu0 %v7619_v61  ;;  %5214 = vmatpush1.bf16.msra.mxu1 %v7622_v62  ;;  %v7681_v61 = vld [vmem:[%s10346_s3 + $0x244] ss:$16 sps:$4 sm:$0xff]   ;;  %v7684_v62 = vld [vmem:[%s10346_s3 + $0x24c] ss:$16 sps:$4 sm:$0xff]  }
 0x264   :  { %5133 = vmatprep.subr.bf16.mxu0 %v7627_v63  ;;  %5215 = vmatprep.subr.bf16.mxu1 %v7630_v0  ;;  %v7679_v63 = vld [vmem:[%s10346_s3 + $0x240] ss:$16 sps:$4 sm:$0xff]   ;;  %v7682_v0 = vld [vmem:[%s10346_s3 + $0x248] ss:$16 sps:$4 sm:$0xff]  }
 0x267   :  { %5134 = vmatpush1.bf16.msra.mxu0 %v7625_v1  ;;  %5216 = vmatpush1.bf16.msra.mxu1 %v7628_v2  ;;  %v7687_v1 = vld [vmem:[%s10346_s3 + $0x264] ss:$16 sps:$4 sm:$0xff]   ;;  %v7690_v2 = vld [vmem:[%s10346_s3 + $0x26c] ss:$16 sps:$4 sm:$0xff]  }
 0x268   :  { %5135 = vmatprep.subr.bf16.mxu0 %v7633_v3  ;;  %5217 = vmatprep.subr.bf16.mxu1 %v7636_v4  ;;  %v7685_v3 = vld [vmem:[%s10346_s3 + $0x260] ss:$16 sps:$4 sm:$0xff]   ;;  %v7688_v4 = vld [vmem:[%s10346_s3 + $0x268] ss:$16 sps:$4 sm:$0xff]  }
 0x26b   :  { %5136 = vmatpush1.bf16.msra.mxu0 %v7631_v5  ;;  %5218 = vmatpush1.bf16.msra.mxu1 %v7634_v6  ;;  %v7693_v5 = vld [vmem:[%s10346_s3 + $0x284] ss:$16 sps:$4 sm:$0xff]   ;;  %v7696_v6 = vld [vmem:[%s10346_s3 + $0x28c] ss:$16 sps:$4 sm:$0xff]  }
 0x26c   :  { %5137 = vmatprep.subr.bf16.mxu0 %v7639_v7  ;;  %5219 = vmatprep.subr.bf16.mxu1 %v7642_v8  ;;  %v7691_v7 = vld [vmem:[%s10346_s3 + $0x280] ss:$16 sps:$4 sm:$0xff]   ;;  %v7694_v8 = vld [vmem:[%s10346_s3 + $0x288] ss:$16 sps:$4 sm:$0xff]  }
 0x26f   :  { %5138 = vmatpush1.bf16.msra.mxu0 %v7637_v9  ;;  %5220 = vmatpush1.bf16.msra.mxu1 %v7640_v10  ;;  %v7699_v9 = vld [vmem:[%s10346_s3 + $0x2a4] ss:$16 sps:$4 sm:$0xff]   ;;  %v7702_v10 = vld [vmem:[%s10346_s3 + $0x2ac] ss:$16 sps:$4 sm:$0xff]  }
 0x270   :  { %5139 = vmatprep.subr.bf16.mxu0 %v7645_v12  ;;  %5221 = vmatprep.subr.bf16.mxu1 %v7648_v13  ;;  %v7697_v12 = vld [vmem:[%s10346_s3 + $0x2a0] ss:$16 sps:$4 sm:$0xff]   ;;  %v7700_v13 = vld [vmem:[%s10346_s3 + $0x2a8] ss:$16 sps:$4 sm:$0xff]  }
 0x273   :  { %5140 = vmatpush1.bf16.msra.mxu0 %v7643_v15  ;;  %5222 = vmatpush1.bf16.msra.mxu1 %v7646_v11  ;;  %v7705_v15 = vld [vmem:[%s10346_s3 + $0x2c4] ss:$16 sps:$4 sm:$0xff]   ;;  %v7708_v11 = vld [vmem:[%s10346_s3 + $0x2cc] ss:$16 sps:$4 sm:$0xff]  }
 0x274   :  { %5141 = vmatprep.subr.bf16.mxu0 %v7651_v17  ;;  %5223 = vmatprep.subr.bf16.mxu1 %v7654_v14  ;;  %v7703_v17 = vld [vmem:[%s10346_s3 + $0x2c0] ss:$16 sps:$4 sm:$0xff]   ;;  %v7706_v14 = vld [vmem:[%s10346_s3 + $0x2c8] ss:$16 sps:$4 sm:$0xff]  }
 0x277   :  { %5142 = vmatpush1.bf16.msra.mxu0 %v7649_v19  ;;  %5224 = vmatpush1.bf16.msra.mxu1 %v7652_v20  ;;  %v7711_v19 = vld [vmem:[%s10346_s3 + $0x2e4] ss:$16 sps:$4 sm:$0xff]   ;;  %v7714_v20 = vld [vmem:[%s10346_s3 + $0x2ec] ss:$16 sps:$4 sm:$0xff]  }
 0x278   :  { %5143 = vmatprep.subr.bf16.mxu0 %v7657_v21  ;;  %5225 = vmatprep.subr.bf16.mxu1 %v7660_v22  ;;  %v7709_v21 = vld [vmem:[%s10346_s3 + $0x2e0] ss:$16 sps:$4 sm:$0xff]   ;;  %v7712_v22 = vld [vmem:[%s10346_s3 + $0x2e8] ss:$16 sps:$4 sm:$0xff]  }
 0x27b   :  { %5144 = vmatpush1.bf16.msra.mxu0 %v7655_v23  ;;  %5226 = vmatpush1.bf16.msra.mxu1 %v7658_v18  ;;  %v7717_v23 = vld [vmem:[%s10346_s3 + $0x304] ss:$16 sps:$4 sm:$0xff]   ;;  %v7720_v18 = vld [vmem:[%s10346_s3 + $0x30c] ss:$16 sps:$4 sm:$0xff]  }
 0x27c   :  { %5145 = vmatprep.subr.bf16.mxu0 %v7663_v25  ;;  %5227 = vmatprep.subr.bf16.mxu1 %v7666_v26  ;;  %v7715_v25 = vld [vmem:[%s10346_s3 + $0x300] ss:$16 sps:$4 sm:$0xff]   ;;  %v7718_v26 = vld [vmem:[%s10346_s3 + $0x308] ss:$16 sps:$4 sm:$0xff]  }
 0x27f   :  { %5146 = vmatpush1.bf16.msra.mxu0 %v7661_v27  ;;  %5228 = vmatpush1.bf16.msra.mxu1 %v7664_v28  ;;  %v7723_v27 = vld [vmem:[%s10346_s3 + $0x324] ss:$16 sps:$4 sm:$0xff]   ;;  %v7726_v28 = vld [vmem:[%s10346_s3 + $0x32c] ss:$16 sps:$4 sm:$0xff]  }
 0x280   :  { %5156 = vmatprep.subr.bf16.mxu0 %v7669_v29  ;;  %5238 = vmatprep.subr.bf16.mxu1 %v7672_v30  ;;  %v7721_v29 = vld [vmem:[%s10346_s3 + $0x320] ss:$16 sps:$4 sm:$0xff]   ;;  %v7724_v30 = vld [vmem:[%s10346_s3 + $0x328] ss:$16 sps:$4 sm:$0xff]  }
 0x315   :  { %v3941_v38 = vpop.f32.mrb[0].mxu0  ;;  %v9929_v39 = vpop.f32.mrb[0].mxu1 }
 0x316   :  { %v6597_v40 = vadd.f32 %v3941_v38, %v619_v35  ;;  %v3943_v41 = vpop.f32.mrb[1].mxu0  ;;  %v4312_v42 = vpop.f32.mrb[1].mxu1  ;;  %v7732_v35 = vld [vmem:[%s10346_s3 + $0x34c] ss:$16 sps:$4 sm:$0xff]   ;;  %v7735_v38 = vld [vmem:[%s10346_s3 + $0x364] ss:$16 sps:$4 sm:$0xff]  }
 0x317   :  { %v6598_v43 = vadd.f32 %v3943_v41, %v623_v36  ;;  %v6600_v44 = vadd.f32 %v4312_v42, %v631_v37  ;;  %v3945_v45 = vpop.f32.mrb[2].mxu0  ;;  %v4314_v46 = vpop.f32.mrb[2].mxu1  ;;  %v7727_v36 = vld [vmem:[%s10346_s3 + $0x340] ss:$16 sps:$4 sm:$0xff]   ;;  %v7730_v37 = vld [vmem:[%s10346_s3 + $0x348] ss:$16 sps:$4 sm:$0xff]  }
 0x318   :  { %v4317_v47 = vmax.f32 %v6597_v40, 0.0  ;;  %v3946_v48 = vpop.f32.mrb[3].mxu0  ;;  %v4315_v49 = vpop.f32.mrb[3].mxu1  ;;  %v7738_v40 = vld [vmem:[%s10346_s3 + $0x36c] ss:$16 sps:$4 sm:$0xff]  }
 0x319   :  { %v4318_v50 = vmax.f32 %v6598_v43, 0.0  ;;  %v4320_v51 = vmax.f32 %v6600_v44, 0.0  ;;  %v7733_v41 = vld [vmem:[%s10346_s3 + $0x360] ss:$16 sps:$4 sm:$0xff]   ;;  %v7736_v42 = vld [vmem:[%s10346_s3 + $0x368] ss:$16 sps:$4 sm:$0xff]  }
 0x31a   :  { %v4321_v55 = vpack.c.bf16 %v4317_v47, %v4317_v47  ;;  %v7741_v43 = vld [vmem:[%s10346_s3 + $0x384] ss:$16 sps:$4 sm:$0xff]   ;;  %v7744_v44 = vld [vmem:[%s10346_s3 + $0x38c] ss:$16 sps:$4 sm:$0xff]   ;;  %v7739_v45 = vld [vmem:[%s10346_s3 + $0x380] ss:$16 sps:$4 sm:$0xff]  }
 0x31b   :  { %v4322_v52 = vpack.c.bf16 %v4318_v50, %v4318_v50  ;;  %v4324_v58 = vpack.c.bf16 %v4320_v51, %v4320_v51  ;;  %v7742_v46 = vld [vmem:[%s10346_s3 + $0x388] ss:$16 sps:$4 sm:$0xff]   ;;  %v10082_v47 = vsub.s32 2, %v9907_v32  ;;  %v7747_v48 = vld [vmem:[%s10346_s3 + $0x3a4] ss:$16 sps:$4 sm:$0xff]  }
 0x31c   :  { %v7750_v49 = vld [vmem:[%s10346_s3 + $0x3ac] ss:$16 sps:$4 sm:$0xff]   ;;  %v7745_v50 = vld [vmem:[%s10346_s3 + $0x3a0] ss:$16 sps:$4 sm:$0xff]   ;;  %v7748_v32 = vld [vmem:[%s10346_s3 + $0x3a8] ss:$16 sps:$4 sm:$0xff]  }
 0x31d   :  { %5147 = vmatprep.mubr.bf16.mxu0 %v4322_v52  ;;  %5229 = vmatprep.mubr.bf16.mxu1 %v4322_v52  ;;  %v627_v51 = vrot.slane %v9915_v16, %v10082_v47  ;;  %v7753_v52 = vld [vmem:[%s10346_s3 + $0x3c4] ss:$16 sps:$4 sm:$0xff]   ;;  %v7754_v16 = vld [vmem:[%s10346_s3 + $0x3c8] ss:$16 sps:$4 sm:$0xff]  }
 0x31e   :  { %5148 = vmatmul.mubr.bf16.vlgmr.msra.gmra.mrb[4].mxu0 %v4321_v55  ;;  %5230 = vmatmul.mubr.bf16.vlgmr.msra.gmra.mrb[4].mxu1 %v4321_v55 }
 0x31f   :  { %5157 = vmatpush1.bf16.msra.mxu0 %v7667_v53  ;;  %5239 = vmatpush1.bf16.msra.mxu1 %v7670_v54  ;;  %v7756_v53 = vld [vmem:[%s10346_s3 + $0x3cc] ss:$16 sps:$4 sm:$0xff]   ;;  %v7751_v54 = vld [vmem:[%s10346_s3 + $0x3c0] ss:$16 sps:$4 sm:$0xff]   ;;  %v6599_v55 = vadd.f32 %v9929_v39, %v627_v51  ;;  %v7760_v39 = vld [vmem:[%s10346_s3 + $0x3e8] ss:$16 sps:$4 sm:$0xff]  }
 0x320   :  { %5188 = vmatprep.mubr.bf16.mxu0 %v4324_v58  ;;  %5270 = vmatprep.mubr.bf16.mxu1 %v4324_v58  ;;  %v7757_v58 = vld [vmem:[%s10346_s3 + $0x3e0] ss:$16 sps:$4 sm:$0xff]  }
 0x321   :  { %5158 = vmatprep.subr.bf16.mxu0 %v7675_v56  ;;  %5240 = vmatprep.subr.bf16.mxu1 %v7678_v57  ;;  %v7759_v56 = vld [vmem:[%s10346_s3 + $0x3e4] ss:$16 sps:$4 sm:$0xff]   ;;  %v7762_v57 = vld [vmem:[%s10346_s3 + $0x3ec] ss:$16 sps:$4 sm:$0xff]   ;;  %v7829_v51 = vld [vmem:[%s10347_s6 + $0x160] ss:$16 sps:$4 sm:$0xff]  }
 0x323   :  { %5159 = vmatpush1.bf16.msra.mxu0 %v7673_v59  ;;  %5241 = vmatpush1.bf16.msra.mxu1 %v7676_v60  ;;  %v4319_v59 = vmax.f32 %v6599_v55, 0.0  ;;  %v7765_v60 = vld [vmem:[%s10347_s6 + $0x4] ss:$16 sps:$4 sm:$0xff]   ;;  %v7838_v55 = vld [vmem:[%s10347_s6 + $0x188] ss:$16 sps:$4 sm:$0xff]  }
 0x324   :  { %5160 = vmatprep.subr.bf16.mxu0 %v7681_v61  ;;  %5242 = vmatprep.subr.bf16.mxu1 %v7684_v62  ;;  %v7768_v61 = vld [vmem:[%s10347_s6 + $0xc] ss:$16 sps:$4 sm:$0xff]   ;;  %v10132_v62 = vld [vmem:[%s10349_s5] sm:$0xff] }
 0x327   :  { %5161 = vmatpush1.bf16.msra.mxu0 %v7679_v63  ;;  %5243 = vmatpush1.bf16.msra.mxu1 %v7682_v0  ;;  %v7763_v63 = vld [vmem:[%s10347_s6] ss:$16 sps:$4 sm:$0xff]   ;;  %v7766_v0 = vld [vmem:[%s10347_s6 + $0x8] ss:$16 sps:$4 sm:$0xff]  }
 0x328   :  { %5162 = vmatprep.subr.bf16.mxu0 %v7687_v1  ;;  %5244 = vmatprep.subr.bf16.mxu1 %v7690_v2  ;;  %v4323_v1 = vpack.c.bf16 %v4319_v59, %v4319_v59  ;;  %v7771_v2 = vld [vmem:[%s10347_s6 + $0x24] ss:$16 sps:$4 sm:$0xff]  }
 0x329   :  { %v7849_v59 = vld [vmem:[%s10347_s6 + $0x1c4] ss:$16 sps:$4 sm:$0xff]  }
 0x32b   :  { %5163 = vmatpush1.bf16.msra.mxu0 %v7685_v3  ;;  %5245 = vmatpush1.bf16.msra.mxu1 %v7688_v4  ;;  %v7774_v3 = vld [vmem:[%s10347_s6 + $0x2c] ss:$16 sps:$4 sm:$0xff]   ;;  %v6528_v4 = vcombine.high %v10132_v62, %v10132_v62 }
 0x32c   :  { %5164 = vmatprep.subr.bf16.mxu0 %v7693_v5  ;;  %5246 = vmatprep.subr.bf16.mxu1 %v7696_v6  ;;  %v7769_v5 = vld [vmem:[%s10347_s6 + $0x20] ss:$16 sps:$4 sm:$0xff]   ;;  %v7772_v6 = vld [vmem:[%s10347_s6 + $0x28] ss:$16 sps:$4 sm:$0xff]  }
 0x32f   :  { %5165 = vmatpush1.bf16.msra.mxu0 %v7691_v7  ;;  %5247 = vmatpush1.bf16.msra.mxu1 %v7694_v8  ;;  %v7777_v7 = vld [vmem:[%s10347_s6 + $0x44] ss:$16 sps:$4 sm:$0xff]   ;;  %v7780_v8 = vld [vmem:[%s10347_s6 + $0x4c] ss:$16 sps:$4 sm:$0xff]  }
 0x330   :  { %5166 = vmatprep.subr.bf16.mxu0 %v7699_v9  ;;  %5248 = vmatprep.subr.bf16.mxu1 %v7702_v10  ;;  %v7775_v9 = vld [vmem:[%s10347_s6 + $0x40] ss:$16 sps:$4 sm:$0xff]   ;;  %v7778_v10 = vld [vmem:[%s10347_s6 + $0x48] ss:$16 sps:$4 sm:$0xff]  }
 0x333   :  { %5167 = vmatpush1.bf16.msra.mxu0 %v7697_v12  ;;  %5249 = vmatpush1.bf16.msra.mxu1 %v7700_v13  ;;  %v7783_v12 = vld [vmem:[%s10347_s6 + $0x64] ss:$16 sps:$4 sm:$0xff]   ;;  %v7786_v13 = vld [vmem:[%s10347_s6 + $0x6c] ss:$16 sps:$4 sm:$0xff]  }
 0x334   :  { %5168 = vmatprep.subr.bf16.mxu0 %v7705_v15  ;;  %5250 = vmatprep.subr.bf16.mxu1 %v7708_v11  ;;  %v7781_v15 = vld [vmem:[%s10347_s6 + $0x60] ss:$16 sps:$4 sm:$0xff]   ;;  %v7784_v11 = vld [vmem:[%s10347_s6 + $0x68] ss:$16 sps:$4 sm:$0xff]  }
 0x337   :  { %5169 = vmatpush1.bf16.msra.mxu0 %v7703_v17  ;;  %5251 = vmatpush1.bf16.msra.mxu1 %v7706_v14  ;;  %v7789_v17 = vld [vmem:[%s10347_s6 + $0x84] ss:$16 sps:$4 sm:$0xff]   ;;  %v7792_v14 = vld [vmem:[%s10347_s6 + $0x8c] ss:$16 sps:$4 sm:$0xff]  }
 0x338   :  { %5170 = vmatprep.subr.bf16.mxu0 %v7711_v19  ;;  %5252 = vmatprep.subr.bf16.mxu1 %v7714_v20  ;;  %v7787_v19 = vld [vmem:[%s10347_s6 + $0x80] ss:$16 sps:$4 sm:$0xff]   ;;  %v7790_v20 = vld [vmem:[%s10347_s6 + $0x88] ss:$16 sps:$4 sm:$0xff]  }
 0x33b   :  { %5171 = vmatpush1.bf16.msra.mxu0 %v7709_v21  ;;  %5253 = vmatpush1.bf16.msra.mxu1 %v7712_v22  ;;  %v7795_v21 = vld [vmem:[%s10347_s6 + $0xa4] ss:$16 sps:$4 sm:$0xff]   ;;  %v7798_v22 = vld [vmem:[%s10347_s6 + $0xac] ss:$16 sps:$4 sm:$0xff]  }
 0x33c   :  { %5172 = vmatprep.subr.bf16.mxu0 %v7717_v23  ;;  %5254 = vmatprep.subr.bf16.mxu1 %v7720_v18  ;;  %v7793_v23 = vld [vmem:[%s10347_s6 + $0xa0] ss:$16 sps:$4 sm:$0xff]   ;;  %v7796_v18 = vld [vmem:[%s10347_s6 + $0xa8] ss:$16 sps:$4 sm:$0xff]  }
 0x33f   :  { %5173 = vmatpush1.bf16.msra.mxu0 %v7715_v25  ;;  %5255 = vmatpush1.bf16.msra.mxu1 %v7718_v26  ;;  %v7801_v25 = vld [vmem:[%s10347_s6 + $0xc4] ss:$16 sps:$4 sm:$0xff]   ;;  %v7804_v26 = vld [vmem:[%s10347_s6 + $0xcc] ss:$16 sps:$4 sm:$0xff]  }
 0x340   :  { %5174 = vmatprep.subr.bf16.mxu0 %v7723_v27  ;;  %5256 = vmatprep.subr.bf16.mxu1 %v7726_v28  ;;  %v7799_v27 = vld [vmem:[%s10347_s6 + $0xc0] ss:$16 sps:$4 sm:$0xff]   ;;  %v7802_v28 = vld [vmem:[%s10347_s6 + $0xc8] ss:$16 sps:$4 sm:$0xff]  }
 0x343   :  { %5175 = vmatpush1.bf16.msra.mxu0 %v7721_v29  ;;  %5257 = vmatpush1.bf16.msra.mxu1 %v7724_v30  ;;  %v7807_v29 = vld [vmem:[%s10347_s6 + $0xe4] ss:$16 sps:$4 sm:$0xff]   ;;  %v7810_v30 = vld [vmem:[%s10347_s6 + $0xec] ss:$16 sps:$4 sm:$0xff]  }
 0x344   :  { %5176 = vmatprep.subr.bf16.mxu0 %v7729_v31  ;;  %5258 = vmatprep.subr.bf16.mxu1 %v7732_v35  ;;  %v7805_v31 = vld [vmem:[%s10347_s6 + $0xe0] ss:$16 sps:$4 sm:$0xff]   ;;  %v7808_v35 = vld [vmem:[%s10347_s6 + $0xe8] ss:$16 sps:$4 sm:$0xff]  }
 0x347   :  { %5177 = vmatpush1.bf16.msra.mxu0 %v7727_v36  ;;  %5259 = vmatpush1.bf16.msra.mxu1 %v7730_v37  ;;  %v7813_v36 = vld [vmem:[%s10347_s6 + $0x104] ss:$16 sps:$4 sm:$0xff]   ;;  %v7816_v37 = vld [vmem:[%s10347_s6 + $0x10c] ss:$16 sps:$4 sm:$0xff]  }
 0x348   :  { %5178 = vmatprep.subr.bf16.mxu0 %v7735_v38  ;;  %5260 = vmatprep.subr.bf16.mxu1 %v7738_v40  ;;  %v7811_v38 = vld [vmem:[%s10347_s6 + $0x100] ss:$16 sps:$4 sm:$0xff]   ;;  %v7814_v40 = vld [vmem:[%s10347_s6 + $0x108] ss:$16 sps:$4 sm:$0xff]  }
 0x34b   :  { %5179 = vmatpush1.bf16.msra.mxu0 %v7733_v41  ;;  %5261 = vmatpush1.bf16.msra.mxu1 %v7736_v42  ;;  %v7819_v41 = vld [vmem:[%s10347_s6 + $0x124] ss:$16 sps:$4 sm:$0xff]   ;;  %v7822_v42 = vld [vmem:[%s10347_s6 + $0x12c] ss:$16 sps:$4 sm:$0xff]  }
 0x34c   :  { %5180 = vmatprep.subr.bf16.mxu0 %v7741_v43  ;;  %5262 = vmatprep.subr.bf16.mxu1 %v7744_v44  ;;  %v7817_v43 = vld [vmem:[%s10347_s6 + $0x120] ss:$16 sps:$4 sm:$0xff]   ;;  %v7820_v44 = vld [vmem:[%s10347_s6 + $0x128] ss:$16 sps:$4 sm:$0xff]  }
 0x34f   :  { %5181 = vmatpush1.bf16.msra.mxu0 %v7739_v45  ;;  %5263 = vmatpush1.bf16.msra.mxu1 %v7742_v46  ;;  %v7825_v45 = vld [vmem:[%s10347_s6 + $0x144] ss:$16 sps:$4 sm:$0xff]   ;;  %v7828_v46 = vld [vmem:[%s10347_s6 + $0x14c] ss:$16 sps:$4 sm:$0xff]  }
 0x350   :  { %5182 = vmatprep.subr.bf16.mxu0 %v7747_v48  ;;  %5264 = vmatprep.subr.bf16.mxu1 %v7750_v49  ;;  %v7823_v48 = vld [vmem:[%s10347_s6 + $0x140] ss:$16 sps:$4 sm:$0xff]   ;;  %v7826_v49 = vld [vmem:[%s10347_s6 + $0x148] ss:$16 sps:$4 sm:$0xff]  }
 0x353   :  { %5183 = vmatpush1.bf16.msra.mxu0 %v7745_v50  ;;  %5265 = vmatpush1.bf16.msra.mxu1 %v7748_v32  ;;  %v7831_v50 = vld [vmem:[%s10347_s6 + $0x164] ss:$16 sps:$4 sm:$0xff]   ;;  %v7834_v32 = vld [vmem:[%s10347_s6 + $0x16c] ss:$16 sps:$4 sm:$0xff]  }
 0x354   :  { %5184 = vmatprep.subr.bf16.mxu0 %v7753_v52  ;;  %5266 = vmatprep.subr.bf16.mxu1 %v7756_v53  ;;  %v7832_v52 = vld [vmem:[%s10347_s6 + $0x168] ss:$16 sps:$4 sm:$0xff]   ;;  %v7837_v53 = vld [vmem:[%s10347_s6 + $0x184] ss:$16 sps:$4 sm:$0xff]  }
 0x357   :  { %5185 = vmatpush1.bf16.msra.mxu0 %v7751_v54  ;;  %5267 = vmatpush1.bf16.msra.mxu1 %v7754_v16  ;;  %v7840_v54 = vld [vmem:[%s10347_s6 + $0x18c] ss:$16 sps:$4 sm:$0xff]   ;;  %v7835_v16 = vld [vmem:[%s10347_s6 + $0x180] ss:$16 sps:$4 sm:$0xff]  }
 0x358   :  { %5186 = vmatprep.subr.bf16.mxu0 %v7759_v56  ;;  %5268 = vmatprep.subr.bf16.mxu1 %v7762_v57  ;;  %v7843_v56 = vld [vmem:[%s10347_s6 + $0x1a4] ss:$16 sps:$4 sm:$0xff]   ;;  %v7846_v57 = vld [vmem:[%s10347_s6 + $0x1ac] ss:$16 sps:$4 sm:$0xff]  }
 0x35b   :  { %5187 = vmatpush1.bf16.msra.mxu0 %v7757_v58  ;;  %5269 = vmatpush1.bf16.msra.mxu1 %v7760_v39  ;;  %v7841_v58 = vld [vmem:[%s10347_s6 + $0x1a0] ss:$16 sps:$4 sm:$0xff]   ;;  %v7844_v39 = vld [vmem:[%s10347_s6 + $0x1a8] ss:$16 sps:$4 sm:$0xff]  }
 0x35c   :  { %5693 = vmatprep.subr.bf16.mxu0 %v7765_v60  ;;  %5734 = vmatprep.subr.bf16.mxu1 %v7768_v61  ;;  %v7852_v60 = vld [vmem:[%s10347_s6 + $0x1cc] ss:$16 sps:$4 sm:$0xff]   ;;  %v7847_v61 = vld [vmem:[%s10347_s6 + $0x1c0] ss:$16 sps:$4 sm:$0xff]  }
 0x35e   :  { %5189 = vmatmul.mubr.bf16.vlgmr.msra.gmra.mrb[4].mxu0 %v4323_v1  ;;  %5271 = vmatmul.mubr.bf16.vlgmr.msra.gmra.mrb[4].mxu1 %v4323_v1  ;;  %v7858_v1 = vld [vmem:[%s10347_s6 + $0x1ec] ss:$16 sps:$4 sm:$0xff]  }
 0x35f   :  { %5694 = vmatpush1.bf16.msra.mxu0 %v7763_v63  ;;  %5735 = vmatpush1.bf16.msra.mxu1 %v7766_v0  ;;  %v7850_v63 = vld [vmem:[%s10347_s6 + $0x1c8] ss:$16 sps:$4 sm:$0xff]   ;;  %v7855_v0 = vld [vmem:[%s10347_s6 + $0x1e4] ss:$16 sps:$4 sm:$0xff]  }
 0x360   :  { %5695 = vmatprep.subr.bf16.mxu0 %v7771_v2  ;;  %5736 = vmatprep.subr.bf16.mxu1 %v7774_v3  ;;  %v7853_v2 = vld [vmem:[%s10347_s6 + $0x1e0] ss:$16 sps:$4 sm:$0xff]   ;;  %v7856_v3 = vld [vmem:[%s10347_s6 + $0x1e8] ss:$16 sps:$4 sm:$0xff]  }
 0x361   :  { %5725 = vmatprep.mubr.bf16.mxu0 %v6528_v4  ;;  %5766 = vmatprep.mubr.bf16.mxu1 %v6528_v4  ;;  %v6527_v4 = vcombine.low %v10132_v62, %v10132_v62 }
 0x363   :  { %5696 = vmatpush1.bf16.msra.mxu0 %v7769_v5  ;;  %5737 = vmatpush1.bf16.msra.mxu1 %v7772_v6  ;;  %v4453_v5 = vld [vmem:[%s10350_s4] sm:$0xf] }
 0x364   :  { %5697 = vmatprep.subr.bf16.mxu0 %v7777_v7  ;;  %5738 = vmatprep.subr.bf16.mxu1 %v7780_v8  ;;  %v5344_v6 = vld [vmem:[%s10351_s7] sm:$0xf]  ;;  %v4458_v7 = vrot.slane %v4453_v5, %v9910_v24 }
 0x365   :  { %v5349_v8 = vrot.slane %v5344_v6, %v9910_v24  ;;  %v5357_v62 = vrot.slane %v5344_v6, %v10082_v47 }
 0x367   :  { %5698 = vmatpush1.bf16.msra.mxu0 %v7775_v9  ;;  %5739 = vmatpush1.bf16.msra.mxu1 %v7778_v10  ;;  %v4466_v9 = vrot.slane %v4453_v5, %v10082_v47  ;;  %v4462_v10 = vrot.slane %v4453_v5, %v9918_v33 }
 0x368   :  { %5699 = vmatprep.subr.bf16.mxu0 %v7783_v12  ;;  %5740 = vmatprep.subr.bf16.mxu1 %v7786_v13  ;;  %v5353_v12 = vrot.slane %v5344_v6, %v9918_v33  ;;  %v4470_v13 = vrot.slane %v4453_v5, %v9921_v34 }
 0x36b   :  { %5700 = vmatpush1.bf16.msra.mxu0 %v7781_v15  ;;  %5741 = vmatpush1.bf16.msra.mxu1 %v7784_v11  ;;  %v5361_v15 = vrot.slane %v5344_v6, %v9921_v34  ;;  %v6601_v11 = vadd.f32 %v5349_v8, %v4458_v7 }
 0x36c   :  { %5701 = vmatprep.subr.bf16.mxu0 %v7789_v17  ;;  %5742 = vmatprep.subr.bf16.mxu1 %v7792_v14  ;;  %v6605_v17 = vadd.f32 %v5357_v62, %v4466_v9  ;;  %v6603_v14 = vadd.f32 %v5353_v12, %v4462_v10 }
 0x36f   :  { %5702 = vmatpush1.bf16.msra.mxu0 %v7787_v19  ;;  %5743 = vmatpush1.bf16.msra.mxu1 %v7790_v20  ;;  %v6607_v19 = vadd.f32 %v5361_v15, %v4470_v13 }
 0x370   :  { %5703 = vmatprep.subr.bf16.mxu0 %v7795_v21  ;;  %5744 = vmatprep.subr.bf16.mxu1 %v7798_v22 }
 0x373   :  { %5704 = vmatpush1.bf16.msra.mxu0 %v7793_v23  ;;  %5745 = vmatpush1.bf16.msra.mxu1 %v7796_v18 }
 0x374   :  { %5705 = vmatprep.subr.bf16.mxu0 %v7801_v25  ;;  %5746 = vmatprep.subr.bf16.mxu1 %v7804_v26 }
 0x377   :  { %5706 = vmatpush1.bf16.msra.mxu0 %v7799_v27  ;;  %5747 = vmatpush1.bf16.msra.mxu1 %v7802_v28 }
 0x378   :  { %5707 = vmatprep.subr.bf16.mxu0 %v7807_v29  ;;  %5748 = vmatprep.subr.bf16.mxu1 %v7810_v30 }
 0x37b   :  { %5708 = vmatpush1.bf16.msra.mxu0 %v7805_v31  ;;  %5749 = vmatpush1.bf16.msra.mxu1 %v7808_v35 }
 0x37c   :  { %5709 = vmatprep.subr.bf16.mxu0 %v7813_v36  ;;  %5750 = vmatprep.subr.bf16.mxu1 %v7816_v37 }
 0x37f   :  { %5710 = vmatpush1.bf16.msra.mxu0 %v7811_v38  ;;  %5751 = vmatpush1.bf16.msra.mxu1 %v7814_v40 }
 0x380   :  { %5711 = vmatprep.subr.bf16.mxu0 %v7819_v41  ;;  %5752 = vmatprep.subr.bf16.mxu1 %v7822_v42 }
 0x383   :  { %5712 = vmatpush1.bf16.msra.mxu0 %v7817_v43  ;;  %5753 = vmatpush1.bf16.msra.mxu1 %v7820_v44 }
 0x384   :  { %5713 = vmatprep.subr.bf16.mxu0 %v7825_v45  ;;  %5754 = vmatprep.subr.bf16.mxu1 %v7828_v46 }
 0x387   :  { %5714 = vmatpush1.bf16.msra.mxu0 %v7823_v48  ;;  %5755 = vmatpush1.bf16.msra.mxu1 %v7826_v49 }
 0x388   :  { %5715 = vmatprep.subr.bf16.mxu0 %v7831_v50  ;;  %5756 = vmatprep.subr.bf16.mxu1 %v7834_v32 }
 0x38b   :  { %5716 = vmatpush1.bf16.msra.mxu0 %v7829_v51  ;;  %5757 = vmatpush1.bf16.msra.mxu1 %v7832_v52 }
 0x38c   :  { %5717 = vmatprep.subr.bf16.mxu0 %v7837_v53  ;;  %5758 = vmatprep.subr.bf16.mxu1 %v7840_v54 }
 0x38f   :  { %5718 = vmatpush1.bf16.msra.mxu0 %v7835_v16  ;;  %5759 = vmatpush1.bf16.msra.mxu1 %v7838_v55 }
 0x390   :  { %5719 = vmatprep.subr.bf16.mxu0 %v7843_v56  ;;  %5760 = vmatprep.subr.bf16.mxu1 %v7846_v57 }
 0x393   :  { %5720 = vmatpush1.bf16.msra.mxu0 %v7841_v58  ;;  %5761 = vmatpush1.bf16.msra.mxu1 %v7844_v39 }
 0x394   :  { %5721 = vmatprep.subr.bf16.mxu0 %v7849_v59  ;;  %5762 = vmatprep.subr.bf16.mxu1 %v7852_v60 }
 0x397   :  { %5722 = vmatpush1.bf16.msra.mxu0 %v7847_v61  ;;  %5763 = vmatpush1.bf16.msra.mxu1 %v7850_v63 }
 0x398   :  { %5723 = vmatprep.subr.bf16.mxu0 %v7855_v0  ;;  %5764 = vmatprep.subr.bf16.mxu1 %v7858_v1 }
 0x39b   :  { %5724 = vmatpush1.bf16.msra.mxu0 %v7853_v2  ;;  %5765 = vmatpush1.bf16.msra.mxu1 %v7856_v3 }
 0x39e   :  { %5726 = vmatmul.mubr.bf16.vlgmr.msra.gmra.mrb[4].mxu0 %v6527_v4  ;;  %5767 = vmatmul.mubr.bf16.vlgmr.msra.gmra.mrb[4].mxu1 %v6527_v4 }
 0x471   :  { %v5727_v20 = vpop.f32.mrb[4].mxu0  ;;  %v5768_v21 = vpop.f32.mrb[4].mxu1 }
 0x472   :  { %v6602_v22 = vadd.f32 %v6601_v11, %v5727_v20  ;;  %v6606_v24 = vadd.f32 %v6605_v17, %v5768_v21  ;;  %v5729_v23 = vpop.f32.mrb[5].mxu0  ;;  %v5770_v18 = vpop.f32.mrb[5].mxu1 }
 0x473   :  { %v6604_v25 = vadd.f32 %v6603_v14, %v5729_v23  ;;  %v6608_v47 = vadd.f32 %v6607_v19, %v5770_v18  ;;  %v5731_v26 = vpop.f32.mrb[6].mxu0  ;;  %v5772_v27 = vpop.f32.mrb[6].mxu1 }
 0x474   :  { %v5779_v28 = vmax.f32 %v6602_v22, 0.0  ;;  %v5781_v33 = vmax.f32 %v6606_v24, 0.0  ;;  %v5732_v29 = vpop.f32.mrb[7].mxu0  ;;  %v5773_v30 = vpop.f32.mrb[7].mxu1 }
 0x475   :  { %v5780_v31 = vmax.f32 %v6604_v25, 0.0  ;;  %v5782_v34 = vmax.f32 %v6608_v47, 0.0 }
 0x477   :  { %v6595_v35 = vpack.c.bf16 %v5780_v31, %v5779_v28  ;;  %v6596_v36 = vpack.c.bf16 %v5782_v34, %v5781_v33 }
 0x479   :  { %5799 = vst [vmem:[%s10352_s8] sm:$0xff] %v6595_v35  ;;  %5800 = vst [vmem:[%s10352_s8 + $0x8] sm:$0xff] %v6596_v36 }

</bundles_post_ra>
